<compile_context>
chip_gen: v5e
topology: v5e:2x2
jax: 0.10.0
libtpu: 0.0.40
codegen_flags: <defaults>
</compile_context>

<pallas_src>
import jax
import jax.numpy as jnp
from jax.experimental import pallas as pl
from jax.experimental.pallas import tpu as pltpu

COMPUTE_DTYPE = jnp.bfloat16   # MXU-native on v5e/v6e/v7x; accumulation stays f32.
LANE = 128


def _round_up(v, m):
    return (v + m - 1) // m * m


def _pick_tile_m(m, max_tile=2048, min_tile=256, target_steps=4):
    """Lane tile for the conv M axis: big enough to amortise per-step overhead, small
    enough that the 'parallel' grid has multiple steps (v7x megacore)."""
    per_step = _round_up(pl.cdiv(m, target_steps), LANE)
    return int(min(max_tile, max(min_tile, per_step)))


# ---------------------------------------------------------------------------
# Pallas kernels
# ---------------------------------------------------------------------------
def _conv_relu_pool_kernel(w_ref, b_ref, p_ref, o_ref):
    """Fused conv (as matmul) + bias + ReLU + 2x2/stride-2 max-pool.

    w_ref: (Coutp, Kp)       conv weights; K zero-padded (%16 bf16 / %8 f32)
    b_ref: (Coutp, 1)        f32 bias
    p_ref: (4, Kp, TILE_M)   im2col patches; leading dim = 4 pool-window positions
    o_ref: (Coutp, TILE_M)   pooled activation; lanes = (pooled_h, pooled_w, batch)
    """
    w = w_ref[...]
    acc = jnp.dot(w, p_ref[0], preferred_element_type=jnp.float32)
    for q in range(1, 4):                         # 4 MXU matmuls + 3 VPU maxima
        acc = jnp.maximum(acc, jnp.dot(w, p_ref[q], preferred_element_type=jnp.float32))
    # relu(max_q(y_q) + b) == max_q(relu(y_q + b)): shared bias, monotone relu.
    o_ref[...] = jnp.maximum(acc + b_ref[...], 0.0).astype(o_ref.dtype)


def _mlp_kernel(x_ref, w1_ref, b1_ref, w2_ref, b2_ref, w3_ref, b3_ref, o_ref):
    """Fused fc1+ReLU -> fc2+ReLU -> fc3; batch on lanes, intermediates never leave VMEM."""
    h = jnp.dot(w1_ref[...], x_ref[...], preferred_element_type=jnp.float32) + b1_ref[...]
    h = jnp.maximum(h, 0.0).astype(w2_ref.dtype)
    h = jnp.dot(w2_ref[...], h, preferred_element_type=jnp.float32) + b2_ref[...]
    h = jnp.maximum(h, 0.0).astype(w3_ref.dtype)
    y = jnp.dot(w3_ref[...], h, preferred_element_type=jnp.float32) + b3_ref[...]
    o_ref[...] = y.astype(o_ref.dtype)


# ---------------------------------------------------------------------------
# pallas_call wrappers
# ---------------------------------------------------------------------------
def _conv_relu_pool(w, b, patches):
    """w: (Coutp, Kp); b: (Coutp, 1) f32; patches: (4, K, M) -> (Coutp, Mp)."""
    cout, kp = w.shape
    _, k, m = patches.shape
    tile_m = _pick_tile_m(m)
    mp = _round_up(m, tile_m)
    p = jnp.pad(patches, ((0, 0), (0, kp - k), (0, mp - m)))
    isz = p.dtype.itemsize
    cost = pl.CostEstimate(
        flops=2 * 4 * cout * kp * mp,
        transcendentals=0,
        bytes_accessed=(4 * kp * mp + cout * kp) * isz + cout * mp * w.dtype.itemsize + cout * 4,
    )
    return pl.pallas_call(
        _conv_relu_pool_kernel,
        out_shape=jax.ShapeDtypeStruct((cout, mp), w.dtype),
        grid=(mp // tile_m,),
        in_specs=[
            pl.BlockSpec((cout, kp), lambda i: (0, 0)),            # weights (resident)
            pl.BlockSpec((cout, 1), lambda i: (0, 0)),             # bias (resident)
            pl.BlockSpec((4, kp, tile_m), lambda i: (0, 0, i)),    # patch tile
        ],
        out_specs=pl.BlockSpec((cout, tile_m), lambda i: (0, i)),
        compiler_params=pltpu.CompilerParams(
            dimension_semantics=("parallel",),
            vmem_limit_bytes=32 * 1024 * 1024,   # explicit: exceeds v5e's 16 MiB default
        ),
        cost_estimate=cost,
    )(w, b, p)


def _mlp(x, w1, b1, w2, b2, w3, b3):
    """x: (IN, Npad) batch-on-lanes; weights (out, in); returns (OUT3, Npad) f32."""
    in_dim, npad = x.shape
    out_dim = w3.shape[0]
    tn = LANE
    wbytes = sum(int(a.size) * a.dtype.itemsize for a in (w1, b1, w2, b2, w3, b3))
    cost = pl.CostEstimate(
        flops=2 * npad * (w1.shape[0] * w1.shape[1] + w2.shape[0] * w2.shape[1]
                          + w3.shape[0] * w3.shape[1]),
        transcendentals=0,
        bytes_accessed=in_dim * npad * x.dtype.itemsize + wbytes + out_dim * npad * 4,
    )
    full = lambda a: pl.BlockSpec(a.shape, lambda i: (0, 0))
    return pl.pallas_call(
        _mlp_kernel,
        out_shape=jax.ShapeDtypeStruct((out_dim, npad), jnp.float32),
        grid=(npad // tn,),
        in_specs=[pl.BlockSpec((in_dim, tn), lambda i: (0, i)),
                  full(w1), full(b1), full(w2), full(b2), full(w3), full(b3)],
        out_specs=pl.BlockSpec((out_dim, tn), lambda i: (0, i)),
        compiler_params=pltpu.CompilerParams(dimension_semantics=("parallel",)),
        cost_estimate=cost,
    )(x, w1, b1, w2, b2, w3, b3)


# ---------------------------------------------------------------------------
# Glue: pool-window-aware im2col (static strided slices, fused by XLA inside the jit)
# ---------------------------------------------------------------------------
def _pool_window_patches(xc, kh, kw, ph, pw):
    """im2col for a stride-1 conv followed by a 2x2/stride-2 max-pool.

    xc: (C, H, W, Npad) activation, batch on the last (lane) axis.
    Returns (4, C*kh*kw, ph*pw*Npad): leading dim = 4 positions of the pool window,
    rows ordered (c, ki, kj), columns ordered (pooled_h, pooled_w, batch).
    # TODO(synk): this patch tensor is materialised in HBM by XLA; building patches
    # in-kernel from a VMEM-resident activation tile is the remaining big HBM-traffic win.
    """
    c, _, _, npad = xc.shape
    quads = []
    for qi in range(2):
        for qj in range(2):
            taps = [
                xc[:, qi + ki: qi + ki + 2 * ph - 1: 2,
                      qj + kj: qj + kj + 2 * pw - 1: 2, :]
                for ki in range(kh) for kj in range(kw)
            ]                                        # each: (C, ph, pw, Npad)
            q = jnp.stack(taps, axis=1)              # (C, kh*kw, ph, pw, Npad)
            quads.append(q.reshape(c * kh * kw, ph * pw * npad))
    return jnp.stack(quads, axis=0)                  # (4, C*kh*kw, ph*pw*Npad)


# ---------------------------------------------------------------------------
# Parameters (PyTorch shapes) + one-time layout preparation
# ---------------------------------------------------------------------------
def init_lenet_params(key):
    """Random params with the exact PyTorch LeNet shapes (Linear weights are (out, in))."""
    def dense(k, shape, scale=0.05):
        return scale * jax.random.normal(k, shape, dtype=jnp.float32)
    ks = jax.random.split(key, 10)
    return {
        "conv1_w": dense(ks[0], (6, 1, 5, 5)),  "conv1_b": dense(ks[1], (6,)),
        "conv2_w": dense(ks[2], (16, 6, 5, 5)), "conv2_b": dense(ks[3], (16,)),
        "fc1_w": dense(ks[4], (120, 400)),      "fc1_b": dense(ks[5], (120,)),
        "fc2_w": dense(ks[6], (84, 120)),       "fc2_b": dense(ks[7], (84,)),
        "fc3_w": dense(ks[8], (10, 84)),        "fc3_b": dense(ks[9], (10,)),
    }


def prepare_params(p, compute_dtype=COMPUTE_DTYPE):
    """One-time prep: conv weights as (Coutp, Kp) matrices (K padded %16 bf16 / %8 f32,
    Cout padded to a sublane multiple); FC weights kept (out, in) with zero-padded dims."""
    kgrain = 8 if jnp.dtype(compute_dtype).itemsize == 4 else 16

    def conv_mat(w, cout_pad):
        cout, cin, kh, kw = w.shape
        k = cin * kh * kw
        wm = w.reshape(cout, k)                       # rows match patch row order (c, ki, kj)
        wm = jnp.pad(wm, ((0, cout_pad - cout), (0, _round_up(k, kgrain) - k)))
        return wm.astype(compute_dtype)

    def fc(w, out_pad, in_pad=None):
        o, i = w.shape
        in_pad = i if in_pad is None else in_pad
        return jnp.pad(w, ((0, out_pad - o), (0, in_pad - i))).astype(compute_dtype)

    def bias(b, out_pad):
        return jnp.pad(b, (0, out_pad - b.shape[0])).reshape(-1, 1).astype(jnp.float32)

    return {
        "conv1_w": conv_mat(p["conv1_w"], 8),  "conv1_b": bias(p["conv1_b"], 8),
        "conv2_w": conv_mat(p["conv2_w"], 16), "conv2_b": bias(p["conv2_b"], 16),
        "fc1_w": fc(p["fc1_w"], 128),          "fc1_b": bias(p["fc1_b"], 128),
        "fc2_w": fc(p["fc2_w"], 96, 128),      "fc2_b": bias(p["fc2_b"], 96),
        "fc3_w": fc(p["fc3_w"], 16, 96),       "fc3_b": bias(p["fc3_b"], 16),
    }


# ---------------------------------------------------------------------------
# Forward pass (single jit; 3 pallas_calls + small fused XLA glue)
# ---------------------------------------------------------------------------
@jax.jit
def lenet_forward(params, x):
    """x: (N, 1, 28, 28) f32 -> logits (N, 10). Matches PyTorch LeNet.forward."""
    n = x.shape[0]
    npad = _round_up(n, LANE)          # batch padded -> lane-dense everywhere
    cdt = params["conv1_w"].dtype

    # conv1: Conv2d(1, 6, 5, stride=1, padding=2) + ReLU + MaxPool2d(2, 2)
    xp = jnp.pad(x, ((0, npad - n), (0, 0), (2, 2), (2, 2)))          # (Npad, 1, 32, 32)
    xc = xp.transpose(1, 2, 3, 0).astype(cdt)                         # (1, 32, 32, Npad)
    p1 = _pool_window_patches(xc, 5, 5, 14, 14)                       # (4, 25, 196*Npad)
    y1 = _conv_relu_pool(params["conv1_w"], params["conv1_b"], p1)    # (8, Mp1)
    a1 = y1[:6, : 196 * npad].reshape(6, 14, 14, npad)                # (C, H, W, Npad)

    # conv2: Conv2d(6, 16, 5) + ReLU + MaxPool2d(2)
    p2 = _pool_window_patches(a1, 5, 5, 5, 5)                         # (4, 150, 25*Npad)
    y2 = _conv_relu_pool(params["conv2_w"], params["conv2_b"], p2)    # (16, Mp2)

    # Flatten: rows become (c, h, w) in PyTorch order, batch stays on lanes -> pure reshape.
    a2 = y2[:, : 25 * npad].reshape(400, npad)

    # Fused fc1+ReLU -> fc2+ReLU -> fc3 (out rows padded to 16, batch on lanes).
    z = _mlp(a2, params["fc1_w"], params["fc1_b"],
             params["fc2_w"], params["fc2_b"],
             params["fc3_w"], params["fc3_b"])                        # (16, Npad) f32
    return z[:10, :n].T                                               # (N, 10)


# ---------------------------------------------------------------------------
# Pure-XLA reference (original PyTorch parameterization) for a correctness check
# ---------------------------------------------------------------------------
def lenet_reference(p, x):
    def conv(x, w, b, pad):
        y = jax.lax.conv_general_dilated(
            x, w, window_strides=(1, 1), padding=((pad, pad), (pad, pad)),
            dimension_numbers=("NCHW", "OIHW", "NCHW"))
        return y + b.reshape(1, -1, 1, 1)

    def pool(x):
        return jax.lax.reduce_window(x, -jnp.inf, jax.lax.max,
                                     (1, 1, 2, 2), (1, 1, 2, 2), "VALID")

    x = pool(jax.nn.relu(conv(x, p["conv1_w"], p["conv1_b"], 2)))
    x = pool(jax.nn.relu(conv(x, p["conv2_w"], p["conv2_b"], 0)))
    x = x.reshape(x.shape[0], -1)
    x = jax.nn.relu(x @ p["fc1_w"].T + p["fc1_b"])
    x = jax.nn.relu(x @ p["fc2_w"].T + p["fc2_b"])
    return x @ p["fc3_w"].T + p["fc3_b"]


if __name__ == "__main__":
    key = jax.random.PRNGKey(0)
    pkey, xkey = jax.random.split(key)
    raw_params = init_lenet_params(pkey)

    # LeNet's fc1 (16*5*5 inputs) implies 1x28x28 images; small batch of 2.
    x = jax.random.normal(xkey, (2, 1, 28, 28), dtype=jnp.float32)
    ref = lenet_reference(raw_params, x)

    # f32 compute path: tight check against plain XLA (layout bugs would show as O(1) errors).
    out_f32 = jax.block_until_ready(lenet_forward(prepare_params(raw_params, jnp.float32), x))
    assert out_f32.shape == (2, 10), out_f32.shape
    assert bool(jnp.allclose(out_f32, ref, rtol=1e-2, atol=1e-2)), \
        float(jnp.max(jnp.abs(out_f32 - ref)))

    # bf16 compute path (default): bf16 inputs/weights, f32 accumulation -> looser tolerance.
    out = jax.block_until_ready(lenet_forward(prepare_params(raw_params, COMPUTE_DTYPE), x))
    assert out.shape == (2, 10), out.shape
    assert bool(jnp.all(jnp.isfinite(out)))
    assert bool(jnp.allclose(out, ref, rtol=5e-2, atol=5e-2)), \
        float(jnp.max(jnp.abs(out - ref)))

    print("KERNEL_OK")
</pallas_src>

<mosaic_0001>
module attributes {stable_mosaic.version = 11 : i64} {
  func.func @_conv_relu_pool_kernel(%arg0: i32, %arg1: memref<8x32xf32, #tpu.memory_space<vmem>>, %arg2: memref<8x1xf32, #tpu.memory_space<vmem>>, %arg3: memref<4x32x2048xf32, #tpu.memory_space<vmem>>, %arg4: memref<8x2048xf32, #tpu.memory_space<vmem>>) attributes {dimension_semantics = [#tpu.dimension_semantics<parallel>], iteration_bounds = array<i64: 13>, scalar_prefetch = 0 : i64, scratch_operands = 0 : i64, tpu.core_type = #tpu.core_type<tc>, window_params = [{pipeline_mode = #tpu.pipeline_mode<synchronous>, transform_indices = @transform_0, window_bounds = array<i64: 8, 32>}, {pipeline_mode = #tpu.pipeline_mode<synchronous>, transform_indices = @transform_1, window_bounds = array<i64: 8, 1>}, {transform_indices = @transform_2, window_bounds = array<i64: 4, 32, 2048>}, {transform_indices = @transform_3, window_bounds = array<i64: 8, 2048>}]} {
    %c0 = arith.constant 0 : index
    %c0_0 = arith.constant 0 : index
    %0 = vector.load %arg1[%c0, %c0_0] : memref<8x32xf32, #tpu.memory_space<vmem>>, vector<8x32xf32>
    %c0_1 = arith.constant 0 : index
    %c0_2 = arith.constant 0 : index
    %c0_3 = arith.constant 0 : index
    %1 = vector.load %arg3[%c0_1, %c0_2, %c0_3] : memref<4x32x2048xf32, #tpu.memory_space<vmem>>, vector<1x32x2048xf32>
    %2 = vector.shape_cast %1 : vector<1x32x2048xf32> to vector<32x2048xf32>
    %cst = arith.constant dense<0.000000e+00> : vector<8x2048xf32>
    %3 = tpu.matmul %0, %2, %cst {dimension_numbers = #tpu.dot_dimension_numbers<[1], [0], [0], [1], [0, 0, 1, 1], [], []>} : vector<8x32xf32>, vector<32x2048xf32>, vector<8x2048xf32> -> vector<8x2048xf32>
    %c1 = arith.constant 1 : index
    %c0_4 = arith.constant 0 : index
    %c0_5 = arith.constant 0 : index
    %4 = vector.load %arg3[%c1, %c0_4, %c0_5] : memref<4x32x2048xf32, #tpu.memory_space<vmem>>, vector<1x32x2048xf32>
    %5 = vector.shape_cast %4 : vector<1x32x2048xf32> to vector<32x2048xf32>
    %cst_6 = arith.constant dense<0.000000e+00> : vector<8x2048xf32>
    %6 = tpu.matmul %0, %5, %cst_6 {dimension_numbers = #tpu.dot_dimension_numbers<[1], [0], [0], [1], [0, 0, 1, 1], [], []>} : vector<8x32xf32>, vector<32x2048xf32>, vector<8x2048xf32> -> vector<8x2048xf32>
    %7 = arith.maximumf %3, %6 : vector<8x2048xf32>
    %c2 = arith.constant 2 : index
    %c0_7 = arith.constant 0 : index
    %c0_8 = arith.constant 0 : index
    %8 = vector.load %arg3[%c2, %c0_7, %c0_8] : memref<4x32x2048xf32, #tpu.memory_space<vmem>>, vector<1x32x2048xf32>
    %9 = vector.shape_cast %8 : vector<1x32x2048xf32> to vector<32x2048xf32>
    %cst_9 = arith.constant dense<0.000000e+00> : vector<8x2048xf32>
    %10 = tpu.matmul %0, %9, %cst_9 {dimension_numbers = #tpu.dot_dimension_numbers<[1], [0], [0], [1], [0, 0, 1, 1], [], []>} : vector<8x32xf32>, vector<32x2048xf32>, vector<8x2048xf32> -> vector<8x2048xf32>
    %11 = arith.maximumf %7, %10 : vector<8x2048xf32>
    %c3 = arith.constant 3 : index
    %c0_10 = arith.constant 0 : index
    %c0_11 = arith.constant 0 : index
    %12 = vector.load %arg3[%c3, %c0_10, %c0_11] : memref<4x32x2048xf32, #tpu.memory_space<vmem>>, vector<1x32x2048xf32>
    %13 = vector.shape_cast %12 : vector<1x32x2048xf32> to vector<32x2048xf32>
    %cst_12 = arith.constant dense<0.000000e+00> : vector<8x2048xf32>
    %14 = tpu.matmul %0, %13, %cst_12 {dimension_numbers = #tpu.dot_dimension_numbers<[1], [0], [0], [1], [0, 0, 1, 1], [], []>} : vector<8x32xf32>, vector<32x2048xf32>, vector<8x2048xf32> -> vector<8x2048xf32>
    %15 = arith.maximumf %11, %14 : vector<8x2048xf32>
    %c0_13 = arith.constant 0 : index
    %c0_14 = arith.constant 0 : index
    %16 = vector.load %arg2[%c0_13, %c0_14] : memref<8x1xf32, #tpu.memory_space<vmem>>, vector<8x1xf32>
    %17 = vector.broadcast %16 : vector<8x1xf32> to vector<8x2048xf32>
    %18 = arith.addf %15, %17 : vector<8x2048xf32>
    %cst_15 = arith.constant 0.000000e+00 : f32
    %19 = vector.broadcast %cst_15 : f32 to vector<8x2048xf32>
    %20 = arith.maximumf %18, %19 : vector<8x2048xf32>
    %c0_16 = arith.constant 0 : index
    %c0_17 = arith.constant 0 : index
    %21 = vector.load %arg4[%c0_16, %c0_17] : memref<8x2048xf32, #tpu.memory_space<vmem>>, vector<8x2048xf32>
    tpu.vector_store %arg4[%c0_16, %c0_17], %20 {strides = array<i32>} : memref<8x2048xf32, #tpu.memory_space<vmem>>, vector<8x2048xf32>,
    return
  }
  func.func @transform_0(%arg0: i32) -> (i32, i32) {
    %c0_i32 = arith.constant 0 : i32
    %c0_i32_0 = arith.constant 0 : i32
    %c0_i32_1 = arith.constant 0 : i32
    return %c0_i32, %c0_i32_0 : i32, i32
  }
  func.func @transform_1(%arg0: i32) -> (i32, i32) {
    %c0_i32 = arith.constant 0 : i32
    %c0_i32_0 = arith.constant 0 : i32
    %c0_i32_1 = arith.constant 0 : i32
    return %c0_i32, %c0_i32_0 : i32, i32
  }
  func.func @transform_2(%arg0: i32) -> (i32, i32, i32) {
    %c0_i32 = arith.constant 0 : i32
    %c0_i32_0 = arith.constant 0 : i32
    %c0_i32_1 = arith.constant 0 : i32
    return %c0_i32, %c0_i32_0, %arg0 : i32, i32, i32
  }
  func.func @transform_3(%arg0: i32) -> (i32, i32) {
    %c0_i32 = arith.constant 0 : i32
    %c0_i32_0 = arith.constant 0 : i32
    return %c0_i32, %arg0 : i32, i32
  }
}

module attributes {stable_mosaic.version = 11 : i64} {
  func.func @_conv_relu_pool_kernel(%arg0: i32, %arg1: memref<16x152xf32, #tpu.memory_space<vmem>>, %arg2: memref<16x1xf32, #tpu.memory_space<vmem>>, %arg3: memref<4x152x896xf32, #tpu.memory_space<vmem>>, %arg4: memref<16x896xf32, #tpu.memory_space<vmem>>) attributes {dimension_semantics = [#tpu.dimension_semantics<parallel>], iteration_bounds = array<i64: 4>, scalar_prefetch = 0 : i64, scratch_operands = 0 : i64, tpu.core_type = #tpu.core_type<tc>, window_params = [{pipeline_mode = #tpu.pipeline_mode<synchronous>, transform_indices = @transform_0, window_bounds = array<i64: 16, 152>}, {pipeline_mode = #tpu.pipeline_mode<synchronous>, transform_indices = @transform_1, window_bounds = array<i64: 16, 1>}, {transform_indices = @transform_2, window_bounds = array<i64: 4, 152, 896>}, {transform_indices = @transform_3, window_bounds = array<i64: 16, 896>}]} {
    %c0 = arith.constant 0 : index
    %c0_0 = arith.constant 0 : index
    %0 = vector.load %arg1[%c0, %c0_0] : memref<16x152xf32, #tpu.memory_space<vmem>>, vector<16x152xf32>
    %c0_1 = arith.constant 0 : index
    %c0_2 = arith.constant 0 : index
    %c0_3 = arith.constant 0 : index
    %1 = vector.load %arg3[%c0_1, %c0_2, %c0_3] : memref<4x152x896xf32, #tpu.memory_space<vmem>>, vector<1x152x896xf32>
    %2 = vector.shape_cast %1 : vector<1x152x896xf32> to vector<152x896xf32>
    %cst = arith.constant dense<0.000000e+00> : vector<16x896xf32>
    %3 = tpu.matmul %0, %2, %cst {dimension_numbers = #tpu.dot_dimension_numbers<[1], [0], [0], [1], [0, 0, 1, 1], [], []>} : vector<16x152xf32>, vector<152x896xf32>, vector<16x896xf32> -> vector<16x896xf32>
    %c1 = arith.constant 1 : index
    %c0_4 = arith.constant 0 : index
    %c0_5 = arith.constant 0 : index
    %4 = vector.load %arg3[%c1, %c0_4, %c0_5] : memref<4x152x896xf32, #tpu.memory_space<vmem>>, vector<1x152x896xf32>
    %5 = vector.shape_cast %4 : vector<1x152x896xf32> to vector<152x896xf32>
    %cst_6 = arith.constant dense<0.000000e+00> : vector<16x896xf32>
    %6 = tpu.matmul %0, %5, %cst_6 {dimension_numbers = #tpu.dot_dimension_numbers<[1], [0], [0], [1], [0, 0, 1, 1], [], []>} : vector<16x152xf32>, vector<152x896xf32>, vector<16x896xf32> -> vector<16x896xf32>
    %7 = arith.maximumf %3, %6 : vector<16x896xf32>
    %c2 = arith.constant 2 : index
    %c0_7 = arith.constant 0 : index
    %c0_8 = arith.constant 0 : index
    %8 = vector.load %arg3[%c2, %c0_7, %c0_8] : memref<4x152x896xf32, #tpu.memory_space<vmem>>, vector<1x152x896xf32>
    %9 = vector.shape_cast %8 : vector<1x152x896xf32> to vector<152x896xf32>
    %cst_9 = arith.constant dense<0.000000e+00> : vector<16x896xf32>
    %10 = tpu.matmul %0, %9, %cst_9 {dimension_numbers = #tpu.dot_dimension_numbers<[1], [0], [0], [1], [0, 0, 1, 1], [], []>} : vector<16x152xf32>, vector<152x896xf32>, vector<16x896xf32> -> vector<16x896xf32>
    %11 = arith.maximumf %7, %10 : vector<16x896xf32>
    %c3 = arith.constant 3 : index
    %c0_10 = arith.constant 0 : index
    %c0_11 = arith.constant 0 : index
    %12 = vector.load %arg3[%c3, %c0_10, %c0_11] : memref<4x152x896xf32, #tpu.memory_space<vmem>>, vector<1x152x896xf32>
    %13 = vector.shape_cast %12 : vector<1x152x896xf32> to vector<152x896xf32>
    %cst_12 = arith.constant dense<0.000000e+00> : vector<16x896xf32>
    %14 = tpu.matmul %0, %13, %cst_12 {dimension_numbers = #tpu.dot_dimension_numbers<[1], [0], [0], [1], [0, 0, 1, 1], [], []>} : vector<16x152xf32>, vector<152x896xf32>, vector<16x896xf32> -> vector<16x896xf32>
    %15 = arith.maximumf %11, %14 : vector<16x896xf32>
    %c0_13 = arith.constant 0 : index
    %c0_14 = arith.constant 0 : index
    %16 = vector.load %arg2[%c0_13, %c0_14] : memref<16x1xf32, #tpu.memory_space<vmem>>, vector<16x1xf32>
    %17 = vector.broadcast %16 : vector<16x1xf32> to vector<16x896xf32>
    %18 = arith.addf %15, %17 : vector<16x896xf32>
    %cst_15 = arith.constant 0.000000e+00 : f32
    %19 = vector.broadcast %cst_15 : f32 to vector<16x896xf32>
    %20 = arith.maximumf %18, %19 : vector<16x896xf32>
    %c0_16 = arith.constant 0 : index
    %c0_17 = arith.constant 0 : index
    %21 = vector.load %arg4[%c0_16, %c0_17] : memref<16x896xf32, #tpu.memory_space<vmem>>, vector<16x896xf32>
    tpu.vector_store %arg4[%c0_16, %c0_17], %20 {strides = array<i32>} : memref<16x896xf32, #tpu.memory_space<vmem>>, vector<16x896xf32>,
    return
  }
  func.func @transform_0(%arg0: i32) -> (i32, i32) {
    %c0_i32 = arith.constant 0 : i32
    %c0_i32_0 = arith.constant 0 : i32
    %c0_i32_1 = arith.constant 0 : i32
    return %c0_i32, %c0_i32_0 : i32, i32
  }
  func.func @transform_1(%arg0: i32) -> (i32, i32) {
    %c0_i32 = arith.constant 0 : i32
    %c0_i32_0 = arith.constant 0 : i32
    %c0_i32_1 = arith.constant 0 : i32
    return %c0_i32, %c0_i32_0 : i32, i32
  }
  func.func @transform_2(%arg0: i32) -> (i32, i32, i32) {
    %c0_i32 = arith.constant 0 : i32
    %c0_i32_0 = arith.constant 0 : i32
    %c0_i32_1 = arith.constant 0 : i32
    return %c0_i32, %c0_i32_0, %arg0 : i32, i32, i32
  }
  func.func @transform_3(%arg0: i32) -> (i32, i32) {
    %c0_i32 = arith.constant 0 : i32
    %c0_i32_0 = arith.constant 0 : i32
    return %c0_i32, %arg0 : i32, i32
  }
}

module attributes {stable_mosaic.version = 11 : i64} {
  func.func @_mlp_kernel(%arg0: i32, %arg1: memref<400x128xf32, #tpu.memory_space<vmem>>, %arg2: memref<128x400xf32, #tpu.memory_space<vmem>>, %arg3: memref<128x1xf32, #tpu.memory_space<vmem>>, %arg4: memref<96x128xf32, #tpu.memory_space<vmem>>, %arg5: memref<96x1xf32, #tpu.memory_space<vmem>>, %arg6: memref<16x96xf32, #tpu.memory_space<vmem>>, %arg7: memref<16x1xf32, #tpu.memory_space<vmem>>, %arg8: memref<16x128xf32, #tpu.memory_space<vmem>>) attributes {dimension_semantics = [#tpu.dimension_semantics<parallel>], iteration_bounds = array<i64: 1>, scalar_prefetch = 0 : i64, scratch_operands = 0 : i64, tpu.core_type = #tpu.core_type<tc>, window_params = [{transform_indices = @transform_0, window_bounds = array<i64: 400, 128>}, {pipeline_mode = #tpu.pipeline_mode<synchronous>, transform_indices = @transform_1, window_bounds = array<i64: 128, 400>}, {pipeline_mode = #tpu.pipeline_mode<synchronous>, transform_indices = @transform_2, window_bounds = array<i64: 128, 1>}, {pipeline_mode = #tpu.pipeline_mode<synchronous>, transform_indices = @transform_3, window_bounds = array<i64: 96, 128>}, {pipeline_mode = #tpu.pipeline_mode<synchronous>, transform_indices = @transform_4, window_bounds = array<i64: 96, 1>}, {pipeline_mode = #tpu.pipeline_mode<synchronous>, transform_indices = @transform_5, window_bounds = array<i64: 16, 96>}, {pipeline_mode = #tpu.pipeline_mode<synchronous>, transform_indices = @transform_6, window_bounds = array<i64: 16, 1>}, {transform_indices = @transform_7, window_bounds = array<i64: 16, 128>}]} {
    %c0 = arith.constant 0 : index
    %c0_0 = arith.constant 0 : index
    %0 = vector.load %arg2[%c0, %c0_0] : memref<128x400xf32, #tpu.memory_space<vmem>>, vector<128x400xf32>
    %c0_1 = arith.constant 0 : index
    %c0_2 = arith.constant 0 : index
    %1 = vector.load %arg1[%c0_1, %c0_2] : memref<400x128xf32, #tpu.memory_space<vmem>>, vector<400x128xf32>
    %cst = arith.constant dense<0.000000e+00> : vector<128x128xf32>
    %2 = tpu.matmul %0, %1, %cst {dimension_numbers = #tpu.dot_dimension_numbers<[1], [0], [0], [1], [0, 0, 1, 1], [], []>} : vector<128x400xf32>, vector<400x128xf32>, vector<128x128xf32> -> vector<128x128xf32>
    %c0_3 = arith.constant 0 : index
    %c0_4 = arith.constant 0 : index
    %3 = vector.load %arg3[%c0_3, %c0_4] : memref<128x1xf32, #tpu.memory_space<vmem>>, vector<128x1xf32>
    %4 = vector.broadcast %3 : vector<128x1xf32> to vector<128x128xf32>
    %5 = arith.addf %2, %4 : vector<128x128xf32>
    %cst_5 = arith.constant 0.000000e+00 : f32
    %6 = vector.broadcast %cst_5 : f32 to vector<128x128xf32>
    %7 = arith.maximumf %5, %6 : vector<128x128xf32>
    %c0_6 = arith.constant 0 : index
    %c0_7 = arith.constant 0 : index
    %8 = vector.load %arg4[%c0_6, %c0_7] : memref<96x128xf32, #tpu.memory_space<vmem>>, vector<96x128xf32>
    %cst_8 = arith.constant dense<0.000000e+00> : vector<96x128xf32>
    %9 = tpu.matmul %8, %7, %cst_8 {dimension_numbers = #tpu.dot_dimension_numbers<[1], [0], [0], [1], [0, 0, 1, 1], [], []>} : vector<96x128xf32>, vector<128x128xf32>, vector<96x128xf32> -> vector<96x128xf32>
    %c0_9 = arith.constant 0 : index
    %c0_10 = arith.constant 0 : index
    %10 = vector.load %arg5[%c0_9, %c0_10] : memref<96x1xf32, #tpu.memory_space<vmem>>, vector<96x1xf32>
    %11 = vector.broadcast %10 : vector<96x1xf32> to vector<96x128xf32>
    %12 = arith.addf %9, %11 : vector<96x128xf32>
    %cst_11 = arith.constant 0.000000e+00 : f32
    %13 = vector.broadcast %cst_11 : f32 to vector<96x128xf32>
    %14 = arith.maximumf %12, %13 : vector<96x128xf32>
    %c0_12 = arith.constant 0 : index
    %c0_13 = arith.constant 0 : index
    %15 = vector.load %arg6[%c0_12, %c0_13] : memref<16x96xf32, #tpu.memory_space<vmem>>, vector<16x96xf32>
    %cst_14 = arith.constant dense<0.000000e+00> : vector<16x128xf32>
    %16 = tpu.matmul %15, %14, %cst_14 {dimension_numbers = #tpu.dot_dimension_numbers<[1], [0], [0], [1], [0, 0, 1, 1], [], []>} : vector<16x96xf32>, vector<96x128xf32>, vector<16x128xf32> -> vector<16x128xf32>
    %c0_15 = arith.constant 0 : index
    %c0_16 = arith.constant 0 : index
    %17 = vector.load %arg7[%c0_15, %c0_16] : memref<16x1xf32, #tpu.memory_space<vmem>>, vector<16x1xf32>
    %18 = vector.broadcast %17 : vector<16x1xf32> to vector<16x128xf32>
    %19 = arith.addf %16, %18 : vector<16x128xf32>
    %c0_17 = arith.constant 0 : index
    %c0_18 = arith.constant 0 : index
    %20 = vector.load %arg8[%c0_17, %c0_18] : memref<16x128xf32, #tpu.memory_space<vmem>>, vector<16x128xf32>
    tpu.vector_store %arg8[%c0_17, %c0_18], %19 {strides = array<i32>} : memref<16x128xf32, #tpu.memory_space<vmem>>, vector<16x128xf32>,
    return
  }
  func.func @transform_0(%arg0: i32) -> (i32, i32) {
    %c0_i32 = arith.constant 0 : i32
    %c0_i32_0 = arith.constant 0 : i32
    return %c0_i32, %arg0 : i32, i32
  }
  func.func @transform_1(%arg0: i32) -> (i32, i32) {
    %c0_i32 = arith.constant 0 : i32
    %c0_i32_0 = arith.constant 0 : i32
    %c0_i32_1 = arith.constant 0 : i32
    return %c0_i32, %c0_i32_0 : i32, i32
  }
  func.func @transform_2(%arg0: i32) -> (i32, i32) {
    %c0_i32 = arith.constant 0 : i32
    %c0_i32_0 = arith.constant 0 : i32
    %c0_i32_1 = arith.constant 0 : i32
    return %c0_i32, %c0_i32_0 : i32, i32
  }
  func.func @transform_3(%arg0: i32) -> (i32, i32) {
    %c0_i32 = arith.constant 0 : i32
    %c0_i32_0 = arith.constant 0 : i32
    %c0_i32_1 = arith.constant 0 : i32
    return %c0_i32, %c0_i32_0 : i32, i32
  }
  func.func @transform_4(%arg0: i32) -> (i32, i32) {
    %c0_i32 = arith.constant 0 : i32
    %c0_i32_0 = arith.constant 0 : i32
    %c0_i32_1 = arith.constant 0 : i32
    return %c0_i32, %c0_i32_0 : i32, i32
  }
  func.func @transform_5(%arg0: i32) -> (i32, i32) {
    %c0_i32 = arith.constant 0 : i32
    %c0_i32_0 = arith.constant 0 : i32
    %c0_i32_1 = arith.constant 0 : i32
    return %c0_i32, %c0_i32_0 : i32, i32
  }
  func.func @transform_6(%arg0: i32) -> (i32, i32) {
    %c0_i32 = arith.constant 0 : i32
    %c0_i32_0 = arith.constant 0 : i32
    %c0_i32_1 = arith.constant 0 : i32
    return %c0_i32, %c0_i32_0 : i32, i32
  }
  func.func @transform_7(%arg0: i32) -> (i32, i32) {
    %c0_i32 = arith.constant 0 : i32
    %c0_i32_0 = arith.constant 0 : i32
    return %c0_i32, %arg0 : i32, i32
  }
}

</mosaic_0001>

<bundles_post_ra>
// kernel: lenet_forward.3
= control target key start
LH: loop header
LB: loop body
LE: loop exit
PB: predicated region body
PF: predicated region fallthrough
CT: control target
= control target key end

     0   :  { %s2753_s12 = smov 0   ;;  %s2755_s13 = smov 0   ;;  %s3866_s0 = inlined_call_operand.vmem [shape: f32[8,32], index: 0, kind: input, shape index: {}]   ;;  %s3867_s1 = inlined_call_operand.vmem [shape: f32[8,1], index: 1, kind: input, shape index: {}]   ;;  %s3868_s2 = inlined_call_operand.vmem [shape: f32[4,32,26624], index: 2, kind: input, shape index: {}]   ;;  %s3869_s3 = inlined_call_operand.vmem [shape: f32[8,26624], index: 3, kind: output, shape index: {}]  }
   0x1   :  { %s2757_s14 = smov 0  }
   0x2 LB: > { %s2411_s15 = sadd.s32 4294967295, %s2730_s14   ;;  %s2770_s16 = sadd.s32 1, %s2730_s14   ;;  %s2730_s14 = sphi %s2757_s14, %s3875_s14   ;;  %s2726_s13 = sphi %s2755_s13, %s3874_s13   ;;  %s2722_s12 = sphi %s2753_s12, %s3873_s12  }
   0x3   : > { %s59_s17 = ssub.s32 %s2730_s14, %s2770_s16  ;;  %s62_s18 = sadd.s32 1, %s2726_s13 }
   0x4   : > { %p60_p0 = scmp.eq.s32.totalorder %s59_s17, 0  ;;  %p69_p1 = scmp.ne.s32.totalorder %s2726_s13, %s2722_s12 }
   0x5   : > { %p70_p2 = scmp.eq.s32.totalorder %s2730_s14, 0  ;;  %p2414_p4 = scmp.ge.s32.totalorder %s2730_s14, 13 }
   0x6   : > { %s2779_s19 = scalar_select %p60_p0, %s2726_s13, %s62_s18  }
   0x7   : > { %p71_p3 = por %p70_p2, %p69_p1  ;;  %127 = sbr.rel (%p2414_p4) target bundleno = 272 (0x110), region = 24 }
   0xc   : > { %130 = sbr.rel (!%p71_p3) target bundleno = 272 (0x110), region = 28  ;;  %s132_s20 = sand.u32 (%p71_p3), 1, %s2726_s13  }
   0xd   : > { %s2680_s21 = sshll.u32 (%p71_p3), %s2730_s14, 7  ;;  %s2415_s22 = sshll.u32 (%p71_p3), %s132_s20, 11 }
   0xe   : > { %s2787_s25 = scalar_lea.vmem (%p71_p3), %s3868_s2, %s2680_s21  ;;  %s2792_s26 = scalar_lea.vmem (%p71_p3), [#allocation2], %s2415_s22 }
   0xf   : > { %v150_v0 = vld [vmem:[%s2787_s25] sm:$0xff] (%p71_p3)  ;;  %v152_v1 = vld [vmem:[%s2787_s25 + $0x8] sm:$0xff] (%p71_p3)  ;;  %v154_v2 = vld [vmem:[%s2787_s25 + $0x10] sm:$0xff] (%p71_p3) }
  0x10   : > { %151 = vst [vmem:[%s2792_s26] sm:$0xff] (%p71_p3), %v150_v0  ;;  %v156_v3 = vld [vmem:[%s2787_s25 + $0x18] sm:$0xff] (%p71_p3)  ;;  %v158_v4 = vld [vmem:[%s2787_s25 + $0x20] sm:$0xff] (%p71_p3)  ;;  %v160_v5 = vld [vmem:[%s2787_s25 + $0x28] sm:$0xff] (%p71_p3) }
  0x11   : > { %153 = vst [vmem:[%s2792_s26 + $0x8] sm:$0xff] %v152_v1  ;;  %v162_v6 = vld [vmem:[%s2787_s25 + $0x30] sm:$0xff]  ;;  %v164_v7 = vld [vmem:[%s2787_s25 + $0x38] sm:$0xff]  ;;  %v166_v8 = vld [vmem:[%s2787_s25 + $0x40] sm:$0xff] }
  0x12   : > { %155 = vst [vmem:[%s2792_s26 + $0x10] sm:$0xff] %v154_v2  ;;  %v168_v9 = vld [vmem:[%s2787_s25 + $0x48] sm:$0xff]  ;;  %v170_v10 = vld [vmem:[%s2787_s25 + $0x50] sm:$0xff]  ;;  %v172_v11 = vld [vmem:[%s2787_s25 + $0x58] sm:$0xff] }
  0x13   : > { %157 = vst [vmem:[%s2792_s26 + $0x18] sm:$0xff] %v156_v3  ;;  %v174_v12 = vld [vmem:[%s2787_s25 + $0x60] sm:$0xff]  ;;  %v176_v13 = vld [vmem:[%s2787_s25 + $0x68] sm:$0xff]  ;;  %v178_v14 = vld [vmem:[%s2787_s25 + $0x70] sm:$0xff] }
  0x14   : > { %159 = vst [vmem:[%s2792_s26 + $0x20] sm:$0xff] %v158_v4  ;;  %v180_v15 = vld [vmem:[%s2787_s25 + $0x78] sm:$0xff]  ;;  %v182_v16 = vld [vmem:[%s2787_s25 + $0x680] sm:$0xff]  ;;  %v184_v17 = vld [vmem:[%s2787_s25 + $0x688] sm:$0xff] }
  0x15   : > { %161 = vst [vmem:[%s2792_s26 + $0x28] sm:$0xff] %v160_v5  ;;  %v186_v18 = vld [vmem:[%s2787_s25 + $0x690] sm:$0xff]  ;;  %v188_v19 = vld [vmem:[%s2787_s25 + $0x698] sm:$0xff]  ;;  %v190_v20 = vld [vmem:[%s2787_s25 + $0x6a0] sm:$0xff] }
  0x16   : > { %163 = vst [vmem:[%s2792_s26 + $0x30] sm:$0xff] %v162_v6  ;;  %v192_v21 = vld [vmem:[%s2787_s25 + $0x6a8] sm:$0xff]  ;;  %v194_v22 = vld [vmem:[%s2787_s25 + $0x6b0] sm:$0xff]  ;;  %v196_v23 = vld [vmem:[%s2787_s25 + $0x6b8] sm:$0xff] }
  0x17   : > { %165 = vst [vmem:[%s2792_s26 + $0x38] sm:$0xff] %v164_v7  ;;  %v198_v24 = vld [vmem:[%s2787_s25 + $0x6c0] sm:$0xff]  ;;  %v200_v25 = vld [vmem:[%s2787_s25 + $0x6c8] sm:$0xff]  ;;  %v202_v26 = vld [vmem:[%s2787_s25 + $0x6d0] sm:$0xff] }
  0x18   : > { %167 = vst [vmem:[%s2792_s26 + $0x40] sm:$0xff] %v166_v8  ;;  %v204_v27 = vld [vmem:[%s2787_s25 + $0x6d8] sm:$0xff]  ;;  %v206_v28 = vld [vmem:[%s2787_s25 + $0x6e0] sm:$0xff]  ;;  %v208_v29 = vld [vmem:[%s2787_s25 + $0x6e8] sm:$0xff] }
  0x19   : > { %169 = vst [vmem:[%s2792_s26 + $0x48] sm:$0xff] %v168_v9  ;;  %v210_v30 = vld [vmem:[%s2787_s25 + $0x6f0] sm:$0xff]  ;;  %v212_v31 = vld [vmem:[%s2787_s25 + $0x6f8] sm:$0xff]  ;;  %v214_v32 = vld [vmem:[%s2787_s25 + $0xd00] sm:$0xff] }
  0x1a   : > { %171 = vst [vmem:[%s2792_s26 + $0x50] sm:$0xff] %v170_v10  ;;  %v216_v33 = vld [vmem:[%s2787_s25 + $0xd08] sm:$0xff]  ;;  %v218_v34 = vld [vmem:[%s2787_s25 + $0xd10] sm:$0xff]  ;;  %v220_v35 = vld [vmem:[%s2787_s25 + $0xd18] sm:$0xff] }
  0x1b   : > { %173 = vst [vmem:[%s2792_s26 + $0x58] sm:$0xff] %v172_v11  ;;  %v222_v36 = vld [vmem:[%s2787_s25 + $0xd20] sm:$0xff]  ;;  %v224_v37 = vld [vmem:[%s2787_s25 + $0xd28] sm:$0xff]  ;;  %v226_v38 = vld [vmem:[%s2787_s25 + $0xd30] sm:$0xff] }
  0x1c   : > { %175 = vst [vmem:[%s2792_s26 + $0x60] sm:$0xff] %v174_v12  ;;  %v228_v39 = vld [vmem:[%s2787_s25 + $0xd38] sm:$0xff]  ;;  %v230_v40 = vld [vmem:[%s2787_s25 + $0xd40] sm:$0xff]  ;;  %v232_v41 = vld [vmem:[%s2787_s25 + $0xd48] sm:$0xff] }
  0x1d   : > { %177 = vst [vmem:[%s2792_s26 + $0x68] sm:$0xff] %v176_v13  ;;  %v234_v42 = vld [vmem:[%s2787_s25 + $0xd50] sm:$0xff]  ;;  %v236_v43 = vld [vmem:[%s2787_s25 + $0xd58] sm:$0xff]  ;;  %v238_v44 = vld [vmem:[%s2787_s25 + $0xd60] sm:$0xff] }
  0x1e   : > { %179 = vst [vmem:[%s2792_s26 + $0x70] sm:$0xff] %v178_v14  ;;  %v240_v45 = vld [vmem:[%s2787_s25 + $0xd68] sm:$0xff]  ;;  %v242_v46 = vld [vmem:[%s2787_s25 + $0xd70] sm:$0xff]  ;;  %v244_v47 = vld [vmem:[%s2787_s25 + $0xd78] sm:$0xff] }
  0x1f   : > { %181 = vst [vmem:[%s2792_s26 + $0x78] sm:$0xff] %v180_v15  ;;  %v246_v48 = vld [vmem:[%s2787_s25 + $0x1380] sm:$0xff]  ;;  %v248_v49 = vld [vmem:[%s2787_s25 + $0x1388] sm:$0xff]  ;;  %v250_v50 = vld [vmem:[%s2787_s25 + $0x1390] sm:$0xff] }
  0x20   : > { %183 = vst [vmem:[%s2792_s26 + $0x80] sm:$0xff] %v182_v16  ;;  %v252_v51 = vld [vmem:[%s2787_s25 + $0x1398] sm:$0xff]  ;;  %v254_v52 = vld [vmem:[%s2787_s25 + $0x13a0] sm:$0xff]  ;;  %v256_v53 = vld [vmem:[%s2787_s25 + $0x13a8] sm:$0xff] }
  0x21   : > { %185 = vst [vmem:[%s2792_s26 + $0x88] sm:$0xff] %v184_v17  ;;  %v258_v54 = vld [vmem:[%s2787_s25 + $0x13b0] sm:$0xff]  ;;  %v260_v55 = vld [vmem:[%s2787_s25 + $0x13b8] sm:$0xff]  ;;  %v262_v56 = vld [vmem:[%s2787_s25 + $0x13c0] sm:$0xff] }
  0x22   : > { %187 = vst [vmem:[%s2792_s26 + $0x90] sm:$0xff] %v186_v18  ;;  %v264_v57 = vld [vmem:[%s2787_s25 + $0x13c8] sm:$0xff]  ;;  %v266_v58 = vld [vmem:[%s2787_s25 + $0x13d0] sm:$0xff]  ;;  %v268_v59 = vld [vmem:[%s2787_s25 + $0x13d8] sm:$0xff] }
  0x23   : > { %189 = vst [vmem:[%s2792_s26 + $0x98] sm:$0xff] %v188_v19  ;;  %v270_v60 = vld [vmem:[%s2787_s25 + $0x13e0] sm:$0xff]  ;;  %v272_v61 = vld [vmem:[%s2787_s25 + $0x13e8] sm:$0xff]  ;;  %v274_v62 = vld [vmem:[%s2787_s25 + $0x13f0] sm:$0xff] }
  0x24   : > { %191 = vst [vmem:[%s2792_s26 + $0xa0] sm:$0xff] %v190_v20  ;;  %v276_v63 = vld [vmem:[%s2787_s25 + $0x13f8] sm:$0xff]  ;;  %v278_v0 = vld [vmem:[%s2787_s25 + $0x1a00] sm:$0xff]  ;;  %v280_v1 = vld [vmem:[%s2787_s25 + $0x1a08] sm:$0xff] }
  0x25   : > { %193 = vst [vmem:[%s2792_s26 + $0xa8] sm:$0xff] %v192_v21  ;;  %v282_v2 = vld [vmem:[%s2787_s25 + $0x1a10] sm:$0xff]  ;;  %v284_v3 = vld [vmem:[%s2787_s25 + $0x1a18] sm:$0xff]  ;;  %v286_v4 = vld [vmem:[%s2787_s25 + $0x1a20] sm:$0xff] }
  0x26   : > { %195 = vst [vmem:[%s2792_s26 + $0xb0] sm:$0xff] %v194_v22  ;;  %v288_v5 = vld [vmem:[%s2787_s25 + $0x1a28] sm:$0xff]  ;;  %v290_v6 = vld [vmem:[%s2787_s25 + $0x1a30] sm:$0xff]  ;;  %v292_v7 = vld [vmem:[%s2787_s25 + $0x1a38] sm:$0xff] }
  0x27   : > { %197 = vst [vmem:[%s2792_s26 + $0xb8] sm:$0xff] %v196_v23  ;;  %v294_v8 = vld [vmem:[%s2787_s25 + $0x1a40] sm:$0xff]  ;;  %v296_v9 = vld [vmem:[%s2787_s25 + $0x1a48] sm:$0xff]  ;;  %v298_v10 = vld [vmem:[%s2787_s25 + $0x1a50] sm:$0xff] }
  0x28   : > { %199 = vst [vmem:[%s2792_s26 + $0xc0] sm:$0xff] %v198_v24  ;;  %v300_v11 = vld [vmem:[%s2787_s25 + $0x1a58] sm:$0xff]  ;;  %v302_v12 = vld [vmem:[%s2787_s25 + $0x1a60] sm:$0xff]  ;;  %v304_v13 = vld [vmem:[%s2787_s25 + $0x1a68] sm:$0xff] }
  0x29   : > { %201 = vst [vmem:[%s2792_s26 + $0xc8] sm:$0xff] %v200_v25  ;;  %v306_v14 = vld [vmem:[%s2787_s25 + $0x1a70] sm:$0xff]  ;;  %v308_v15 = vld [vmem:[%s2787_s25 + $0x1a78] sm:$0xff]  ;;  %v310_v16 = vld [vmem:[%s2787_s25 + $0x2080] sm:$0xff] }
  0x2a   : > { %203 = vst [vmem:[%s2792_s26 + $0xd0] sm:$0xff] %v202_v26  ;;  %v312_v17 = vld [vmem:[%s2787_s25 + $0x2088] sm:$0xff]  ;;  %v314_v18 = vld [vmem:[%s2787_s25 + $0x2090] sm:$0xff]  ;;  %v316_v19 = vld [vmem:[%s2787_s25 + $0x2098] sm:$0xff] }
  0x2b   : > { %205 = vst [vmem:[%s2792_s26 + $0xd8] sm:$0xff] %v204_v27  ;;  %v318_v20 = vld [vmem:[%s2787_s25 + $0x20a0] sm:$0xff]  ;;  %v320_v21 = vld [vmem:[%s2787_s25 + $0x20a8] sm:$0xff]  ;;  %v322_v22 = vld [vmem:[%s2787_s25 + $0x20b0] sm:$0xff] }
  0x2c   : > { %207 = vst [vmem:[%s2792_s26 + $0xe0] sm:$0xff] %v206_v28  ;;  %v324_v23 = vld [vmem:[%s2787_s25 + $0x20b8] sm:$0xff]  ;;  %v326_v24 = vld [vmem:[%s2787_s25 + $0x20c0] sm:$0xff]  ;;  %v328_v25 = vld [vmem:[%s2787_s25 + $0x20c8] sm:$0xff] }
  0x2d   : > { %209 = vst [vmem:[%s2792_s26 + $0xe8] sm:$0xff] %v208_v29  ;;  %v330_v26 = vld [vmem:[%s2787_s25 + $0x20d0] sm:$0xff]  ;;  %v332_v27 = vld [vmem:[%s2787_s25 + $0x20d8] sm:$0xff]  ;;  %v334_v28 = vld [vmem:[%s2787_s25 + $0x20e0] sm:$0xff] }
  0x2e   : > { %211 = vst [vmem:[%s2792_s26 + $0xf0] sm:$0xff] %v210_v30  ;;  %v336_v29 = vld [vmem:[%s2787_s25 + $0x20e8] sm:$0xff]  ;;  %v338_v30 = vld [vmem:[%s2787_s25 + $0x20f0] sm:$0xff] }
  0x2f   : > { %213 = vst [vmem:[%s2792_s26 + $0xf8] sm:$0xff] %v212_v31  ;;  %v340_v31 = vld [vmem:[%s2787_s25 + $0x20f8] sm:$0xff] }
  0x30   : > { %215 = vst [vmem:[%s2792_s26 + $0x100] sm:$0xff] %v214_v32  ;;  %v342_v32 = vld [vmem:[%s2787_s25 + $0x2700] sm:$0xff] }
  0x31   : > { %217 = vst [vmem:[%s2792_s26 + $0x108] sm:$0xff] %v216_v33  ;;  %v344_v33 = vld [vmem:[%s2787_s25 + $0x2708] sm:$0xff] }
  0x32   : > { %219 = vst [vmem:[%s2792_s26 + $0x110] sm:$0xff] %v218_v34  ;;  %v346_v34 = vld [vmem:[%s2787_s25 + $0x2710] sm:$0xff] }
  0x33   : > { %221 = vst [vmem:[%s2792_s26 + $0x118] sm:$0xff] %v220_v35  ;;  %v348_v35 = vld [vmem:[%s2787_s25 + $0x2718] sm:$0xff] }
  0x34   : > { %223 = vst [vmem:[%s2792_s26 + $0x120] sm:$0xff] %v222_v36  ;;  %v350_v36 = vld [vmem:[%s2787_s25 + $0x2720] sm:$0xff] }
  0x35   : > { %225 = vst [vmem:[%s2792_s26 + $0x128] sm:$0xff] %v224_v37  ;;  %v352_v37 = vld [vmem:[%s2787_s25 + $0x2728] sm:$0xff] }
  0x36   : > { %227 = vst [vmem:[%s2792_s26 + $0x130] sm:$0xff] %v226_v38  ;;  %v354_v38 = vld [vmem:[%s2787_s25 + $0x2730] sm:$0xff] }
  0x37   : > { %229 = vst [vmem:[%s2792_s26 + $0x138] sm:$0xff] %v228_v39  ;;  %v356_v39 = vld [vmem:[%s2787_s25 + $0x2738] sm:$0xff] }
  0x38   : > { %231 = vst [vmem:[%s2792_s26 + $0x140] sm:$0xff] %v230_v40  ;;  %v358_v40 = vld [vmem:[%s2787_s25 + $0x2740] sm:$0xff] }
  0x39   : > { %233 = vst [vmem:[%s2792_s26 + $0x148] sm:$0xff] %v232_v41  ;;  %v360_v41 = vld [vmem:[%s2787_s25 + $0x2748] sm:$0xff] }
  0x3a   : > { %235 = vst [vmem:[%s2792_s26 + $0x150] sm:$0xff] %v234_v42  ;;  %v362_v42 = vld [vmem:[%s2787_s25 + $0x2750] sm:$0xff] }
  0x3b   : > { %237 = vst [vmem:[%s2792_s26 + $0x158] sm:$0xff] %v236_v43  ;;  %v364_v43 = vld [vmem:[%s2787_s25 + $0x2758] sm:$0xff] }
  0x3c   : > { %239 = vst [vmem:[%s2792_s26 + $0x160] sm:$0xff] %v238_v44  ;;  %v366_v44 = vld [vmem:[%s2787_s25 + $0x2760] sm:$0xff] }
  0x3d   : > { %241 = vst [vmem:[%s2792_s26 + $0x168] sm:$0xff] %v240_v45  ;;  %v368_v45 = vld [vmem:[%s2787_s25 + $0x2768] sm:$0xff] }
  0x3e   : > { %243 = vst [vmem:[%s2792_s26 + $0x170] sm:$0xff] %v242_v46  ;;  %v370_v46 = vld [vmem:[%s2787_s25 + $0x2770] sm:$0xff] }
  0x3f   : > { %245 = vst [vmem:[%s2792_s26 + $0x178] sm:$0xff] %v244_v47  ;;  %v372_v47 = vld [vmem:[%s2787_s25 + $0x2778] sm:$0xff] }
  0x40   : > { %247 = vst [vmem:[%s2792_s26 + $0x180] sm:$0xff] %v246_v48  ;;  %v374_v48 = vld [vmem:[%s2787_s25 + $0x2d80] sm:$0xff] }
  0x41   : > { %249 = vst [vmem:[%s2792_s26 + $0x188] sm:$0xff] %v248_v49  ;;  %v376_v49 = vld [vmem:[%s2787_s25 + $0x2d88] sm:$0xff] }
  0x42   : > { %251 = vst [vmem:[%s2792_s26 + $0x190] sm:$0xff] %v250_v50  ;;  %v378_v50 = vld [vmem:[%s2787_s25 + $0x2d90] sm:$0xff] }
  0x43   : > { %253 = vst [vmem:[%s2792_s26 + $0x198] sm:$0xff] %v252_v51  ;;  %v380_v51 = vld [vmem:[%s2787_s25 + $0x2d98] sm:$0xff] }
  0x44   : > { %255 = vst [vmem:[%s2792_s26 + $0x1a0] sm:$0xff] %v254_v52  ;;  %v382_v52 = vld [vmem:[%s2787_s25 + $0x2da0] sm:$0xff] }
  0x45   : > { %257 = vst [vmem:[%s2792_s26 + $0x1a8] sm:$0xff] %v256_v53  ;;  %v384_v53 = vld [vmem:[%s2787_s25 + $0x2da8] sm:$0xff] }
  0x46   : > { %259 = vst [vmem:[%s2792_s26 + $0x1b0] sm:$0xff] %v258_v54  ;;  %v386_v54 = vld [vmem:[%s2787_s25 + $0x2db0] sm:$0xff] }
  0x47   : > { %261 = vst [vmem:[%s2792_s26 + $0x1b8] sm:$0xff] %v260_v55  ;;  %v388_v55 = vld [vmem:[%s2787_s25 + $0x2db8] sm:$0xff] }
  0x48   : > { %263 = vst [vmem:[%s2792_s26 + $0x1c0] sm:$0xff] %v262_v56  ;;  %v390_v56 = vld [vmem:[%s2787_s25 + $0x2dc0] sm:$0xff] }
  0x49   : > { %265 = vst [vmem:[%s2792_s26 + $0x1c8] sm:$0xff] %v264_v57  ;;  %v392_v57 = vld [vmem:[%s2787_s25 + $0x2dc8] sm:$0xff] }
  0x4a   : > { %267 = vst [vmem:[%s2792_s26 + $0x1d0] sm:$0xff] %v266_v58  ;;  %v394_v58 = vld [vmem:[%s2787_s25 + $0x2dd0] sm:$0xff] }
  0x4b   : > { %269 = vst [vmem:[%s2792_s26 + $0x1d8] sm:$0xff] %v268_v59  ;;  %v396_v59 = vld [vmem:[%s2787_s25 + $0x2dd8] sm:$0xff] }
  0x4c   : > { %271 = vst [vmem:[%s2792_s26 + $0x1e0] sm:$0xff] %v270_v60  ;;  %v398_v60 = vld [vmem:[%s2787_s25 + $0x2de0] sm:$0xff] }
  0x4d   : > { %273 = vst [vmem:[%s2792_s26 + $0x1e8] sm:$0xff] %v272_v61  ;;  %v400_v61 = vld [vmem:[%s2787_s25 + $0x2de8] sm:$0xff] }
  0x4e   : > { %275 = vst [vmem:[%s2792_s26 + $0x1f0] sm:$0xff] %v274_v62  ;;  %v402_v62 = vld [vmem:[%s2787_s25 + $0x2df0] sm:$0xff] }
  0x4f   : > { %277 = vst [vmem:[%s2792_s26 + $0x1f8] sm:$0xff] %v276_v63  ;;  %v404_v63 = vld [vmem:[%s2787_s25 + $0x2df8] sm:$0xff] }
  0x50   : > { %279 = vst [vmem:[%s2792_s26 + $0x200] sm:$0xff] %v278_v0  ;;  %v406_v0 = vld [vmem:[%s2787_s25 + $0x3400] sm:$0xff] }
  0x51   : > { %281 = vst [vmem:[%s2792_s26 + $0x208] sm:$0xff] %v280_v1  ;;  %v408_v1 = vld [vmem:[%s2787_s25 + $0x3408] sm:$0xff] }
  0x52   : > { %283 = vst [vmem:[%s2792_s26 + $0x210] sm:$0xff] %v282_v2  ;;  %v410_v2 = vld [vmem:[%s2787_s25 + $0x3410] sm:$0xff] }
  0x53   : > { %285 = vst [vmem:[%s2792_s26 + $0x218] sm:$0xff] %v284_v3  ;;  %v412_v3 = vld [vmem:[%s2787_s25 + $0x3418] sm:$0xff] }
  0x54   : > { %287 = vst [vmem:[%s2792_s26 + $0x220] sm:$0xff] %v286_v4  ;;  %v414_v4 = vld [vmem:[%s2787_s25 + $0x3420] sm:$0xff] }
  0x55   : > { %289 = vst [vmem:[%s2792_s26 + $0x228] sm:$0xff] %v288_v5  ;;  %v416_v5 = vld [vmem:[%s2787_s25 + $0x3428] sm:$0xff] }
  0x56   : > { %291 = vst [vmem:[%s2792_s26 + $0x230] sm:$0xff] %v290_v6  ;;  %v418_v6 = vld [vmem:[%s2787_s25 + $0x3430] sm:$0xff] }
  0x57   : > { %293 = vst [vmem:[%s2792_s26 + $0x238] sm:$0xff] %v292_v7  ;;  %v420_v7 = vld [vmem:[%s2787_s25 + $0x3438] sm:$0xff] }
  0x58   : > { %295 = vst [vmem:[%s2792_s26 + $0x240] sm:$0xff] %v294_v8  ;;  %v422_v8 = vld [vmem:[%s2787_s25 + $0x3440] sm:$0xff] }
  0x59   : > { %297 = vst [vmem:[%s2792_s26 + $0x248] sm:$0xff] %v296_v9  ;;  %v424_v9 = vld [vmem:[%s2787_s25 + $0x3448] sm:$0xff] }
  0x5a   : > { %299 = vst [vmem:[%s2792_s26 + $0x250] sm:$0xff] %v298_v10  ;;  %v426_v10 = vld [vmem:[%s2787_s25 + $0x3450] sm:$0xff] }
  0x5b   : > { %301 = vst [vmem:[%s2792_s26 + $0x258] sm:$0xff] %v300_v11  ;;  %v428_v11 = vld [vmem:[%s2787_s25 + $0x3458] sm:$0xff] }
  0x5c   : > { %303 = vst [vmem:[%s2792_s26 + $0x260] sm:$0xff] %v302_v12  ;;  %v430_v12 = vld [vmem:[%s2787_s25 + $0x3460] sm:$0xff] }
  0x5d   : > { %305 = vst [vmem:[%s2792_s26 + $0x268] sm:$0xff] %v304_v13  ;;  %v432_v13 = vld [vmem:[%s2787_s25 + $0x3468] sm:$0xff] }
  0x5e   : > { %307 = vst [vmem:[%s2792_s26 + $0x270] sm:$0xff] %v306_v14  ;;  %v434_v14 = vld [vmem:[%s2787_s25 + $0x3470] sm:$0xff] }
  0x5f   : > { %309 = vst [vmem:[%s2792_s26 + $0x278] sm:$0xff] %v308_v15  ;;  %v436_v15 = vld [vmem:[%s2787_s25 + $0x3478] sm:$0xff] }
  0x60   : > { %311 = vst [vmem:[%s2792_s26 + $0x280] sm:$0xff] %v310_v16  ;;  %v438_v16 = vld [vmem:[%s2787_s25 + $0x3a80] sm:$0xff] }
  0x61   : > { %313 = vst [vmem:[%s2792_s26 + $0x288] sm:$0xff] %v312_v17  ;;  %v440_v17 = vld [vmem:[%s2787_s25 + $0x3a88] sm:$0xff] }
  0x62   : > { %315 = vst [vmem:[%s2792_s26 + $0x290] sm:$0xff] %v314_v18  ;;  %v442_v18 = vld [vmem:[%s2787_s25 + $0x3a90] sm:$0xff] }
  0x63   : > { %317 = vst [vmem:[%s2792_s26 + $0x298] sm:$0xff] %v316_v19  ;;  %v444_v19 = vld [vmem:[%s2787_s25 + $0x3a98] sm:$0xff] }
  0x64   : > { %319 = vst [vmem:[%s2792_s26 + $0x2a0] sm:$0xff] %v318_v20  ;;  %v446_v20 = vld [vmem:[%s2787_s25 + $0x3aa0] sm:$0xff] }
  0x65   : > { %321 = vst [vmem:[%s2792_s26 + $0x2a8] sm:$0xff] %v320_v21  ;;  %v448_v21 = vld [vmem:[%s2787_s25 + $0x3aa8] sm:$0xff] }
  0x66   : > { %323 = vst [vmem:[%s2792_s26 + $0x2b0] sm:$0xff] %v322_v22  ;;  %v450_v22 = vld [vmem:[%s2787_s25 + $0x3ab0] sm:$0xff] }
  0x67   : > { %325 = vst [vmem:[%s2792_s26 + $0x2b8] sm:$0xff] %v324_v23  ;;  %v452_v23 = vld [vmem:[%s2787_s25 + $0x3ab8] sm:$0xff] }
  0x68   : > { %327 = vst [vmem:[%s2792_s26 + $0x2c0] sm:$0xff] %v326_v24  ;;  %v454_v24 = vld [vmem:[%s2787_s25 + $0x3ac0] sm:$0xff] }
  0x69   : > { %329 = vst [vmem:[%s2792_s26 + $0x2c8] sm:$0xff] %v328_v25  ;;  %v456_v25 = vld [vmem:[%s2787_s25 + $0x3ac8] sm:$0xff] }
  0x6a   : > { %331 = vst [vmem:[%s2792_s26 + $0x2d0] sm:$0xff] %v330_v26  ;;  %v458_v26 = vld [vmem:[%s2787_s25 + $0x3ad0] sm:$0xff] }
  0x6b   : > { %333 = vst [vmem:[%s2792_s26 + $0x2d8] sm:$0xff] %v332_v27  ;;  %v460_v27 = vld [vmem:[%s2787_s25 + $0x3ad8] sm:$0xff] }
  0x6c   : > { %335 = vst [vmem:[%s2792_s26 + $0x2e0] sm:$0xff] %v334_v28  ;;  %v462_v28 = vld [vmem:[%s2787_s25 + $0x3ae0] sm:$0xff] }
  0x6d   : > { %337 = vst [vmem:[%s2792_s26 + $0x2e8] sm:$0xff] %v336_v29  ;;  %v464_v29 = vld [vmem:[%s2787_s25 + $0x3ae8] sm:$0xff] }
  0x6e   : > { %339 = vst [vmem:[%s2792_s26 + $0x2f0] sm:$0xff] %v338_v30  ;;  %v466_v30 = vld [vmem:[%s2787_s25 + $0x3af0] sm:$0xff] }
  0x6f   : > { %341 = vst [vmem:[%s2792_s26 + $0x2f8] sm:$0xff] %v340_v31  ;;  %v468_v31 = vld [vmem:[%s2787_s25 + $0x3af8] sm:$0xff] }
  0x70   : > { %343 = vst [vmem:[%s2792_s26 + $0x300] sm:$0xff] %v342_v32  ;;  %v470_v32 = vld [vmem:[%s2787_s25 + $0x4100] sm:$0xff] }
  0x71   : > { %345 = vst [vmem:[%s2792_s26 + $0x308] sm:$0xff] %v344_v33  ;;  %v472_v33 = vld [vmem:[%s2787_s25 + $0x4108] sm:$0xff] }
  0x72   : > { %347 = vst [vmem:[%s2792_s26 + $0x310] sm:$0xff] %v346_v34  ;;  %v474_v34 = vld [vmem:[%s2787_s25 + $0x4110] sm:$0xff] }
  0x73   : > { %349 = vst [vmem:[%s2792_s26 + $0x318] sm:$0xff] %v348_v35  ;;  %v476_v35 = vld [vmem:[%s2787_s25 + $0x4118] sm:$0xff] }
  0x74   : > { %351 = vst [vmem:[%s2792_s26 + $0x320] sm:$0xff] %v350_v36  ;;  %v478_v36 = vld [vmem:[%s2787_s25 + $0x4120] sm:$0xff] }
  0x75   : > { %353 = vst [vmem:[%s2792_s26 + $0x328] sm:$0xff] %v352_v37  ;;  %v480_v37 = vld [vmem:[%s2787_s25 + $0x4128] sm:$0xff] }
  0x76   : > { %355 = vst [vmem:[%s2792_s26 + $0x330] sm:$0xff] %v354_v38  ;;  %v482_v38 = vld [vmem:[%s2787_s25 + $0x4130] sm:$0xff] }
  0x77   : > { %357 = vst [vmem:[%s2792_s26 + $0x338] sm:$0xff] %v356_v39  ;;  %v484_v39 = vld [vmem:[%s2787_s25 + $0x4138] sm:$0xff] }
  0x78   : > { %359 = vst [vmem:[%s2792_s26 + $0x340] sm:$0xff] %v358_v40  ;;  %v486_v40 = vld [vmem:[%s2787_s25 + $0x4140] sm:$0xff] }
  0x79   : > { %361 = vst [vmem:[%s2792_s26 + $0x348] sm:$0xff] %v360_v41  ;;  %v488_v41 = vld [vmem:[%s2787_s25 + $0x4148] sm:$0xff] }
  0x7a   : > { %363 = vst [vmem:[%s2792_s26 + $0x350] sm:$0xff] %v362_v42  ;;  %v490_v42 = vld [vmem:[%s2787_s25 + $0x4150] sm:$0xff] }
  0x7b   : > { %365 = vst [vmem:[%s2792_s26 + $0x358] sm:$0xff] %v364_v43  ;;  %v492_v43 = vld [vmem:[%s2787_s25 + $0x4158] sm:$0xff] }
  0x7c   : > { %367 = vst [vmem:[%s2792_s26 + $0x360] sm:$0xff] %v366_v44  ;;  %v494_v44 = vld [vmem:[%s2787_s25 + $0x4160] sm:$0xff] }
  0x7d   : > { %369 = vst [vmem:[%s2792_s26 + $0x368] sm:$0xff] %v368_v45  ;;  %v496_v45 = vld [vmem:[%s2787_s25 + $0x4168] sm:$0xff] }
  0x7e   : > { %371 = vst [vmem:[%s2792_s26 + $0x370] sm:$0xff] %v370_v46  ;;  %v498_v46 = vld [vmem:[%s2787_s25 + $0x4170] sm:$0xff] }
  0x7f   : > { %373 = vst [vmem:[%s2792_s26 + $0x378] sm:$0xff] %v372_v47  ;;  %v500_v47 = vld [vmem:[%s2787_s25 + $0x4178] sm:$0xff] }
  0x80   : > { %375 = vst [vmem:[%s2792_s26 + $0x380] sm:$0xff] %v374_v48  ;;  %v502_v48 = vld [vmem:[%s2787_s25 + $0x4780] sm:$0xff] }
  0x81   : > { %377 = vst [vmem:[%s2792_s26 + $0x388] sm:$0xff] %v376_v49  ;;  %v504_v49 = vld [vmem:[%s2787_s25 + $0x4788] sm:$0xff] }
  0x82   : > { %379 = vst [vmem:[%s2792_s26 + $0x390] sm:$0xff] %v378_v50  ;;  %v506_v50 = vld [vmem:[%s2787_s25 + $0x4790] sm:$0xff] }
  0x83   : > { %381 = vst [vmem:[%s2792_s26 + $0x398] sm:$0xff] %v380_v51  ;;  %v508_v51 = vld [vmem:[%s2787_s25 + $0x4798] sm:$0xff] }
  0x84   : > { %383 = vst [vmem:[%s2792_s26 + $0x3a0] sm:$0xff] %v382_v52  ;;  %v510_v52 = vld [vmem:[%s2787_s25 + $0x47a0] sm:$0xff] }
  0x85   : > { %385 = vst [vmem:[%s2792_s26 + $0x3a8] sm:$0xff] %v384_v53  ;;  %v512_v53 = vld [vmem:[%s2787_s25 + $0x47a8] sm:$0xff] }
  0x86   : > { %387 = vst [vmem:[%s2792_s26 + $0x3b0] sm:$0xff] %v386_v54  ;;  %v514_v54 = vld [vmem:[%s2787_s25 + $0x47b0] sm:$0xff] }
  0x87   : > { %389 = vst [vmem:[%s2792_s26 + $0x3b8] sm:$0xff] %v388_v55  ;;  %v516_v55 = vld [vmem:[%s2787_s25 + $0x47b8] sm:$0xff] }
  0x88   : > { %391 = vst [vmem:[%s2792_s26 + $0x3c0] sm:$0xff] %v390_v56  ;;  %v518_v56 = vld [vmem:[%s2787_s25 + $0x47c0] sm:$0xff] }
  0x89   : > { %393 = vst [vmem:[%s2792_s26 + $0x3c8] sm:$0xff] %v392_v57  ;;  %v520_v57 = vld [vmem:[%s2787_s25 + $0x47c8] sm:$0xff] }
  0x8a   : > { %395 = vst [vmem:[%s2792_s26 + $0x3d0] sm:$0xff] %v394_v58  ;;  %v522_v58 = vld [vmem:[%s2787_s25 + $0x47d0] sm:$0xff] }
  0x8b   : > { %397 = vst [vmem:[%s2792_s26 + $0x3d8] sm:$0xff] %v396_v59  ;;  %v524_v59 = vld [vmem:[%s2787_s25 + $0x47d8] sm:$0xff] }
  0x8c   : > { %399 = vst [vmem:[%s2792_s26 + $0x3e0] sm:$0xff] %v398_v60  ;;  %v526_v60 = vld [vmem:[%s2787_s25 + $0x47e0] sm:$0xff] }
  0x8d   : > { %401 = vst [vmem:[%s2792_s26 + $0x3e8] sm:$0xff] %v400_v61  ;;  %v528_v61 = vld [vmem:[%s2787_s25 + $0x47e8] sm:$0xff] }
  0x8e   : > { %403 = vst [vmem:[%s2792_s26 + $0x3f0] sm:$0xff] %v402_v62  ;;  %v530_v62 = vld [vmem:[%s2787_s25 + $0x47f0] sm:$0xff] }
  0x8f   : > { %405 = vst [vmem:[%s2792_s26 + $0x3f8] sm:$0xff] %v404_v63  ;;  %v532_v63 = vld [vmem:[%s2787_s25 + $0x47f8] sm:$0xff] }
  0x90   : > { %407 = vst [vmem:[%s2792_s26 + $0x400] sm:$0xff] %v406_v0  ;;  %v534_v0 = vld [vmem:[%s2787_s25 + $0x4e00] sm:$0xff] }
  0x91   : > { %409 = vst [vmem:[%s2792_s26 + $0x408] sm:$0xff] %v408_v1  ;;  %v536_v1 = vld [vmem:[%s2787_s25 + $0x4e08] sm:$0xff] }
  0x92   : > { %411 = vst [vmem:[%s2792_s26 + $0x410] sm:$0xff] %v410_v2  ;;  %v538_v2 = vld [vmem:[%s2787_s25 + $0x4e10] sm:$0xff] }
  0x93   : > { %413 = vst [vmem:[%s2792_s26 + $0x418] sm:$0xff] %v412_v3  ;;  %v540_v3 = vld [vmem:[%s2787_s25 + $0x4e18] sm:$0xff] }
  0x94   : > { %415 = vst [vmem:[%s2792_s26 + $0x420] sm:$0xff] %v414_v4  ;;  %v542_v4 = vld [vmem:[%s2787_s25 + $0x4e20] sm:$0xff] }
  0x95   : > { %417 = vst [vmem:[%s2792_s26 + $0x428] sm:$0xff] %v416_v5  ;;  %v544_v5 = vld [vmem:[%s2787_s25 + $0x4e28] sm:$0xff] }
  0x96   : > { %419 = vst [vmem:[%s2792_s26 + $0x430] sm:$0xff] %v418_v6  ;;  %v546_v6 = vld [vmem:[%s2787_s25 + $0x4e30] sm:$0xff] }
  0x97   : > { %421 = vst [vmem:[%s2792_s26 + $0x438] sm:$0xff] %v420_v7  ;;  %v548_v7 = vld [vmem:[%s2787_s25 + $0x4e38] sm:$0xff] }
  0x98   : > { %423 = vst [vmem:[%s2792_s26 + $0x440] sm:$0xff] %v422_v8  ;;  %v550_v8 = vld [vmem:[%s2787_s25 + $0x4e40] sm:$0xff] }
  0x99   : > { %425 = vst [vmem:[%s2792_s26 + $0x448] sm:$0xff] %v424_v9  ;;  %v552_v9 = vld [vmem:[%s2787_s25 + $0x4e48] sm:$0xff] }
  0x9a   : > { %427 = vst [vmem:[%s2792_s26 + $0x450] sm:$0xff] %v426_v10  ;;  %v554_v10 = vld [vmem:[%s2787_s25 + $0x4e50] sm:$0xff] }
  0x9b   : > { %429 = vst [vmem:[%s2792_s26 + $0x458] sm:$0xff] %v428_v11  ;;  %v556_v11 = vld [vmem:[%s2787_s25 + $0x4e58] sm:$0xff] }
  0x9c   : > { %431 = vst [vmem:[%s2792_s26 + $0x460] sm:$0xff] %v430_v12  ;;  %v558_v12 = vld [vmem:[%s2787_s25 + $0x4e60] sm:$0xff] }
  0x9d   : > { %433 = vst [vmem:[%s2792_s26 + $0x468] sm:$0xff] %v432_v13  ;;  %v560_v13 = vld [vmem:[%s2787_s25 + $0x4e68] sm:$0xff] }
  0x9e   : > { %435 = vst [vmem:[%s2792_s26 + $0x470] sm:$0xff] %v434_v14  ;;  %v562_v14 = vld [vmem:[%s2787_s25 + $0x4e70] sm:$0xff] }
  0x9f   : > { %437 = vst [vmem:[%s2792_s26 + $0x478] sm:$0xff] %v436_v15  ;;  %v564_v15 = vld [vmem:[%s2787_s25 + $0x4e78] sm:$0xff] }
  0xa0   : > { %439 = vst [vmem:[%s2792_s26 + $0x480] sm:$0xff] %v438_v16  ;;  %v566_v16 = vld [vmem:[%s2787_s25 + $0x5480] sm:$0xff] }
  0xa1   : > { %441 = vst [vmem:[%s2792_s26 + $0x488] sm:$0xff] %v440_v17  ;;  %v568_v17 = vld [vmem:[%s2787_s25 + $0x5488] sm:$0xff] }
  0xa2   : > { %443 = vst [vmem:[%s2792_s26 + $0x490] sm:$0xff] %v442_v18  ;;  %v570_v18 = vld [vmem:[%s2787_s25 + $0x5490] sm:$0xff] }
  0xa3   : > { %445 = vst [vmem:[%s2792_s26 + $0x498] sm:$0xff] %v444_v19  ;;  %v572_v19 = vld [vmem:[%s2787_s25 + $0x5498] sm:$0xff] }
  0xa4   : > { %447 = vst [vmem:[%s2792_s26 + $0x4a0] sm:$0xff] %v446_v20  ;;  %v574_v20 = vld [vmem:[%s2787_s25 + $0x54a0] sm:$0xff] }
  0xa5   : > { %449 = vst [vmem:[%s2792_s26 + $0x4a8] sm:$0xff] %v448_v21  ;;  %v576_v21 = vld [vmem:[%s2787_s25 + $0x54a8] sm:$0xff] }
  0xa6   : > { %451 = vst [vmem:[%s2792_s26 + $0x4b0] sm:$0xff] %v450_v22  ;;  %v578_v22 = vld [vmem:[%s2787_s25 + $0x54b0] sm:$0xff] }
  0xa7   : > { %453 = vst [vmem:[%s2792_s26 + $0x4b8] sm:$0xff] %v452_v23  ;;  %v580_v23 = vld [vmem:[%s2787_s25 + $0x54b8] sm:$0xff] }
  0xa8   : > { %455 = vst [vmem:[%s2792_s26 + $0x4c0] sm:$0xff] %v454_v24  ;;  %v582_v24 = vld [vmem:[%s2787_s25 + $0x54c0] sm:$0xff] }
  0xa9   : > { %457 = vst [vmem:[%s2792_s26 + $0x4c8] sm:$0xff] %v456_v25  ;;  %v584_v25 = vld [vmem:[%s2787_s25 + $0x54c8] sm:$0xff] }
  0xaa   : > { %459 = vst [vmem:[%s2792_s26 + $0x4d0] sm:$0xff] %v458_v26  ;;  %v586_v26 = vld [vmem:[%s2787_s25 + $0x54d0] sm:$0xff] }
  0xab   : > { %461 = vst [vmem:[%s2792_s26 + $0x4d8] sm:$0xff] %v460_v27  ;;  %v588_v27 = vld [vmem:[%s2787_s25 + $0x54d8] sm:$0xff] }
  0xac   : > { %463 = vst [vmem:[%s2792_s26 + $0x4e0] sm:$0xff] %v462_v28  ;;  %v590_v28 = vld [vmem:[%s2787_s25 + $0x54e0] sm:$0xff] }
  0xad   : > { %465 = vst [vmem:[%s2792_s26 + $0x4e8] sm:$0xff] %v464_v29  ;;  %v592_v29 = vld [vmem:[%s2787_s25 + $0x54e8] sm:$0xff] }
  0xae   : > { %467 = vst [vmem:[%s2792_s26 + $0x4f0] sm:$0xff] %v466_v30  ;;  %v594_v30 = vld [vmem:[%s2787_s25 + $0x54f0] sm:$0xff] }
  0xaf   : > { %469 = vst [vmem:[%s2792_s26 + $0x4f8] sm:$0xff] %v468_v31  ;;  %v596_v31 = vld [vmem:[%s2787_s25 + $0x54f8] sm:$0xff] }
  0xb0   : > { %471 = vst [vmem:[%s2792_s26 + $0x500] sm:$0xff] %v470_v32  ;;  %v598_v32 = vld [vmem:[%s2787_s25 + $0x5b00] sm:$0xff] }
  0xb1   : > { %473 = vst [vmem:[%s2792_s26 + $0x508] sm:$0xff] %v472_v33  ;;  %v600_v33 = vld [vmem:[%s2787_s25 + $0x5b08] sm:$0xff] }
  0xb2   : > { %475 = vst [vmem:[%s2792_s26 + $0x510] sm:$0xff] %v474_v34  ;;  %v602_v34 = vld [vmem:[%s2787_s25 + $0x5b10] sm:$0xff] }
  0xb3   : > { %477 = vst [vmem:[%s2792_s26 + $0x518] sm:$0xff] %v476_v35  ;;  %v604_v35 = vld [vmem:[%s2787_s25 + $0x5b18] sm:$0xff] }
  0xb4   : > { %479 = vst [vmem:[%s2792_s26 + $0x520] sm:$0xff] %v478_v36  ;;  %v606_v36 = vld [vmem:[%s2787_s25 + $0x5b20] sm:$0xff] }
  0xb5   : > { %481 = vst [vmem:[%s2792_s26 + $0x528] sm:$0xff] %v480_v37  ;;  %v608_v37 = vld [vmem:[%s2787_s25 + $0x5b28] sm:$0xff] }
  0xb6   : > { %483 = vst [vmem:[%s2792_s26 + $0x530] sm:$0xff] %v482_v38  ;;  %v610_v38 = vld [vmem:[%s2787_s25 + $0x5b30] sm:$0xff] }
  0xb7   : > { %485 = vst [vmem:[%s2792_s26 + $0x538] sm:$0xff] %v484_v39  ;;  %v612_v39 = vld [vmem:[%s2787_s25 + $0x5b38] sm:$0xff] }
  0xb8   : > { %487 = vst [vmem:[%s2792_s26 + $0x540] sm:$0xff] %v486_v40  ;;  %v614_v40 = vld [vmem:[%s2787_s25 + $0x5b40] sm:$0xff] }
  0xb9   : > { %489 = vst [vmem:[%s2792_s26 + $0x548] sm:$0xff] %v488_v41  ;;  %v616_v41 = vld [vmem:[%s2787_s25 + $0x5b48] sm:$0xff] }
  0xba   : > { %491 = vst [vmem:[%s2792_s26 + $0x550] sm:$0xff] %v490_v42  ;;  %v618_v42 = vld [vmem:[%s2787_s25 + $0x5b50] sm:$0xff] }
  0xbb   : > { %493 = vst [vmem:[%s2792_s26 + $0x558] sm:$0xff] %v492_v43  ;;  %v620_v43 = vld [vmem:[%s2787_s25 + $0x5b58] sm:$0xff] }
  0xbc   : > { %495 = vst [vmem:[%s2792_s26 + $0x560] sm:$0xff] %v494_v44  ;;  %v622_v44 = vld [vmem:[%s2787_s25 + $0x5b60] sm:$0xff] }
  0xbd   : > { %497 = vst [vmem:[%s2792_s26 + $0x568] sm:$0xff] %v496_v45  ;;  %v624_v45 = vld [vmem:[%s2787_s25 + $0x5b68] sm:$0xff] }
  0xbe   : > { %499 = vst [vmem:[%s2792_s26 + $0x570] sm:$0xff] %v498_v46  ;;  %v626_v46 = vld [vmem:[%s2787_s25 + $0x5b70] sm:$0xff] }
  0xbf   : > { %501 = vst [vmem:[%s2792_s26 + $0x578] sm:$0xff] %v500_v47  ;;  %v628_v47 = vld [vmem:[%s2787_s25 + $0x5b78] sm:$0xff] }
  0xc0   : > { %503 = vst [vmem:[%s2792_s26 + $0x580] sm:$0xff] %v502_v48  ;;  %v630_v48 = vld [vmem:[%s2787_s25 + $0x6180] sm:$0xff] }
  0xc1   : > { %505 = vst [vmem:[%s2792_s26 + $0x588] sm:$0xff] %v504_v49  ;;  %v632_v49 = vld [vmem:[%s2787_s25 + $0x6188] sm:$0xff] }
  0xc2   : > { %507 = vst [vmem:[%s2792_s26 + $0x590] sm:$0xff] %v506_v50  ;;  %v634_v50 = vld [vmem:[%s2787_s25 + $0x6190] sm:$0xff] }
  0xc3   : > { %509 = vst [vmem:[%s2792_s26 + $0x598] sm:$0xff] %v508_v51  ;;  %v636_v51 = vld [vmem:[%s2787_s25 + $0x6198] sm:$0xff] }
  0xc4   : > { %511 = vst [vmem:[%s2792_s26 + $0x5a0] sm:$0xff] %v510_v52  ;;  %v638_v52 = vld [vmem:[%s2787_s25 + $0x61a0] sm:$0xff] }
  0xc5   : > { %513 = vst [vmem:[%s2792_s26 + $0x5a8] sm:$0xff] %v512_v53  ;;  %v640_v53 = vld [vmem:[%s2787_s25 + $0x61a8] sm:$0xff] }
  0xc6   : > { %515 = vst [vmem:[%s2792_s26 + $0x5b0] sm:$0xff] %v514_v54  ;;  %v642_v54 = vld [vmem:[%s2787_s25 + $0x61b0] sm:$0xff] }
  0xc7   : > { %517 = vst [vmem:[%s2792_s26 + $0x5b8] sm:$0xff] %v516_v55  ;;  %v644_v55 = vld [vmem:[%s2787_s25 + $0x61b8] sm:$0xff] }
  0xc8   : > { %519 = vst [vmem:[%s2792_s26 + $0x5c0] sm:$0xff] %v518_v56  ;;  %v646_v56 = vld [vmem:[%s2787_s25 + $0x61c0] sm:$0xff] }
  0xc9   : > { %521 = vst [vmem:[%s2792_s26 + $0x5c8] sm:$0xff] %v520_v57  ;;  %v648_v57 = vld [vmem:[%s2787_s25 + $0x61c8] sm:$0xff] }
  0xca   : > { %523 = vst [vmem:[%s2792_s26 + $0x5d0] sm:$0xff] %v522_v58  ;;  %v650_v58 = vld [vmem:[%s2787_s25 + $0x61d0] sm:$0xff] }
  0xcb   : > { %525 = vst [vmem:[%s2792_s26 + $0x5d8] sm:$0xff] %v524_v59  ;;  %v652_v59 = vld [vmem:[%s2787_s25 + $0x61d8] sm:$0xff] }
  0xcc   : > { %527 = vst [vmem:[%s2792_s26 + $0x5e0] sm:$0xff] %v526_v60  ;;  %v654_v60 = vld [vmem:[%s2787_s25 + $0x61e0] sm:$0xff] }
  0xcd   : > { %529 = vst [vmem:[%s2792_s26 + $0x5e8] sm:$0xff] %v528_v61  ;;  %v656_v61 = vld [vmem:[%s2787_s25 + $0x61e8] sm:$0xff] }
  0xce   : > { %531 = vst [vmem:[%s2792_s26 + $0x5f0] sm:$0xff] %v530_v62  ;;  %v658_v62 = vld [vmem:[%s2787_s25 + $0x61f0] sm:$0xff] }
  0xcf   : > { %533 = vst [vmem:[%s2792_s26 + $0x5f8] sm:$0xff] %v532_v63  ;;  %v660_v63 = vld [vmem:[%s2787_s25 + $0x61f8] sm:$0xff] }
  0xd0   : > { %535 = vst [vmem:[%s2792_s26 + $0x600] sm:$0xff] %v534_v0 }
  0xd1   : > { %537 = vst [vmem:[%s2792_s26 + $0x608] sm:$0xff] %v536_v1 }
  0xd2   : > { %539 = vst [vmem:[%s2792_s26 + $0x610] sm:$0xff] %v538_v2 }
  0xd3   : > { %541 = vst [vmem:[%s2792_s26 + $0x618] sm:$0xff] %v540_v3 }
  0xd4   : > { %543 = vst [vmem:[%s2792_s26 + $0x620] sm:$0xff] %v542_v4 }
  0xd5   : > { %545 = vst [vmem:[%s2792_s26 + $0x628] sm:$0xff] %v544_v5 }
  0xd6   : > { %547 = vst [vmem:[%s2792_s26 + $0x630] sm:$0xff] %v546_v6 }
  0xd7   : > { %549 = vst [vmem:[%s2792_s26 + $0x638] sm:$0xff] %v548_v7 }
  0xd8   : > { %551 = vst [vmem:[%s2792_s26 + $0x640] sm:$0xff] %v550_v8 }
  0xd9   : > { %553 = vst [vmem:[%s2792_s26 + $0x648] sm:$0xff] %v552_v9 }
  0xda   : > { %555 = vst [vmem:[%s2792_s26 + $0x650] sm:$0xff] %v554_v10 }
  0xdb   : > { %557 = vst [vmem:[%s2792_s26 + $0x658] sm:$0xff] %v556_v11 }
  0xdc   : > { %559 = vst [vmem:[%s2792_s26 + $0x660] sm:$0xff] %v558_v12 }
  0xdd   : > { %561 = vst [vmem:[%s2792_s26 + $0x668] sm:$0xff] %v560_v13 }
  0xde   : > { %563 = vst [vmem:[%s2792_s26 + $0x670] sm:$0xff] %v562_v14 }
  0xdf   : > { %565 = vst [vmem:[%s2792_s26 + $0x678] sm:$0xff] %v564_v15 }
  0xe0   : > { %567 = vst [vmem:[%s2792_s26 + $0x680] sm:$0xff] %v566_v16 }
  0xe1   : > { %569 = vst [vmem:[%s2792_s26 + $0x688] sm:$0xff] %v568_v17 }
  0xe2   : > { %571 = vst [vmem:[%s2792_s26 + $0x690] sm:$0xff] %v570_v18 }
  0xe3   : > { %573 = vst [vmem:[%s2792_s26 + $0x698] sm:$0xff] %v572_v19 }
  0xe4   : > { %575 = vst [vmem:[%s2792_s26 + $0x6a0] sm:$0xff] %v574_v20 }
  0xe5   : > { %577 = vst [vmem:[%s2792_s26 + $0x6a8] sm:$0xff] %v576_v21 }
  0xe6   : > { %579 = vst [vmem:[%s2792_s26 + $0x6b0] sm:$0xff] %v578_v22 }
  0xe7   : > { %581 = vst [vmem:[%s2792_s26 + $0x6b8] sm:$0xff] %v580_v23 }
  0xe8   : > { %583 = vst [vmem:[%s2792_s26 + $0x6c0] sm:$0xff] %v582_v24 }
  0xe9   : > { %585 = vst [vmem:[%s2792_s26 + $0x6c8] sm:$0xff] %v584_v25 }
  0xea   : > { %587 = vst [vmem:[%s2792_s26 + $0x6d0] sm:$0xff] %v586_v26 }
  0xeb   : > { %589 = vst [vmem:[%s2792_s26 + $0x6d8] sm:$0xff] %v588_v27 }
  0xec   : > { %591 = vst [vmem:[%s2792_s26 + $0x6e0] sm:$0xff] %v590_v28 }
  0xed   : > { %593 = vst [vmem:[%s2792_s26 + $0x6e8] sm:$0xff] %v592_v29 }
  0xee   : > { %595 = vst [vmem:[%s2792_s26 + $0x6f0] sm:$0xff] %v594_v30 }
  0xef   : > { %597 = vst [vmem:[%s2792_s26 + $0x6f8] sm:$0xff] %v596_v31 }
  0xf0   : > { %599 = vst [vmem:[%s2792_s26 + $0x700] sm:$0xff] %v598_v32 }
  0xf1   : > { %601 = vst [vmem:[%s2792_s26 + $0x708] sm:$0xff] %v600_v33 }
  0xf2   : > { %603 = vst [vmem:[%s2792_s26 + $0x710] sm:$0xff] %v602_v34 }
  0xf3   : > { %605 = vst [vmem:[%s2792_s26 + $0x718] sm:$0xff] %v604_v35 }
  0xf4   : > { %607 = vst [vmem:[%s2792_s26 + $0x720] sm:$0xff] %v606_v36 }
  0xf5   : > { %609 = vst [vmem:[%s2792_s26 + $0x728] sm:$0xff] %v608_v37 }
  0xf6   : > { %611 = vst [vmem:[%s2792_s26 + $0x730] sm:$0xff] %v610_v38 }
  0xf7   : > { %613 = vst [vmem:[%s2792_s26 + $0x738] sm:$0xff] %v612_v39 }
  0xf8   : > { %615 = vst [vmem:[%s2792_s26 + $0x740] sm:$0xff] %v614_v40 }
  0xf9   : > { %617 = vst [vmem:[%s2792_s26 + $0x748] sm:$0xff] %v616_v41 }
  0xfa   : > { %619 = vst [vmem:[%s2792_s26 + $0x750] sm:$0xff] %v618_v42 }
  0xfb   : > { %621 = vst [vmem:[%s2792_s26 + $0x758] sm:$0xff] %v620_v43 }
  0xfc   : > { %623 = vst [vmem:[%s2792_s26 + $0x760] sm:$0xff] %v622_v44 }
  0xfd   : > { %625 = vst [vmem:[%s2792_s26 + $0x768] sm:$0xff] %v624_v45 }
  0xfe   : > { %627 = vst [vmem:[%s2792_s26 + $0x770] sm:$0xff] %v626_v46 }
  0xff   : > { %629 = vst [vmem:[%s2792_s26 + $0x778] sm:$0xff] %v628_v47 }
 0x100   : > { %631 = vst [vmem:[%s2792_s26 + $0x780] sm:$0xff] %v630_v48 }
 0x101   : > { %633 = vst [vmem:[%s2792_s26 + $0x788] sm:$0xff] %v632_v49 }
 0x102   : > { %635 = vst [vmem:[%s2792_s26 + $0x790] sm:$0xff] %v634_v50 }
 0x103   : > { %637 = vst [vmem:[%s2792_s26 + $0x798] sm:$0xff] %v636_v51 }
 0x104   : > { %639 = vst [vmem:[%s2792_s26 + $0x7a0] sm:$0xff] %v638_v52 }
 0x105   : > { %641 = vst [vmem:[%s2792_s26 + $0x7a8] sm:$0xff] %v640_v53 }
 0x106   : > { %643 = vst [vmem:[%s2792_s26 + $0x7b0] sm:$0xff] %v642_v54 }
 0x107   : > { %645 = vst [vmem:[%s2792_s26 + $0x7b8] sm:$0xff] %v644_v55 }
 0x108   : > { %647 = vst [vmem:[%s2792_s26 + $0x7c0] sm:$0xff] %v646_v56 }
 0x109   : > { %649 = vst [vmem:[%s2792_s26 + $0x7c8] sm:$0xff] %v648_v57 }
 0x10a   : > { %651 = vst [vmem:[%s2792_s26 + $0x7d0] sm:$0xff] %v650_v58 }
 0x10b   : > { %653 = vst [vmem:[%s2792_s26 + $0x7d8] sm:$0xff] %v652_v59 }
 0x10c   : > { %655 = vst [vmem:[%s2792_s26 + $0x7e0] sm:$0xff] %v654_v60 }
 0x10d   : > { %657 = vst [vmem:[%s2792_s26 + $0x7e8] sm:$0xff] %v656_v61 }
 0x10e   : > { %659 = vst [vmem:[%s2792_s26 + $0x7f0] sm:$0xff] %v658_v62 }
 0x10f   : > { %661 = vst [vmem:[%s2792_s26 + $0x7f8] sm:$0xff] %v660_v63 }
 0x110 PF: > { %p2418_p5 = scmp.ge.s32.totalorder %s2730_s14, 1  ;;  %p666_p6 = scmp.lt.s32.totalorder %s2730_s14, 14 }
 0x112   : > { %p667_p7 = pnand %p2418_p5, %p666_p6 }
 0x113   : > { %s673_s27 = sand.u32 (!%p667_p7), 1, %s2722_s12   ;;  %s2420_s9 = sshll.u32 (!%p667_p7), %s2411_s15, 4 }
 0x114   : > { %670 = sbr.rel (%p667_p7) target bundleno = 582 (0x246), region = 51  ;;  %s2419_s28 = sshll.u32 (!%p667_p7), %s673_s27, 11 }
 0x115   : > { %s3306_s29 = scalar_lea.vmem (!%p667_p7), [#allocation2], %s2419_s28  ;;  %p698_p8 = scmp.lt.s32.totalorder (!%p667_p7), %s2420_s9, 207 }
 0x119   : > { %v752_v0 = vld [vmem:[%s3306_s29 + $0x180] sm:$0xff]  ;;  %v753_v1 = vld [vmem:[%s3306_s29 + $0x188] sm:$0xff]  ;;  %v754_v2 = vld [vmem:[%s3306_s29 + $0x190] sm:$0xff]  ;;  %vm768_vm0 = vcmask 261120   ;;  %s3877_s9 = smov (!%p698_p8, %s2420_s9), 207 }
 0x11a   : > { %784 = vmatpush.msra.mxu0 %v752_v0  ;;  %804 = vmatpush.msra.mxu1 %v753_v1  ;;  %v755_v3 = vld [vmem:[%s3306_s29 + $0x198] sm:$0xff]  ;;  %v736_v4 = vld [vmem:[%s3306_s29 + $0x100] sm:$0xff]  ;;  %v737_v5 = vld [vmem:[%s3306_s29 + $0x108] sm:$0xff]  ;;  %s2421_s10 = sshll.u32 %s3877_s9, 3 }
 0x11b   : > { %824 = vmatpush.msra.mxu2 %v754_v2  ;;  %844 = vmatpush.msra.mxu3 %v755_v3  ;;  %v738_v6 = vld [vmem:[%s3306_s29 + $0x110] sm:$0xff]  ;;  %v739_v7 = vld [vmem:[%s3306_s29 + $0x118] sm:$0xff]  ;;  %v720_v8 = vld [vmem:[%s3306_s29 + $0x80] sm:$0xff]  ;;  %s3790_s14 = scalar_lea.vmem %s3869_s3, %s2421_s10 }
 0x11c   : > { %785 = vmatpush.msra.mxu0 %v736_v4  ;;  %805 = vmatpush.msra.mxu1 %v737_v5  ;;  %v721_v9 = vld [vmem:[%s3306_s29 + $0x88] sm:$0xff]  ;;  %v722_v10 = vld [vmem:[%s3306_s29 + $0x90] sm:$0xff]  ;;  %v723_v11 = vld [vmem:[%s3306_s29 + $0x98] sm:$0xff] }
 0x11d   : > { %825 = vmatpush.msra.mxu2 %v738_v6  ;;  %845 = vmatpush.msra.mxu3 %v739_v7  ;;  %v704_v12 = vld [vmem:[%s3306_s29] sm:$0xff]  ;;  %v705_v13 = vld [vmem:[%s3306_s29 + $0x8] sm:$0xff]  ;;  %v706_v14 = vld [vmem:[%s3306_s29 + $0x10] sm:$0xff] }
 0x11e   : > { %786 = vmatpush.msra.mxu0 %v720_v8  ;;  %806 = vmatpush.msra.mxu1 %v721_v9  ;;  %v707_v15 = vld [vmem:[%s3306_s29 + $0x18] sm:$0xff]  ;;  %v3327_v16 = vld [vmem:[%s3866_s0] sm:$0xff]  ;;  %v758_v17 = vld [vmem:[%s3306_s29 + $0x1b0] sm:$0xff] }
 0x11f   : > { %826 = vmatpush.msra.mxu2 %v722_v10  ;;  %846 = vmatpush.msra.mxu3 %v723_v11  ;;  %v759_v18 = vld [vmem:[%s3306_s29 + $0x1b8] sm:$0xff]  ;;  %v756_v19 = vld [vmem:[%s3306_s29 + $0x1a0] sm:$0xff]  ;;  %v757_v20 = vld [vmem:[%s3306_s29 + $0x1a8] sm:$0xff] }
 0x120   : > { %787 = vmatpush.msra.mxu0 %v704_v12  ;;  %807 = vmatpush.msra.mxu1 %v705_v13  ;;  %v742_v21 = vld [vmem:[%s3306_s29 + $0x130] sm:$0xff]  ;;  %v743_v22 = vld [vmem:[%s3306_s29 + $0x138] sm:$0xff]  ;;  %v740_v23 = vld [vmem:[%s3306_s29 + $0x120] sm:$0xff] }
 0x121   : > { %827 = vmatpush.msra.mxu2 %v706_v14  ;;  %847 = vmatpush.msra.mxu3 %v707_v15  ;;  %v741_v24 = vld [vmem:[%s3306_s29 + $0x128] sm:$0xff]  ;;  %v726_v25 = vld [vmem:[%s3306_s29 + $0xb0] sm:$0xff]  ;;  %v727_v26 = vld [vmem:[%s3306_s29 + $0xb8] sm:$0xff] }
 0x122   : > { %2422 = vmatmul.msk.f32.vlgmr.msra.gmra.mxu0 %vm768_vm0, %v3327_v16  ;;  %2423 = vmatmul.msk.f32.vlgmr.msra.gmra.mxu1 %vm768_vm0, %v3327_v16  ;;  %v724_v27 = vld [vmem:[%s3306_s29 + $0xa0] sm:$0xff]  ;;  %v725_v28 = vld [vmem:[%s3306_s29 + $0xa8] sm:$0xff]  ;;  %v710_v29 = vld [vmem:[%s3306_s29 + $0x30] sm:$0xff] }
 0x123   : > { %2424 = vmatmul.msk.f32.vlgmr.msra.gmra.mxu2 %vm768_vm0, %v3327_v16  ;;  %2425 = vmatmul.msk.f32.vlgmr.msra.gmra.mxu3 %vm768_vm0, %v3327_v16  ;;  %v711_v30 = vld [vmem:[%s3306_s29 + $0x38] sm:$0xff]  ;;  %v708_v31 = vld [vmem:[%s3306_s29 + $0x20] sm:$0xff]  ;;  %v709_v32 = vld [vmem:[%s3306_s29 + $0x28] sm:$0xff] }
 0x124   : > { %904 = vmatpush.msrb.mxu2 %v758_v17  ;;  %924 = vmatpush.msrb.mxu3 %v759_v18  ;;  %v762_v33 = vld [vmem:[%s3306_s29 + $0x1d0] sm:$0xff]  ;;  %v763_v34 = vld [vmem:[%s3306_s29 + $0x1d8] sm:$0xff]  ;;  %v760_v35 = vld [vmem:[%s3306_s29 + $0x1c0] sm:$0xff] }
 0x125   : > { %864 = vmatpush.msrb.mxu0 %v756_v19  ;;  %884 = vmatpush.msrb.mxu1 %v757_v20  ;;  %v761_v36 = vld [vmem:[%s3306_s29 + $0x1c8] sm:$0xff]  ;;  %v746_v37 = vld [vmem:[%s3306_s29 + $0x150] sm:$0xff]  ;;  %v747_v38 = vld [vmem:[%s3306_s29 + $0x158] sm:$0xff] }
 0x126   : > { %905 = vmatpush.msrb.mxu2 %v742_v21  ;;  %925 = vmatpush.msrb.mxu3 %v743_v22  ;;  %v744_v39 = vld [vmem:[%s3306_s29 + $0x140] sm:$0xff]  ;;  %v745_v40 = vld [vmem:[%s3306_s29 + $0x148] sm:$0xff]  ;;  %v730_v41 = vld [vmem:[%s3306_s29 + $0xd0] sm:$0xff] }
 0x127   : > { %865 = vmatpush.msrb.mxu0 %v740_v23  ;;  %885 = vmatpush.msrb.mxu1 %v741_v24  ;;  %v731_v42 = vld [vmem:[%s3306_s29 + $0xd8] sm:$0xff]  ;;  %v728_v43 = vld [vmem:[%s3306_s29 + $0xc0] sm:$0xff]  ;;  %v729_v44 = vld [vmem:[%s3306_s29 + $0xc8] sm:$0xff] }
 0x128   : > { %906 = vmatpush.msrb.mxu2 %v726_v25  ;;  %926 = vmatpush.msrb.mxu3 %v727_v26  ;;  %v714_v45 = vld [vmem:[%s3306_s29 + $0x50] sm:$0xff]  ;;  %v715_v46 = vld [vmem:[%s3306_s29 + $0x58] sm:$0xff]  ;;  %v712_v47 = vld [vmem:[%s3306_s29 + $0x40] sm:$0xff] }
 0x129   : > { %866 = vmatpush.msrb.mxu0 %v724_v27  ;;  %886 = vmatpush.msrb.mxu1 %v725_v28  ;;  %v713_v48 = vld [vmem:[%s3306_s29 + $0x48] sm:$0xff]  ;;  %v766_v49 = vld [vmem:[%s3306_s29 + $0x1f0] sm:$0xff]  ;;  %v767_v50 = vld [vmem:[%s3306_s29 + $0x1f8] sm:$0xff] }
 0x12a   : > { %907 = vmatpush.msrb.mxu2 %v710_v29  ;;  %927 = vmatpush.msrb.mxu3 %v711_v30  ;;  %v764_v51 = vld [vmem:[%s3306_s29 + $0x1e0] sm:$0xff]  ;;  %v765_v52 = vld [vmem:[%s3306_s29 + $0x1e8] sm:$0xff]  ;;  %v750_v53 = vld [vmem:[%s3306_s29 + $0x170] sm:$0xff] }
 0x12b   : > { %867 = vmatpush.msrb.mxu0 %v708_v31  ;;  %887 = vmatpush.msrb.mxu1 %v709_v32  ;;  %v751_v54 = vld [vmem:[%s3306_s29 + $0x178] sm:$0xff]  ;;  %v748_v55 = vld [vmem:[%s3306_s29 + $0x160] sm:$0xff]  ;;  %v749_v56 = vld [vmem:[%s3306_s29 + $0x168] sm:$0xff] }
 0x12c   : > { %2426 = vmatmul.msk.f32.vlgmr.msrb.gmra.mxu0 %vm768_vm0, %v3327_v16  ;;  %2427 = vmatmul.msk.f32.vlgmr.msrb.gmra.mxu1 %vm768_vm0, %v3327_v16  ;;  %v734_v57 = vld [vmem:[%s3306_s29 + $0xf0] sm:$0xff]  ;;  %v735_v58 = vld [vmem:[%s3306_s29 + $0xf8] sm:$0xff]  ;;  %v732_v59 = vld [vmem:[%s3306_s29 + $0xe0] sm:$0xff] }
 0x12d   : > { %2428 = vmatmul.msk.f32.vlgmr.msrb.gmra.mxu2 %vm768_vm0, %v3327_v16  ;;  %2429 = vmatmul.msk.f32.vlgmr.msrb.gmra.mxu3 %vm768_vm0, %v3327_v16  ;;  %v733_v60 = vld [vmem:[%s3306_s29 + $0xe8] sm:$0xff]  ;;  %v718_v61 = vld [vmem:[%s3306_s29 + $0x70] sm:$0xff]  ;;  %v719_v62 = vld [vmem:[%s3306_s29 + $0x78] sm:$0xff] }
 0x12e   : > { %984 = vmatpush.msra.mxu2 %v762_v33  ;;  %1004 = vmatpush.msra.mxu3 %v763_v34  ;;  %v716_v63 = vld [vmem:[%s3306_s29 + $0x60] sm:$0xff]  ;;  %v717_v0 = vld [vmem:[%s3306_s29 + $0x68] sm:$0xff]  ;;  %v2488_v1 = vld [vmem:[%s3306_s29 + $0x390] sm:$0xff] }
 0x12f   : > { %944 = vmatpush.msra.mxu0 %v760_v35  ;;  %964 = vmatpush.msra.mxu1 %v761_v36  ;;  %v2489_v2 = vld [vmem:[%s3306_s29 + $0x398] sm:$0xff]  ;;  %v2486_v3 = vld [vmem:[%s3306_s29 + $0x380] sm:$0xff]  ;;  %v2487_v4 = vld [vmem:[%s3306_s29 + $0x388] sm:$0xff] }
 0x130   : > { %985 = vmatpush.msra.mxu2 %v746_v37  ;;  %1005 = vmatpush.msra.mxu3 %v747_v38  ;;  %v2472_v5 = vld [vmem:[%s3306_s29 + $0x310] sm:$0xff]  ;;  %v2473_v6 = vld [vmem:[%s3306_s29 + $0x318] sm:$0xff]  ;;  %v2470_v7 = vld [vmem:[%s3306_s29 + $0x300] sm:$0xff] }
 0x131   : > { %945 = vmatpush.msra.mxu0 %v744_v39  ;;  %965 = vmatpush.msra.mxu1 %v745_v40  ;;  %v2471_v8 = vld [vmem:[%s3306_s29 + $0x308] sm:$0xff]  ;;  %v2456_v9 = vld [vmem:[%s3306_s29 + $0x290] sm:$0xff]  ;;  %v2457_v10 = vld [vmem:[%s3306_s29 + $0x298] sm:$0xff] }
 0x132   : > { %986 = vmatpush.msra.mxu2 %v730_v41  ;;  %1006 = vmatpush.msra.mxu3 %v731_v42  ;;  %v2454_v11 = vld [vmem:[%s3306_s29 + $0x280] sm:$0xff]  ;;  %v2455_v12 = vld [vmem:[%s3306_s29 + $0x288] sm:$0xff]  ;;  %v2440_v13 = vld [vmem:[%s3306_s29 + $0x210] sm:$0xff] }
 0x133   : > { %946 = vmatpush.msra.mxu0 %v728_v43  ;;  %966 = vmatpush.msra.mxu1 %v729_v44  ;;  %v2441_v14 = vld [vmem:[%s3306_s29 + $0x218] sm:$0xff]  ;;  %v2438_v15 = vld [vmem:[%s3306_s29 + $0x200] sm:$0xff]  ;;  %v2439_v17 = vld [vmem:[%s3306_s29 + $0x208] sm:$0xff] }
 0x134   : > { %987 = vmatpush.msra.mxu2 %v714_v45  ;;  %1007 = vmatpush.msra.mxu3 %v715_v46  ;;  %v2492_v18 = vld [vmem:[%s3306_s29 + $0x3b0] sm:$0xff]  ;;  %v2493_v19 = vld [vmem:[%s3306_s29 + $0x3b8] sm:$0xff]  ;;  %v2490_v20 = vld [vmem:[%s3306_s29 + $0x3a0] sm:$0xff] }
 0x135   : > { %947 = vmatpush.msra.mxu0 %v712_v47  ;;  %967 = vmatpush.msra.mxu1 %v713_v48  ;;  %v2491_v21 = vld [vmem:[%s3306_s29 + $0x3a8] sm:$0xff]  ;;  %v2476_v22 = vld [vmem:[%s3306_s29 + $0x330] sm:$0xff]  ;;  %v2477_v23 = vld [vmem:[%s3306_s29 + $0x338] sm:$0xff] }
 0x136   : > { %2430 = vmatmul.msk.f32.vlgmr.msra.gmra.mxu0 %vm768_vm0, %v3327_v16  ;;  %2431 = vmatmul.msk.f32.vlgmr.msra.gmra.mxu1 %vm768_vm0, %v3327_v16  ;;  %v2474_v24 = vld [vmem:[%s3306_s29 + $0x320] sm:$0xff]  ;;  %v2475_v25 = vld [vmem:[%s3306_s29 + $0x328] sm:$0xff]  ;;  %v2460_v26 = vld [vmem:[%s3306_s29 + $0x2b0] sm:$0xff] }
 0x137   : > { %2432 = vmatmul.msk.f32.vlgmr.msra.gmra.mxu2 %vm768_vm0, %v3327_v16  ;;  %2433 = vmatmul.msk.f32.vlgmr.msra.gmra.mxu3 %vm768_vm0, %v3327_v16  ;;  %v2461_v27 = vld [vmem:[%s3306_s29 + $0x2b8] sm:$0xff]  ;;  %v2458_v28 = vld [vmem:[%s3306_s29 + $0x2a0] sm:$0xff]  ;;  %v2459_v29 = vld [vmem:[%s3306_s29 + $0x2a8] sm:$0xff] }
 0x138   : > { %1064 = vmatpush.msrb.mxu2 %v766_v49  ;;  %1084 = vmatpush.msrb.mxu3 %v767_v50  ;;  %v2444_v30 = vld [vmem:[%s3306_s29 + $0x230] sm:$0xff]  ;;  %v2445_v31 = vld [vmem:[%s3306_s29 + $0x238] sm:$0xff]  ;;  %v2442_v32 = vld [vmem:[%s3306_s29 + $0x220] sm:$0xff] }
 0x139   : > { %1024 = vmatpush.msrb.mxu0 %v764_v51  ;;  %1044 = vmatpush.msrb.mxu1 %v765_v52  ;;  %v2443_v33 = vld [vmem:[%s3306_s29 + $0x228] sm:$0xff]  ;;  %v2496_v34 = vld [vmem:[%s3306_s29 + $0x3d0] sm:$0xff]  ;;  %v2497_v35 = vld [vmem:[%s3306_s29 + $0x3d8] sm:$0xff] }
 0x13a   : > { %1065 = vmatpush.msrb.mxu2 %v750_v53  ;;  %1085 = vmatpush.msrb.mxu3 %v751_v54  ;;  %v2494_v36 = vld [vmem:[%s3306_s29 + $0x3c0] sm:$0xff]  ;;  %v2495_v37 = vld [vmem:[%s3306_s29 + $0x3c8] sm:$0xff]  ;;  %v2480_v38 = vld [vmem:[%s3306_s29 + $0x350] sm:$0xff] }
 0x13b   : > { %1025 = vmatpush.msrb.mxu0 %v748_v55  ;;  %1045 = vmatpush.msrb.mxu1 %v749_v56  ;;  %v2481_v39 = vld [vmem:[%s3306_s29 + $0x358] sm:$0xff]  ;;  %v2478_v40 = vld [vmem:[%s3306_s29 + $0x340] sm:$0xff]  ;;  %v2479_v41 = vld [vmem:[%s3306_s29 + $0x348] sm:$0xff] }
 0x13c   : > { %1066 = vmatpush.msrb.mxu2 %v734_v57  ;;  %1086 = vmatpush.msrb.mxu3 %v735_v58  ;;  %v2464_v42 = vld [vmem:[%s3306_s29 + $0x2d0] sm:$0xff]  ;;  %v2465_v43 = vld [vmem:[%s3306_s29 + $0x2d8] sm:$0xff]  ;;  %v2462_v44 = vld [vmem:[%s3306_s29 + $0x2c0] sm:$0xff] }
 0x13d   : > { %1026 = vmatpush.msrb.mxu0 %v732_v59  ;;  %1046 = vmatpush.msrb.mxu1 %v733_v60  ;;  %v2463_v45 = vld [vmem:[%s3306_s29 + $0x2c8] sm:$0xff]  ;;  %v2448_v46 = vld [vmem:[%s3306_s29 + $0x250] sm:$0xff]  ;;  %v2449_v47 = vld [vmem:[%s3306_s29 + $0x258] sm:$0xff] }
 0x13e   : > { %1067 = vmatpush.msrb.mxu2 %v718_v61  ;;  %1087 = vmatpush.msrb.mxu3 %v719_v62  ;;  %v2446_v48 = vld [vmem:[%s3306_s29 + $0x240] sm:$0xff]  ;;  %v2447_v49 = vld [vmem:[%s3306_s29 + $0x248] sm:$0xff]  ;;  %v2500_v50 = vld [vmem:[%s3306_s29 + $0x3f0] sm:$0xff] }
 0x13f   : > { %1027 = vmatpush.msrb.mxu0 %v716_v63  ;;  %1047 = vmatpush.msrb.mxu1 %v717_v0  ;;  %v2501_v51 = vld [vmem:[%s3306_s29 + $0x3f8] sm:$0xff]  ;;  %v2498_v52 = vld [vmem:[%s3306_s29 + $0x3e0] sm:$0xff]  ;;  %v2499_v53 = vld [vmem:[%s3306_s29 + $0x3e8] sm:$0xff] }
 0x140   : > { %2434 = vmatmul.msk.f32.vlgmr.msrb.gmra.mxu0 %vm768_vm0, %v3327_v16  ;;  %2435 = vmatmul.msk.f32.vlgmr.msrb.gmra.mxu1 %vm768_vm0, %v3327_v16  ;;  %v2484_v54 = vld [vmem:[%s3306_s29 + $0x370] sm:$0xff]  ;;  %v2485_v55 = vld [vmem:[%s3306_s29 + $0x378] sm:$0xff]  ;;  %v2482_v56 = vld [vmem:[%s3306_s29 + $0x360] sm:$0xff] }
 0x141   : > { %2436 = vmatmul.msk.f32.vlgmr.msrb.gmra.mxu2 %vm768_vm0, %v3327_v16  ;;  %2437 = vmatmul.msk.f32.vlgmr.msrb.gmra.mxu3 %vm768_vm0, %v3327_v16  ;;  %v2483_v57 = vld [vmem:[%s3306_s29 + $0x368] sm:$0xff]  ;;  %v2468_v58 = vld [vmem:[%s3306_s29 + $0x2f0] sm:$0xff]  ;;  %v2469_v59 = vld [vmem:[%s3306_s29 + $0x2f8] sm:$0xff] }
 0x142   : > { %1209 = vmatpush.msra.mxu2 %v2488_v1  ;;  %1229 = vmatpush.msra.mxu3 %v2489_v2  ;;  %v2466_v60 = vld [vmem:[%s3306_s29 + $0x2e0] sm:$0xff]  ;;  %v2467_v61 = vld [vmem:[%s3306_s29 + $0x2e8] sm:$0xff]  ;;  %v2452_v62 = vld [vmem:[%s3306_s29 + $0x270] sm:$0xff] }
 0x143   : > { %1169 = vmatpush.msra.mxu0 %v2486_v3  ;;  %1189 = vmatpush.msra.mxu1 %v2487_v4  ;;  %v2453_v63 = vld [vmem:[%s3306_s29 + $0x278] sm:$0xff]  ;;  %v2450_v0 = vld [vmem:[%s3306_s29 + $0x260] sm:$0xff]  ;;  %v2451_v1 = vld [vmem:[%s3306_s29 + $0x268] sm:$0xff] }
 0x144   : > { %1210 = vmatpush.msra.mxu2 %v2472_v5  ;;  %1230 = vmatpush.msra.mxu3 %v2473_v6  ;;  %v2568_v2 = vld [vmem:[%s3306_s29 + $0x590] sm:$0xff]  ;;  %v2569_v3 = vld [vmem:[%s3306_s29 + $0x598] sm:$0xff]  ;;  %v2566_v4 = vld [vmem:[%s3306_s29 + $0x580] sm:$0xff] }
 0x145   : > { %1170 = vmatpush.msra.mxu0 %v2470_v7  ;;  %1190 = vmatpush.msra.mxu1 %v2471_v8  ;;  %v2567_v5 = vld [vmem:[%s3306_s29 + $0x588] sm:$0xff]  ;;  %v2552_v6 = vld [vmem:[%s3306_s29 + $0x510] sm:$0xff]  ;;  %v2553_v7 = vld [vmem:[%s3306_s29 + $0x518] sm:$0xff] }
 0x146   : > { %1211 = vmatpush.msra.mxu2 %v2456_v9  ;;  %1231 = vmatpush.msra.mxu3 %v2457_v10  ;;  %v2550_v8 = vld [vmem:[%s3306_s29 + $0x500] sm:$0xff]  ;;  %v2551_v9 = vld [vmem:[%s3306_s29 + $0x508] sm:$0xff]  ;;  %v2536_v10 = vld [vmem:[%s3306_s29 + $0x490] sm:$0xff] }
 0x147   : > { %1171 = vmatpush.msra.mxu0 %v2454_v11  ;;  %1191 = vmatpush.msra.mxu1 %v2455_v12  ;;  %v2537_v11 = vld [vmem:[%s3306_s29 + $0x498] sm:$0xff]  ;;  %v2534_v12 = vld [vmem:[%s3306_s29 + $0x480] sm:$0xff] }
 0x148   : > { %1212 = vmatpush.msra.mxu2 %v2440_v13  ;;  %1232 = vmatpush.msra.mxu3 %v2441_v14  ;;  %v2535_v13 = vld [vmem:[%s3306_s29 + $0x488] sm:$0xff]  ;;  %v2520_v14 = vld [vmem:[%s3306_s29 + $0x410] sm:$0xff] }
 0x149   : > { %1172 = vmatpush.msra.mxu0 %v2438_v15  ;;  %1192 = vmatpush.msra.mxu1 %v2439_v17  ;;  %v2521_v15 = vld [vmem:[%s3306_s29 + $0x418] sm:$0xff]  ;;  %v2518_v17 = vld [vmem:[%s3306_s29 + $0x400] sm:$0xff] }
 0x14a   : > { %2502 = vmatmul.msk.f32.vlgmr.msra.gmra.mxu0 %vm768_vm0, %v3327_v16  ;;  %2503 = vmatmul.msk.f32.vlgmr.msra.gmra.mxu1 %vm768_vm0, %v3327_v16 }
 0x14b   : > { %2504 = vmatmul.msk.f32.vlgmr.msra.gmra.mxu2 %vm768_vm0, %v3327_v16  ;;  %2505 = vmatmul.msk.f32.vlgmr.msra.gmra.mxu3 %vm768_vm0, %v3327_v16 }
 0x14c   : > { %1289 = vmatpush.msrb.mxu2 %v2492_v18  ;;  %1309 = vmatpush.msrb.mxu3 %v2493_v19  ;;  %v2519_v18 = vld [vmem:[%s3306_s29 + $0x408] sm:$0xff]  ;;  %v2572_v19 = vld [vmem:[%s3306_s29 + $0x5b0] sm:$0xff] }
 0x14d   : > { %1249 = vmatpush.msrb.mxu0 %v2490_v20  ;;  %1269 = vmatpush.msrb.mxu1 %v2491_v21  ;;  %v2573_v20 = vld [vmem:[%s3306_s29 + $0x5b8] sm:$0xff]  ;;  %v2570_v21 = vld [vmem:[%s3306_s29 + $0x5a0] sm:$0xff] }
 0x14e   : > { %1290 = vmatpush.msrb.mxu2 %v2476_v22  ;;  %1310 = vmatpush.msrb.mxu3 %v2477_v23  ;;  %v2571_v22 = vld [vmem:[%s3306_s29 + $0x5a8] sm:$0xff]  ;;  %v2556_v23 = vld [vmem:[%s3306_s29 + $0x530] sm:$0xff] }
 0x14f   : > { %1250 = vmatpush.msrb.mxu0 %v2474_v24  ;;  %1270 = vmatpush.msrb.mxu1 %v2475_v25  ;;  %v2557_v24 = vld [vmem:[%s3306_s29 + $0x538] sm:$0xff]  ;;  %v2554_v25 = vld [vmem:[%s3306_s29 + $0x520] sm:$0xff] }
 0x150   : > { %1291 = vmatpush.msrb.mxu2 %v2460_v26  ;;  %1311 = vmatpush.msrb.mxu3 %v2461_v27  ;;  %v2555_v26 = vld [vmem:[%s3306_s29 + $0x528] sm:$0xff]  ;;  %v2540_v27 = vld [vmem:[%s3306_s29 + $0x4b0] sm:$0xff] }
 0x151   : > { %1251 = vmatpush.msrb.mxu0 %v2458_v28  ;;  %1271 = vmatpush.msrb.mxu1 %v2459_v29  ;;  %v2541_v28 = vld [vmem:[%s3306_s29 + $0x4b8] sm:$0xff]  ;;  %v2538_v29 = vld [vmem:[%s3306_s29 + $0x4a0] sm:$0xff] }
 0x152   : > { %1292 = vmatpush.msrb.mxu2 %v2444_v30  ;;  %1312 = vmatpush.msrb.mxu3 %v2445_v31  ;;  %v2539_v30 = vld [vmem:[%s3306_s29 + $0x4a8] sm:$0xff]  ;;  %v2524_v31 = vld [vmem:[%s3306_s29 + $0x430] sm:$0xff] }
 0x153   : > { %1252 = vmatpush.msrb.mxu0 %v2442_v32  ;;  %1272 = vmatpush.msrb.mxu1 %v2443_v33  ;;  %v2525_v32 = vld [vmem:[%s3306_s29 + $0x438] sm:$0xff]  ;;  %v2522_v33 = vld [vmem:[%s3306_s29 + $0x420] sm:$0xff] }
 0x154   : > { %2506 = vmatmul.msk.f32.vlgmr.msrb.gmra.mxu0 %vm768_vm0, %v3327_v16  ;;  %2507 = vmatmul.msk.f32.vlgmr.msrb.gmra.mxu1 %vm768_vm0, %v3327_v16 }
 0x155   : > { %2508 = vmatmul.msk.f32.vlgmr.msrb.gmra.mxu2 %vm768_vm0, %v3327_v16  ;;  %2509 = vmatmul.msk.f32.vlgmr.msrb.gmra.mxu3 %vm768_vm0, %v3327_v16 }
 0x156   : > { %1369 = vmatpush.msra.mxu2 %v2496_v34  ;;  %1389 = vmatpush.msra.mxu3 %v2497_v35  ;;  %v2523_v34 = vld [vmem:[%s3306_s29 + $0x428] sm:$0xff]  ;;  %v2576_v35 = vld [vmem:[%s3306_s29 + $0x5d0] sm:$0xff] }
 0x157   : > { %1329 = vmatpush.msra.mxu0 %v2494_v36  ;;  %1349 = vmatpush.msra.mxu1 %v2495_v37  ;;  %v2577_v36 = vld [vmem:[%s3306_s29 + $0x5d8] sm:$0xff]  ;;  %v2574_v37 = vld [vmem:[%s3306_s29 + $0x5c0] sm:$0xff] }
 0x158   : > { %1370 = vmatpush.msra.mxu2 %v2480_v38  ;;  %1390 = vmatpush.msra.mxu3 %v2481_v39  ;;  %v2575_v38 = vld [vmem:[%s3306_s29 + $0x5c8] sm:$0xff]  ;;  %v2560_v39 = vld [vmem:[%s3306_s29 + $0x550] sm:$0xff] }
 0x159   : > { %1330 = vmatpush.msra.mxu0 %v2478_v40  ;;  %1350 = vmatpush.msra.mxu1 %v2479_v41  ;;  %v2561_v40 = vld [vmem:[%s3306_s29 + $0x558] sm:$0xff]  ;;  %v2558_v41 = vld [vmem:[%s3306_s29 + $0x540] sm:$0xff] }
 0x15a   : > { %1371 = vmatpush.msra.mxu2 %v2464_v42  ;;  %1391 = vmatpush.msra.mxu3 %v2465_v43  ;;  %v2559_v42 = vld [vmem:[%s3306_s29 + $0x548] sm:$0xff]  ;;  %v2544_v43 = vld [vmem:[%s3306_s29 + $0x4d0] sm:$0xff] }
 0x15b   : > { %1331 = vmatpush.msra.mxu0 %v2462_v44  ;;  %1351 = vmatpush.msra.mxu1 %v2463_v45  ;;  %v2545_v44 = vld [vmem:[%s3306_s29 + $0x4d8] sm:$0xff]  ;;  %v2542_v45 = vld [vmem:[%s3306_s29 + $0x4c0] sm:$0xff] }
 0x15c   : > { %1372 = vmatpush.msra.mxu2 %v2448_v46  ;;  %1392 = vmatpush.msra.mxu3 %v2449_v47  ;;  %v2543_v46 = vld [vmem:[%s3306_s29 + $0x4c8] sm:$0xff]  ;;  %v2528_v47 = vld [vmem:[%s3306_s29 + $0x450] sm:$0xff] }
 0x15d   : > { %1332 = vmatpush.msra.mxu0 %v2446_v48  ;;  %1352 = vmatpush.msra.mxu1 %v2447_v49  ;;  %v2529_v48 = vld [vmem:[%s3306_s29 + $0x458] sm:$0xff]  ;;  %v2526_v49 = vld [vmem:[%s3306_s29 + $0x440] sm:$0xff] }
 0x15e   : > { %2510 = vmatmul.msk.f32.vlgmr.msra.gmra.mxu0 %vm768_vm0, %v3327_v16  ;;  %2511 = vmatmul.msk.f32.vlgmr.msra.gmra.mxu1 %vm768_vm0, %v3327_v16 }
 0x15f   : > { %2512 = vmatmul.msk.f32.vlgmr.msra.gmra.mxu2 %vm768_vm0, %v3327_v16  ;;  %2513 = vmatmul.msk.f32.vlgmr.msra.gmra.mxu3 %vm768_vm0, %v3327_v16 }
 0x160   : > { %1449 = vmatpush.msrb.mxu2 %v2500_v50  ;;  %1469 = vmatpush.msrb.mxu3 %v2501_v51  ;;  %v2527_v50 = vld [vmem:[%s3306_s29 + $0x448] sm:$0xff]  ;;  %v2580_v51 = vld [vmem:[%s3306_s29 + $0x5f0] sm:$0xff] }
 0x161   : > { %1409 = vmatpush.msrb.mxu0 %v2498_v52  ;;  %1429 = vmatpush.msrb.mxu1 %v2499_v53  ;;  %v2581_v52 = vld [vmem:[%s3306_s29 + $0x5f8] sm:$0xff]  ;;  %v2578_v53 = vld [vmem:[%s3306_s29 + $0x5e0] sm:$0xff] }
 0x162   : > { %1450 = vmatpush.msrb.mxu2 %v2484_v54  ;;  %1470 = vmatpush.msrb.mxu3 %v2485_v55  ;;  %v2579_v54 = vld [vmem:[%s3306_s29 + $0x5e8] sm:$0xff]  ;;  %v2564_v55 = vld [vmem:[%s3306_s29 + $0x570] sm:$0xff] }
 0x163   : > { %1410 = vmatpush.msrb.mxu0 %v2482_v56  ;;  %1430 = vmatpush.msrb.mxu1 %v2483_v57  ;;  %v2565_v56 = vld [vmem:[%s3306_s29 + $0x578] sm:$0xff]  ;;  %v2562_v57 = vld [vmem:[%s3306_s29 + $0x560] sm:$0xff] }
 0x164   : > { %1451 = vmatpush.msrb.mxu2 %v2468_v58  ;;  %1471 = vmatpush.msrb.mxu3 %v2469_v59  ;;  %v2563_v58 = vld [vmem:[%s3306_s29 + $0x568] sm:$0xff]  ;;  %v2548_v59 = vld [vmem:[%s3306_s29 + $0x4f0] sm:$0xff] }
 0x165   : > { %1411 = vmatpush.msrb.mxu0 %v2466_v60  ;;  %1431 = vmatpush.msrb.mxu1 %v2467_v61  ;;  %v2549_v60 = vld [vmem:[%s3306_s29 + $0x4f8] sm:$0xff]  ;;  %v2546_v61 = vld [vmem:[%s3306_s29 + $0x4e0] sm:$0xff] }
 0x166   : > { %1452 = vmatpush.msrb.mxu2 %v2452_v62  ;;  %1472 = vmatpush.msrb.mxu3 %v2453_v63  ;;  %v2547_v62 = vld [vmem:[%s3306_s29 + $0x4e8] sm:$0xff]  ;;  %v2532_v63 = vld [vmem:[%s3306_s29 + $0x470] sm:$0xff] }
 0x167   : > { %1412 = vmatpush.msrb.mxu0 %v2450_v0  ;;  %1432 = vmatpush.msrb.mxu1 %v2451_v1  ;;  %v2533_v0 = vld [vmem:[%s3306_s29 + $0x478] sm:$0xff]  ;;  %v2530_v1 = vld [vmem:[%s3306_s29 + $0x460] sm:$0xff] }
 0x168   : > { %2514 = vmatmul.msk.f32.vlgmr.msrb.gmra.mxu0 %vm768_vm0, %v3327_v16  ;;  %2515 = vmatmul.msk.f32.vlgmr.msrb.gmra.mxu1 %vm768_vm0, %v3327_v16 }
 0x169   : > { %2516 = vmatmul.msk.f32.vlgmr.msrb.gmra.mxu2 %vm768_vm0, %v3327_v16  ;;  %2517 = vmatmul.msk.f32.vlgmr.msrb.gmra.mxu3 %vm768_vm0, %v3327_v16 }
 0x16a   : > { %1610 = vmatpush.msra.mxu2 %v2568_v2  ;;  %1630 = vmatpush.msra.mxu3 %v2569_v3  ;;  %v2531_v2 = vld [vmem:[%s3306_s29 + $0x468] sm:$0xff]  ;;  %v2648_v3 = vld [vmem:[%s3306_s29 + $0x790] sm:$0xff] }
 0x16b   : > { %1570 = vmatpush.msra.mxu0 %v2566_v4  ;;  %1590 = vmatpush.msra.mxu1 %v2567_v5  ;;  %v2649_v4 = vld [vmem:[%s3306_s29 + $0x798] sm:$0xff]  ;;  %v2646_v5 = vld [vmem:[%s3306_s29 + $0x780] sm:$0xff] }
 0x16c   : > { %1611 = vmatpush.msra.mxu2 %v2552_v6  ;;  %1631 = vmatpush.msra.mxu3 %v2553_v7  ;;  %v2647_v6 = vld [vmem:[%s3306_s29 + $0x788] sm:$0xff]  ;;  %v2632_v7 = vld [vmem:[%s3306_s29 + $0x710] sm:$0xff] }
 0x16d   : > { %1571 = vmatpush.msra.mxu0 %v2550_v8  ;;  %1591 = vmatpush.msra.mxu1 %v2551_v9  ;;  %v2633_v8 = vld [vmem:[%s3306_s29 + $0x718] sm:$0xff]  ;;  %v2630_v9 = vld [vmem:[%s3306_s29 + $0x700] sm:$0xff] }
 0x16e   : > { %1612 = vmatpush.msra.mxu2 %v2536_v10  ;;  %1632 = vmatpush.msra.mxu3 %v2537_v11  ;;  %v2631_v10 = vld [vmem:[%s3306_s29 + $0x708] sm:$0xff]  ;;  %v2616_v11 = vld [vmem:[%s3306_s29 + $0x690] sm:$0xff] }
 0x16f   : > { %1572 = vmatpush.msra.mxu0 %v2534_v12  ;;  %1592 = vmatpush.msra.mxu1 %v2535_v13  ;;  %v2617_v12 = vld [vmem:[%s3306_s29 + $0x698] sm:$0xff]  ;;  %v2614_v13 = vld [vmem:[%s3306_s29 + $0x680] sm:$0xff] }
 0x170   : > { %1613 = vmatpush.msra.mxu2 %v2520_v14  ;;  %1633 = vmatpush.msra.mxu3 %v2521_v15  ;;  %v2615_v14 = vld [vmem:[%s3306_s29 + $0x688] sm:$0xff]  ;;  %v2600_v15 = vld [vmem:[%s3306_s29 + $0x610] sm:$0xff] }
 0x171   : > { %1573 = vmatpush.msra.mxu0 %v2518_v17  ;;  %1593 = vmatpush.msra.mxu1 %v2519_v18  ;;  %v2601_v17 = vld [vmem:[%s3306_s29 + $0x618] sm:$0xff]  ;;  %v2598_v18 = vld [vmem:[%s3306_s29 + $0x600] sm:$0xff] }
 0x172   : > { %2582 = vmatmul.msk.f32.vlgmr.msra.gmra.mxu0 %vm768_vm0, %v3327_v16  ;;  %2583 = vmatmul.msk.f32.vlgmr.msra.gmra.mxu1 %vm768_vm0, %v3327_v16 }
 0x173   : > { %2584 = vmatmul.msk.f32.vlgmr.msra.gmra.mxu2 %vm768_vm0, %v3327_v16  ;;  %2585 = vmatmul.msk.f32.vlgmr.msra.gmra.mxu3 %vm768_vm0, %v3327_v16 }
 0x174   : > { %1690 = vmatpush.msrb.mxu2 %v2572_v19  ;;  %1710 = vmatpush.msrb.mxu3 %v2573_v20  ;;  %v2599_v19 = vld [vmem:[%s3306_s29 + $0x608] sm:$0xff]  ;;  %v2652_v20 = vld [vmem:[%s3306_s29 + $0x7b0] sm:$0xff] }
 0x175   : > { %1650 = vmatpush.msrb.mxu0 %v2570_v21  ;;  %1670 = vmatpush.msrb.mxu1 %v2571_v22  ;;  %v2653_v21 = vld [vmem:[%s3306_s29 + $0x7b8] sm:$0xff]  ;;  %v2650_v22 = vld [vmem:[%s3306_s29 + $0x7a0] sm:$0xff] }
 0x176   : > { %1691 = vmatpush.msrb.mxu2 %v2556_v23  ;;  %1711 = vmatpush.msrb.mxu3 %v2557_v24  ;;  %v2651_v23 = vld [vmem:[%s3306_s29 + $0x7a8] sm:$0xff]  ;;  %v2636_v24 = vld [vmem:[%s3306_s29 + $0x730] sm:$0xff] }
 0x177   : > { %1651 = vmatpush.msrb.mxu0 %v2554_v25  ;;  %1671 = vmatpush.msrb.mxu1 %v2555_v26  ;;  %v2637_v25 = vld [vmem:[%s3306_s29 + $0x738] sm:$0xff]  ;;  %v2634_v26 = vld [vmem:[%s3306_s29 + $0x720] sm:$0xff] }
 0x178   : > { %1692 = vmatpush.msrb.mxu2 %v2540_v27  ;;  %1712 = vmatpush.msrb.mxu3 %v2541_v28  ;;  %v2635_v27 = vld [vmem:[%s3306_s29 + $0x728] sm:$0xff]  ;;  %v2620_v28 = vld [vmem:[%s3306_s29 + $0x6b0] sm:$0xff] }
 0x179   : > { %1652 = vmatpush.msrb.mxu0 %v2538_v29  ;;  %1672 = vmatpush.msrb.mxu1 %v2539_v30  ;;  %v2621_v29 = vld [vmem:[%s3306_s29 + $0x6b8] sm:$0xff]  ;;  %v2618_v30 = vld [vmem:[%s3306_s29 + $0x6a0] sm:$0xff] }
 0x17a   : > { %1693 = vmatpush.msrb.mxu2 %v2524_v31  ;;  %1713 = vmatpush.msrb.mxu3 %v2525_v32  ;;  %v2619_v31 = vld [vmem:[%s3306_s29 + $0x6a8] sm:$0xff]  ;;  %v2604_v32 = vld [vmem:[%s3306_s29 + $0x630] sm:$0xff] }
 0x17b   : > { %1653 = vmatpush.msrb.mxu0 %v2522_v33  ;;  %1673 = vmatpush.msrb.mxu1 %v2523_v34  ;;  %v2605_v33 = vld [vmem:[%s3306_s29 + $0x638] sm:$0xff] }
 0x17c   : > { %2586 = vmatmul.msk.f32.vlgmr.msrb.gmra.mxu0 %vm768_vm0, %v3327_v16  ;;  %2587 = vmatmul.msk.f32.vlgmr.msrb.gmra.mxu1 %vm768_vm0, %v3327_v16 }
 0x17d   : > { %2588 = vmatmul.msk.f32.vlgmr.msrb.gmra.mxu2 %vm768_vm0, %v3327_v16  ;;  %2589 = vmatmul.msk.f32.vlgmr.msrb.gmra.mxu3 %vm768_vm0, %v3327_v16 }
 0x17e   : > { %1770 = vmatpush.msra.mxu2 %v2576_v35  ;;  %1790 = vmatpush.msra.mxu3 %v2577_v36  ;;  %v2602_v36 = vld [vmem:[%s3306_s29 + $0x620] sm:$0xff] }
 0x17f   : > { %1730 = vmatpush.msra.mxu0 %v2574_v37  ;;  %1750 = vmatpush.msra.mxu1 %v2575_v38  ;;  %v2603_v37 = vld [vmem:[%s3306_s29 + $0x628] sm:$0xff]  ;;  %v2656_v38 = vld [vmem:[%s3306_s29 + $0x7d0] sm:$0xff] }
 0x180   : > { %1771 = vmatpush.msra.mxu2 %v2560_v39  ;;  %1791 = vmatpush.msra.mxu3 %v2561_v40  ;;  %v2657_v39 = vld [vmem:[%s3306_s29 + $0x7d8] sm:$0xff]  ;;  %v2654_v40 = vld [vmem:[%s3306_s29 + $0x7c0] sm:$0xff] }
 0x181   : > { %1731 = vmatpush.msra.mxu0 %v2558_v41  ;;  %1751 = vmatpush.msra.mxu1 %v2559_v42  ;;  %v2655_v41 = vld [vmem:[%s3306_s29 + $0x7c8] sm:$0xff]  ;;  %v2640_v42 = vld [vmem:[%s3306_s29 + $0x750] sm:$0xff] }
 0x182   : > { %1772 = vmatpush.msra.mxu2 %v2544_v43  ;;  %1792 = vmatpush.msra.mxu3 %v2545_v44  ;;  %v2641_v43 = vld [vmem:[%s3306_s29 + $0x758] sm:$0xff]  ;;  %v2638_v44 = vld [vmem:[%s3306_s29 + $0x740] sm:$0xff] }
 0x183   : > { %1732 = vmatpush.msra.mxu0 %v2542_v45  ;;  %1752 = vmatpush.msra.mxu1 %v2543_v46  ;;  %v2639_v45 = vld [vmem:[%s3306_s29 + $0x748] sm:$0xff] }
 0x184   : > { %1773 = vmatpush.msra.mxu2 %v2528_v47  ;;  %1793 = vmatpush.msra.mxu3 %v2529_v48  ;;  %v2624_v48 = vld [vmem:[%s3306_s29 + $0x6d0] sm:$0xff] }
 0x185   : > { %1733 = vmatpush.msra.mxu0 %v2526_v49  ;;  %1753 = vmatpush.msra.mxu1 %v2527_v50  ;;  %v2295_v49 = vld [vmem:[%s3867_s1] sm:$0xff] }
 0x186   : > { %2590 = vmatmul.msk.f32.vlgmr.msra.gmra.mxu0 %vm768_vm0, %v3327_v16  ;;  %2591 = vmatmul.msk.f32.vlgmr.msra.gmra.mxu1 %vm768_vm0, %v3327_v16  ;;  %v2622_v50 = vld [vmem:[%s3306_s29 + $0x6c0] sm:$0xff] }
 0x187   : > { %2592 = vmatmul.msk.f32.vlgmr.msra.gmra.mxu2 %vm768_vm0, %v3327_v16  ;;  %2593 = vmatmul.msk.f32.vlgmr.msra.gmra.mxu3 %vm768_vm0, %v3327_v16 }
 0x188   : > { %1850 = vmatpush.msrb.mxu2 %v2580_v51  ;;  %1870 = vmatpush.msrb.mxu3 %v2581_v52  ;;  %v2623_v51 = vld [vmem:[%s3306_s29 + $0x6c8] sm:$0xff] }
 0x189   : > { %1810 = vmatpush.msrb.mxu0 %v2578_v53  ;;  %1830 = vmatpush.msrb.mxu1 %v2579_v54  ;;  %v2732_v54 = vmov 0  }
 0x18a   : > { %1851 = vmatpush.msrb.mxu2 %v2564_v55  ;;  %1871 = vmatpush.msrb.mxu3 %v2565_v56  ;;  %v2608_v55 = vld [vmem:[%s3306_s29 + $0x650] sm:$0xff]  ;;  %v2609_v56 = vld [vmem:[%s3306_s29 + $0x658] sm:$0xff] }
 0x18b   : > { %1811 = vmatpush.msrb.mxu0 %v2562_v57  ;;  %1831 = vmatpush.msrb.mxu1 %v2563_v58  ;;  %v2606_v57 = vld [vmem:[%s3306_s29 + $0x640] sm:$0xff]  ;;  %v2607_v58 = vld [vmem:[%s3306_s29 + $0x648] sm:$0xff] }
 0x18c   : > { %1852 = vmatpush.msrb.mxu2 %v2548_v59  ;;  %1872 = vmatpush.msrb.mxu3 %v2549_v60  ;;  %v2660_v59 = vld [vmem:[%s3306_s29 + $0x7f0] sm:$0xff]  ;;  %v2661_v60 = vld [vmem:[%s3306_s29 + $0x7f8] sm:$0xff] }
 0x18d   : > { %1812 = vmatpush.msrb.mxu0 %v2546_v61  ;;  %1832 = vmatpush.msrb.mxu1 %v2547_v62  ;;  %v2707_v61 = vld [vmem:[%s3866_s0] sm:$0xff] }
 0x18e   : > { %1853 = vmatpush.msrb.mxu2 %v2532_v63  ;;  %1873 = vmatpush.msrb.mxu3 %v2533_v0  ;;  %v2658_v62 = vld [vmem:[%s3306_s29 + $0x7e0] sm:$0xff]  ;;  %v2659_v63 = vld [vmem:[%s3306_s29 + $0x7e8] sm:$0xff]  ;;  %v2644_v0 = vld [vmem:[%s3306_s29 + $0x770] sm:$0xff] }
 0x18f   : > { %1813 = vmatpush.msrb.mxu0 %v2530_v1  ;;  %1833 = vmatpush.msrb.mxu1 %v2531_v2  ;;  %v2645_v1 = vld [vmem:[%s3306_s29 + $0x778] sm:$0xff] }
 0x190   : > { %2594 = vmatmul.msk.f32.vlgmr.msrb.gmra.mxu0 %vm768_vm0, %v3327_v16  ;;  %2595 = vmatmul.msk.f32.vlgmr.msrb.gmra.mxu1 %vm768_vm0, %v3327_v16 }
 0x191   : > { %2596 = vmatmul.msk.f32.vlgmr.msrb.gmra.mxu2 %vm768_vm0, %v3327_v16  ;;  %2597 = vmatmul.msk.f32.vlgmr.msrb.gmra.mxu3 %vm768_vm0, %v3327_v16 }
 0x192   : > { %2011 = vmatpush.msra.mxu2 %v2648_v3  ;;  %2031 = vmatpush.msra.mxu3 %v2649_v4  ;;  %v2642_v4 = vld [vmem:[%s3306_s29 + $0x760] sm:$0xff] }
 0x193   : > { %1971 = vmatpush.msra.mxu0 %v2646_v5  ;;  %1991 = vmatpush.msra.mxu1 %v2647_v6  ;;  %v2643_v5 = vld [vmem:[%s3306_s29 + $0x768] sm:$0xff]  ;;  %v2628_v6 = vld [vmem:[%s3306_s29 + $0x6f0] sm:$0xff] }
 0x194   : > { %2012 = vmatpush.msra.mxu2 %v2632_v7  ;;  %2032 = vmatpush.msra.mxu3 %v2633_v8  ;;  %v2629_v7 = vld [vmem:[%s3306_s29 + $0x6f8] sm:$0xff]  ;;  %v2626_v8 = vld [vmem:[%s3306_s29 + $0x6e0] sm:$0xff] }
 0x195   : > { %1972 = vmatpush.msra.mxu0 %v2630_v9  ;;  %1992 = vmatpush.msra.mxu1 %v2631_v10  ;;  %v2627_v9 = vld [vmem:[%s3306_s29 + $0x6e8] sm:$0xff] }
 0x196   : > { %2013 = vmatpush.msra.mxu2 %v2616_v11  ;;  %2033 = vmatpush.msra.mxu3 %v2617_v12  ;;  %v2612_v12 = vld [vmem:[%s3306_s29 + $0x670] sm:$0xff] }
 0x197   : > { %1973 = vmatpush.msra.mxu0 %v2614_v13  ;;  %1993 = vmatpush.msra.mxu1 %v2615_v14  ;;  %v2613_v13 = vld [vmem:[%s3306_s29 + $0x678] sm:$0xff]  ;;  %v2610_v14 = vld [vmem:[%s3306_s29 + $0x660] sm:$0xff] }
 0x198   : > { %2014 = vmatpush.msra.mxu2 %v2600_v15  ;;  %2034 = vmatpush.msra.mxu3 %v2601_v17  ;;  %v2611_v15 = vld [vmem:[%s3306_s29 + $0x668] sm:$0xff] }
 0x199   : > { %1974 = vmatpush.msra.mxu0 %v2598_v18  ;;  %1994 = vmatpush.msra.mxu1 %v2599_v19 }
 0x19a   : > { %2662 = vmatmul.msk.f32.vlgmr.msra.gmra.mxu0 %vm768_vm0, %v3327_v16  ;;  %2663 = vmatmul.msk.f32.vlgmr.msra.gmra.mxu1 %vm768_vm0, %v3327_v16 }
 0x19b   : > { %2664 = vmatmul.msk.f32.vlgmr.msra.gmra.mxu2 %vm768_vm0, %v3327_v16  ;;  %2665 = vmatmul.msk.f32.vlgmr.msra.gmra.mxu3 %vm768_vm0, %v3327_v16 }
 0x19c   : > { %2091 = vmatpush.msrb.mxu2 %v2652_v20  ;;  %2111 = vmatpush.msrb.mxu3 %v2653_v21 }
 0x19d   : > { %2051 = vmatpush.msrb.mxu0 %v2650_v22  ;;  %2071 = vmatpush.msrb.mxu1 %v2651_v23 }
 0x19e   : > { %2092 = vmatpush.msrb.mxu2 %v2636_v24  ;;  %2112 = vmatpush.msrb.mxu3 %v2637_v25 }
 0x19f   : > { %2052 = vmatpush.msrb.mxu0 %v2634_v26  ;;  %2072 = vmatpush.msrb.mxu1 %v2635_v27  ;;  %v3639_v34 = vpop.f32.mrf.mxu0  ;;  %v3641_v35 = vpop.f32.mrf.mxu1 }
 0x1a0   : > { %2093 = vmatpush.msrb.mxu2 %v2620_v28  ;;  %2113 = vmatpush.msrb.mxu3 %v2621_v29 }
 0x1a1   : > { %2053 = vmatpush.msrb.mxu0 %v2618_v30  ;;  %2073 = vmatpush.msrb.mxu1 %v2619_v31 }
 0x1a2   : > { %2094 = vmatpush.msrb.mxu2 %v2604_v32  ;;  %2114 = vmatpush.msrb.mxu3 %v2605_v33 }
 0x1a3   : > { %2054 = vmatpush.msrb.mxu0 %v2602_v36  ;;  %2074 = vmatpush.msrb.mxu1 %v2603_v37 }
 0x1a4   : > { %2666 = vmatmul.msk.f32.vlgmr.msrb.gmra.mxu0 %vm768_vm0, %v3327_v16  ;;  %2667 = vmatmul.msk.f32.vlgmr.msrb.gmra.mxu1 %vm768_vm0, %v3327_v16 }
 0x1a5   : > { %2668 = vmatmul.msk.f32.vlgmr.msrb.gmra.mxu2 %vm768_vm0, %v3327_v16  ;;  %2669 = vmatmul.msk.f32.vlgmr.msrb.gmra.mxu3 %vm768_vm0, %v3327_v16  ;;  %v2625_v16 = vld [vmem:[%s3306_s29 + $0x6d8] sm:$0xff] }
 0x1a6   : > { %2171 = vmatpush.msra.mxu2 %v2656_v38  ;;  %2191 = vmatpush.msra.mxu3 %v2657_v39  ;;  %v3661_v46 = vpop.f32.mrf.mxu2  ;;  %v3663_v47 = vpop.f32.mrf.mxu3 }
 0x1a7   : > { %2131 = vmatpush.msra.mxu0 %v2654_v40  ;;  %2151 = vmatpush.msra.mxu1 %v2655_v41 }
 0x1a8   : > { %2172 = vmatpush.msra.mxu2 %v2640_v42  ;;  %2192 = vmatpush.msra.mxu3 %v2641_v43 }
 0x1a9   : > { %2132 = vmatpush.msra.mxu0 %v2638_v44  ;;  %2152 = vmatpush.msra.mxu1 %v2639_v45  ;;  %v3672_v52 = vpop.f32.mrf.mxu0  ;;  %v3674_v53 = vpop.f32.mrf.mxu1 }
 0x1aa   : > { %2706 = vset.pattern.permute.xlu0 %v2732_v54  ;;  %2173 = vmatpush.msra.mxu2 %v2624_v48 }
 0x1ab   : > { %2193 = vmatpush.msra.mxu3 %v2625_v16  ;;  %2298 = vperm.xlu0 %2706, %v2295_v49  }
 0x1ac   : > { %2133 = vmatpush.msra.mxu0 %v2622_v50  ;;  %2153 = vmatpush.msra.mxu1 %v2623_v51 }
 0x1ad   : > { %2174 = vmatpush.msra.mxu2 %v2608_v55  ;;  %2194 = vmatpush.msra.mxu3 %v2609_v56 }
 0x1ae   : > { %2134 = vmatpush.msra.mxu0 %v2606_v57  ;;  %2154 = vmatpush.msra.mxu1 %v2607_v58 }
 0x1af   : > { %2670 = vmatmul.msk.f32.vlgmr.msra.gmra.mxu0 %vm768_vm0, %v2707_v61  ;;  %2671 = vmatmul.msk.f32.vlgmr.msra.gmra.mxu1 %vm768_vm0, %v2707_v61 }
 0x1b0   : > { %2672 = vmatmul.msk.f32.vlgmr.msra.gmra.mxu2 %vm768_vm0, %v2707_v61  ;;  %2673 = vmatmul.msk.f32.vlgmr.msra.gmra.mxu3 %vm768_vm0, %v2707_v61  ;;  %v3693_v2 = vpop.f32.mrf.mxu2  ;;  %v3695_v3 = vpop.f32.mrf.mxu3 }
 0x1b1   : > { %2251 = vmatpush.msrb.mxu2 %v2660_v59  ;;  %2271 = vmatpush.msrb.mxu3 %v2661_v60 }
 0x1b2   : > { %2211 = vmatpush.msrb.mxu0 %v2658_v62  ;;  %2231 = vmatpush.msrb.mxu1 %v2659_v63 }
 0x1b3   : > { %2252 = vmatpush.msrb.mxu2 %v2644_v0  ;;  %2272 = vmatpush.msrb.mxu3 %v2645_v1  ;;  %v3703_v10 = vpop.f32.mrf.mxu0  ;;  %v3705_v11 = vpop.f32.mrf.mxu1 }
 0x1b4   : > { %2212 = vmatpush.msrb.mxu0 %v2642_v4  ;;  %2232 = vmatpush.msrb.mxu1 %v2643_v5 }
 0x1b5   : > { %2253 = vmatpush.msrb.mxu2 %v2628_v6  ;;  %2273 = vmatpush.msrb.mxu3 %v2629_v7 }
 0x1b6   : > { %2213 = vmatpush.msrb.mxu0 %v2626_v8  ;;  %2233 = vmatpush.msrb.mxu1 %v2627_v9 }
 0x1b7   : > { %2254 = vmatpush.msrb.mxu2 %v2612_v12  ;;  %2274 = vmatpush.msrb.mxu3 %v2613_v13 }
 0x1b8   : > { %2214 = vmatpush.msrb.mxu0 %v2610_v14  ;;  %2234 = vmatpush.msrb.mxu1 %v2611_v15 }
 0x1b9   : > { %2674 = vmatmul.msk.f32.vlgmr.msrb.gmra.mxu0 %vm768_vm0, %v2707_v61  ;;  %2675 = vmatmul.msk.f32.vlgmr.msrb.gmra.mxu1 %vm768_vm0, %v2707_v61 }
 0x1ba   : > { %2676 = vmatmul.msk.f32.vlgmr.msrb.gmra.mxu2 %vm768_vm0, %v2707_v61  ;;  %2677 = vmatmul.msk.f32.vlgmr.msrb.gmra.mxu3 %vm768_vm0, %v2707_v61  ;;  %v3715_v17 = vpop.f32.mrf.mxu2  ;;  %v3717_v18 = vpop.f32.mrf.mxu3 }
 0x1bd   : > { %v3719_v19 = vpop.f32.mrf.mxu0  ;;  %v3721_v20 = vpop.f32.mrf.mxu1 }
 0x1c4   : > { %v3723_v21 = vpop.f32.mrf.mxu2  ;;  %v3725_v22 = vpop.f32.mrf.mxu3 }
 0x1c7   : > { %v1174_v23 = vpop.f32.mrf.mxu0  ;;  %v1194_v24 = vpop.f32.mrf.mxu1 }
 0x1c8   : > { %v1477_v4 = vmax.f32 %v3639_v34, %v1174_v23  ;;  %v1478_v5 = vmax.f32 %v3641_v35, %v1194_v24 }
 0x1ce   : > { %v1214_v25 = vpop.f32.mrf.mxu2  ;;  %v1234_v26 = vpop.f32.mrf.mxu3 }
 0x1cf   : > { %v1479_v14 = vmax.f32 %v3661_v46, %v1214_v25  ;;  %v1480_v15 = vmax.f32 %v3663_v47, %v1234_v26 }
 0x1d1   : > { %v1254_v27 = vpop.f32.mrf.mxu0  ;;  %v1274_v28 = vpop.f32.mrf.mxu1 }
 0x1d2   : > { %v1481_v34 = vmax.f32 %v3672_v52, %v1254_v27  ;;  %v1482_v35 = vmax.f32 %v3674_v53, %v1274_v28 }
 0x1d8   : > { %v3727_v29 = vpop.f32.mrf.mxu2  ;;  %v3729_v30 = vpop.f32.mrf.mxu3 }
 0x1db   : > { %v3731_v31 = vpop.f32.mrf.mxu0  ;;  %v3733_v32 = vpop.f32.mrf.mxu1 }
 0x1e2   : > { %v3735_v33 = vpop.f32.mrf.mxu2  ;;  %v3737_v36 = vpop.f32.mrf.mxu3 }
 0x1e3   : > { %v1487_v37 = vmax.f32 %v3715_v17, %v3735_v33  ;;  %v1488_v38 = vmax.f32 %v3717_v18, %v3737_v36 }
 0x1e5   : > { %v3743_v39 = vpop.f32.mrf.mxu0  ;;  %v3745_v40 = vpop.f32.mrf.mxu1 }
 0x1e6   : > { %v1489_v41 = vmax.f32 %v3719_v19, %v3743_v39  ;;  %v3870_v17 = vmax.f32 %v3721_v20, %v3745_v40 }
 0x1ec   : > { %v3751_v43 = vpop.f32.mrf.mxu2  ;;  %v3753_v44 = vpop.f32.mrf.mxu3 }
 0x1ef   : > { %v1575_v16 = vpop.f32.mrf.mxu0  ;;  %v1595_v49 = vpop.f32.mrf.mxu1 }
 0x1f0   : > { %v1878_v8 = vmax.f32 %v1477_v4, %v1575_v16  ;;  %v1879_v9 = vmax.f32 %v1478_v5, %v1595_v49 }
 0x1f6   : > { %v1615_v50 = vpop.f32.mrf.mxu2  ;;  %v1635_v51 = vpop.f32.mrf.mxu3 }
 0x1f7   : > { %v1880_v48 = vmax.f32 %v1479_v14, %v1615_v50  ;;  %v1881_v45 = vmax.f32 %v1480_v15, %v1635_v51 }
 0x1f9   : > { %v1655_v54 = vpop.f32.mrf.mxu0  ;;  %v1675_v55 = vpop.f32.mrf.mxu1 }
 0x1fa   : > { %v1882_v25 = vmax.f32 %v1481_v34, %v1655_v54  ;;  %v1883_v26 = vmax.f32 %v1482_v35, %v1675_v55  ;;  %v1483_v55 = vmax.f32 %v3693_v2, %v3727_v29  ;;  %v1485_v34 = vmax.f32 %v3703_v10, %v3731_v31 }
 0x1fb   : > { %v1486_v35 = vmax.f32 %v3705_v11, %v3733_v32 }
 0x200   : > { %v1695_v56 = vpop.f32.mrf.mxu2  ;;  %v1715_v57 = vpop.f32.mrf.mxu3 }
 0x203   : > { %v3759_v58 = vpop.f32.mrf.mxu0  ;;  %v3761_v59 = vpop.f32.mrf.mxu1 }
 0x204   : > { %v1886_v29 = vmax.f32 %v1485_v34, %v3759_v58 }
 0x20a   : > { %v3763_v60 = vpop.f32.mrf.mxu2  ;;  %v3765_v61 = vpop.f32.mrf.mxu3 }
 0x20d   : > { %v3767_v62 = vpop.f32.mrf.mxu0  ;;  %v3769_v63 = vpop.f32.mrf.mxu1 }
 0x20e   : > { %v1891_v33 = vmax.f32 %v3870_v17, %v3769_v63  ;;  %v3872_v63 = vmax.f32 %v3725_v22, %v3753_v44 }
 0x214   : > { %v3773_v0 = vpop.f32.mrf.mxu2  ;;  %v3775_v1 = vpop.f32.mrf.mxu3 }
 0x217   : > { %v1976_v6 = vpop.f32.mrf.mxu0  ;;  %v1996_v7 = vpop.f32.mrf.mxu1 }
 0x218   : > { %v2279_v12 = vmax.f32 %v1878_v8, %v1976_v6  ;;  %v2280_v13 = vmax.f32 %v1879_v9, %v1996_v7  ;;  %v1484_v7 = vmax.f32 %v3695_v3, %v3729_v30  ;;  %v1887_v30 = vmax.f32 %v1486_v35, %v3761_v59 }
 0x21d   : > { %v3781_v42 = vpop.permute.xlu0 %2298 }
 0x21e   : > { %v2301_v23 = vadd.f32 %v3781_v42, %v2279_v12  ;;  %v2302_v24 = vadd.f32 %v3781_v42, %v2280_v13  ;;  %v2016_v16 = vpop.f32.mrf.mxu2  ;;  %v2036_v49 = vpop.f32.mrf.mxu3  ;;  %v1884_v12 = vmax.f32 %v1483_v55, %v1695_v56  ;;  %v1885_v13 = vmax.f32 %v1484_v7, %v1715_v57 }
 0x21f   : > { %v2281_v46 = vmax.f32 %v1880_v48, %v2016_v16  ;;  %v2282_v47 = vmax.f32 %v1881_v45, %v2036_v49 }
 0x220   : > { %v2317_v52 = vmax.f32 %v2301_v23, 0.0  ;;  %v2318_v53 = vmax.f32 %v2302_v24, 0.0 }
 0x221   : > { %v2303_v27 = vadd.f32 %v3781_v42, %v2281_v46  ;;  %v2304_v28 = vadd.f32 %v3781_v42, %v2282_v47  ;;  %v2056_v50 = vpop.f32.mrf.mxu0  ;;  %v2076_v51 = vpop.f32.mrf.mxu1  ;;  %v1888_v46 = vmax.f32 %v1487_v37, %v3763_v60  ;;  %v1889_v47 = vmax.f32 %v1488_v38, %v3765_v61 }
 0x222   : > { %2333 = vst [vmem:[%s3790_s14] sm:$0xff] %v2317_v52  ;;  %v2283_v4 = vmax.f32 %v1882_v25, %v2056_v50  ;;  %v2284_v5 = vmax.f32 %v1883_v26, %v2076_v51  ;;  %v1893_v51 = vmax.f32 %v3872_v63, %v3775_v1 }
 0x223   : > { %2334 = vst [vmem:[%s3790_s14 + $0x8] sm:$0xff] %v2318_v53  ;;  %v2319_v6 = vmax.f32 %v2303_v27, 0.0  ;;  %v2320_v48 = vmax.f32 %v2304_v28, 0.0  ;;  %v1890_v27 = vmax.f32 %v1489_v41, %v3767_v62  ;;  %v3871_v41 = vmax.f32 %v3723_v21, %v3751_v43 }
 0x224   : > { %v2305_v45 = vadd.f32 %v3781_v42, %v2283_v4  ;;  %v2306_v54 = vadd.f32 %v3781_v42, %v2284_v5 }
 0x225   : > { %2335 = vst [vmem:[%s3790_s14 + $0x10] sm:$0xff] %v2319_v6  ;;  %v1892_v62 = vmax.f32 %v3871_v41, %v3773_v0 }
 0x226   : > { %2336 = vst [vmem:[%s3790_s14 + $0x18] sm:$0xff] %v2320_v48  ;;  %v2321_v8 = vmax.f32 %v2305_v45, 0.0  ;;  %v2322_v9 = vmax.f32 %v2306_v54, 0.0 }
 0x228   : > { %2337 = vst [vmem:[%s3790_s14 + $0x20] sm:$0xff] %v2321_v8  ;;  %v2096_v14 = vpop.f32.mrf.mxu2  ;;  %v2116_v15 = vpop.f32.mrf.mxu3 }
 0x229   : > { %2338 = vst [vmem:[%s3790_s14 + $0x28] sm:$0xff] %v2322_v9  ;;  %v2285_v2 = vmax.f32 %v1884_v12, %v2096_v14  ;;  %v2286_v3 = vmax.f32 %v1885_v13, %v2116_v15 }
 0x22b   : > { %v2307_v56 = vadd.f32 %v3781_v42, %v2285_v2  ;;  %v2308_v57 = vadd.f32 %v3781_v42, %v2286_v3 }
 0x22c   : > { %v2136_v23 = vpop.f32.mrf.mxu0  ;;  %v2156_v24 = vpop.f32.mrf.mxu1 }
 0x22d   : > { %v2323_v10 = vmax.f32 %v2307_v56, 0.0  ;;  %v2324_v31 = vmax.f32 %v2308_v57, 0.0  ;;  %v2287_v16 = vmax.f32 %v1886_v29, %v2136_v23  ;;  %v2288_v11 = vmax.f32 %v1887_v30, %v2156_v24 }
 0x22f   : > { %2339 = vst [vmem:[%s3790_s14 + $0x30] sm:$0xff] %v2323_v10  ;;  %v2309_v32 = vadd.f32 %v3781_v42, %v2287_v16  ;;  %v2310_v49 = vadd.f32 %v3781_v42, %v2288_v11 }
 0x230   : > { %2340 = vst [vmem:[%s3790_s14 + $0x38] sm:$0xff] %v2324_v31 }
 0x231   : > { %v2325_v58 = vmax.f32 %v2309_v32, 0.0  ;;  %v2326_v59 = vmax.f32 %v2310_v49, 0.0 }
 0x233   : > { %2341 = vst [vmem:[%s3790_s14 + $0x40] sm:$0xff] %v2325_v58  ;;  %v2176_v25 = vpop.f32.mrf.mxu2  ;;  %v2196_v26 = vpop.f32.mrf.mxu3 }
 0x234   : > { %2342 = vst [vmem:[%s3790_s14 + $0x48] sm:$0xff] %v2326_v59  ;;  %v2289_v52 = vmax.f32 %v1888_v46, %v2176_v25  ;;  %v2290_v53 = vmax.f32 %v1889_v47, %v2196_v26 }
 0x236   : > { %v2311_v18 = vadd.f32 %v3781_v42, %v2289_v52  ;;  %v2312_v36 = vadd.f32 %v3781_v42, %v2290_v53  ;;  %v2216_v37 = vpop.f32.mrf.mxu0  ;;  %v2236_v38 = vpop.f32.mrf.mxu1 }
 0x237   : > { %v2291_v60 = vmax.f32 %v1890_v27, %v2216_v37  ;;  %v2292_v61 = vmax.f32 %v1891_v33, %v2236_v38 }
 0x238   : > { %v2327_v28 = vmax.f32 %v2311_v18, 0.0  ;;  %v2328_v50 = vmax.f32 %v2312_v36, 0.0 }
 0x239   : > { %v2313_v19 = vadd.f32 %v3781_v42, %v2291_v60  ;;  %v2314_v39 = vadd.f32 %v3781_v42, %v2292_v61 }
 0x23a   : > { %2343 = vst [vmem:[%s3790_s14 + $0x50] sm:$0xff] %v2327_v28 }
 0x23b   : > { %2344 = vst [vmem:[%s3790_s14 + $0x58] sm:$0xff] %v2328_v50  ;;  %v2329_v20 = vmax.f32 %v2313_v19, 0.0  ;;  %v2330_v40 = vmax.f32 %v2314_v39, 0.0 }
 0x23d   : > { %2345 = vst [vmem:[%s3790_s14 + $0x60] sm:$0xff] %v2329_v20  ;;  %v2256_v4 = vpop.f32.mrf.mxu2  ;;  %v2276_v5 = vpop.f32.mrf.mxu3 }
 0x23e   : > { %2346 = vst [vmem:[%s3790_s14 + $0x68] sm:$0xff] %v2330_v40  ;;  %v2293_v6 = vmax.f32 %v1892_v62, %v2256_v4  ;;  %v2294_v48 = vmax.f32 %v1893_v51, %v2276_v5 }
 0x240   : > { %v2315_v45 = vadd.f32 %v3781_v42, %v2293_v6  ;;  %v2316_v54 = vadd.f32 %v3781_v42, %v2294_v48 }
 0x242   : > { %v2331_v55 = vmax.f32 %v2315_v45, 0.0  ;;  %v2332_v7 = vmax.f32 %v2316_v54, 0.0 }
 0x244   : > { %2347 = vst [vmem:[%s3790_s14 + $0x70] sm:$0xff] %v2331_v55 }
 0x245   : > { %2348 = vst [vmem:[%s3790_s14 + $0x78] sm:$0xff] %v2332_v7 }
 0x246 PF: > { %p10_p9 = scmp.ge.s32.totalorder %s2770_s16, 15   ;;  %s3873_s12 = smov %s2726_s13 }
 0x247   : > { %s3874_s13 = smov %s2779_s19  ;;  %s3875_s14 = smov %s2770_s16 }
 0x248   :  { %12 = sbr.rel (!%p10_p9) target bundleno = 2 (0x2), region = 93 }

// kernel: lenet_forward.4
= control target key start
LH: loop header
LB: loop body
LE: loop exit
PB: predicated region body
PF: predicated region fallthrough
CT: control target
= control target key end

     0   :  { %s3842_s12 = smov 0   ;;  %s3844_s13 = smov 0   ;;  %s5955_s0 = inlined_call_operand.vmem [shape: f32[16,152], index: 0, kind: input, shape index: {}]   ;;  %s5956_s1 = inlined_call_operand.vmem [shape: f32[16,1], index: 1, kind: input, shape index: {}]   ;;  %s5957_s2 = inlined_call_operand.vmem [shape: f32[4,152,3584], index: 2, kind: input, shape index: {}]   ;;  %s5958_s3 = inlined_call_operand.vmem [shape: f32[16,3584], index: 3, kind: output, shape index: {}]  }
   0x1   :  { %s3846_s14 = smov 0  }
   0x2 LB: > { %s3288_s15 = sadd.s32 4294967295, %s3819_s14   ;;  %s3859_s16 = sadd.s32 1, %s3819_s14   ;;  %s3819_s14 = sphi %s3846_s14, %s5962_s14   ;;  %s3815_s13 = sphi %s3844_s13, %s5961_s13   ;;  %s3811_s12 = sphi %s3842_s12, %s5960_s12  }
   0x3   : > { %s59_s17 = ssub.s32 %s3819_s14, %s3859_s16  ;;  %s62_s18 = sadd.s32 1, %s3815_s13 }
   0x4   : > { %p60_p0 = scmp.eq.s32.totalorder %s59_s17, 0  ;;  %p69_p1 = scmp.ne.s32.totalorder %s3815_s13, %s3811_s12 }
   0x5   : > { %p70_p2 = scmp.eq.s32.totalorder %s3819_s14, 0  ;;  %p99_p3 = scmp.eq.s32.totalorder %s3288_s15, 3 }
   0x6   : > { %s3870_s19 = scalar_select %p60_p0, %s3815_s13, %s62_s18  }
   0x7   : > { %p71_p4 = por %p70_p2, %p69_p1  ;;  %p3872_p5 = por %p99_p3, %p69_p1 }
   0x8   : > { %p3291_p6 = scmp.ge.s32.totalorder %s3819_s14, 4 }
   0xa   : > { %127 = sbr.rel (%p3291_p6) target bundleno = 552 (0x228), region = 24 }
   0xf   : > { %130 = sbr.rel (!%p71_p4) target bundleno = 552 (0x228), region = 28  ;;  %s132_s21 = sand.u32 (%p71_p4), 1, %s3815_s13  }
  0x10   : > { %s3752_s22 = smul.u32 (%p71_p4), 56, %s3819_s14 }
  0x11   : > { %s3760_s23 = smul.u32 (%p71_p4), 4256, %s132_s21 }
  0x12   : > { %s3882_s26 = scalar_lea.vmem (%p71_p4), %s5957_s2, %s3752_s22 }
  0x13   : > { %v150_v0 = vld [vmem:[%s3882_s26] sm:$0xff] (%p71_p4)  ;;  %v152_v1 = vld [vmem:[%s3882_s26 + $0x8] sm:$0xff] (%p71_p4)  ;;  %v154_v2 = vld [vmem:[%s3882_s26 + $0x10] sm:$0xff] (%p71_p4)  ;;  %s3887_s27 = scalar_lea.vmem (%p71_p4), [#allocation2], %s3760_s23 }
  0x14   : > { %151 = vst [vmem:[%s3887_s27] sm:$0xff] %v150_v0  ;;  %v156_v3 = vld [vmem:[%s3882_s26 + $0x18] sm:$0xff]  ;;  %v158_v4 = vld [vmem:[%s3882_s26 + $0x20] sm:$0xff]  ;;  %v160_v5 = vld [vmem:[%s3882_s26 + $0x28] sm:$0xff] }
  0x15   : > { %153 = vst [vmem:[%s3887_s27 + $0x8] sm:$0xff] %v152_v1  ;;  %v162_v6 = vld [vmem:[%s3882_s26 + $0x30] sm:$0xff]  ;;  %v164_v7 = vld [vmem:[%s3882_s26 + $0xe0] sm:$0xff]  ;;  %v166_v8 = vld [vmem:[%s3882_s26 + $0xe8] sm:$0xff] }
  0x16   : > { %155 = vst [vmem:[%s3887_s27 + $0x10] sm:$0xff] %v154_v2  ;;  %v168_v9 = vld [vmem:[%s3882_s26 + $0xf0] sm:$0xff]  ;;  %v170_v10 = vld [vmem:[%s3882_s26 + $0xf8] sm:$0xff]  ;;  %v172_v11 = vld [vmem:[%s3882_s26 + $0x100] sm:$0xff] }
  0x17   : > { %157 = vst [vmem:[%s3887_s27 + $0x18] sm:$0xff] %v156_v3  ;;  %v174_v12 = vld [vmem:[%s3882_s26 + $0x108] sm:$0xff]  ;;  %v176_v13 = vld [vmem:[%s3882_s26 + $0x110] sm:$0xff]  ;;  %v178_v14 = vld [vmem:[%s3882_s26 + $0x1c0] sm:$0xff] }
  0x18   : > { %159 = vst [vmem:[%s3887_s27 + $0x20] sm:$0xff] %v158_v4  ;;  %v180_v15 = vld [vmem:[%s3882_s26 + $0x1c8] sm:$0xff]  ;;  %v182_v16 = vld [vmem:[%s3882_s26 + $0x1d0] sm:$0xff]  ;;  %v184_v17 = vld [vmem:[%s3882_s26 + $0x1d8] sm:$0xff] }
  0x19   : > { %161 = vst [vmem:[%s3887_s27 + $0x28] sm:$0xff] %v160_v5  ;;  %v186_v18 = vld [vmem:[%s3882_s26 + $0x1e0] sm:$0xff]  ;;  %v188_v19 = vld [vmem:[%s3882_s26 + $0x1e8] sm:$0xff]  ;;  %v190_v20 = vld [vmem:[%s3882_s26 + $0x1f0] sm:$0xff] }
  0x1a   : > { %163 = vst [vmem:[%s3887_s27 + $0x30] sm:$0xff] %v162_v6  ;;  %v192_v21 = vld [vmem:[%s3882_s26 + $0x2a0] sm:$0xff]  ;;  %v194_v22 = vld [vmem:[%s3882_s26 + $0x2a8] sm:$0xff]  ;;  %v196_v23 = vld [vmem:[%s3882_s26 + $0x2b0] sm:$0xff] }
  0x1b   : > { %165 = vst [vmem:[%s3887_s27 + $0x38] sm:$0xff] %v164_v7  ;;  %v198_v24 = vld [vmem:[%s3882_s26 + $0x2b8] sm:$0xff]  ;;  %v200_v25 = vld [vmem:[%s3882_s26 + $0x2c0] sm:$0xff]  ;;  %v202_v26 = vld [vmem:[%s3882_s26 + $0x2c8] sm:$0xff] }
  0x1c   : > { %167 = vst [vmem:[%s3887_s27 + $0x40] sm:$0xff] %v166_v8  ;;  %v204_v27 = vld [vmem:[%s3882_s26 + $0x2d0] sm:$0xff]  ;;  %v206_v28 = vld [vmem:[%s3882_s26 + $0x380] sm:$0xff]  ;;  %v208_v29 = vld [vmem:[%s3882_s26 + $0x388] sm:$0xff] }
  0x1d   : > { %169 = vst [vmem:[%s3887_s27 + $0x48] sm:$0xff] %v168_v9  ;;  %v210_v30 = vld [vmem:[%s3882_s26 + $0x390] sm:$0xff]  ;;  %v212_v31 = vld [vmem:[%s3882_s26 + $0x398] sm:$0xff]  ;;  %v214_v32 = vld [vmem:[%s3882_s26 + $0x3a0] sm:$0xff] }
  0x1e   : > { %171 = vst [vmem:[%s3887_s27 + $0x50] sm:$0xff] %v170_v10  ;;  %v216_v33 = vld [vmem:[%s3882_s26 + $0x3a8] sm:$0xff]  ;;  %v218_v34 = vld [vmem:[%s3882_s26 + $0x3b0] sm:$0xff]  ;;  %v220_v35 = vld [vmem:[%s3882_s26 + $0x460] sm:$0xff] }
  0x1f   : > { %173 = vst [vmem:[%s3887_s27 + $0x58] sm:$0xff] %v172_v11  ;;  %v222_v36 = vld [vmem:[%s3882_s26 + $0x468] sm:$0xff]  ;;  %v224_v37 = vld [vmem:[%s3882_s26 + $0x470] sm:$0xff]  ;;  %v226_v38 = vld [vmem:[%s3882_s26 + $0x478] sm:$0xff] }
  0x20   : > { %175 = vst [vmem:[%s3887_s27 + $0x60] sm:$0xff] %v174_v12  ;;  %v228_v39 = vld [vmem:[%s3882_s26 + $0x480] sm:$0xff]  ;;  %v230_v40 = vld [vmem:[%s3882_s26 + $0x488] sm:$0xff]  ;;  %v232_v41 = vld [vmem:[%s3882_s26 + $0x490] sm:$0xff] }
  0x21   : > { %177 = vst [vmem:[%s3887_s27 + $0x68] sm:$0xff] %v176_v13  ;;  %v234_v42 = vld [vmem:[%s3882_s26 + $0x540] sm:$0xff]  ;;  %v236_v43 = vld [vmem:[%s3882_s26 + $0x548] sm:$0xff]  ;;  %v238_v44 = vld [vmem:[%s3882_s26 + $0x550] sm:$0xff] }
  0x22   : > { %179 = vst [vmem:[%s3887_s27 + $0x70] sm:$0xff] %v178_v14  ;;  %v240_v45 = vld [vmem:[%s3882_s26 + $0x558] sm:$0xff]  ;;  %v242_v46 = vld [vmem:[%s3882_s26 + $0x560] sm:$0xff]  ;;  %v244_v47 = vld [vmem:[%s3882_s26 + $0x568] sm:$0xff] }
  0x23   : > { %181 = vst [vmem:[%s3887_s27 + $0x78] sm:$0xff] %v180_v15  ;;  %v246_v48 = vld [vmem:[%s3882_s26 + $0x570] sm:$0xff]  ;;  %v248_v49 = vld [vmem:[%s3882_s26 + $0x620] sm:$0xff]  ;;  %v250_v50 = vld [vmem:[%s3882_s26 + $0x628] sm:$0xff] }
  0x24   : > { %183 = vst [vmem:[%s3887_s27 + $0x80] sm:$0xff] %v182_v16  ;;  %v252_v51 = vld [vmem:[%s3882_s26 + $0x630] sm:$0xff]  ;;  %v254_v52 = vld [vmem:[%s3882_s26 + $0x638] sm:$0xff]  ;;  %v256_v53 = vld [vmem:[%s3882_s26 + $0x640] sm:$0xff] }
  0x25   : > { %185 = vst [vmem:[%s3887_s27 + $0x88] sm:$0xff] %v184_v17  ;;  %v258_v54 = vld [vmem:[%s3882_s26 + $0x648] sm:$0xff]  ;;  %v260_v55 = vld [vmem:[%s3882_s26 + $0x650] sm:$0xff]  ;;  %v262_v56 = vld [vmem:[%s3882_s26 + $0x700] sm:$0xff] }
  0x26   : > { %187 = vst [vmem:[%s3887_s27 + $0x90] sm:$0xff] %v186_v18  ;;  %v264_v57 = vld [vmem:[%s3882_s26 + $0x708] sm:$0xff]  ;;  %v266_v58 = vld [vmem:[%s3882_s26 + $0x710] sm:$0xff]  ;;  %v268_v59 = vld [vmem:[%s3882_s26 + $0x718] sm:$0xff] }
  0x27   : > { %189 = vst [vmem:[%s3887_s27 + $0x98] sm:$0xff] %v188_v19  ;;  %v270_v60 = vld [vmem:[%s3882_s26 + $0x720] sm:$0xff]  ;;  %v272_v61 = vld [vmem:[%s3882_s26 + $0x728] sm:$0xff]  ;;  %v274_v62 = vld [vmem:[%s3882_s26 + $0x730] sm:$0xff] }
  0x28   : > { %191 = vst [vmem:[%s3887_s27 + $0xa0] sm:$0xff] %v190_v20  ;;  %v276_v63 = vld [vmem:[%s3882_s26 + $0x7e0] sm:$0xff]  ;;  %v278_v0 = vld [vmem:[%s3882_s26 + $0x7e8] sm:$0xff]  ;;  %v280_v1 = vld [vmem:[%s3882_s26 + $0x7f0] sm:$0xff] }
  0x29   : > { %193 = vst [vmem:[%s3887_s27 + $0xa8] sm:$0xff] %v192_v21  ;;  %v282_v2 = vld [vmem:[%s3882_s26 + $0x7f8] sm:$0xff]  ;;  %v284_v3 = vld [vmem:[%s3882_s26 + $0x800] sm:$0xff]  ;;  %v286_v4 = vld [vmem:[%s3882_s26 + $0x808] sm:$0xff] }
  0x2a   : > { %195 = vst [vmem:[%s3887_s27 + $0xb0] sm:$0xff] %v194_v22  ;;  %v288_v5 = vld [vmem:[%s3882_s26 + $0x810] sm:$0xff]  ;;  %v290_v6 = vld [vmem:[%s3882_s26 + $0x8c0] sm:$0xff]  ;;  %v292_v7 = vld [vmem:[%s3882_s26 + $0x8c8] sm:$0xff] }
  0x2b   : > { %197 = vst [vmem:[%s3887_s27 + $0xb8] sm:$0xff] %v196_v23  ;;  %v294_v8 = vld [vmem:[%s3882_s26 + $0x8d0] sm:$0xff]  ;;  %v296_v9 = vld [vmem:[%s3882_s26 + $0x8d8] sm:$0xff]  ;;  %v298_v10 = vld [vmem:[%s3882_s26 + $0x8e0] sm:$0xff] }
  0x2c   : > { %199 = vst [vmem:[%s3887_s27 + $0xc0] sm:$0xff] %v198_v24  ;;  %v300_v11 = vld [vmem:[%s3882_s26 + $0x8e8] sm:$0xff]  ;;  %v302_v12 = vld [vmem:[%s3882_s26 + $0x8f0] sm:$0xff]  ;;  %v304_v13 = vld [vmem:[%s3882_s26 + $0x9a0] sm:$0xff] }
  0x2d   : > { %201 = vst [vmem:[%s3887_s27 + $0xc8] sm:$0xff] %v200_v25  ;;  %v306_v14 = vld [vmem:[%s3882_s26 + $0x9a8] sm:$0xff]  ;;  %v308_v15 = vld [vmem:[%s3882_s26 + $0x9b0] sm:$0xff]  ;;  %v310_v16 = vld [vmem:[%s3882_s26 + $0x9b8] sm:$0xff] }
  0x2e   : > { %203 = vst [vmem:[%s3887_s27 + $0xd0] sm:$0xff] %v202_v26  ;;  %v312_v17 = vld [vmem:[%s3882_s26 + $0x9c0] sm:$0xff]  ;;  %v314_v18 = vld [vmem:[%s3882_s26 + $0x9c8] sm:$0xff]  ;;  %v316_v19 = vld [vmem:[%s3882_s26 + $0x9d0] sm:$0xff] }
  0x2f   : > { %205 = vst [vmem:[%s3887_s27 + $0xd8] sm:$0xff] %v204_v27  ;;  %v318_v20 = vld [vmem:[%s3882_s26 + $0xa80] sm:$0xff]  ;;  %v320_v21 = vld [vmem:[%s3882_s26 + $0xa88] sm:$0xff]  ;;  %v322_v22 = vld [vmem:[%s3882_s26 + $0xa90] sm:$0xff] }
  0x30   : > { %207 = vst [vmem:[%s3887_s27 + $0xe0] sm:$0xff] %v206_v28  ;;  %v324_v23 = vld [vmem:[%s3882_s26 + $0xa98] sm:$0xff]  ;;  %v326_v24 = vld [vmem:[%s3882_s26 + $0xaa0] sm:$0xff]  ;;  %v328_v25 = vld [vmem:[%s3882_s26 + $0xaa8] sm:$0xff] }
  0x31   : > { %209 = vst [vmem:[%s3887_s27 + $0xe8] sm:$0xff] %v208_v29  ;;  %v330_v26 = vld [vmem:[%s3882_s26 + $0xab0] sm:$0xff]  ;;  %v332_v27 = vld [vmem:[%s3882_s26 + $0xb60] sm:$0xff]  ;;  %v334_v28 = vld [vmem:[%s3882_s26 + $0xb68] sm:$0xff] }
  0x32   : > { %211 = vst [vmem:[%s3887_s27 + $0xf0] sm:$0xff] %v210_v30  ;;  %v336_v29 = vld [vmem:[%s3882_s26 + $0xb70] sm:$0xff]  ;;  %v338_v30 = vld [vmem:[%s3882_s26 + $0xb78] sm:$0xff] }
  0x33   : > { %213 = vst [vmem:[%s3887_s27 + $0xf8] sm:$0xff] %v212_v31  ;;  %v340_v31 = vld [vmem:[%s3882_s26 + $0xb80] sm:$0xff] }
  0x34   : > { %215 = vst [vmem:[%s3887_s27 + $0x100] sm:$0xff] %v214_v32  ;;  %v342_v32 = vld [vmem:[%s3882_s26 + $0xb88] sm:$0xff] }
  0x35   : > { %217 = vst [vmem:[%s3887_s27 + $0x108] sm:$0xff] %v216_v33  ;;  %v344_v33 = vld [vmem:[%s3882_s26 + $0xb90] sm:$0xff] }
  0x36   : > { %219 = vst [vmem:[%s3887_s27 + $0x110] sm:$0xff] %v218_v34  ;;  %v346_v34 = vld [vmem:[%s3882_s26 + $0xc40] sm:$0xff] }
  0x37   : > { %221 = vst [vmem:[%s3887_s27 + $0x118] sm:$0xff] %v220_v35  ;;  %v348_v35 = vld [vmem:[%s3882_s26 + $0xc48] sm:$0xff] }
  0x38   : > { %223 = vst [vmem:[%s3887_s27 + $0x120] sm:$0xff] %v222_v36  ;;  %v350_v36 = vld [vmem:[%s3882_s26 + $0xc50] sm:$0xff] }
  0x39   : > { %225 = vst [vmem:[%s3887_s27 + $0x128] sm:$0xff] %v224_v37  ;;  %v352_v37 = vld [vmem:[%s3882_s26 + $0xc58] sm:$0xff] }
  0x3a   : > { %227 = vst [vmem:[%s3887_s27 + $0x130] sm:$0xff] %v226_v38  ;;  %v354_v38 = vld [vmem:[%s3882_s26 + $0xc60] sm:$0xff] }
  0x3b   : > { %229 = vst [vmem:[%s3887_s27 + $0x138] sm:$0xff] %v228_v39  ;;  %v356_v39 = vld [vmem:[%s3882_s26 + $0xc68] sm:$0xff] }
  0x3c   : > { %231 = vst [vmem:[%s3887_s27 + $0x140] sm:$0xff] %v230_v40  ;;  %v358_v40 = vld [vmem:[%s3882_s26 + $0xc70] sm:$0xff] }
  0x3d   : > { %233 = vst [vmem:[%s3887_s27 + $0x148] sm:$0xff] %v232_v41  ;;  %v360_v41 = vld [vmem:[%s3882_s26 + $0xd20] sm:$0xff] }
  0x3e   : > { %235 = vst [vmem:[%s3887_s27 + $0x150] sm:$0xff] %v234_v42  ;;  %v362_v42 = vld [vmem:[%s3882_s26 + $0xd28] sm:$0xff] }
  0x3f   : > { %237 = vst [vmem:[%s3887_s27 + $0x158] sm:$0xff] %v236_v43  ;;  %v364_v43 = vld [vmem:[%s3882_s26 + $0xd30] sm:$0xff] }
  0x40   : > { %239 = vst [vmem:[%s3887_s27 + $0x160] sm:$0xff] %v238_v44  ;;  %v366_v44 = vld [vmem:[%s3882_s26 + $0xd38] sm:$0xff] }
  0x41   : > { %241 = vst [vmem:[%s3887_s27 + $0x168] sm:$0xff] %v240_v45  ;;  %v368_v45 = vld [vmem:[%s3882_s26 + $0xd40] sm:$0xff] }
  0x42   : > { %243 = vst [vmem:[%s3887_s27 + $0x170] sm:$0xff] %v242_v46  ;;  %v370_v46 = vld [vmem:[%s3882_s26 + $0xd48] sm:$0xff] }
  0x43   : > { %245 = vst [vmem:[%s3887_s27 + $0x178] sm:$0xff] %v244_v47  ;;  %v372_v47 = vld [vmem:[%s3882_s26 + $0xd50] sm:$0xff] }
  0x44   : > { %247 = vst [vmem:[%s3887_s27 + $0x180] sm:$0xff] %v246_v48  ;;  %v374_v48 = vld [vmem:[%s3882_s26 + $0xe00] sm:$0xff] }
  0x45   : > { %249 = vst [vmem:[%s3887_s27 + $0x188] sm:$0xff] %v248_v49  ;;  %v376_v49 = vld [vmem:[%s3882_s26 + $0xe08] sm:$0xff] }
  0x46   : > { %251 = vst [vmem:[%s3887_s27 + $0x190] sm:$0xff] %v250_v50  ;;  %v378_v50 = vld [vmem:[%s3882_s26 + $0xe10] sm:$0xff] }
  0x47   : > { %253 = vst [vmem:[%s3887_s27 + $0x198] sm:$0xff] %v252_v51  ;;  %v380_v51 = vld [vmem:[%s3882_s26 + $0xe18] sm:$0xff] }
  0x48   : > { %255 = vst [vmem:[%s3887_s27 + $0x1a0] sm:$0xff] %v254_v52  ;;  %v382_v52 = vld [vmem:[%s3882_s26 + $0xe20] sm:$0xff] }
  0x49   : > { %257 = vst [vmem:[%s3887_s27 + $0x1a8] sm:$0xff] %v256_v53  ;;  %v384_v53 = vld [vmem:[%s3882_s26 + $0xe28] sm:$0xff] }
  0x4a   : > { %259 = vst [vmem:[%s3887_s27 + $0x1b0] sm:$0xff] %v258_v54  ;;  %v386_v54 = vld [vmem:[%s3882_s26 + $0xe30] sm:$0xff] }
  0x4b   : > { %261 = vst [vmem:[%s3887_s27 + $0x1b8] sm:$0xff] %v260_v55  ;;  %v388_v55 = vld [vmem:[%s3882_s26 + $0xee0] sm:$0xff] }
  0x4c   : > { %263 = vst [vmem:[%s3887_s27 + $0x1c0] sm:$0xff] %v262_v56  ;;  %v390_v56 = vld [vmem:[%s3882_s26 + $0xee8] sm:$0xff] }
  0x4d   : > { %265 = vst [vmem:[%s3887_s27 + $0x1c8] sm:$0xff] %v264_v57  ;;  %v392_v57 = vld [vmem:[%s3882_s26 + $0xef0] sm:$0xff] }
  0x4e   : > { %267 = vst [vmem:[%s3887_s27 + $0x1d0] sm:$0xff] %v266_v58  ;;  %v394_v58 = vld [vmem:[%s3882_s26 + $0xef8] sm:$0xff] }
  0x4f   : > { %269 = vst [vmem:[%s3887_s27 + $0x1d8] sm:$0xff] %v268_v59  ;;  %v396_v59 = vld [vmem:[%s3882_s26 + $0xf00] sm:$0xff] }
  0x50   : > { %271 = vst [vmem:[%s3887_s27 + $0x1e0] sm:$0xff] %v270_v60  ;;  %v398_v60 = vld [vmem:[%s3882_s26 + $0xf08] sm:$0xff] }
  0x51   : > { %273 = vst [vmem:[%s3887_s27 + $0x1e8] sm:$0xff] %v272_v61  ;;  %v400_v61 = vld [vmem:[%s3882_s26 + $0xf10] sm:$0xff] }
  0x52   : > { %275 = vst [vmem:[%s3887_s27 + $0x1f0] sm:$0xff] %v274_v62  ;;  %v402_v62 = vld [vmem:[%s3882_s26 + $0xfc0] sm:$0xff] }
  0x53   : > { %277 = vst [vmem:[%s3887_s27 + $0x1f8] sm:$0xff] %v276_v63  ;;  %v404_v63 = vld [vmem:[%s3882_s26 + $0xfc8] sm:$0xff] }
  0x54   : > { %279 = vst [vmem:[%s3887_s27 + $0x200] sm:$0xff] %v278_v0  ;;  %v406_v0 = vld [vmem:[%s3882_s26 + $0xfd0] sm:$0xff] }
  0x55   : > { %281 = vst [vmem:[%s3887_s27 + $0x208] sm:$0xff] %v280_v1  ;;  %v408_v1 = vld [vmem:[%s3882_s26 + $0xfd8] sm:$0xff] }
  0x56   : > { %283 = vst [vmem:[%s3887_s27 + $0x210] sm:$0xff] %v282_v2  ;;  %v410_v2 = vld [vmem:[%s3882_s26 + $0xfe0] sm:$0xff] }
  0x57   : > { %285 = vst [vmem:[%s3887_s27 + $0x218] sm:$0xff] %v284_v3  ;;  %v412_v3 = vld [vmem:[%s3882_s26 + $0xfe8] sm:$0xff] }
  0x58   : > { %287 = vst [vmem:[%s3887_s27 + $0x220] sm:$0xff] %v286_v4  ;;  %v414_v4 = vld [vmem:[%s3882_s26 + $0xff0] sm:$0xff] }
  0x59   : > { %289 = vst [vmem:[%s3887_s27 + $0x228] sm:$0xff] %v288_v5  ;;  %v416_v5 = vld [vmem:[%s3882_s26 + $0x10a0] sm:$0xff] }
  0x5a   : > { %291 = vst [vmem:[%s3887_s27 + $0x230] sm:$0xff] %v290_v6  ;;  %v418_v6 = vld [vmem:[%s3882_s26 + $0x10a8] sm:$0xff] }
  0x5b   : > { %293 = vst [vmem:[%s3887_s27 + $0x238] sm:$0xff] %v292_v7  ;;  %v420_v7 = vld [vmem:[%s3882_s26 + $0x10b0] sm:$0xff] }
  0x5c   : > { %295 = vst [vmem:[%s3887_s27 + $0x240] sm:$0xff] %v294_v8  ;;  %v422_v8 = vld [vmem:[%s3882_s26 + $0x10b8] sm:$0xff] }
  0x5d   : > { %297 = vst [vmem:[%s3887_s27 + $0x248] sm:$0xff] %v296_v9  ;;  %v424_v9 = vld [vmem:[%s3882_s26 + $0x10c0] sm:$0xff] }
  0x5e   : > { %299 = vst [vmem:[%s3887_s27 + $0x250] sm:$0xff] %v298_v10  ;;  %v426_v10 = vld [vmem:[%s3882_s26 + $0x10c8] sm:$0xff] }
  0x5f   : > { %301 = vst [vmem:[%s3887_s27 + $0x258] sm:$0xff] %v300_v11  ;;  %v428_v11 = vld [vmem:[%s3882_s26 + $0x10d0] sm:$0xff] }
  0x60   : > { %303 = vst [vmem:[%s3887_s27 + $0x260] sm:$0xff] %v302_v12  ;;  %v430_v12 = vld [vmem:[%s3882_s26 + $0x1180] sm:$0xff] }
  0x61   : > { %305 = vst [vmem:[%s3887_s27 + $0x268] sm:$0xff] %v304_v13  ;;  %v432_v13 = vld [vmem:[%s3882_s26 + $0x1188] sm:$0xff] }
  0x62   : > { %307 = vst [vmem:[%s3887_s27 + $0x270] sm:$0xff] %v306_v14  ;;  %v434_v14 = vld [vmem:[%s3882_s26 + $0x1190] sm:$0xff] }
  0x63   : > { %309 = vst [vmem:[%s3887_s27 + $0x278] sm:$0xff] %v308_v15  ;;  %v436_v15 = vld [vmem:[%s3882_s26 + $0x1198] sm:$0xff] }
  0x64   : > { %311 = vst [vmem:[%s3887_s27 + $0x280] sm:$0xff] %v310_v16  ;;  %v438_v16 = vld [vmem:[%s3882_s26 + $0x11a0] sm:$0xff] }
  0x65   : > { %313 = vst [vmem:[%s3887_s27 + $0x288] sm:$0xff] %v312_v17  ;;  %v440_v17 = vld [vmem:[%s3882_s26 + $0x11a8] sm:$0xff] }
  0x66   : > { %315 = vst [vmem:[%s3887_s27 + $0x290] sm:$0xff] %v314_v18  ;;  %v442_v18 = vld [vmem:[%s3882_s26 + $0x11b0] sm:$0xff] }
  0x67   : > { %317 = vst [vmem:[%s3887_s27 + $0x298] sm:$0xff] %v316_v19  ;;  %v444_v19 = vld [vmem:[%s3882_s26 + $0x1260] sm:$0xff] }
  0x68   : > { %319 = vst [vmem:[%s3887_s27 + $0x2a0] sm:$0xff] %v318_v20  ;;  %v446_v20 = vld [vmem:[%s3882_s26 + $0x1268] sm:$0xff] }
  0x69   : > { %321 = vst [vmem:[%s3887_s27 + $0x2a8] sm:$0xff] %v320_v21  ;;  %v448_v21 = vld [vmem:[%s3882_s26 + $0x1270] sm:$0xff] }
  0x6a   : > { %323 = vst [vmem:[%s3887_s27 + $0x2b0] sm:$0xff] %v322_v22  ;;  %v450_v22 = vld [vmem:[%s3882_s26 + $0x1278] sm:$0xff] }
  0x6b   : > { %325 = vst [vmem:[%s3887_s27 + $0x2b8] sm:$0xff] %v324_v23  ;;  %v452_v23 = vld [vmem:[%s3882_s26 + $0x1280] sm:$0xff] }
  0x6c   : > { %327 = vst [vmem:[%s3887_s27 + $0x2c0] sm:$0xff] %v326_v24  ;;  %v454_v24 = vld [vmem:[%s3882_s26 + $0x1288] sm:$0xff] }
  0x6d   : > { %329 = vst [vmem:[%s3887_s27 + $0x2c8] sm:$0xff] %v328_v25  ;;  %v456_v25 = vld [vmem:[%s3882_s26 + $0x1290] sm:$0xff] }
  0x6e   : > { %331 = vst [vmem:[%s3887_s27 + $0x2d0] sm:$0xff] %v330_v26  ;;  %v458_v26 = vld [vmem:[%s3882_s26 + $0x1340] sm:$0xff] }
  0x6f   : > { %333 = vst [vmem:[%s3887_s27 + $0x2d8] sm:$0xff] %v332_v27  ;;  %v460_v27 = vld [vmem:[%s3882_s26 + $0x1348] sm:$0xff] }
  0x70   : > { %335 = vst [vmem:[%s3887_s27 + $0x2e0] sm:$0xff] %v334_v28  ;;  %v462_v28 = vld [vmem:[%s3882_s26 + $0x1350] sm:$0xff] }
  0x71   : > { %337 = vst [vmem:[%s3887_s27 + $0x2e8] sm:$0xff] %v336_v29  ;;  %v464_v29 = vld [vmem:[%s3882_s26 + $0x1358] sm:$0xff] }
  0x72   : > { %339 = vst [vmem:[%s3887_s27 + $0x2f0] sm:$0xff] %v338_v30  ;;  %v466_v30 = vld [vmem:[%s3882_s26 + $0x1360] sm:$0xff] }
  0x73   : > { %341 = vst [vmem:[%s3887_s27 + $0x2f8] sm:$0xff] %v340_v31  ;;  %v468_v31 = vld [vmem:[%s3882_s26 + $0x1368] sm:$0xff] }
  0x74   : > { %343 = vst [vmem:[%s3887_s27 + $0x300] sm:$0xff] %v342_v32  ;;  %v470_v32 = vld [vmem:[%s3882_s26 + $0x1370] sm:$0xff] }
  0x75   : > { %345 = vst [vmem:[%s3887_s27 + $0x308] sm:$0xff] %v344_v33  ;;  %v472_v33 = vld [vmem:[%s3882_s26 + $0x1420] sm:$0xff] }
  0x76   : > { %347 = vst [vmem:[%s3887_s27 + $0x310] sm:$0xff] %v346_v34  ;;  %v474_v34 = vld [vmem:[%s3882_s26 + $0x1428] sm:$0xff] }
  0x77   : > { %349 = vst [vmem:[%s3887_s27 + $0x318] sm:$0xff] %v348_v35  ;;  %v476_v35 = vld [vmem:[%s3882_s26 + $0x1430] sm:$0xff] }
  0x78   : > { %351 = vst [vmem:[%s3887_s27 + $0x320] sm:$0xff] %v350_v36  ;;  %v478_v36 = vld [vmem:[%s3882_s26 + $0x1438] sm:$0xff] }
  0x79   : > { %353 = vst [vmem:[%s3887_s27 + $0x328] sm:$0xff] %v352_v37  ;;  %v480_v37 = vld [vmem:[%s3882_s26 + $0x1440] sm:$0xff] }
  0x7a   : > { %355 = vst [vmem:[%s3887_s27 + $0x330] sm:$0xff] %v354_v38  ;;  %v482_v38 = vld [vmem:[%s3882_s26 + $0x1448] sm:$0xff] }
  0x7b   : > { %357 = vst [vmem:[%s3887_s27 + $0x338] sm:$0xff] %v356_v39  ;;  %v484_v39 = vld [vmem:[%s3882_s26 + $0x1450] sm:$0xff] }
  0x7c   : > { %359 = vst [vmem:[%s3887_s27 + $0x340] sm:$0xff] %v358_v40  ;;  %v486_v40 = vld [vmem:[%s3882_s26 + $0x1500] sm:$0xff] }
  0x7d   : > { %361 = vst [vmem:[%s3887_s27 + $0x348] sm:$0xff] %v360_v41  ;;  %v488_v41 = vld [vmem:[%s3882_s26 + $0x1508] sm:$0xff] }
  0x7e   : > { %363 = vst [vmem:[%s3887_s27 + $0x350] sm:$0xff] %v362_v42  ;;  %v490_v42 = vld [vmem:[%s3882_s26 + $0x1510] sm:$0xff] }
  0x7f   : > { %365 = vst [vmem:[%s3887_s27 + $0x358] sm:$0xff] %v364_v43  ;;  %v492_v43 = vld [vmem:[%s3882_s26 + $0x1518] sm:$0xff] }
  0x80   : > { %367 = vst [vmem:[%s3887_s27 + $0x360] sm:$0xff] %v366_v44  ;;  %v494_v44 = vld [vmem:[%s3882_s26 + $0x1520] sm:$0xff] }
  0x81   : > { %369 = vst [vmem:[%s3887_s27 + $0x368] sm:$0xff] %v368_v45  ;;  %v496_v45 = vld [vmem:[%s3882_s26 + $0x1528] sm:$0xff] }
  0x82   : > { %371 = vst [vmem:[%s3887_s27 + $0x370] sm:$0xff] %v370_v46  ;;  %v498_v46 = vld [vmem:[%s3882_s26 + $0x1530] sm:$0xff] }
  0x83   : > { %373 = vst [vmem:[%s3887_s27 + $0x378] sm:$0xff] %v372_v47  ;;  %v500_v47 = vld [vmem:[%s3882_s26 + $0x15e0] sm:$0xff] }
  0x84   : > { %375 = vst [vmem:[%s3887_s27 + $0x380] sm:$0xff] %v374_v48  ;;  %v502_v48 = vld [vmem:[%s3882_s26 + $0x15e8] sm:$0xff] }
  0x85   : > { %377 = vst [vmem:[%s3887_s27 + $0x388] sm:$0xff] %v376_v49  ;;  %v504_v49 = vld [vmem:[%s3882_s26 + $0x15f0] sm:$0xff] }
  0x86   : > { %379 = vst [vmem:[%s3887_s27 + $0x390] sm:$0xff] %v378_v50  ;;  %v506_v50 = vld [vmem:[%s3882_s26 + $0x15f8] sm:$0xff] }
  0x87   : > { %381 = vst [vmem:[%s3887_s27 + $0x398] sm:$0xff] %v380_v51  ;;  %v508_v51 = vld [vmem:[%s3882_s26 + $0x1600] sm:$0xff] }
  0x88   : > { %383 = vst [vmem:[%s3887_s27 + $0x3a0] sm:$0xff] %v382_v52  ;;  %v510_v52 = vld [vmem:[%s3882_s26 + $0x1608] sm:$0xff] }
  0x89   : > { %385 = vst [vmem:[%s3887_s27 + $0x3a8] sm:$0xff] %v384_v53  ;;  %v512_v53 = vld [vmem:[%s3882_s26 + $0x1610] sm:$0xff] }
  0x8a   : > { %387 = vst [vmem:[%s3887_s27 + $0x3b0] sm:$0xff] %v386_v54  ;;  %v514_v54 = vld [vmem:[%s3882_s26 + $0x16c0] sm:$0xff] }
  0x8b   : > { %389 = vst [vmem:[%s3887_s27 + $0x3b8] sm:$0xff] %v388_v55  ;;  %v516_v55 = vld [vmem:[%s3882_s26 + $0x16c8] sm:$0xff] }
  0x8c   : > { %391 = vst [vmem:[%s3887_s27 + $0x3c0] sm:$0xff] %v390_v56  ;;  %v518_v56 = vld [vmem:[%s3882_s26 + $0x16d0] sm:$0xff] }
  0x8d   : > { %393 = vst [vmem:[%s3887_s27 + $0x3c8] sm:$0xff] %v392_v57  ;;  %v520_v57 = vld [vmem:[%s3882_s26 + $0x16d8] sm:$0xff] }
  0x8e   : > { %395 = vst [vmem:[%s3887_s27 + $0x3d0] sm:$0xff] %v394_v58  ;;  %v522_v58 = vld [vmem:[%s3882_s26 + $0x16e0] sm:$0xff] }
  0x8f   : > { %397 = vst [vmem:[%s3887_s27 + $0x3d8] sm:$0xff] %v396_v59  ;;  %v524_v59 = vld [vmem:[%s3882_s26 + $0x16e8] sm:$0xff] }
  0x90   : > { %399 = vst [vmem:[%s3887_s27 + $0x3e0] sm:$0xff] %v398_v60  ;;  %v526_v60 = vld [vmem:[%s3882_s26 + $0x16f0] sm:$0xff] }
  0x91   : > { %401 = vst [vmem:[%s3887_s27 + $0x3e8] sm:$0xff] %v400_v61  ;;  %v528_v61 = vld [vmem:[%s3882_s26 + $0x17a0] sm:$0xff] }
  0x92   : > { %403 = vst [vmem:[%s3887_s27 + $0x3f0] sm:$0xff] %v402_v62  ;;  %v530_v62 = vld [vmem:[%s3882_s26 + $0x17a8] sm:$0xff] }
  0x93   : > { %405 = vst [vmem:[%s3887_s27 + $0x3f8] sm:$0xff] %v404_v63  ;;  %v532_v63 = vld [vmem:[%s3882_s26 + $0x17b0] sm:$0xff] }
  0x94   : > { %407 = vst [vmem:[%s3887_s27 + $0x400] sm:$0xff] %v406_v0  ;;  %v534_v0 = vld [vmem:[%s3882_s26 + $0x17b8] sm:$0xff] }
  0x95   : > { %409 = vst [vmem:[%s3887_s27 + $0x408] sm:$0xff] %v408_v1  ;;  %v536_v1 = vld [vmem:[%s3882_s26 + $0x17c0] sm:$0xff] }
  0x96   : > { %411 = vst [vmem:[%s3887_s27 + $0x410] sm:$0xff] %v410_v2  ;;  %v538_v2 = vld [vmem:[%s3882_s26 + $0x17c8] sm:$0xff] }
  0x97   : > { %413 = vst [vmem:[%s3887_s27 + $0x418] sm:$0xff] %v412_v3  ;;  %v540_v3 = vld [vmem:[%s3882_s26 + $0x17d0] sm:$0xff] }
  0x98   : > { %415 = vst [vmem:[%s3887_s27 + $0x420] sm:$0xff] %v414_v4  ;;  %v542_v4 = vld [vmem:[%s3882_s26 + $0x1880] sm:$0xff] }
  0x99   : > { %417 = vst [vmem:[%s3887_s27 + $0x428] sm:$0xff] %v416_v5  ;;  %v544_v5 = vld [vmem:[%s3882_s26 + $0x1888] sm:$0xff] }
  0x9a   : > { %419 = vst [vmem:[%s3887_s27 + $0x430] sm:$0xff] %v418_v6  ;;  %v546_v6 = vld [vmem:[%s3882_s26 + $0x1890] sm:$0xff] }
  0x9b   : > { %421 = vst [vmem:[%s3887_s27 + $0x438] sm:$0xff] %v420_v7  ;;  %v548_v7 = vld [vmem:[%s3882_s26 + $0x1898] sm:$0xff] }
  0x9c   : > { %423 = vst [vmem:[%s3887_s27 + $0x440] sm:$0xff] %v422_v8  ;;  %v550_v8 = vld [vmem:[%s3882_s26 + $0x18a0] sm:$0xff] }
  0x9d   : > { %425 = vst [vmem:[%s3887_s27 + $0x448] sm:$0xff] %v424_v9  ;;  %v552_v9 = vld [vmem:[%s3882_s26 + $0x18a8] sm:$0xff] }
  0x9e   : > { %427 = vst [vmem:[%s3887_s27 + $0x450] sm:$0xff] %v426_v10  ;;  %v554_v10 = vld [vmem:[%s3882_s26 + $0x18b0] sm:$0xff] }
  0x9f   : > { %429 = vst [vmem:[%s3887_s27 + $0x458] sm:$0xff] %v428_v11  ;;  %v556_v11 = vld [vmem:[%s3882_s26 + $0x1960] sm:$0xff] }
  0xa0   : > { %431 = vst [vmem:[%s3887_s27 + $0x460] sm:$0xff] %v430_v12  ;;  %v558_v12 = vld [vmem:[%s3882_s26 + $0x1968] sm:$0xff] }
  0xa1   : > { %433 = vst [vmem:[%s3887_s27 + $0x468] sm:$0xff] %v432_v13  ;;  %v560_v13 = vld [vmem:[%s3882_s26 + $0x1970] sm:$0xff] }
  0xa2   : > { %435 = vst [vmem:[%s3887_s27 + $0x470] sm:$0xff] %v434_v14  ;;  %v562_v14 = vld [vmem:[%s3882_s26 + $0x1978] sm:$0xff] }
  0xa3   : > { %437 = vst [vmem:[%s3887_s27 + $0x478] sm:$0xff] %v436_v15  ;;  %v564_v15 = vld [vmem:[%s3882_s26 + $0x1980] sm:$0xff] }
  0xa4   : > { %439 = vst [vmem:[%s3887_s27 + $0x480] sm:$0xff] %v438_v16  ;;  %v566_v16 = vld [vmem:[%s3882_s26 + $0x1988] sm:$0xff] }
  0xa5   : > { %441 = vst [vmem:[%s3887_s27 + $0x488] sm:$0xff] %v440_v17  ;;  %v568_v17 = vld [vmem:[%s3882_s26 + $0x1990] sm:$0xff] }
  0xa6   : > { %443 = vst [vmem:[%s3887_s27 + $0x490] sm:$0xff] %v442_v18  ;;  %v570_v18 = vld [vmem:[%s3882_s26 + $0x1a40] sm:$0xff] }
  0xa7   : > { %445 = vst [vmem:[%s3887_s27 + $0x498] sm:$0xff] %v444_v19  ;;  %v572_v19 = vld [vmem:[%s3882_s26 + $0x1a48] sm:$0xff] }
  0xa8   : > { %447 = vst [vmem:[%s3887_s27 + $0x4a0] sm:$0xff] %v446_v20  ;;  %v574_v20 = vld [vmem:[%s3882_s26 + $0x1a50] sm:$0xff] }
  0xa9   : > { %449 = vst [vmem:[%s3887_s27 + $0x4a8] sm:$0xff] %v448_v21  ;;  %v576_v21 = vld [vmem:[%s3882_s26 + $0x1a58] sm:$0xff] }
  0xaa   : > { %451 = vst [vmem:[%s3887_s27 + $0x4b0] sm:$0xff] %v450_v22  ;;  %v578_v22 = vld [vmem:[%s3882_s26 + $0x1a60] sm:$0xff] }
  0xab   : > { %453 = vst [vmem:[%s3887_s27 + $0x4b8] sm:$0xff] %v452_v23  ;;  %v580_v23 = vld [vmem:[%s3882_s26 + $0x1a68] sm:$0xff] }
  0xac   : > { %455 = vst [vmem:[%s3887_s27 + $0x4c0] sm:$0xff] %v454_v24  ;;  %v582_v24 = vld [vmem:[%s3882_s26 + $0x1a70] sm:$0xff] }
  0xad   : > { %457 = vst [vmem:[%s3887_s27 + $0x4c8] sm:$0xff] %v456_v25  ;;  %v584_v25 = vld [vmem:[%s3882_s26 + $0x1b20] sm:$0xff] }
  0xae   : > { %459 = vst [vmem:[%s3887_s27 + $0x4d0] sm:$0xff] %v458_v26  ;;  %v586_v26 = vld [vmem:[%s3882_s26 + $0x1b28] sm:$0xff] }
  0xaf   : > { %461 = vst [vmem:[%s3887_s27 + $0x4d8] sm:$0xff] %v460_v27  ;;  %v588_v27 = vld [vmem:[%s3882_s26 + $0x1b30] sm:$0xff] }
  0xb0   : > { %463 = vst [vmem:[%s3887_s27 + $0x4e0] sm:$0xff] %v462_v28  ;;  %v590_v28 = vld [vmem:[%s3882_s26 + $0x1b38] sm:$0xff] }
  0xb1   : > { %465 = vst [vmem:[%s3887_s27 + $0x4e8] sm:$0xff] %v464_v29  ;;  %v592_v29 = vld [vmem:[%s3882_s26 + $0x1b40] sm:$0xff] }
  0xb2   : > { %467 = vst [vmem:[%s3887_s27 + $0x4f0] sm:$0xff] %v466_v30  ;;  %v594_v30 = vld [vmem:[%s3882_s26 + $0x1b48] sm:$0xff] }
  0xb3   : > { %469 = vst [vmem:[%s3887_s27 + $0x4f8] sm:$0xff] %v468_v31  ;;  %v596_v31 = vld [vmem:[%s3882_s26 + $0x1b50] sm:$0xff] }
  0xb4   : > { %471 = vst [vmem:[%s3887_s27 + $0x500] sm:$0xff] %v470_v32  ;;  %v598_v32 = vld [vmem:[%s3882_s26 + $0x1c00] sm:$0xff] }
  0xb5   : > { %473 = vst [vmem:[%s3887_s27 + $0x508] sm:$0xff] %v472_v33  ;;  %v600_v33 = vld [vmem:[%s3882_s26 + $0x1c08] sm:$0xff] }
  0xb6   : > { %475 = vst [vmem:[%s3887_s27 + $0x510] sm:$0xff] %v474_v34  ;;  %v602_v34 = vld [vmem:[%s3882_s26 + $0x1c10] sm:$0xff] }
  0xb7   : > { %477 = vst [vmem:[%s3887_s27 + $0x518] sm:$0xff] %v476_v35  ;;  %v604_v35 = vld [vmem:[%s3882_s26 + $0x1c18] sm:$0xff] }
  0xb8   : > { %479 = vst [vmem:[%s3887_s27 + $0x520] sm:$0xff] %v478_v36  ;;  %v606_v36 = vld [vmem:[%s3882_s26 + $0x1c20] sm:$0xff] }
  0xb9   : > { %481 = vst [vmem:[%s3887_s27 + $0x528] sm:$0xff] %v480_v37  ;;  %v608_v37 = vld [vmem:[%s3882_s26 + $0x1c28] sm:$0xff] }
  0xba   : > { %483 = vst [vmem:[%s3887_s27 + $0x530] sm:$0xff] %v482_v38  ;;  %v610_v38 = vld [vmem:[%s3882_s26 + $0x1c30] sm:$0xff] }
  0xbb   : > { %485 = vst [vmem:[%s3887_s27 + $0x538] sm:$0xff] %v484_v39  ;;  %v612_v39 = vld [vmem:[%s3882_s26 + $0x1ce0] sm:$0xff] }
  0xbc   : > { %487 = vst [vmem:[%s3887_s27 + $0x540] sm:$0xff] %v486_v40  ;;  %v614_v40 = vld [vmem:[%s3882_s26 + $0x1ce8] sm:$0xff] }
  0xbd   : > { %489 = vst [vmem:[%s3887_s27 + $0x548] sm:$0xff] %v488_v41  ;;  %v616_v41 = vld [vmem:[%s3882_s26 + $0x1cf0] sm:$0xff] }
  0xbe   : > { %491 = vst [vmem:[%s3887_s27 + $0x550] sm:$0xff] %v490_v42  ;;  %v618_v42 = vld [vmem:[%s3882_s26 + $0x1cf8] sm:$0xff] }
  0xbf   : > { %493 = vst [vmem:[%s3887_s27 + $0x558] sm:$0xff] %v492_v43  ;;  %v620_v43 = vld [vmem:[%s3882_s26 + $0x1d00] sm:$0xff] }
  0xc0   : > { %495 = vst [vmem:[%s3887_s27 + $0x560] sm:$0xff] %v494_v44  ;;  %v622_v44 = vld [vmem:[%s3882_s26 + $0x1d08] sm:$0xff] }
  0xc1   : > { %497 = vst [vmem:[%s3887_s27 + $0x568] sm:$0xff] %v496_v45  ;;  %v624_v45 = vld [vmem:[%s3882_s26 + $0x1d10] sm:$0xff] }
  0xc2   : > { %499 = vst [vmem:[%s3887_s27 + $0x570] sm:$0xff] %v498_v46  ;;  %v626_v46 = vld [vmem:[%s3882_s26 + $0x1dc0] sm:$0xff] }
  0xc3   : > { %501 = vst [vmem:[%s3887_s27 + $0x578] sm:$0xff] %v500_v47  ;;  %v628_v47 = vld [vmem:[%s3882_s26 + $0x1dc8] sm:$0xff] }
  0xc4   : > { %503 = vst [vmem:[%s3887_s27 + $0x580] sm:$0xff] %v502_v48  ;;  %v630_v48 = vld [vmem:[%s3882_s26 + $0x1dd0] sm:$0xff] }
  0xc5   : > { %505 = vst [vmem:[%s3887_s27 + $0x588] sm:$0xff] %v504_v49  ;;  %v632_v49 = vld [vmem:[%s3882_s26 + $0x1dd8] sm:$0xff] }
  0xc6   : > { %507 = vst [vmem:[%s3887_s27 + $0x590] sm:$0xff] %v506_v50  ;;  %v634_v50 = vld [vmem:[%s3882_s26 + $0x1de0] sm:$0xff] }
  0xc7   : > { %509 = vst [vmem:[%s3887_s27 + $0x598] sm:$0xff] %v508_v51  ;;  %v636_v51 = vld [vmem:[%s3882_s26 + $0x1de8] sm:$0xff] }
  0xc8   : > { %511 = vst [vmem:[%s3887_s27 + $0x5a0] sm:$0xff] %v510_v52  ;;  %v638_v52 = vld [vmem:[%s3882_s26 + $0x1df0] sm:$0xff] }
  0xc9   : > { %513 = vst [vmem:[%s3887_s27 + $0x5a8] sm:$0xff] %v512_v53  ;;  %v640_v53 = vld [vmem:[%s3882_s26 + $0x1ea0] sm:$0xff] }
  0xca   : > { %515 = vst [vmem:[%s3887_s27 + $0x5b0] sm:$0xff] %v514_v54  ;;  %v642_v54 = vld [vmem:[%s3882_s26 + $0x1ea8] sm:$0xff] }
  0xcb   : > { %517 = vst [vmem:[%s3887_s27 + $0x5b8] sm:$0xff] %v516_v55  ;;  %v644_v55 = vld [vmem:[%s3882_s26 + $0x1eb0] sm:$0xff] }
  0xcc   : > { %519 = vst [vmem:[%s3887_s27 + $0x5c0] sm:$0xff] %v518_v56  ;;  %v646_v56 = vld [vmem:[%s3882_s26 + $0x1eb8] sm:$0xff] }
  0xcd   : > { %521 = vst [vmem:[%s3887_s27 + $0x5c8] sm:$0xff] %v520_v57  ;;  %v648_v57 = vld [vmem:[%s3882_s26 + $0x1ec0] sm:$0xff] }
  0xce   : > { %523 = vst [vmem:[%s3887_s27 + $0x5d0] sm:$0xff] %v522_v58  ;;  %v650_v58 = vld [vmem:[%s3882_s26 + $0x1ec8] sm:$0xff] }
  0xcf   : > { %525 = vst [vmem:[%s3887_s27 + $0x5d8] sm:$0xff] %v524_v59  ;;  %v652_v59 = vld [vmem:[%s3882_s26 + $0x1ed0] sm:$0xff] }
  0xd0   : > { %527 = vst [vmem:[%s3887_s27 + $0x5e0] sm:$0xff] %v526_v60  ;;  %v654_v60 = vld [vmem:[%s3882_s26 + $0x1f80] sm:$0xff] }
  0xd1   : > { %529 = vst [vmem:[%s3887_s27 + $0x5e8] sm:$0xff] %v528_v61  ;;  %v656_v61 = vld [vmem:[%s3882_s26 + $0x1f88] sm:$0xff] }
  0xd2   : > { %531 = vst [vmem:[%s3887_s27 + $0x5f0] sm:$0xff] %v530_v62  ;;  %v658_v62 = vld [vmem:[%s3882_s26 + $0x1f90] sm:$0xff] }
  0xd3   : > { %533 = vst [vmem:[%s3887_s27 + $0x5f8] sm:$0xff] %v532_v63  ;;  %v660_v63 = vld [vmem:[%s3882_s26 + $0x1f98] sm:$0xff] }
  0xd4   : > { %535 = vst [vmem:[%s3887_s27 + $0x600] sm:$0xff] %v534_v0  ;;  %v662_v0 = vld [vmem:[%s3882_s26 + $0x1fa0] sm:$0xff] }
  0xd5   : > { %537 = vst [vmem:[%s3887_s27 + $0x608] sm:$0xff] %v536_v1  ;;  %v664_v1 = vld [vmem:[%s3882_s26 + $0x1fa8] sm:$0xff] }
  0xd6   : > { %539 = vst [vmem:[%s3887_s27 + $0x610] sm:$0xff] %v538_v2  ;;  %v666_v2 = vld [vmem:[%s3882_s26 + $0x1fb0] sm:$0xff] }
  0xd7   : > { %541 = vst [vmem:[%s3887_s27 + $0x618] sm:$0xff] %v540_v3  ;;  %v668_v3 = vld [vmem:[%s3882_s26 + $0x2060] sm:$0xff] }
  0xd8   : > { %543 = vst [vmem:[%s3887_s27 + $0x620] sm:$0xff] %v542_v4  ;;  %v670_v4 = vld [vmem:[%s3882_s26 + $0x2068] sm:$0xff] }
  0xd9   : > { %545 = vst [vmem:[%s3887_s27 + $0x628] sm:$0xff] %v544_v5  ;;  %v672_v5 = vld [vmem:[%s3882_s26 + $0x2070] sm:$0xff] }
  0xda   : > { %547 = vst [vmem:[%s3887_s27 + $0x630] sm:$0xff] %v546_v6  ;;  %v674_v6 = vld [vmem:[%s3882_s26 + $0x2078] sm:$0xff] }
  0xdb   : > { %549 = vst [vmem:[%s3887_s27 + $0x638] sm:$0xff] %v548_v7  ;;  %v676_v7 = vld [vmem:[%s3882_s26 + $0x2080] sm:$0xff] }
  0xdc   : > { %551 = vst [vmem:[%s3887_s27 + $0x640] sm:$0xff] %v550_v8  ;;  %v678_v8 = vld [vmem:[%s3882_s26 + $0x2088] sm:$0xff] }
  0xdd   : > { %553 = vst [vmem:[%s3887_s27 + $0x648] sm:$0xff] %v552_v9  ;;  %v680_v9 = vld [vmem:[%s3882_s26 + $0x2090] sm:$0xff] }
  0xde   : > { %555 = vst [vmem:[%s3887_s27 + $0x650] sm:$0xff] %v554_v10  ;;  %v682_v10 = vld [vmem:[%s3882_s26 + $0x2140] sm:$0xff] }
  0xdf   : > { %557 = vst [vmem:[%s3887_s27 + $0x658] sm:$0xff] %v556_v11  ;;  %v684_v11 = vld [vmem:[%s3882_s26 + $0x2148] sm:$0xff] }
  0xe0   : > { %559 = vst [vmem:[%s3887_s27 + $0x660] sm:$0xff] %v558_v12  ;;  %v686_v12 = vld [vmem:[%s3882_s26 + $0x2150] sm:$0xff] }
  0xe1   : > { %561 = vst [vmem:[%s3887_s27 + $0x668] sm:$0xff] %v560_v13  ;;  %v688_v13 = vld [vmem:[%s3882_s26 + $0x2158] sm:$0xff] }
  0xe2   : > { %563 = vst [vmem:[%s3887_s27 + $0x670] sm:$0xff] %v562_v14  ;;  %v690_v14 = vld [vmem:[%s3882_s26 + $0x2160] sm:$0xff] }
  0xe3   : > { %565 = vst [vmem:[%s3887_s27 + $0x678] sm:$0xff] %v564_v15  ;;  %v692_v15 = vld [vmem:[%s3882_s26 + $0x2168] sm:$0xff] }
  0xe4   : > { %567 = vst [vmem:[%s3887_s27 + $0x680] sm:$0xff] %v566_v16  ;;  %v694_v16 = vld [vmem:[%s3882_s26 + $0x2170] sm:$0xff] }
  0xe5   : > { %569 = vst [vmem:[%s3887_s27 + $0x688] sm:$0xff] %v568_v17  ;;  %v696_v17 = vld [vmem:[%s3882_s26 + $0x2220] sm:$0xff] }
  0xe6   : > { %571 = vst [vmem:[%s3887_s27 + $0x690] sm:$0xff] %v570_v18  ;;  %v698_v18 = vld [vmem:[%s3882_s26 + $0x2228] sm:$0xff] }
  0xe7   : > { %573 = vst [vmem:[%s3887_s27 + $0x698] sm:$0xff] %v572_v19  ;;  %v700_v19 = vld [vmem:[%s3882_s26 + $0x2230] sm:$0xff] }
  0xe8   : > { %575 = vst [vmem:[%s3887_s27 + $0x6a0] sm:$0xff] %v574_v20  ;;  %v702_v20 = vld [vmem:[%s3882_s26 + $0x2238] sm:$0xff] }
  0xe9   : > { %577 = vst [vmem:[%s3887_s27 + $0x6a8] sm:$0xff] %v576_v21  ;;  %v704_v21 = vld [vmem:[%s3882_s26 + $0x2240] sm:$0xff] }
  0xea   : > { %579 = vst [vmem:[%s3887_s27 + $0x6b0] sm:$0xff] %v578_v22  ;;  %v706_v22 = vld [vmem:[%s3882_s26 + $0x2248] sm:$0xff] }
  0xeb   : > { %581 = vst [vmem:[%s3887_s27 + $0x6b8] sm:$0xff] %v580_v23  ;;  %v708_v23 = vld [vmem:[%s3882_s26 + $0x2250] sm:$0xff] }
  0xec   : > { %583 = vst [vmem:[%s3887_s27 + $0x6c0] sm:$0xff] %v582_v24  ;;  %v710_v24 = vld [vmem:[%s3882_s26 + $0x2300] sm:$0xff] }
  0xed   : > { %585 = vst [vmem:[%s3887_s27 + $0x6c8] sm:$0xff] %v584_v25  ;;  %v712_v25 = vld [vmem:[%s3882_s26 + $0x2308] sm:$0xff] }
  0xee   : > { %587 = vst [vmem:[%s3887_s27 + $0x6d0] sm:$0xff] %v586_v26  ;;  %v714_v26 = vld [vmem:[%s3882_s26 + $0x2310] sm:$0xff] }
  0xef   : > { %589 = vst [vmem:[%s3887_s27 + $0x6d8] sm:$0xff] %v588_v27  ;;  %v716_v27 = vld [vmem:[%s3882_s26 + $0x2318] sm:$0xff] }
  0xf0   : > { %591 = vst [vmem:[%s3887_s27 + $0x6e0] sm:$0xff] %v590_v28  ;;  %v718_v28 = vld [vmem:[%s3882_s26 + $0x2320] sm:$0xff] }
  0xf1   : > { %593 = vst [vmem:[%s3887_s27 + $0x6e8] sm:$0xff] %v592_v29  ;;  %v720_v29 = vld [vmem:[%s3882_s26 + $0x2328] sm:$0xff] }
  0xf2   : > { %595 = vst [vmem:[%s3887_s27 + $0x6f0] sm:$0xff] %v594_v30  ;;  %v722_v30 = vld [vmem:[%s3882_s26 + $0x2330] sm:$0xff] }
  0xf3   : > { %597 = vst [vmem:[%s3887_s27 + $0x6f8] sm:$0xff] %v596_v31  ;;  %v724_v31 = vld [vmem:[%s3882_s26 + $0x23e0] sm:$0xff] }
  0xf4   : > { %599 = vst [vmem:[%s3887_s27 + $0x700] sm:$0xff] %v598_v32  ;;  %v726_v32 = vld [vmem:[%s3882_s26 + $0x23e8] sm:$0xff] }
  0xf5   : > { %601 = vst [vmem:[%s3887_s27 + $0x708] sm:$0xff] %v600_v33  ;;  %v728_v33 = vld [vmem:[%s3882_s26 + $0x23f0] sm:$0xff] }
  0xf6   : > { %603 = vst [vmem:[%s3887_s27 + $0x710] sm:$0xff] %v602_v34  ;;  %v730_v34 = vld [vmem:[%s3882_s26 + $0x23f8] sm:$0xff] }
  0xf7   : > { %605 = vst [vmem:[%s3887_s27 + $0x718] sm:$0xff] %v604_v35  ;;  %v732_v35 = vld [vmem:[%s3882_s26 + $0x2400] sm:$0xff] }
  0xf8   : > { %607 = vst [vmem:[%s3887_s27 + $0x720] sm:$0xff] %v606_v36  ;;  %v734_v36 = vld [vmem:[%s3882_s26 + $0x2408] sm:$0xff] }
  0xf9   : > { %609 = vst [vmem:[%s3887_s27 + $0x728] sm:$0xff] %v608_v37  ;;  %v736_v37 = vld [vmem:[%s3882_s26 + $0x2410] sm:$0xff] }
  0xfa   : > { %611 = vst [vmem:[%s3887_s27 + $0x730] sm:$0xff] %v610_v38  ;;  %v738_v38 = vld [vmem:[%s3882_s26 + $0x24c0] sm:$0xff] }
  0xfb   : > { %613 = vst [vmem:[%s3887_s27 + $0x738] sm:$0xff] %v612_v39  ;;  %v740_v39 = vld [vmem:[%s3882_s26 + $0x24c8] sm:$0xff] }
  0xfc   : > { %615 = vst [vmem:[%s3887_s27 + $0x740] sm:$0xff] %v614_v40  ;;  %v742_v40 = vld [vmem:[%s3882_s26 + $0x24d0] sm:$0xff] }
  0xfd   : > { %617 = vst [vmem:[%s3887_s27 + $0x748] sm:$0xff] %v616_v41  ;;  %v744_v41 = vld [vmem:[%s3882_s26 + $0x24d8] sm:$0xff] }
  0xfe   : > { %619 = vst [vmem:[%s3887_s27 + $0x750] sm:$0xff] %v618_v42  ;;  %v746_v42 = vld [vmem:[%s3882_s26 + $0x24e0] sm:$0xff] }
  0xff   : > { %621 = vst [vmem:[%s3887_s27 + $0x758] sm:$0xff] %v620_v43  ;;  %v748_v43 = vld [vmem:[%s3882_s26 + $0x24e8] sm:$0xff] }
 0x100   : > { %623 = vst [vmem:[%s3887_s27 + $0x760] sm:$0xff] %v622_v44  ;;  %v750_v44 = vld [vmem:[%s3882_s26 + $0x24f0] sm:$0xff] }
 0x101   : > { %625 = vst [vmem:[%s3887_s27 + $0x768] sm:$0xff] %v624_v45  ;;  %v752_v45 = vld [vmem:[%s3882_s26 + $0x25a0] sm:$0xff] }
 0x102   : > { %627 = vst [vmem:[%s3887_s27 + $0x770] sm:$0xff] %v626_v46  ;;  %v754_v46 = vld [vmem:[%s3882_s26 + $0x25a8] sm:$0xff] }
 0x103   : > { %629 = vst [vmem:[%s3887_s27 + $0x778] sm:$0xff] %v628_v47  ;;  %v756_v47 = vld [vmem:[%s3882_s26 + $0x25b0] sm:$0xff] }
 0x104   : > { %631 = vst [vmem:[%s3887_s27 + $0x780] sm:$0xff] %v630_v48  ;;  %v758_v48 = vld [vmem:[%s3882_s26 + $0x25b8] sm:$0xff] }
 0x105   : > { %633 = vst [vmem:[%s3887_s27 + $0x788] sm:$0xff] %v632_v49  ;;  %v760_v49 = vld [vmem:[%s3882_s26 + $0x25c0] sm:$0xff] }
 0x106   : > { %635 = vst [vmem:[%s3887_s27 + $0x790] sm:$0xff] %v634_v50  ;;  %v762_v50 = vld [vmem:[%s3882_s26 + $0x25c8] sm:$0xff] }
 0x107   : > { %637 = vst [vmem:[%s3887_s27 + $0x798] sm:$0xff] %v636_v51  ;;  %v764_v51 = vld [vmem:[%s3882_s26 + $0x25d0] sm:$0xff] }
 0x108   : > { %639 = vst [vmem:[%s3887_s27 + $0x7a0] sm:$0xff] %v638_v52  ;;  %v766_v52 = vld [vmem:[%s3882_s26 + $0x2680] sm:$0xff] }
 0x109   : > { %641 = vst [vmem:[%s3887_s27 + $0x7a8] sm:$0xff] %v640_v53  ;;  %v768_v53 = vld [vmem:[%s3882_s26 + $0x2688] sm:$0xff] }
 0x10a   : > { %643 = vst [vmem:[%s3887_s27 + $0x7b0] sm:$0xff] %v642_v54  ;;  %v770_v54 = vld [vmem:[%s3882_s26 + $0x2690] sm:$0xff] }
 0x10b   : > { %645 = vst [vmem:[%s3887_s27 + $0x7b8] sm:$0xff] %v644_v55  ;;  %v772_v55 = vld [vmem:[%s3882_s26 + $0x2698] sm:$0xff] }
 0x10c   : > { %647 = vst [vmem:[%s3887_s27 + $0x7c0] sm:$0xff] %v646_v56  ;;  %v774_v56 = vld [vmem:[%s3882_s26 + $0x26a0] sm:$0xff] }
 0x10d   : > { %649 = vst [vmem:[%s3887_s27 + $0x7c8] sm:$0xff] %v648_v57  ;;  %v776_v57 = vld [vmem:[%s3882_s26 + $0x26a8] sm:$0xff] }
 0x10e   : > { %651 = vst [vmem:[%s3887_s27 + $0x7d0] sm:$0xff] %v650_v58  ;;  %v778_v58 = vld [vmem:[%s3882_s26 + $0x26b0] sm:$0xff] }
 0x10f   : > { %653 = vst [vmem:[%s3887_s27 + $0x7d8] sm:$0xff] %v652_v59  ;;  %v780_v59 = vld [vmem:[%s3882_s26 + $0x2760] sm:$0xff] }
 0x110   : > { %655 = vst [vmem:[%s3887_s27 + $0x7e0] sm:$0xff] %v654_v60  ;;  %v782_v60 = vld [vmem:[%s3882_s26 + $0x2768] sm:$0xff] }
 0x111   : > { %657 = vst [vmem:[%s3887_s27 + $0x7e8] sm:$0xff] %v656_v61  ;;  %v784_v61 = vld [vmem:[%s3882_s26 + $0x2770] sm:$0xff] }
 0x112   : > { %659 = vst [vmem:[%s3887_s27 + $0x7f0] sm:$0xff] %v658_v62  ;;  %v786_v62 = vld [vmem:[%s3882_s26 + $0x2778] sm:$0xff] }
 0x113   : > { %661 = vst [vmem:[%s3887_s27 + $0x7f8] sm:$0xff] %v660_v63  ;;  %v788_v63 = vld [vmem:[%s3882_s26 + $0x2780] sm:$0xff] }
 0x114   : > { %663 = vst [vmem:[%s3887_s27 + $0x800] sm:$0xff] %v662_v0  ;;  %v790_v0 = vld [vmem:[%s3882_s26 + $0x2788] sm:$0xff] }
 0x115   : > { %665 = vst [vmem:[%s3887_s27 + $0x808] sm:$0xff] %v664_v1  ;;  %v792_v1 = vld [vmem:[%s3882_s26 + $0x2790] sm:$0xff] }
 0x116   : > { %667 = vst [vmem:[%s3887_s27 + $0x810] sm:$0xff] %v666_v2  ;;  %v794_v2 = vld [vmem:[%s3882_s26 + $0x2840] sm:$0xff] }
 0x117   : > { %669 = vst [vmem:[%s3887_s27 + $0x818] sm:$0xff] %v668_v3  ;;  %v796_v3 = vld [vmem:[%s3882_s26 + $0x2848] sm:$0xff] }
 0x118   : > { %671 = vst [vmem:[%s3887_s27 + $0x820] sm:$0xff] %v670_v4  ;;  %v798_v4 = vld [vmem:[%s3882_s26 + $0x2850] sm:$0xff] }
 0x119   : > { %673 = vst [vmem:[%s3887_s27 + $0x828] sm:$0xff] %v672_v5  ;;  %v800_v5 = vld [vmem:[%s3882_s26 + $0x2858] sm:$0xff] }
 0x11a   : > { %675 = vst [vmem:[%s3887_s27 + $0x830] sm:$0xff] %v674_v6  ;;  %v802_v6 = vld [vmem:[%s3882_s26 + $0x2860] sm:$0xff] }
 0x11b   : > { %677 = vst [vmem:[%s3887_s27 + $0x838] sm:$0xff] %v676_v7  ;;  %v804_v7 = vld [vmem:[%s3882_s26 + $0x2868] sm:$0xff] }
 0x11c   : > { %679 = vst [vmem:[%s3887_s27 + $0x840] sm:$0xff] %v678_v8  ;;  %v806_v8 = vld [vmem:[%s3882_s26 + $0x2870] sm:$0xff] }
 0x11d   : > { %681 = vst [vmem:[%s3887_s27 + $0x848] sm:$0xff] %v680_v9  ;;  %v808_v9 = vld [vmem:[%s3882_s26 + $0x2920] sm:$0xff] }
 0x11e   : > { %683 = vst [vmem:[%s3887_s27 + $0x850] sm:$0xff] %v682_v10  ;;  %v810_v10 = vld [vmem:[%s3882_s26 + $0x2928] sm:$0xff] }
 0x11f   : > { %685 = vst [vmem:[%s3887_s27 + $0x858] sm:$0xff] %v684_v11  ;;  %v812_v11 = vld [vmem:[%s3882_s26 + $0x2930] sm:$0xff] }
 0x120   : > { %687 = vst [vmem:[%s3887_s27 + $0x860] sm:$0xff] %v686_v12  ;;  %v814_v12 = vld [vmem:[%s3882_s26 + $0x2938] sm:$0xff] }
 0x121   : > { %689 = vst [vmem:[%s3887_s27 + $0x868] sm:$0xff] %v688_v13  ;;  %v816_v13 = vld [vmem:[%s3882_s26 + $0x2940] sm:$0xff] }
 0x122   : > { %691 = vst [vmem:[%s3887_s27 + $0x870] sm:$0xff] %v690_v14  ;;  %v818_v14 = vld [vmem:[%s3882_s26 + $0x2948] sm:$0xff] }
 0x123   : > { %693 = vst [vmem:[%s3887_s27 + $0x878] sm:$0xff] %v692_v15  ;;  %v820_v15 = vld [vmem:[%s3882_s26 + $0x2950] sm:$0xff] }
 0x124   : > { %695 = vst [vmem:[%s3887_s27 + $0x880] sm:$0xff] %v694_v16  ;;  %v822_v16 = vld [vmem:[%s3882_s26 + $0x2a00] sm:$0xff] }
 0x125   : > { %697 = vst [vmem:[%s3887_s27 + $0x888] sm:$0xff] %v696_v17  ;;  %v824_v17 = vld [vmem:[%s3882_s26 + $0x2a08] sm:$0xff] }
 0x126   : > { %699 = vst [vmem:[%s3887_s27 + $0x890] sm:$0xff] %v698_v18  ;;  %v826_v18 = vld [vmem:[%s3882_s26 + $0x2a10] sm:$0xff] }
 0x127   : > { %701 = vst [vmem:[%s3887_s27 + $0x898] sm:$0xff] %v700_v19  ;;  %v828_v19 = vld [vmem:[%s3882_s26 + $0x2a18] sm:$0xff] }
 0x128   : > { %703 = vst [vmem:[%s3887_s27 + $0x8a0] sm:$0xff] %v702_v20  ;;  %v830_v20 = vld [vmem:[%s3882_s26 + $0x2a20] sm:$0xff] }
 0x129   : > { %705 = vst [vmem:[%s3887_s27 + $0x8a8] sm:$0xff] %v704_v21  ;;  %v832_v21 = vld [vmem:[%s3882_s26 + $0x2a28] sm:$0xff] }
 0x12a   : > { %707 = vst [vmem:[%s3887_s27 + $0x8b0] sm:$0xff] %v706_v22  ;;  %v834_v22 = vld [vmem:[%s3882_s26 + $0x2a30] sm:$0xff] }
 0x12b   : > { %709 = vst [vmem:[%s3887_s27 + $0x8b8] sm:$0xff] %v708_v23  ;;  %v836_v23 = vld [vmem:[%s3882_s26 + $0x2ae0] sm:$0xff] }
 0x12c   : > { %711 = vst [vmem:[%s3887_s27 + $0x8c0] sm:$0xff] %v710_v24  ;;  %v838_v24 = vld [vmem:[%s3882_s26 + $0x2ae8] sm:$0xff] }
 0x12d   : > { %713 = vst [vmem:[%s3887_s27 + $0x8c8] sm:$0xff] %v712_v25  ;;  %v840_v25 = vld [vmem:[%s3882_s26 + $0x2af0] sm:$0xff] }
 0x12e   : > { %715 = vst [vmem:[%s3887_s27 + $0x8d0] sm:$0xff] %v714_v26  ;;  %v842_v26 = vld [vmem:[%s3882_s26 + $0x2af8] sm:$0xff] }
 0x12f   : > { %717 = vst [vmem:[%s3887_s27 + $0x8d8] sm:$0xff] %v716_v27  ;;  %v844_v27 = vld [vmem:[%s3882_s26 + $0x2b00] sm:$0xff] }
 0x130   : > { %719 = vst [vmem:[%s3887_s27 + $0x8e0] sm:$0xff] %v718_v28  ;;  %v846_v28 = vld [vmem:[%s3882_s26 + $0x2b08] sm:$0xff] }
 0x131   : > { %721 = vst [vmem:[%s3887_s27 + $0x8e8] sm:$0xff] %v720_v29  ;;  %v848_v29 = vld [vmem:[%s3882_s26 + $0x2b10] sm:$0xff] }
 0x132   : > { %723 = vst [vmem:[%s3887_s27 + $0x8f0] sm:$0xff] %v722_v30  ;;  %v850_v30 = vld [vmem:[%s3882_s26 + $0x2bc0] sm:$0xff] }
 0x133   : > { %725 = vst [vmem:[%s3887_s27 + $0x8f8] sm:$0xff] %v724_v31  ;;  %v852_v31 = vld [vmem:[%s3882_s26 + $0x2bc8] sm:$0xff] }
 0x134   : > { %727 = vst [vmem:[%s3887_s27 + $0x900] sm:$0xff] %v726_v32  ;;  %v854_v32 = vld [vmem:[%s3882_s26 + $0x2bd0] sm:$0xff] }
 0x135   : > { %729 = vst [vmem:[%s3887_s27 + $0x908] sm:$0xff] %v728_v33  ;;  %v856_v33 = vld [vmem:[%s3882_s26 + $0x2bd8] sm:$0xff] }
 0x136   : > { %731 = vst [vmem:[%s3887_s27 + $0x910] sm:$0xff] %v730_v34  ;;  %v858_v34 = vld [vmem:[%s3882_s26 + $0x2be0] sm:$0xff] }
 0x137   : > { %733 = vst [vmem:[%s3887_s27 + $0x918] sm:$0xff] %v732_v35  ;;  %v860_v35 = vld [vmem:[%s3882_s26 + $0x2be8] sm:$0xff] }
 0x138   : > { %735 = vst [vmem:[%s3887_s27 + $0x920] sm:$0xff] %v734_v36  ;;  %v862_v36 = vld [vmem:[%s3882_s26 + $0x2bf0] sm:$0xff] }
 0x139   : > { %737 = vst [vmem:[%s3887_s27 + $0x928] sm:$0xff] %v736_v37  ;;  %v864_v37 = vld [vmem:[%s3882_s26 + $0x2ca0] sm:$0xff] }
 0x13a   : > { %739 = vst [vmem:[%s3887_s27 + $0x930] sm:$0xff] %v738_v38  ;;  %v866_v38 = vld [vmem:[%s3882_s26 + $0x2ca8] sm:$0xff] }
 0x13b   : > { %741 = vst [vmem:[%s3887_s27 + $0x938] sm:$0xff] %v740_v39  ;;  %v868_v39 = vld [vmem:[%s3882_s26 + $0x2cb0] sm:$0xff] }
 0x13c   : > { %743 = vst [vmem:[%s3887_s27 + $0x940] sm:$0xff] %v742_v40  ;;  %v870_v40 = vld [vmem:[%s3882_s26 + $0x2cb8] sm:$0xff] }
 0x13d   : > { %745 = vst [vmem:[%s3887_s27 + $0x948] sm:$0xff] %v744_v41  ;;  %v872_v41 = vld [vmem:[%s3882_s26 + $0x2cc0] sm:$0xff] }
 0x13e   : > { %747 = vst [vmem:[%s3887_s27 + $0x950] sm:$0xff] %v746_v42  ;;  %v874_v42 = vld [vmem:[%s3882_s26 + $0x2cc8] sm:$0xff] }
 0x13f   : > { %749 = vst [vmem:[%s3887_s27 + $0x958] sm:$0xff] %v748_v43  ;;  %v876_v43 = vld [vmem:[%s3882_s26 + $0x2cd0] sm:$0xff] }
 0x140   : > { %751 = vst [vmem:[%s3887_s27 + $0x960] sm:$0xff] %v750_v44  ;;  %v878_v44 = vld [vmem:[%s3882_s26 + $0x2d80] sm:$0xff] }
 0x141   : > { %753 = vst [vmem:[%s3887_s27 + $0x968] sm:$0xff] %v752_v45  ;;  %v880_v45 = vld [vmem:[%s3882_s26 + $0x2d88] sm:$0xff] }
 0x142   : > { %755 = vst [vmem:[%s3887_s27 + $0x970] sm:$0xff] %v754_v46  ;;  %v882_v46 = vld [vmem:[%s3882_s26 + $0x2d90] sm:$0xff] }
 0x143   : > { %757 = vst [vmem:[%s3887_s27 + $0x978] sm:$0xff] %v756_v47  ;;  %v884_v47 = vld [vmem:[%s3882_s26 + $0x2d98] sm:$0xff] }
 0x144   : > { %759 = vst [vmem:[%s3887_s27 + $0x980] sm:$0xff] %v758_v48  ;;  %v886_v48 = vld [vmem:[%s3882_s26 + $0x2da0] sm:$0xff] }
 0x145   : > { %761 = vst [vmem:[%s3887_s27 + $0x988] sm:$0xff] %v760_v49  ;;  %v888_v49 = vld [vmem:[%s3882_s26 + $0x2da8] sm:$0xff] }
 0x146   : > { %763 = vst [vmem:[%s3887_s27 + $0x990] sm:$0xff] %v762_v50  ;;  %v890_v50 = vld [vmem:[%s3882_s26 + $0x2db0] sm:$0xff] }
 0x147   : > { %765 = vst [vmem:[%s3887_s27 + $0x998] sm:$0xff] %v764_v51  ;;  %v892_v51 = vld [vmem:[%s3882_s26 + $0x2e60] sm:$0xff] }
 0x148   : > { %767 = vst [vmem:[%s3887_s27 + $0x9a0] sm:$0xff] %v766_v52  ;;  %v894_v52 = vld [vmem:[%s3882_s26 + $0x2e68] sm:$0xff] }
 0x149   : > { %769 = vst [vmem:[%s3887_s27 + $0x9a8] sm:$0xff] %v768_v53  ;;  %v896_v53 = vld [vmem:[%s3882_s26 + $0x2e70] sm:$0xff] }
 0x14a   : > { %771 = vst [vmem:[%s3887_s27 + $0x9b0] sm:$0xff] %v770_v54  ;;  %v898_v54 = vld [vmem:[%s3882_s26 + $0x2e78] sm:$0xff] }
 0x14b   : > { %773 = vst [vmem:[%s3887_s27 + $0x9b8] sm:$0xff] %v772_v55  ;;  %v900_v55 = vld [vmem:[%s3882_s26 + $0x2e80] sm:$0xff] }
 0x14c   : > { %775 = vst [vmem:[%s3887_s27 + $0x9c0] sm:$0xff] %v774_v56  ;;  %v902_v56 = vld [vmem:[%s3882_s26 + $0x2e88] sm:$0xff] }
 0x14d   : > { %777 = vst [vmem:[%s3887_s27 + $0x9c8] sm:$0xff] %v776_v57  ;;  %v904_v57 = vld [vmem:[%s3882_s26 + $0x2e90] sm:$0xff] }
 0x14e   : > { %779 = vst [vmem:[%s3887_s27 + $0x9d0] sm:$0xff] %v778_v58  ;;  %v906_v58 = vld [vmem:[%s3882_s26 + $0x2f40] sm:$0xff] }
 0x14f   : > { %781 = vst [vmem:[%s3887_s27 + $0x9d8] sm:$0xff] %v780_v59  ;;  %v908_v59 = vld [vmem:[%s3882_s26 + $0x2f48] sm:$0xff] }
 0x150   : > { %783 = vst [vmem:[%s3887_s27 + $0x9e0] sm:$0xff] %v782_v60  ;;  %v910_v60 = vld [vmem:[%s3882_s26 + $0x2f50] sm:$0xff] }
 0x151   : > { %785 = vst [vmem:[%s3887_s27 + $0x9e8] sm:$0xff] %v784_v61  ;;  %v912_v61 = vld [vmem:[%s3882_s26 + $0x2f58] sm:$0xff] }
 0x152   : > { %787 = vst [vmem:[%s3887_s27 + $0x9f0] sm:$0xff] %v786_v62  ;;  %v914_v62 = vld [vmem:[%s3882_s26 + $0x2f60] sm:$0xff] }
 0x153   : > { %789 = vst [vmem:[%s3887_s27 + $0x9f8] sm:$0xff] %v788_v63  ;;  %v916_v63 = vld [vmem:[%s3882_s26 + $0x2f68] sm:$0xff] }
 0x154   : > { %791 = vst [vmem:[%s3887_s27 + $0xa00] sm:$0xff] %v790_v0  ;;  %v918_v0 = vld [vmem:[%s3882_s26 + $0x2f70] sm:$0xff] }
 0x155   : > { %793 = vst [vmem:[%s3887_s27 + $0xa08] sm:$0xff] %v792_v1  ;;  %v920_v1 = vld [vmem:[%s3882_s26 + $0x3020] sm:$0xff] }
 0x156   : > { %795 = vst [vmem:[%s3887_s27 + $0xa10] sm:$0xff] %v794_v2  ;;  %v922_v2 = vld [vmem:[%s3882_s26 + $0x3028] sm:$0xff] }
 0x157   : > { %797 = vst [vmem:[%s3887_s27 + $0xa18] sm:$0xff] %v796_v3  ;;  %v924_v3 = vld [vmem:[%s3882_s26 + $0x3030] sm:$0xff] }
 0x158   : > { %799 = vst [vmem:[%s3887_s27 + $0xa20] sm:$0xff] %v798_v4  ;;  %v926_v4 = vld [vmem:[%s3882_s26 + $0x3038] sm:$0xff] }
 0x159   : > { %801 = vst [vmem:[%s3887_s27 + $0xa28] sm:$0xff] %v800_v5  ;;  %v928_v5 = vld [vmem:[%s3882_s26 + $0x3040] sm:$0xff] }
 0x15a   : > { %803 = vst [vmem:[%s3887_s27 + $0xa30] sm:$0xff] %v802_v6  ;;  %v930_v6 = vld [vmem:[%s3882_s26 + $0x3048] sm:$0xff] }
 0x15b   : > { %805 = vst [vmem:[%s3887_s27 + $0xa38] sm:$0xff] %v804_v7  ;;  %v932_v7 = vld [vmem:[%s3882_s26 + $0x3050] sm:$0xff] }
 0x15c   : > { %807 = vst [vmem:[%s3887_s27 + $0xa40] sm:$0xff] %v806_v8  ;;  %v934_v8 = vld [vmem:[%s3882_s26 + $0x3100] sm:$0xff] }
 0x15d   : > { %809 = vst [vmem:[%s3887_s27 + $0xa48] sm:$0xff] %v808_v9  ;;  %v936_v9 = vld [vmem:[%s3882_s26 + $0x3108] sm:$0xff] }
 0x15e   : > { %811 = vst [vmem:[%s3887_s27 + $0xa50] sm:$0xff] %v810_v10  ;;  %v938_v10 = vld [vmem:[%s3882_s26 + $0x3110] sm:$0xff] }
 0x15f   : > { %813 = vst [vmem:[%s3887_s27 + $0xa58] sm:$0xff] %v812_v11  ;;  %v940_v11 = vld [vmem:[%s3882_s26 + $0x3118] sm:$0xff] }
 0x160   : > { %815 = vst [vmem:[%s3887_s27 + $0xa60] sm:$0xff] %v814_v12  ;;  %v942_v12 = vld [vmem:[%s3882_s26 + $0x3120] sm:$0xff] }
 0x161   : > { %817 = vst [vmem:[%s3887_s27 + $0xa68] sm:$0xff] %v816_v13  ;;  %v944_v13 = vld [vmem:[%s3882_s26 + $0x3128] sm:$0xff] }
 0x162   : > { %819 = vst [vmem:[%s3887_s27 + $0xa70] sm:$0xff] %v818_v14  ;;  %v946_v14 = vld [vmem:[%s3882_s26 + $0x3130] sm:$0xff] }
 0x163   : > { %821 = vst [vmem:[%s3887_s27 + $0xa78] sm:$0xff] %v820_v15  ;;  %v948_v15 = vld [vmem:[%s3882_s26 + $0x31e0] sm:$0xff] }
 0x164   : > { %823 = vst [vmem:[%s3887_s27 + $0xa80] sm:$0xff] %v822_v16  ;;  %v950_v16 = vld [vmem:[%s3882_s26 + $0x31e8] sm:$0xff] }
 0x165   : > { %825 = vst [vmem:[%s3887_s27 + $0xa88] sm:$0xff] %v824_v17  ;;  %v952_v17 = vld [vmem:[%s3882_s26 + $0x31f0] sm:$0xff] }
 0x166   : > { %827 = vst [vmem:[%s3887_s27 + $0xa90] sm:$0xff] %v826_v18  ;;  %v954_v18 = vld [vmem:[%s3882_s26 + $0x31f8] sm:$0xff] }
 0x167   : > { %829 = vst [vmem:[%s3887_s27 + $0xa98] sm:$0xff] %v828_v19  ;;  %v956_v19 = vld [vmem:[%s3882_s26 + $0x3200] sm:$0xff] }
 0x168   : > { %831 = vst [vmem:[%s3887_s27 + $0xaa0] sm:$0xff] %v830_v20  ;;  %v958_v20 = vld [vmem:[%s3882_s26 + $0x3208] sm:$0xff] }
 0x169   : > { %833 = vst [vmem:[%s3887_s27 + $0xaa8] sm:$0xff] %v832_v21  ;;  %v960_v21 = vld [vmem:[%s3882_s26 + $0x3210] sm:$0xff] }
 0x16a   : > { %835 = vst [vmem:[%s3887_s27 + $0xab0] sm:$0xff] %v834_v22  ;;  %v962_v22 = vld [vmem:[%s3882_s26 + $0x32c0] sm:$0xff] }
 0x16b   : > { %837 = vst [vmem:[%s3887_s27 + $0xab8] sm:$0xff] %v836_v23  ;;  %v964_v23 = vld [vmem:[%s3882_s26 + $0x32c8] sm:$0xff] }
 0x16c   : > { %839 = vst [vmem:[%s3887_s27 + $0xac0] sm:$0xff] %v838_v24  ;;  %v966_v24 = vld [vmem:[%s3882_s26 + $0x32d0] sm:$0xff] }
 0x16d   : > { %841 = vst [vmem:[%s3887_s27 + $0xac8] sm:$0xff] %v840_v25  ;;  %v968_v25 = vld [vmem:[%s3882_s26 + $0x32d8] sm:$0xff] }
 0x16e   : > { %843 = vst [vmem:[%s3887_s27 + $0xad0] sm:$0xff] %v842_v26  ;;  %v970_v26 = vld [vmem:[%s3882_s26 + $0x32e0] sm:$0xff] }
 0x16f   : > { %845 = vst [vmem:[%s3887_s27 + $0xad8] sm:$0xff] %v844_v27  ;;  %v972_v27 = vld [vmem:[%s3882_s26 + $0x32e8] sm:$0xff] }
 0x170   : > { %847 = vst [vmem:[%s3887_s27 + $0xae0] sm:$0xff] %v846_v28  ;;  %v974_v28 = vld [vmem:[%s3882_s26 + $0x32f0] sm:$0xff] }
 0x171   : > { %849 = vst [vmem:[%s3887_s27 + $0xae8] sm:$0xff] %v848_v29  ;;  %v976_v29 = vld [vmem:[%s3882_s26 + $0x33a0] sm:$0xff] }
 0x172   : > { %851 = vst [vmem:[%s3887_s27 + $0xaf0] sm:$0xff] %v850_v30  ;;  %v978_v30 = vld [vmem:[%s3882_s26 + $0x33a8] sm:$0xff] }
 0x173   : > { %853 = vst [vmem:[%s3887_s27 + $0xaf8] sm:$0xff] %v852_v31  ;;  %v980_v31 = vld [vmem:[%s3882_s26 + $0x33b0] sm:$0xff] }
 0x174   : > { %855 = vst [vmem:[%s3887_s27 + $0xb00] sm:$0xff] %v854_v32  ;;  %v982_v32 = vld [vmem:[%s3882_s26 + $0x33b8] sm:$0xff] }
 0x175   : > { %857 = vst [vmem:[%s3887_s27 + $0xb08] sm:$0xff] %v856_v33  ;;  %v984_v33 = vld [vmem:[%s3882_s26 + $0x33c0] sm:$0xff] }
 0x176   : > { %859 = vst [vmem:[%s3887_s27 + $0xb10] sm:$0xff] %v858_v34  ;;  %v986_v34 = vld [vmem:[%s3882_s26 + $0x33c8] sm:$0xff] }
 0x177   : > { %861 = vst [vmem:[%s3887_s27 + $0xb18] sm:$0xff] %v860_v35  ;;  %v988_v35 = vld [vmem:[%s3882_s26 + $0x33d0] sm:$0xff] }
 0x178   : > { %863 = vst [vmem:[%s3887_s27 + $0xb20] sm:$0xff] %v862_v36  ;;  %v990_v36 = vld [vmem:[%s3882_s26 + $0x3480] sm:$0xff] }
 0x179   : > { %865 = vst [vmem:[%s3887_s27 + $0xb28] sm:$0xff] %v864_v37  ;;  %v992_v37 = vld [vmem:[%s3882_s26 + $0x3488] sm:$0xff] }
 0x17a   : > { %867 = vst [vmem:[%s3887_s27 + $0xb30] sm:$0xff] %v866_v38  ;;  %v994_v38 = vld [vmem:[%s3882_s26 + $0x3490] sm:$0xff] }
 0x17b   : > { %869 = vst [vmem:[%s3887_s27 + $0xb38] sm:$0xff] %v868_v39  ;;  %v996_v39 = vld [vmem:[%s3882_s26 + $0x3498] sm:$0xff] }
 0x17c   : > { %871 = vst [vmem:[%s3887_s27 + $0xb40] sm:$0xff] %v870_v40  ;;  %v998_v40 = vld [vmem:[%s3882_s26 + $0x34a0] sm:$0xff] }
 0x17d   : > { %873 = vst [vmem:[%s3887_s27 + $0xb48] sm:$0xff] %v872_v41  ;;  %v1000_v41 = vld [vmem:[%s3882_s26 + $0x34a8] sm:$0xff] }
 0x17e   : > { %875 = vst [vmem:[%s3887_s27 + $0xb50] sm:$0xff] %v874_v42  ;;  %v1002_v42 = vld [vmem:[%s3882_s26 + $0x34b0] sm:$0xff] }
 0x17f   : > { %877 = vst [vmem:[%s3887_s27 + $0xb58] sm:$0xff] %v876_v43  ;;  %v1004_v43 = vld [vmem:[%s3882_s26 + $0x3560] sm:$0xff] }
 0x180   : > { %879 = vst [vmem:[%s3887_s27 + $0xb60] sm:$0xff] %v878_v44  ;;  %v1006_v44 = vld [vmem:[%s3882_s26 + $0x3568] sm:$0xff] }
 0x181   : > { %881 = vst [vmem:[%s3887_s27 + $0xb68] sm:$0xff] %v880_v45  ;;  %v1008_v45 = vld [vmem:[%s3882_s26 + $0x3570] sm:$0xff] }
 0x182   : > { %883 = vst [vmem:[%s3887_s27 + $0xb70] sm:$0xff] %v882_v46  ;;  %v1010_v46 = vld [vmem:[%s3882_s26 + $0x3578] sm:$0xff] }
 0x183   : > { %885 = vst [vmem:[%s3887_s27 + $0xb78] sm:$0xff] %v884_v47  ;;  %v1012_v47 = vld [vmem:[%s3882_s26 + $0x3580] sm:$0xff] }
 0x184   : > { %887 = vst [vmem:[%s3887_s27 + $0xb80] sm:$0xff] %v886_v48  ;;  %v1014_v48 = vld [vmem:[%s3882_s26 + $0x3588] sm:$0xff] }
 0x185   : > { %889 = vst [vmem:[%s3887_s27 + $0xb88] sm:$0xff] %v888_v49  ;;  %v1016_v49 = vld [vmem:[%s3882_s26 + $0x3590] sm:$0xff] }
 0x186   : > { %891 = vst [vmem:[%s3887_s27 + $0xb90] sm:$0xff] %v890_v50  ;;  %v1018_v50 = vld [vmem:[%s3882_s26 + $0x3640] sm:$0xff] }
 0x187   : > { %893 = vst [vmem:[%s3887_s27 + $0xb98] sm:$0xff] %v892_v51  ;;  %v1020_v51 = vld [vmem:[%s3882_s26 + $0x3648] sm:$0xff] }
 0x188   : > { %895 = vst [vmem:[%s3887_s27 + $0xba0] sm:$0xff] %v894_v52  ;;  %v1022_v52 = vld [vmem:[%s3882_s26 + $0x3650] sm:$0xff] }
 0x189   : > { %897 = vst [vmem:[%s3887_s27 + $0xba8] sm:$0xff] %v896_v53  ;;  %v1024_v53 = vld [vmem:[%s3882_s26 + $0x3658] sm:$0xff] }
 0x18a   : > { %899 = vst [vmem:[%s3887_s27 + $0xbb0] sm:$0xff] %v898_v54  ;;  %v1026_v54 = vld [vmem:[%s3882_s26 + $0x3660] sm:$0xff] }
 0x18b   : > { %901 = vst [vmem:[%s3887_s27 + $0xbb8] sm:$0xff] %v900_v55  ;;  %v1028_v55 = vld [vmem:[%s3882_s26 + $0x3668] sm:$0xff] }
 0x18c   : > { %903 = vst [vmem:[%s3887_s27 + $0xbc0] sm:$0xff] %v902_v56  ;;  %v1030_v56 = vld [vmem:[%s3882_s26 + $0x3670] sm:$0xff] }
 0x18d   : > { %905 = vst [vmem:[%s3887_s27 + $0xbc8] sm:$0xff] %v904_v57  ;;  %v1032_v57 = vld [vmem:[%s3882_s26 + $0x3720] sm:$0xff] }
 0x18e   : > { %907 = vst [vmem:[%s3887_s27 + $0xbd0] sm:$0xff] %v906_v58  ;;  %v1034_v58 = vld [vmem:[%s3882_s26 + $0x3728] sm:$0xff] }
 0x18f   : > { %909 = vst [vmem:[%s3887_s27 + $0xbd8] sm:$0xff] %v908_v59  ;;  %v1036_v59 = vld [vmem:[%s3882_s26 + $0x3730] sm:$0xff] }
 0x190   : > { %911 = vst [vmem:[%s3887_s27 + $0xbe0] sm:$0xff] %v910_v60  ;;  %v1038_v60 = vld [vmem:[%s3882_s26 + $0x3738] sm:$0xff] }
 0x191   : > { %913 = vst [vmem:[%s3887_s27 + $0xbe8] sm:$0xff] %v912_v61  ;;  %v1040_v61 = vld [vmem:[%s3882_s26 + $0x3740] sm:$0xff] }
 0x192   : > { %915 = vst [vmem:[%s3887_s27 + $0xbf0] sm:$0xff] %v914_v62  ;;  %v1042_v62 = vld [vmem:[%s3882_s26 + $0x3748] sm:$0xff] }
 0x193   : > { %917 = vst [vmem:[%s3887_s27 + $0xbf8] sm:$0xff] %v916_v63  ;;  %v1044_v63 = vld [vmem:[%s3882_s26 + $0x3750] sm:$0xff] }
 0x194   : > { %919 = vst [vmem:[%s3887_s27 + $0xc00] sm:$0xff] %v918_v0  ;;  %v1046_v0 = vld [vmem:[%s3882_s26 + $0x3800] sm:$0xff] }
 0x195   : > { %921 = vst [vmem:[%s3887_s27 + $0xc08] sm:$0xff] %v920_v1  ;;  %v1048_v1 = vld [vmem:[%s3882_s26 + $0x3808] sm:$0xff] }
 0x196   : > { %923 = vst [vmem:[%s3887_s27 + $0xc10] sm:$0xff] %v922_v2  ;;  %v1050_v2 = vld [vmem:[%s3882_s26 + $0x3810] sm:$0xff] }
 0x197   : > { %925 = vst [vmem:[%s3887_s27 + $0xc18] sm:$0xff] %v924_v3  ;;  %v1052_v3 = vld [vmem:[%s3882_s26 + $0x3818] sm:$0xff] }
 0x198   : > { %927 = vst [vmem:[%s3887_s27 + $0xc20] sm:$0xff] %v926_v4  ;;  %v1054_v4 = vld [vmem:[%s3882_s26 + $0x3820] sm:$0xff] }
 0x199   : > { %929 = vst [vmem:[%s3887_s27 + $0xc28] sm:$0xff] %v928_v5  ;;  %v1056_v5 = vld [vmem:[%s3882_s26 + $0x3828] sm:$0xff] }
 0x19a   : > { %931 = vst [vmem:[%s3887_s27 + $0xc30] sm:$0xff] %v930_v6  ;;  %v1058_v6 = vld [vmem:[%s3882_s26 + $0x3830] sm:$0xff] }
 0x19b   : > { %933 = vst [vmem:[%s3887_s27 + $0xc38] sm:$0xff] %v932_v7  ;;  %v1060_v7 = vld [vmem:[%s3882_s26 + $0x38e0] sm:$0xff] }
 0x19c   : > { %935 = vst [vmem:[%s3887_s27 + $0xc40] sm:$0xff] %v934_v8  ;;  %v1062_v8 = vld [vmem:[%s3882_s26 + $0x38e8] sm:$0xff] }
 0x19d   : > { %937 = vst [vmem:[%s3887_s27 + $0xc48] sm:$0xff] %v936_v9  ;;  %v1064_v9 = vld [vmem:[%s3882_s26 + $0x38f0] sm:$0xff] }
 0x19e   : > { %939 = vst [vmem:[%s3887_s27 + $0xc50] sm:$0xff] %v938_v10  ;;  %v1066_v10 = vld [vmem:[%s3882_s26 + $0x38f8] sm:$0xff] }
 0x19f   : > { %941 = vst [vmem:[%s3887_s27 + $0xc58] sm:$0xff] %v940_v11  ;;  %v1068_v11 = vld [vmem:[%s3882_s26 + $0x3900] sm:$0xff] }
 0x1a0   : > { %943 = vst [vmem:[%s3887_s27 + $0xc60] sm:$0xff] %v942_v12  ;;  %v1070_v12 = vld [vmem:[%s3882_s26 + $0x3908] sm:$0xff] }
 0x1a1   : > { %945 = vst [vmem:[%s3887_s27 + $0xc68] sm:$0xff] %v944_v13  ;;  %v1072_v13 = vld [vmem:[%s3882_s26 + $0x3910] sm:$0xff] }
 0x1a2   : > { %947 = vst [vmem:[%s3887_s27 + $0xc70] sm:$0xff] %v946_v14  ;;  %v1074_v14 = vld [vmem:[%s3882_s26 + $0x39c0] sm:$0xff] }
 0x1a3   : > { %949 = vst [vmem:[%s3887_s27 + $0xc78] sm:$0xff] %v948_v15  ;;  %v1076_v15 = vld [vmem:[%s3882_s26 + $0x39c8] sm:$0xff] }
 0x1a4   : > { %951 = vst [vmem:[%s3887_s27 + $0xc80] sm:$0xff] %v950_v16  ;;  %v1078_v16 = vld [vmem:[%s3882_s26 + $0x39d0] sm:$0xff] }
 0x1a5   : > { %953 = vst [vmem:[%s3887_s27 + $0xc88] sm:$0xff] %v952_v17  ;;  %v1080_v17 = vld [vmem:[%s3882_s26 + $0x39d8] sm:$0xff] }
 0x1a6   : > { %955 = vst [vmem:[%s3887_s27 + $0xc90] sm:$0xff] %v954_v18  ;;  %v1082_v18 = vld [vmem:[%s3882_s26 + $0x39e0] sm:$0xff] }
 0x1a7   : > { %957 = vst [vmem:[%s3887_s27 + $0xc98] sm:$0xff] %v956_v19  ;;  %v1084_v19 = vld [vmem:[%s3882_s26 + $0x39e8] sm:$0xff] }
 0x1a8   : > { %959 = vst [vmem:[%s3887_s27 + $0xca0] sm:$0xff] %v958_v20  ;;  %v1086_v20 = vld [vmem:[%s3882_s26 + $0x39f0] sm:$0xff] }
 0x1a9   : > { %961 = vst [vmem:[%s3887_s27 + $0xca8] sm:$0xff] %v960_v21  ;;  %v1088_v21 = vld [vmem:[%s3882_s26 + $0x3aa0] sm:$0xff] }
 0x1aa   : > { %963 = vst [vmem:[%s3887_s27 + $0xcb0] sm:$0xff] %v962_v22  ;;  %v1090_v22 = vld [vmem:[%s3882_s26 + $0x3aa8] sm:$0xff] }
 0x1ab   : > { %965 = vst [vmem:[%s3887_s27 + $0xcb8] sm:$0xff] %v964_v23  ;;  %v1092_v23 = vld [vmem:[%s3882_s26 + $0x3ab0] sm:$0xff] }
 0x1ac   : > { %967 = vst [vmem:[%s3887_s27 + $0xcc0] sm:$0xff] %v966_v24  ;;  %v1094_v24 = vld [vmem:[%s3882_s26 + $0x3ab8] sm:$0xff] }
 0x1ad   : > { %969 = vst [vmem:[%s3887_s27 + $0xcc8] sm:$0xff] %v968_v25  ;;  %v1096_v25 = vld [vmem:[%s3882_s26 + $0x3ac0] sm:$0xff] }
 0x1ae   : > { %971 = vst [vmem:[%s3887_s27 + $0xcd0] sm:$0xff] %v970_v26  ;;  %v1098_v26 = vld [vmem:[%s3882_s26 + $0x3ac8] sm:$0xff] }
 0x1af   : > { %973 = vst [vmem:[%s3887_s27 + $0xcd8] sm:$0xff] %v972_v27  ;;  %v1100_v27 = vld [vmem:[%s3882_s26 + $0x3ad0] sm:$0xff] }
 0x1b0   : > { %975 = vst [vmem:[%s3887_s27 + $0xce0] sm:$0xff] %v974_v28  ;;  %v1102_v28 = vld [vmem:[%s3882_s26 + $0x3b80] sm:$0xff] }
 0x1b1   : > { %977 = vst [vmem:[%s3887_s27 + $0xce8] sm:$0xff] %v976_v29  ;;  %v1104_v29 = vld [vmem:[%s3882_s26 + $0x3b88] sm:$0xff] }
 0x1b2   : > { %979 = vst [vmem:[%s3887_s27 + $0xcf0] sm:$0xff] %v978_v30  ;;  %v1106_v30 = vld [vmem:[%s3882_s26 + $0x3b90] sm:$0xff] }
 0x1b3   : > { %981 = vst [vmem:[%s3887_s27 + $0xcf8] sm:$0xff] %v980_v31  ;;  %v1108_v31 = vld [vmem:[%s3882_s26 + $0x3b98] sm:$0xff] }
 0x1b4   : > { %983 = vst [vmem:[%s3887_s27 + $0xd00] sm:$0xff] %v982_v32  ;;  %v1110_v32 = vld [vmem:[%s3882_s26 + $0x3ba0] sm:$0xff] }
 0x1b5   : > { %985 = vst [vmem:[%s3887_s27 + $0xd08] sm:$0xff] %v984_v33  ;;  %v1112_v33 = vld [vmem:[%s3882_s26 + $0x3ba8] sm:$0xff] }
 0x1b6   : > { %987 = vst [vmem:[%s3887_s27 + $0xd10] sm:$0xff] %v986_v34  ;;  %v1114_v34 = vld [vmem:[%s3882_s26 + $0x3bb0] sm:$0xff] }
 0x1b7   : > { %989 = vst [vmem:[%s3887_s27 + $0xd18] sm:$0xff] %v988_v35  ;;  %v1116_v35 = vld [vmem:[%s3882_s26 + $0x3c60] sm:$0xff] }
 0x1b8   : > { %991 = vst [vmem:[%s3887_s27 + $0xd20] sm:$0xff] %v990_v36  ;;  %v1118_v36 = vld [vmem:[%s3882_s26 + $0x3c68] sm:$0xff] }
 0x1b9   : > { %993 = vst [vmem:[%s3887_s27 + $0xd28] sm:$0xff] %v992_v37  ;;  %v1120_v37 = vld [vmem:[%s3882_s26 + $0x3c70] sm:$0xff] }
 0x1ba   : > { %995 = vst [vmem:[%s3887_s27 + $0xd30] sm:$0xff] %v994_v38  ;;  %v1122_v38 = vld [vmem:[%s3882_s26 + $0x3c78] sm:$0xff] }
 0x1bb   : > { %997 = vst [vmem:[%s3887_s27 + $0xd38] sm:$0xff] %v996_v39  ;;  %v1124_v39 = vld [vmem:[%s3882_s26 + $0x3c80] sm:$0xff] }
 0x1bc   : > { %999 = vst [vmem:[%s3887_s27 + $0xd40] sm:$0xff] %v998_v40  ;;  %v1126_v40 = vld [vmem:[%s3882_s26 + $0x3c88] sm:$0xff] }
 0x1bd   : > { %1001 = vst [vmem:[%s3887_s27 + $0xd48] sm:$0xff] %v1000_v41  ;;  %v1128_v41 = vld [vmem:[%s3882_s26 + $0x3c90] sm:$0xff] }
 0x1be   : > { %1003 = vst [vmem:[%s3887_s27 + $0xd50] sm:$0xff] %v1002_v42  ;;  %v1130_v42 = vld [vmem:[%s3882_s26 + $0x3d40] sm:$0xff] }
 0x1bf   : > { %1005 = vst [vmem:[%s3887_s27 + $0xd58] sm:$0xff] %v1004_v43  ;;  %v1132_v43 = vld [vmem:[%s3882_s26 + $0x3d48] sm:$0xff] }
 0x1c0   : > { %1007 = vst [vmem:[%s3887_s27 + $0xd60] sm:$0xff] %v1006_v44  ;;  %v1134_v44 = vld [vmem:[%s3882_s26 + $0x3d50] sm:$0xff] }
 0x1c1   : > { %1009 = vst [vmem:[%s3887_s27 + $0xd68] sm:$0xff] %v1008_v45  ;;  %v1136_v45 = vld [vmem:[%s3882_s26 + $0x3d58] sm:$0xff] }
 0x1c2   : > { %1011 = vst [vmem:[%s3887_s27 + $0xd70] sm:$0xff] %v1010_v46  ;;  %v1138_v46 = vld [vmem:[%s3882_s26 + $0x3d60] sm:$0xff] }
 0x1c3   : > { %1013 = vst [vmem:[%s3887_s27 + $0xd78] sm:$0xff] %v1012_v47  ;;  %v1140_v47 = vld [vmem:[%s3882_s26 + $0x3d68] sm:$0xff] }
 0x1c4   : > { %1015 = vst [vmem:[%s3887_s27 + $0xd80] sm:$0xff] %v1014_v48  ;;  %v1142_v48 = vld [vmem:[%s3882_s26 + $0x3d70] sm:$0xff] }
 0x1c5   : > { %1017 = vst [vmem:[%s3887_s27 + $0xd88] sm:$0xff] %v1016_v49  ;;  %v1144_v49 = vld [vmem:[%s3882_s26 + $0x3e20] sm:$0xff] }
 0x1c6   : > { %1019 = vst [vmem:[%s3887_s27 + $0xd90] sm:$0xff] %v1018_v50  ;;  %v1146_v50 = vld [vmem:[%s3882_s26 + $0x3e28] sm:$0xff] }
 0x1c7   : > { %1021 = vst [vmem:[%s3887_s27 + $0xd98] sm:$0xff] %v1020_v51  ;;  %v1148_v51 = vld [vmem:[%s3882_s26 + $0x3e30] sm:$0xff] }
 0x1c8   : > { %1023 = vst [vmem:[%s3887_s27 + $0xda0] sm:$0xff] %v1022_v52  ;;  %v1150_v52 = vld [vmem:[%s3882_s26 + $0x3e38] sm:$0xff] }
 0x1c9   : > { %1025 = vst [vmem:[%s3887_s27 + $0xda8] sm:$0xff] %v1024_v53  ;;  %v1152_v53 = vld [vmem:[%s3882_s26 + $0x3e40] sm:$0xff] }
 0x1ca   : > { %1027 = vst [vmem:[%s3887_s27 + $0xdb0] sm:$0xff] %v1026_v54  ;;  %v1154_v54 = vld [vmem:[%s3882_s26 + $0x3e48] sm:$0xff] }
 0x1cb   : > { %1029 = vst [vmem:[%s3887_s27 + $0xdb8] sm:$0xff] %v1028_v55  ;;  %v1156_v55 = vld [vmem:[%s3882_s26 + $0x3e50] sm:$0xff] }
 0x1cc   : > { %1031 = vst [vmem:[%s3887_s27 + $0xdc0] sm:$0xff] %v1030_v56  ;;  %v1158_v56 = vld [vmem:[%s3882_s26 + $0x3f00] sm:$0xff] }
 0x1cd   : > { %1033 = vst [vmem:[%s3887_s27 + $0xdc8] sm:$0xff] %v1032_v57  ;;  %v1160_v57 = vld [vmem:[%s3882_s26 + $0x3f08] sm:$0xff] }
 0x1ce   : > { %1035 = vst [vmem:[%s3887_s27 + $0xdd0] sm:$0xff] %v1034_v58  ;;  %v1162_v58 = vld [vmem:[%s3882_s26 + $0x3f10] sm:$0xff] }
 0x1cf   : > { %1037 = vst [vmem:[%s3887_s27 + $0xdd8] sm:$0xff] %v1036_v59  ;;  %v1164_v59 = vld [vmem:[%s3882_s26 + $0x3f18] sm:$0xff] }
 0x1d0   : > { %1039 = vst [vmem:[%s3887_s27 + $0xde0] sm:$0xff] %v1038_v60  ;;  %v1166_v60 = vld [vmem:[%s3882_s26 + $0x3f20] sm:$0xff] }
 0x1d1   : > { %1041 = vst [vmem:[%s3887_s27 + $0xde8] sm:$0xff] %v1040_v61  ;;  %v1168_v61 = vld [vmem:[%s3882_s26 + $0x3f28] sm:$0xff] }
 0x1d2   : > { %1043 = vst [vmem:[%s3887_s27 + $0xdf0] sm:$0xff] %v1042_v62  ;;  %v1170_v62 = vld [vmem:[%s3882_s26 + $0x3f30] sm:$0xff] }
 0x1d3   : > { %1045 = vst [vmem:[%s3887_s27 + $0xdf8] sm:$0xff] %v1044_v63  ;;  %v1172_v63 = vld [vmem:[%s3882_s26 + $0x3fe0] sm:$0xff] }
 0x1d4   : > { %1047 = vst [vmem:[%s3887_s27 + $0xe00] sm:$0xff] %v1046_v0  ;;  %v1174_v0 = vld [vmem:[%s3882_s26 + $0x3fe8] sm:$0xff] }
 0x1d5   : > { %1049 = vst [vmem:[%s3887_s27 + $0xe08] sm:$0xff] %v1048_v1  ;;  %v1176_v1 = vld [vmem:[%s3882_s26 + $0x3ff0] sm:$0xff] }
 0x1d6   : > { %1051 = vst [vmem:[%s3887_s27 + $0xe10] sm:$0xff] %v1050_v2  ;;  %v1178_v2 = vld [vmem:[%s3882_s26 + $0x3ff8] sm:$0xff] }
 0x1d7   : > { %1053 = vst [vmem:[%s3887_s27 + $0xe18] sm:$0xff] %v1052_v3  ;;  %v1180_v3 = vld [vmem:[%s3882_s26 + $0x4000] sm:$0xff] }
 0x1d8   : > { %1055 = vst [vmem:[%s3887_s27 + $0xe20] sm:$0xff] %v1054_v4  ;;  %v1182_v4 = vld [vmem:[%s3882_s26 + $0x4008] sm:$0xff] }
 0x1d9   : > { %1057 = vst [vmem:[%s3887_s27 + $0xe28] sm:$0xff] %v1056_v5  ;;  %v1184_v5 = vld [vmem:[%s3882_s26 + $0x4010] sm:$0xff] }
 0x1da   : > { %1059 = vst [vmem:[%s3887_s27 + $0xe30] sm:$0xff] %v1058_v6  ;;  %v1186_v6 = vld [vmem:[%s3882_s26 + $0x40c0] sm:$0xff] }
 0x1db   : > { %1061 = vst [vmem:[%s3887_s27 + $0xe38] sm:$0xff] %v1060_v7  ;;  %v1188_v7 = vld [vmem:[%s3882_s26 + $0x40c8] sm:$0xff] }
 0x1dc   : > { %1063 = vst [vmem:[%s3887_s27 + $0xe40] sm:$0xff] %v1062_v8  ;;  %v1190_v8 = vld [vmem:[%s3882_s26 + $0x40d0] sm:$0xff] }
 0x1dd   : > { %1065 = vst [vmem:[%s3887_s27 + $0xe48] sm:$0xff] %v1064_v9  ;;  %v1192_v9 = vld [vmem:[%s3882_s26 + $0x40d8] sm:$0xff] }
 0x1de   : > { %1067 = vst [vmem:[%s3887_s27 + $0xe50] sm:$0xff] %v1066_v10  ;;  %v1194_v10 = vld [vmem:[%s3882_s26 + $0x40e0] sm:$0xff] }
 0x1df   : > { %1069 = vst [vmem:[%s3887_s27 + $0xe58] sm:$0xff] %v1068_v11  ;;  %v1196_v11 = vld [vmem:[%s3882_s26 + $0x40e8] sm:$0xff] }
 0x1e0   : > { %1071 = vst [vmem:[%s3887_s27 + $0xe60] sm:$0xff] %v1070_v12  ;;  %v1198_v12 = vld [vmem:[%s3882_s26 + $0x40f0] sm:$0xff] }
 0x1e1   : > { %1073 = vst [vmem:[%s3887_s27 + $0xe68] sm:$0xff] %v1072_v13  ;;  %v1200_v13 = vld [vmem:[%s3882_s26 + $0x41a0] sm:$0xff] }
 0x1e2   : > { %1075 = vst [vmem:[%s3887_s27 + $0xe70] sm:$0xff] %v1074_v14  ;;  %v1202_v14 = vld [vmem:[%s3882_s26 + $0x41a8] sm:$0xff] }
 0x1e3   : > { %1077 = vst [vmem:[%s3887_s27 + $0xe78] sm:$0xff] %v1076_v15  ;;  %v1204_v15 = vld [vmem:[%s3882_s26 + $0x41b0] sm:$0xff] }
 0x1e4   : > { %1079 = vst [vmem:[%s3887_s27 + $0xe80] sm:$0xff] %v1078_v16  ;;  %v1206_v16 = vld [vmem:[%s3882_s26 + $0x41b8] sm:$0xff] }
 0x1e5   : > { %1081 = vst [vmem:[%s3887_s27 + $0xe88] sm:$0xff] %v1080_v17  ;;  %v1208_v17 = vld [vmem:[%s3882_s26 + $0x41c0] sm:$0xff] }
 0x1e6   : > { %1083 = vst [vmem:[%s3887_s27 + $0xe90] sm:$0xff] %v1082_v18  ;;  %v1210_v18 = vld [vmem:[%s3882_s26 + $0x41c8] sm:$0xff] }
 0x1e7   : > { %1085 = vst [vmem:[%s3887_s27 + $0xe98] sm:$0xff] %v1084_v19  ;;  %v1212_v19 = vld [vmem:[%s3882_s26 + $0x41d0] sm:$0xff] }
 0x1e8   : > { %1087 = vst [vmem:[%s3887_s27 + $0xea0] sm:$0xff] %v1086_v20 }
 0x1e9   : > { %1089 = vst [vmem:[%s3887_s27 + $0xea8] sm:$0xff] %v1088_v21 }
 0x1ea   : > { %1091 = vst [vmem:[%s3887_s27 + $0xeb0] sm:$0xff] %v1090_v22 }
 0x1eb   : > { %1093 = vst [vmem:[%s3887_s27 + $0xeb8] sm:$0xff] %v1092_v23 }
 0x1ec   : > { %1095 = vst [vmem:[%s3887_s27 + $0xec0] sm:$0xff] %v1094_v24 }
 0x1ed   : > { %1097 = vst [vmem:[%s3887_s27 + $0xec8] sm:$0xff] %v1096_v25 }
 0x1ee   : > { %1099 = vst [vmem:[%s3887_s27 + $0xed0] sm:$0xff] %v1098_v26 }
 0x1ef   : > { %1101 = vst [vmem:[%s3887_s27 + $0xed8] sm:$0xff] %v1100_v27 }
 0x1f0   : > { %1103 = vst [vmem:[%s3887_s27 + $0xee0] sm:$0xff] %v1102_v28 }
 0x1f1   : > { %1105 = vst [vmem:[%s3887_s27 + $0xee8] sm:$0xff] %v1104_v29 }
 0x1f2   : > { %1107 = vst [vmem:[%s3887_s27 + $0xef0] sm:$0xff] %v1106_v30 }
 0x1f3   : > { %1109 = vst [vmem:[%s3887_s27 + $0xef8] sm:$0xff] %v1108_v31 }
 0x1f4   : > { %1111 = vst [vmem:[%s3887_s27 + $0xf00] sm:$0xff] %v1110_v32 }
 0x1f5   : > { %1113 = vst [vmem:[%s3887_s27 + $0xf08] sm:$0xff] %v1112_v33 }
 0x1f6   : > { %1115 = vst [vmem:[%s3887_s27 + $0xf10] sm:$0xff] %v1114_v34 }
 0x1f7   : > { %1117 = vst [vmem:[%s3887_s27 + $0xf18] sm:$0xff] %v1116_v35 }
 0x1f8   : > { %1119 = vst [vmem:[%s3887_s27 + $0xf20] sm:$0xff] %v1118_v36 }
 0x1f9   : > { %1121 = vst [vmem:[%s3887_s27 + $0xf28] sm:$0xff] %v1120_v37 }
 0x1fa   : > { %1123 = vst [vmem:[%s3887_s27 + $0xf30] sm:$0xff] %v1122_v38 }
 0x1fb   : > { %1125 = vst [vmem:[%s3887_s27 + $0xf38] sm:$0xff] %v1124_v39 }
 0x1fc   : > { %1127 = vst [vmem:[%s3887_s27 + $0xf40] sm:$0xff] %v1126_v40 }
 0x1fd   : > { %1129 = vst [vmem:[%s3887_s27 + $0xf48] sm:$0xff] %v1128_v41 }
 0x1fe   : > { %1131 = vst [vmem:[%s3887_s27 + $0xf50] sm:$0xff] %v1130_v42 }
 0x1ff   : > { %1133 = vst [vmem:[%s3887_s27 + $0xf58] sm:$0xff] %v1132_v43 }
 0x200   : > { %1135 = vst [vmem:[%s3887_s27 + $0xf60] sm:$0xff] %v1134_v44 }
 0x201   : > { %1137 = vst [vmem:[%s3887_s27 + $0xf68] sm:$0xff] %v1136_v45 }
 0x202   : > { %1139 = vst [vmem:[%s3887_s27 + $0xf70] sm:$0xff] %v1138_v46 }
 0x203   : > { %1141 = vst [vmem:[%s3887_s27 + $0xf78] sm:$0xff] %v1140_v47 }
 0x204   : > { %1143 = vst [vmem:[%s3887_s27 + $0xf80] sm:$0xff] %v1142_v48 }
 0x205   : > { %1145 = vst [vmem:[%s3887_s27 + $0xf88] sm:$0xff] %v1144_v49 }
 0x206   : > { %1147 = vst [vmem:[%s3887_s27 + $0xf90] sm:$0xff] %v1146_v50 }
 0x207   : > { %1149 = vst [vmem:[%s3887_s27 + $0xf98] sm:$0xff] %v1148_v51 }
 0x208   : > { %1151 = vst [vmem:[%s3887_s27 + $0xfa0] sm:$0xff] %v1150_v52 }
 0x209   : > { %1153 = vst [vmem:[%s3887_s27 + $0xfa8] sm:$0xff] %v1152_v53 }
 0x20a   : > { %1155 = vst [vmem:[%s3887_s27 + $0xfb0] sm:$0xff] %v1154_v54 }
 0x20b   : > { %1157 = vst [vmem:[%s3887_s27 + $0xfb8] sm:$0xff] %v1156_v55 }
 0x20c   : > { %1159 = vst [vmem:[%s3887_s27 + $0xfc0] sm:$0xff] %v1158_v56 }
 0x20d   : > { %1161 = vst [vmem:[%s3887_s27 + $0xfc8] sm:$0xff] %v1160_v57 }
 0x20e   : > { %1163 = vst [vmem:[%s3887_s27 + $0xfd0] sm:$0xff] %v1162_v58 }
 0x20f   : > { %1165 = vst [vmem:[%s3887_s27 + $0xfd8] sm:$0xff] %v1164_v59 }
 0x210   : > { %1167 = vst [vmem:[%s3887_s27 + $0xfe0] sm:$0xff] %v1166_v60 }
 0x211   : > { %1169 = vst [vmem:[%s3887_s27 + $0xfe8] sm:$0xff] %v1168_v61 }
 0x212   : > { %1171 = vst [vmem:[%s3887_s27 + $0xff0] sm:$0xff] %v1170_v62 }
 0x213   : > { %1173 = vst [vmem:[%s3887_s27 + $0xff8] sm:$0xff] %v1172_v63 }
 0x214   : > { %1175 = vst [vmem:[%s3887_s27 + $0x1000] sm:$0xff] %v1174_v0 }
 0x215   : > { %1177 = vst [vmem:[%s3887_s27 + $0x1008] sm:$0xff] %v1176_v1 }
 0x216   : > { %1179 = vst [vmem:[%s3887_s27 + $0x1010] sm:$0xff] %v1178_v2 }
 0x217   : > { %1181 = vst [vmem:[%s3887_s27 + $0x1018] sm:$0xff] %v1180_v3 }
 0x218   : > { %1183 = vst [vmem:[%s3887_s27 + $0x1020] sm:$0xff] %v1182_v4 }
 0x219   : > { %1185 = vst [vmem:[%s3887_s27 + $0x1028] sm:$0xff] %v1184_v5 }
 0x21a   : > { %1187 = vst [vmem:[%s3887_s27 + $0x1030] sm:$0xff] %v1186_v6 }
 0x21b   : > { %1189 = vst [vmem:[%s3887_s27 + $0x1038] sm:$0xff] %v1188_v7 }
 0x21c   : > { %1191 = vst [vmem:[%s3887_s27 + $0x1040] sm:$0xff] %v1190_v8 }
 0x21d   : > { %1193 = vst [vmem:[%s3887_s27 + $0x1048] sm:$0xff] %v1192_v9 }
 0x21e   : > { %1195 = vst [vmem:[%s3887_s27 + $0x1050] sm:$0xff] %v1194_v10 }
 0x21f   : > { %1197 = vst [vmem:[%s3887_s27 + $0x1058] sm:$0xff] %v1196_v11 }
 0x220   : > { %1199 = vst [vmem:[%s3887_s27 + $0x1060] sm:$0xff] %v1198_v12 }
 0x221   : > { %1201 = vst [vmem:[%s3887_s27 + $0x1068] sm:$0xff] %v1200_v13 }
 0x222   : > { %1203 = vst [vmem:[%s3887_s27 + $0x1070] sm:$0xff] %v1202_v14 }
 0x223   : > { %1205 = vst [vmem:[%s3887_s27 + $0x1078] sm:$0xff] %v1204_v15 }
 0x224   : > { %1207 = vst [vmem:[%s3887_s27 + $0x1080] sm:$0xff] %v1206_v16 }
 0x225   : > { %1209 = vst [vmem:[%s3887_s27 + $0x1088] sm:$0xff] %v1208_v17 }
 0x226   : > { %1211 = vst [vmem:[%s3887_s27 + $0x1090] sm:$0xff] %v1210_v18 }
 0x227   : > { %1213 = vst [vmem:[%s3887_s27 + $0x1098] sm:$0xff] %v1212_v19 }
 0x228 PF: > { %p3293_p7 = scmp.ge.s32.totalorder %s3819_s14, 1  ;;  %p1218_p8 = scmp.lt.s32.totalorder %s3819_s14, 5 }
 0x22a   : > { %p1219_p9 = pnand %p3293_p7, %p1218_p8 }
 0x22b   : > { %s1225_s28 = sand.u32 (!%p1219_p9), 1, %s3811_s12  }
 0x22c   : > { %1222 = sbr.rel (%p1219_p9) target bundleno = 1050 (0x41a), region = 51 }
 0x22d   : > { %s3761_s29 = smul.u32 (!%p1219_p9), 4256, %s1225_s28 }
 0x22f   : > { %s4955_s30 = scalar_lea.vmem (!%p1219_p9), [#allocation2], %s3761_s29 }
 0x231   : > { %v1358_v20 = vld [vmem:[%s4955_s30 + $0x348] sm:$0xff]  ;;  %v1379_v21 = vld [vmem:[%s4955_s30 + $0x3f0] sm:$0xff]  ;;  %v1380_v23 = vld [vmem:[%s4955_s30 + $0x3f8] sm:$0xff]  ;;  %vm1386_vm0 = vcmask 195584  }
 0x232   : > { %v1359_v22 = vld [vmem:[%s4955_s30 + $0x350] sm:$0xff]  ;;  %1393 = vmatpush.msra.mxu0 %v1358_v20  ;;  %1429 = vmatpush.msra.mxu1 %v1379_v21  ;;  %v1372_v25 = vld [vmem:[%s4955_s30 + $0x3b8] sm:$0xff]  ;;  %v1373_v27 = vld [vmem:[%s4955_s30 + $0x3c0] sm:$0xff] }
 0x233   : > { %v1351_v24 = vld [vmem:[%s4955_s30 + $0x310] sm:$0xff]  ;;  %1439 = vmatpush.msra.mxu2 %v1359_v22  ;;  %1475 = vmatpush.msra.mxu3 %v1380_v23  ;;  %v1352_v26 = vld [vmem:[%s4955_s30 + $0x318] sm:$0xff]  ;;  %v1365_v29 = vld [vmem:[%s4955_s30 + $0x380] sm:$0xff] }
 0x234   : > { %v1344_v28 = vld [vmem:[%s4955_s30 + $0x2d8] sm:$0xff]  ;;  %1394 = vmatpush.msra.mxu0 %v1351_v24  ;;  %1430 = vmatpush.msra.mxu1 %v1372_v25  ;;  %v1345_v30 = vld [vmem:[%s4955_s30 + $0x2e0] sm:$0xff]  ;;  %v1366_v31 = vld [vmem:[%s4955_s30 + $0x388] sm:$0xff] }
 0x235   : > { %1440 = vmatpush.msra.mxu2 %v1352_v26  ;;  %1476 = vmatpush.msra.mxu3 %v1373_v27  ;;  %v1360_v32 = vld [vmem:[%s4955_s30 + $0x358] sm:$0xff]  ;;  %v1381_v33 = vld [vmem:[%s4955_s30 + $0x400] sm:$0xff]  ;;  %v1338_v35 = vld [vmem:[%s4955_s30 + $0x2a8] sm:$0xff] }
 0x236   : > { %1395 = vmatpush.msra.mxu0 %v1344_v28  ;;  %1431 = vmatpush.msra.mxu1 %v1365_v29  ;;  %v1337_v34 = vld [vmem:[%s4955_s30 + $0x2a0] sm:$0xff]  ;;  %v1374_v37 = vld [vmem:[%s4955_s30 + $0x3c8] sm:$0xff]  ;;  %v1331_v39 = vld [vmem:[%s4955_s30 + $0x270] sm:$0xff] }
 0x237   : > { %1441 = vmatpush.msra.mxu2 %v1345_v30  ;;  %1477 = vmatpush.msra.mxu3 %v1366_v31  ;;  %v1353_v36 = vld [vmem:[%s4955_s30 + $0x320] sm:$0xff]  ;;  %v1330_v38 = vld [vmem:[%s4955_s30 + $0x268] sm:$0xff]  ;;  %v1367_v41 = vld [vmem:[%s4955_s30 + $0x390] sm:$0xff] }
 0x238   : > { %1485 = vmatpush.msrb.mxu1 %v1360_v32  ;;  %1396 = vmatpush.msra.mxu0 %v1337_v34  ;;  %v1346_v40 = vld [vmem:[%s4955_s30 + $0x2e8] sm:$0xff]  ;;  %v1323_v42 = vld [vmem:[%s4955_s30 + $0x230] sm:$0xff]  ;;  %v1324_v43 = vld [vmem:[%s4955_s30 + $0x238] sm:$0xff] }
 0x239   : > { %1521 = vmatpush.msrb.mxu3 %v1381_v33  ;;  %1442 = vmatpush.msra.mxu2 %v1338_v35  ;;  %v4984_v44 = vld [vmem:[%s5955_s0 + $0x8] sm:$0xff]  ;;  %v1339_v45 = vld [vmem:[%s4955_s30 + $0x2b0] sm:$0xff]  ;;  %v1361_v46 = vld [vmem:[%s4955_s30 + $0x360] sm:$0xff] }
 0x23a   : > { %1486 = vmatpush.msrb.mxu1 %v1353_v36  ;;  %1397 = vmatpush.msra.mxu0 %v1330_v38  ;;  %v1316_v47 = vld [vmem:[%s4955_s30 + $0x1f8] sm:$0xff]  ;;  %v1317_v48 = vld [vmem:[%s4955_s30 + $0x200] sm:$0xff]  ;;  %v1354_v50 = vld [vmem:[%s4955_s30 + $0x328] sm:$0xff] }
 0x23b   : > { %1522 = vmatpush.msrb.mxu3 %v1374_v37  ;;  %1443 = vmatpush.msra.mxu2 %v1331_v39  ;;  %v1332_v49 = vld [vmem:[%s4955_s30 + $0x278] sm:$0xff]  ;;  %v1309_v51 = vld [vmem:[%s4955_s30 + $0x1c0] sm:$0xff]  ;;  %v1310_v52 = vld [vmem:[%s4955_s30 + $0x1c8] sm:$0xff] }
 0x23c   : > { %1487 = vmatpush.msrb.mxu1 %v1346_v40  ;;  %1398 = vmatpush.msra.mxu0 %v1323_v42  ;;  %v1325_v53 = vld [vmem:[%s4955_s30 + $0x240] sm:$0xff]  ;;  %v1347_v54 = vld [vmem:[%s4955_s30 + $0x2f0] sm:$0xff]  ;;  %v1302_v55 = vld [vmem:[%s4955_s30 + $0x188] sm:$0xff] }
 0x23d   : > { %1523 = vmatpush.msrb.mxu3 %v1367_v41  ;;  %1444 = vmatpush.msra.mxu2 %v1324_v43  ;;  %v1303_v56 = vld [vmem:[%s4955_s30 + $0x190] sm:$0xff]  ;;  %v1318_v57 = vld [vmem:[%s4955_s30 + $0x208] sm:$0xff]  ;;  %v1340_v58 = vld [vmem:[%s4955_s30 + $0x2b8] sm:$0xff] }
 0x23e   : > { %3296 = vmatmul.msk.f32.vlgmr.msra.gmra.mxu3 %vm1386_vm0, %v4984_v44  ;;  %1488 = vmatpush.msrb.mxu1 %v1339_v45  ;;  %v1295_v59 = vld [vmem:[%s4955_s30 + $0x150] sm:$0xff]  ;;  %v1296_v60 = vld [vmem:[%s4955_s30 + $0x158] sm:$0xff]  ;;  %v1333_v62 = vld [vmem:[%s4955_s30 + $0x280] sm:$0xff] }
 0x23f   : > { %1531 = vmatpush.msra.mxu3 %v1361_v46  ;;  %1399 = vmatpush.msra.mxu0 %v1316_v47  ;;  %v1311_v61 = vld [vmem:[%s4955_s30 + $0x1d0] sm:$0xff]  ;;  %v1288_v63 = vld [vmem:[%s4955_s30 + $0x118] sm:$0xff]  ;;  %v1289_v0 = vld [vmem:[%s4955_s30 + $0x120] sm:$0xff] }
 0x240   : > { %1445 = vmatpush.msra.mxu2 %v1317_v48  ;;  %1489 = vmatpush.msrb.mxu1 %v1332_v49  ;;  %v1326_v1 = vld [vmem:[%s4955_s30 + $0x248] sm:$0xff]  ;;  %v1304_v2 = vld [vmem:[%s4955_s30 + $0x198] sm:$0xff]  ;;  %v1281_v3 = vld [vmem:[%s4955_s30 + $0xe0] sm:$0xff] }
 0x241   : > { %1532 = vmatpush.msra.mxu3 %v1354_v50  ;;  %1400 = vmatpush.msra.mxu0 %v1309_v51  ;;  %v1282_v4 = vld [vmem:[%s4955_s30 + $0xe8] sm:$0xff]  ;;  %v1319_v5 = vld [vmem:[%s4955_s30 + $0x210] sm:$0xff]  ;;  %v1297_v6 = vld [vmem:[%s4955_s30 + $0x160] sm:$0xff] }
 0x242   : > { %1446 = vmatpush.msra.mxu2 %v1310_v52  ;;  %1490 = vmatpush.msrb.mxu1 %v1325_v53  ;;  %v1274_v7 = vld [vmem:[%s4955_s30 + $0xa8] sm:$0xff]  ;;  %v1275_v8 = vld [vmem:[%s4955_s30 + $0xb0] sm:$0xff]  ;;  %v1312_v9 = vld [vmem:[%s4955_s30 + $0x1d8] sm:$0xff] }
 0x243   : > { %1533 = vmatpush.msra.mxu3 %v1347_v54  ;;  %1401 = vmatpush.msra.mxu0 %v1302_v55  ;;  %v1290_v10 = vld [vmem:[%s4955_s30 + $0x128] sm:$0xff]  ;;  %v1267_v11 = vld [vmem:[%s4955_s30 + $0x70] sm:$0xff]  ;;  %v1268_v12 = vld [vmem:[%s4955_s30 + $0x78] sm:$0xff] }
 0x244   : > { %1447 = vmatpush.msra.mxu2 %v1303_v56  ;;  %1491 = vmatpush.msrb.mxu1 %v1318_v57  ;;  %v1305_v13 = vld [vmem:[%s4955_s30 + $0x1a0] sm:$0xff]  ;;  %v1283_v14 = vld [vmem:[%s4955_s30 + $0xf0] sm:$0xff]  ;;  %v1260_v15 = vld [vmem:[%s4955_s30 + $0x38] sm:$0xff] }
 0x245   : > { %1534 = vmatpush.msra.mxu3 %v1340_v58  ;;  %1402 = vmatpush.msra.mxu0 %v1295_v59  ;;  %v5028_v16 = vld [vmem:[%s5955_s0 + $0x18] sm:$0xff]  ;;  %v1261_v17 = vld [vmem:[%s4955_s30 + $0x40] sm:$0xff]  ;;  %v1298_v18 = vld [vmem:[%s4955_s30 + $0x168] sm:$0xff] }
 0x246   : > { %1448 = vmatpush.msra.mxu2 %v1296_v60  ;;  %1492 = vmatpush.msrb.mxu1 %v1311_v61  ;;  %v1276_v19 = vld [vmem:[%s4955_s30 + $0xb8] sm:$0xff]  ;;  %v1253_v20 = vld [vmem:[%s4955_s30] sm:$0xff]  ;;  %v1254_v21 = vld [vmem:[%s4955_s30 + $0x8] sm:$0xff] }
 0x247   : > { %1535 = vmatpush.msra.mxu3 %v1333_v62  ;;  %1403 = vmatpush.msra.mxu0 %v1288_v63  ;;  %v1291_v22 = vld [vmem:[%s4955_s30 + $0x130] sm:$0xff]  ;;  %v5041_v23 = vld [vmem:[%s5955_s0] sm:$0xff]  ;;  %v1382_v25 = vld [vmem:[%s4955_s30 + $0x408] sm:$0xff] }
 0x248   : > { %3294 = vmatmul.msk.f32.vlgmr.msra.gmra.mxu1 %vm1386_vm0, %v4984_v44  ;;  %1449 = vmatpush.msra.mxu2 %v1289_v0  ;;  %v1269_v24 = vld [vmem:[%s4955_s30 + $0x80] sm:$0xff]  ;;  %v1362_v26 = vld [vmem:[%s4955_s30 + $0x368] sm:$0xff]  ;;  %v1284_v27 = vld [vmem:[%s4955_s30 + $0xf8] sm:$0xff] }
 0x249   : > { %1536 = vmatpush.msra.mxu3 %v1326_v1  ;;  %1493 = vmatpush.msrb.mxu1 %v1304_v2  ;;  %v1262_v28 = vld [vmem:[%s4955_s30 + $0x48] sm:$0xff]  ;;  %v1375_v29 = vld [vmem:[%s4955_s30 + $0x3d0] sm:$0xff]  ;;  %v1277_v31 = vld [vmem:[%s4955_s30 + $0xc0] sm:$0xff] }
 0x24a   : > { %1404 = vmatpush.msra.mxu0 %v1281_v3  ;;  %1450 = vmatpush.msra.mxu2 %v1282_v4  ;;  %v1355_v30 = vld [vmem:[%s4955_s30 + $0x330] sm:$0xff]  ;;  %v1368_v33 = vld [vmem:[%s4955_s30 + $0x398] sm:$0xff]  ;;  %v1270_v35 = vld [vmem:[%s4955_s30 + $0x88] sm:$0xff] }
 0x24b   : > { %1537 = vmatpush.msra.mxu3 %v1319_v5  ;;  %1494 = vmatpush.msrb.mxu1 %v1297_v6  ;;  %v1255_v32 = vld [vmem:[%s4955_s30 + $0x10] sm:$0xff]  ;;  %v1348_v34 = vld [vmem:[%s4955_s30 + $0x2f8] sm:$0xff]  ;;  %v1341_v37 = vld [vmem:[%s4955_s30 + $0x2c0] sm:$0xff] }
 0x24c   : > { %1405 = vmatpush.msra.mxu0 %v1274_v7  ;;  %1451 = vmatpush.msra.mxu2 %v1275_v8  ;;  %v1363_v36 = vld [vmem:[%s4955_s30 + $0x370] sm:$0xff]  ;;  %v1356_v39 = vld [vmem:[%s4955_s30 + $0x338] sm:$0xff]  ;;  %v1334_v40 = vld [vmem:[%s4955_s30 + $0x288] sm:$0xff] }
 0x24d   : > { %1538 = vmatpush.msra.mxu3 %v1312_v9  ;;  %1495 = vmatpush.msrb.mxu1 %v1290_v10  ;;  %v1263_v38 = vld [vmem:[%s4955_s30 + $0x50] sm:$0xff]  ;;  %v1256_v42 = vld [vmem:[%s4955_s30 + $0x18] sm:$0xff]  ;;  %v1349_v43 = vld [vmem:[%s4955_s30 + $0x300] sm:$0xff] }
 0x24e   : > { %1406 = vmatpush.msra.mxu0 %v1267_v11  ;;  %1452 = vmatpush.msra.mxu2 %v1268_v12  ;;  %v5068_v41 = vld [vmem:[%s5955_s0 + $0x10] sm:$0xff]  ;;  %v1364_v46 = vld [vmem:[%s4955_s30 + $0x378] sm:$0xff]  ;;  %v1342_v48 = vld [vmem:[%s4955_s30 + $0x2c8] sm:$0xff] }
 0x24f   : > { %1539 = vmatpush.msra.mxu3 %v1305_v13  ;;  %1496 = vmatpush.msrb.mxu1 %v1283_v14  ;;  %v1327_v45 = vld [vmem:[%s4955_s30 + $0x250] sm:$0xff]  ;;  %v1320_v49 = vld [vmem:[%s4955_s30 + $0x218] sm:$0xff]  ;;  %v1357_v50 = vld [vmem:[%s4955_s30 + $0x340] sm:$0xff] }
 0x250   : > { %1407 = vmatpush.msra.mxu0 %v1260_v15  ;;  %3295 = vmatmul.msk.f32.gmra.mxu1 %vm1386_vm0, %v5028_v16  ;;  %v5077_v47 = vld [vmem:[%s4955_s30 + $0x410] sm:$0xff]  ;;  %v5087_v52 = vld [vmem:[%s4955_s30 + $0x3d8] sm:$0xff]  ;;  %v1313_v53 = vld [vmem:[%s4955_s30 + $0x1e0] sm:$0xff] }
 0x251   : > { %1453 = vmatpush.msra.mxu2 %v1261_v17  ;;  %1540 = vmatpush.msra.mxu3 %v1298_v18  ;;  %v1335_v51 = vld [vmem:[%s4955_s30 + $0x290] sm:$0xff]  ;;  %v1350_v54 = vld [vmem:[%s4955_s30 + $0x308] sm:$0xff]  ;;  %v1328_v55 = vld [vmem:[%s4955_s30 + $0x258] sm:$0xff] }
 0x252   : > { %1497 = vmatpush.msrb.mxu1 %v1276_v19  ;;  %1408 = vmatpush.msra.mxu0 %v1253_v20  ;;  %v5094_v56 = vld [vmem:[%s4955_s30 + $0x3a0] sm:$0xff]  ;;  %v1306_v57 = vld [vmem:[%s4955_s30 + $0x1a8] sm:$0xff]  ;;  %v1384_v58 = vld [vmem:[%s4955_s30 + $0x418] sm:$0xff] }
 0x253   : > { %1454 = vmatpush.msra.mxu2 %v1254_v21  ;;  %1541 = vmatpush.msra.mxu3 %v1291_v22  ;;  %v1343_v59 = vld [vmem:[%s4955_s30 + $0x2d0] sm:$0xff]  ;;  %v1321_v60 = vld [vmem:[%s4955_s30 + $0x220] sm:$0xff]  ;;  %v1336_v63 = vld [vmem:[%s4955_s30 + $0x298] sm:$0xff] }
 0x254   : > { %1455 = vmatmul.f32.vlgmr.msra.gmra.mxu2 %v5041_v23  ;;  %1498 = vmatpush.msrb.mxu1 %v1269_v24  ;;  %v1299_v61 = vld [vmem:[%s4955_s30 + $0x170] sm:$0xff]  ;;  %v1377_v62 = vld [vmem:[%s4955_s30 + $0x3e0] sm:$0xff]  ;;  %v1314_v0 = vld [vmem:[%s4955_s30 + $0x1e8] sm:$0xff] }
 0x255   : > { %1567 = vmatpush.msrb.mxu0 %v1382_v25  ;;  %1577 = vmatpush.msrb.mxu2 %v1362_v26  ;;  %v1292_v1 = vld [vmem:[%s4955_s30 + $0x138] sm:$0xff]  ;;  %v1370_v2 = vld [vmem:[%s4955_s30 + $0x3a8] sm:$0xff]  ;;  %v1329_v3 = vld [vmem:[%s4955_s30 + $0x260] sm:$0xff] }
 0x256   : > { %1409 = vmatmul.f32.vlgmr.msra.gmra.mxu0 %v5041_v23  ;;  %1542 = vmatpush.msra.mxu3 %v1284_v27  ;;  %v1307_v4 = vld [vmem:[%s4955_s30 + $0x1b0] sm:$0xff]  ;;  %v1285_v6 = vld [vmem:[%s4955_s30 + $0x100] sm:$0xff]  ;;  %v1322_v7 = vld [vmem:[%s4955_s30 + $0x228] sm:$0xff] }
 0x257   : > { %3297 = vmatmul.msk.f32.gmra.mxu3 %vm1386_vm0, %v5028_v16  ;;  %1499 = vmatpush.msrb.mxu1 %v1262_v28  ;;  %v3413_v5 = vld [vmem:[%s4955_s30 + $0x770] sm:$0xff]  ;;  %v1300_v8 = vld [vmem:[%s4955_s30 + $0x178] sm:$0xff]  ;;  %v1278_v10 = vld [vmem:[%s4955_s30 + $0xc8] sm:$0xff] }
 0x258   : > { %1568 = vmatpush.msrb.mxu0 %v1375_v29  ;;  %1578 = vmatpush.msrb.mxu2 %v1355_v30  ;;  %v3406_v9 = vld [vmem:[%s4955_s30 + $0x738] sm:$0xff]  ;;  %v1315_v11 = vld [vmem:[%s4955_s30 + $0x1f0] sm:$0xff]  ;;  %v1293_v12 = vld [vmem:[%s4955_s30 + $0x140] sm:$0xff] }
 0x259   : > { %1543 = vmatpush.msra.mxu3 %v1277_v31  ;;  %1500 = vmatpush.msrb.mxu1 %v1255_v32  ;;  %v3399_v13 = vld [vmem:[%s4955_s30 + $0x700] sm:$0xff]  ;;  %v1271_v14 = vld [vmem:[%s4955_s30 + $0x90] sm:$0xff]  ;;  %v1308_v15 = vld [vmem:[%s4955_s30 + $0x1b8] sm:$0xff] }
 0x25a   : > { %1569 = vmatpush.msrb.mxu0 %v1368_v33  ;;  %1579 = vmatpush.msrb.mxu2 %v1348_v34  ;;  %v1286_v17 = vld [vmem:[%s4955_s30 + $0x108] sm:$0xff]  ;;  %v1264_v19 = vld [vmem:[%s4955_s30 + $0x58] sm:$0xff]  ;;  %v1301_v20 = vld [vmem:[%s4955_s30 + $0x180] sm:$0xff] }
 0x25b   : > { %1501 = vmatmul.f32.vlgmr.msrb.gmra.mxu1 %v5041_v23  ;;  %1544 = vmatpush.msra.mxu3 %v1270_v35  ;;  %v3392_v18 = vld [vmem:[%s4955_s30 + $0x6c8] sm:$0xff]  ;;  %v1279_v21 = vld [vmem:[%s4955_s30 + $0xd0] sm:$0xff]  ;;  %v1257_v24 = vld [vmem:[%s4955_s30 + $0x20] sm:$0xff] }
 0x25c   : > { %1623 = vmatpush.msra.mxu0 %v1363_v36  ;;  %1580 = vmatpush.msrb.mxu2 %v1341_v37  ;;  %v3385_v22 = vld [vmem:[%s4955_s30 + $0x690] sm:$0xff]  ;;  %v1294_v25 = vld [vmem:[%s4955_s30 + $0x148] sm:$0xff]  ;;  %v1272_v26 = vld [vmem:[%s4955_s30 + $0x98] sm:$0xff] }
 0x25d   : > { %1545 = vmatpush.msra.mxu3 %v1263_v38  ;;  %1458 = vmatmul.f32.gmra.mxu2 %v5068_v41  ;;  %v3378_v27 = vld [vmem:[%s4955_s30 + $0x658] sm:$0xff]  ;;  %v1287_v28 = vld [vmem:[%s4955_s30 + $0x110] sm:$0xff]  ;;  %v1265_v29 = vld [vmem:[%s4955_s30 + $0x60] sm:$0xff] }
 0x25e   : > { %1624 = vmatpush.msra.mxu0 %v1356_v39  ;;  %1581 = vmatpush.msrb.mxu2 %v1334_v40  ;;  %v3371_v30 = vld [vmem:[%s4955_s30 + $0x620] sm:$0xff]  ;;  %v1280_v31 = vld [vmem:[%s4955_s30 + $0xd8] sm:$0xff]  ;;  %v1258_v32 = vld [vmem:[%s4955_s30 + $0x28] sm:$0xff] }
 0x25f   : > { %1412 = vmatmul.f32.gmra.mxu0 %v5068_v41  ;;  %1546 = vmatpush.msra.mxu3 %v1256_v42  ;;  %v3364_v33 = vld [vmem:[%s4955_s30 + $0x5e8] sm:$0xff]  ;;  %v1273_v34 = vld [vmem:[%s4955_s30 + $0xa0] sm:$0xff]  ;;  %v3434_v35 = vld [vmem:[%s4955_s30 + $0x818] sm:$0xff] }
 0x260   : > { %1625 = vmatpush.msra.mxu0 %v1349_v43  ;;  %3298 = vmatmul.msk.f32.vlgmr.msrb.gmra.mxu3 %vm1386_vm0, %v4984_v44  ;;  %v3357_v36 = vld [vmem:[%s4955_s30 + $0x5b0] sm:$0xff]  ;;  %v1266_v37 = vld [vmem:[%s4955_s30 + $0x68] sm:$0xff]  ;;  %v3427_v38 = vld [vmem:[%s4955_s30 + $0x7e0] sm:$0xff] }
 0x261   : > { %1582 = vmatpush.msrb.mxu2 %v1327_v45  ;;  %1669 = vmatpush.msrb.mxu3 %v1364_v46  ;;  %v3350_v39 = vld [vmem:[%s4955_s30 + $0x578] sm:$0xff]  ;;  %v1259_v40 = vld [vmem:[%s4955_s30 + $0x30] sm:$0xff]  ;;  %v3420_v42 = vld [vmem:[%s4955_s30 + $0x7a8] sm:$0xff] }
 0x262   : > { %1613 = vmatpush.msra.mxu1 %v5077_v47  ;;  %1626 = vmatpush.msra.mxu0 %v1342_v48  ;;  %v3343_v43 = vld [vmem:[%s4955_s30 + $0x540] sm:$0xff]  ;;  %v3336_v48 = vld [vmem:[%s4955_s30 + $0x508] sm:$0xff] }
 0x263   : > { %1583 = vmatpush.msrb.mxu2 %v1320_v49  ;;  %1670 = vmatpush.msrb.mxu3 %v1357_v50  ;;  %v3435_v45 = vld [vmem:[%s4955_s30 + $0x820] sm:$0xff]  ;;  %v3428_v49 = vld [vmem:[%s4955_s30 + $0x7e8] sm:$0xff] }
 0x264   : > { %1504 = vmatmul.f32.gmra.mxu1 %v5068_v41  ;;  %1627 = vmatpush.msra.mxu0 %v1335_v51  ;;  %v3415_v46 = vld [vmem:[%s4955_s30 + $0x780] sm:$0xff]  ;;  %v3408_v50 = vld [vmem:[%s4955_s30 + $0x748] sm:$0xff] }
 0x265   : > { %1614 = vmatpush.msra.mxu1 %v5087_v52  ;;  %1584 = vmatpush.msrb.mxu2 %v1313_v53  ;;  %v1378_v51 = vld [vmem:[%s4955_s30 + $0x3e8] sm:$0xff]  ;;  %v3421_v53 = vld [vmem:[%s4955_s30 + $0x7b0] sm:$0xff] }
 0x266   : > { %1671 = vmatpush.msrb.mxu3 %v1350_v54  ;;  %1628 = vmatpush.msra.mxu0 %v1328_v55  ;;  %v3401_v54 = vld [vmem:[%s4955_s30 + $0x710] sm:$0xff] }
 0x267   : > { %1615 = vmatpush.msra.mxu1 %v5094_v56  ;;  %1585 = vmatpush.msrb.mxu2 %v1306_v57  ;;  %v1371_v55 = vld [vmem:[%s4955_s30 + $0x3b0] sm:$0xff]  ;;  %v3322_v57 = vld [vmem:[%s4955_s30 + $0x498] sm:$0xff] }
 0x268   : > { %1672 = vmatpush.msrb.mxu3 %v1343_v59  ;;  %1629 = vmatpush.msra.mxu0 %v1321_v60  ;;  %v3394_v59 = vld [vmem:[%s4955_s30 + $0x6d8] sm:$0xff]  ;;  %v3409_v60 = vld [vmem:[%s4955_s30 + $0x750] sm:$0xff] }
 0x269   : > { %1659 = vmatpush.msrb.mxu1 %v1384_v58  ;;  %1586 = vmatpush.msrb.mxu2 %v1299_v61  ;;  %v3414_v58 = vld [vmem:[%s4955_s30 + $0x778] sm:$0xff]  ;;  %v3315_v61 = vld [vmem:[%s4955_s30 + $0x460] sm:$0xff] }
 0x26a   : > { %1673 = vmatpush.msrb.mxu3 %v1336_v63  ;;  %1630 = vmatpush.msra.mxu0 %v1314_v0  ;;  %v3387_v63 = vld [vmem:[%s4955_s30 + $0x6a0] sm:$0xff]  ;;  %v3402_v0 = vld [vmem:[%s4955_s30 + $0x718] sm:$0xff] }
 0x26b   : > { %1660 = vmatpush.msrb.mxu1 %v1377_v62  ;;  %3299 = vmatmul.msk.f32.gmra.mxu3 %vm1386_vm0, %v5028_v16  ;;  %v3407_v62 = vld [vmem:[%s4955_s30 + $0x740] sm:$0xff] }
 0x26c   : > { %3300 = vmatmul.msk.f32.vlgmr.msrb.gmra.mxu0 %vm1386_vm0, %v4984_v44  ;;  %1587 = vmatpush.msrb.mxu2 %v1292_v1  ;;  %v3308_v1 = vld [vmem:[%s4955_s30 + $0x428] sm:$0xff] }
 0x26d   : > { %1661 = vmatpush.msrb.mxu1 %v1370_v2  ;;  %1674 = vmatpush.msrb.mxu3 %v1329_v3  ;;  %v3400_v2 = vld [vmem:[%s4955_s30 + $0x708] sm:$0xff] }
 0x26e   : > { %3302 = vmatmul.msk.f32.vlgmr.msra.gmra.mxu1 %vm1386_vm0, %v4984_v44  ;;  %1631 = vmatpush.msra.mxu0 %v1307_v4  ;;  %v3380_v3 = vld [vmem:[%s4955_s30 + $0x668] sm:$0xff] }
 0x26f   : > { %1849 = vmatpush.msra.mxu1 %v3413_v5  ;;  %1588 = vmatpush.msrb.mxu2 %v1285_v6  ;;  %v3436_v4 = vld [vmem:[%s4955_s30 + $0x828] sm:$0xff]  ;;  %v3395_v5 = vld [vmem:[%s4955_s30 + $0x6e0] sm:$0xff]  ;;  %v3393_v6 = vld [vmem:[%s4955_s30 + $0x6d0] sm:$0xff] }
 0x270   : > { %1675 = vmatpush.msrb.mxu3 %v1322_v7  ;;  %1632 = vmatpush.msra.mxu0 %v1300_v8  ;;  %v3373_v7 = vld [vmem:[%s4955_s30 + $0x630] sm:$0xff] }
 0x271   : > { %1850 = vmatpush.msra.mxu1 %v3406_v9  ;;  %1589 = vmatpush.msrb.mxu2 %v1278_v10  ;;  %v3429_v8 = vld [vmem:[%s4955_s30 + $0x7f0] sm:$0xff]  ;;  %v3388_v9 = vld [vmem:[%s4955_s30 + $0x6a8] sm:$0xff]  ;;  %v3386_v10 = vld [vmem:[%s4955_s30 + $0x698] sm:$0xff] }
 0x272   : > { %1676 = vmatpush.msrb.mxu3 %v1315_v11  ;;  %1633 = vmatpush.msra.mxu0 %v1293_v12  ;;  %v3366_v11 = vld [vmem:[%s4955_s30 + $0x5f8] sm:$0xff] }
 0x273   : > { %1851 = vmatpush.msra.mxu1 %v3399_v13  ;;  %1590 = vmatpush.msrb.mxu2 %v1271_v14  ;;  %v3422_v12 = vld [vmem:[%s4955_s30 + $0x7b8] sm:$0xff]  ;;  %v3381_v13 = vld [vmem:[%s4955_s30 + $0x670] sm:$0xff]  ;;  %v3379_v14 = vld [vmem:[%s4955_s30 + $0x660] sm:$0xff] }
 0x274   : > { %1677 = vmatpush.msrb.mxu3 %v1308_v15  ;;  %1634 = vmatpush.msra.mxu0 %v1286_v17  ;;  %v3359_v15 = vld [vmem:[%s4955_s30 + $0x5c0] sm:$0xff]  ;;  %v3417_v17 = vld [vmem:[%s4955_s30 + $0x790] sm:$0xff] }
 0x275   : > { %1852 = vmatpush.msra.mxu1 %v3392_v18  ;;  %3301 = vmatmul.msk.f32.gmra.mxu0 %vm1386_vm0, %v5028_v16  ;;  %v3374_v18 = vld [vmem:[%s4955_s30 + $0x638] sm:$0xff] }
 0x276   : > { %1591 = vmatpush.msrb.mxu2 %v1264_v19  ;;  %1678 = vmatpush.msrb.mxu3 %v1301_v20  ;;  %v3372_v19 = vld [vmem:[%s4955_s30 + $0x628] sm:$0xff] }
 0x277   : > { %1635 = vmatpush.msra.mxu0 %v1279_v21  ;;  %1853 = vmatpush.msra.mxu1 %v3385_v22  ;;  %v3352_v20 = vld [vmem:[%s4955_s30 + $0x588] sm:$0xff]  ;;  %v3410_v21 = vld [vmem:[%s4955_s30 + $0x758] sm:$0xff]  ;;  %v3367_v22 = vld [vmem:[%s4955_s30 + $0x600] sm:$0xff] }
 0x278   : > { %1547 = vmatmul.f32.vlgmr.msra.gmra.mxu3 %v5041_v23  ;;  %1592 = vmatpush.msrb.mxu2 %v1257_v24  ;;  %v3365_v24 = vld [vmem:[%s4955_s30 + $0x5f0] sm:$0xff] }
 0x279   : > { %1679 = vmatpush.msrb.mxu3 %v1294_v25  ;;  %1593 = vmatmul.f32.vlgmr.msrb.gmra.mxu2 %v5041_v23  ;;  %v3345_v25 = vld [vmem:[%s4955_s30 + $0x550] sm:$0xff] }
 0x27a   : > { %1636 = vmatpush.msra.mxu0 %v1272_v26  ;;  %1854 = vmatpush.msra.mxu1 %v3378_v27  ;;  %v3403_v26 = vld [vmem:[%s4955_s30 + $0x720] sm:$0xff]  ;;  %v3360_v27 = vld [vmem:[%s4955_s30 + $0x5c8] sm:$0xff] }
 0x27b   : > { %1680 = vmatpush.msrb.mxu3 %v1287_v28  ;;  %3304 = vmatmul.msk.f32.vlgmr.msrb.gmra.mxu1 %vm1386_vm0, %v4984_v44  ;;  %v3358_v28 = vld [vmem:[%s4955_s30 + $0x5b8] sm:$0xff] }
 0x27c   : > { %1637 = vmatpush.msra.mxu0 %v1265_v29  ;;  %1855 = vmatpush.msra.mxu1 %v3371_v30  ;;  %v3338_v29 = vld [vmem:[%s4955_s30 + $0x518] sm:$0xff]  ;;  %v3396_v30 = vld [vmem:[%s4955_s30 + $0x6e8] sm:$0xff] }
 0x27d   : > { %1681 = vmatpush.msrb.mxu3 %v1280_v31  ;;  %3754 = vmatpush.msra.mxu2 %v5077_v47  ;;  %v1385_v47 = vld [vmem:[%s4955_s30 + $0x420] sm:$0xff]  ;;  %v3353_v31 = vld [vmem:[%s4955_s30 + $0x590] sm:$0xff] }
 0x27e   : > { %1638 = vmatpush.msra.mxu0 %v1258_v32  ;;  %1856 = vmatpush.msra.mxu1 %v3364_v33  ;;  %v3351_v32 = vld [vmem:[%s4955_s30 + $0x580] sm:$0xff] }
 0x27f   : > { %1639 = vmatmul.f32.vlgmr.msra.gmra.mxu0 %v5041_v23  ;;  %1682 = vmatpush.msrb.mxu3 %v1273_v34  ;;  %v3331_v33 = vld [vmem:[%s4955_s30 + $0x4e0] sm:$0xff]  ;;  %v3389_v34 = vld [vmem:[%s4955_s30 + $0x6b0] sm:$0xff] }
 0x280   : > { %1885 = vmatpush.msrb.mxu0 %v3434_v35  ;;  %1857 = vmatpush.msra.mxu1 %v3357_v36  ;;  %v3346_v35 = vld [vmem:[%s4955_s30 + $0x558] sm:$0xff]  ;;  %v3344_v36 = vld [vmem:[%s4955_s30 + $0x548] sm:$0xff] }
 0x281   : > { %1550 = vmatmul.f32.gmra.mxu3 %v5068_v41  ;;  %1596 = vmatmul.f32.gmra.mxu2 %v5068_v41 }
 0x282   : > { %1683 = vmatpush.msrb.mxu3 %v1266_v37  ;;  %1886 = vmatpush.msrb.mxu0 %v3427_v38  ;;  %v3324_v37 = vld [vmem:[%s4955_s30 + $0x4a8] sm:$0xff]  ;;  %v3382_v38 = vld [vmem:[%s4955_s30 + $0x678] sm:$0xff] }
 0x283   : > { %3755 = vmatpush.msra.mxu2 %v5087_v52  ;;  %1858 = vmatpush.msra.mxu1 %v3350_v39  ;;  %v3329_v52 = vld [vmem:[%s4955_s30 + $0x4d0] sm:$0xff]  ;;  %v3339_v39 = vld [vmem:[%s4955_s30 + $0x520] sm:$0xff] }
 0x284   : > { %1684 = vmatpush.msrb.mxu3 %v1259_v40  ;;  %1887 = vmatpush.msrb.mxu0 %v3420_v42  ;;  %v3337_v40 = vld [vmem:[%s4955_s30 + $0x510] sm:$0xff] }
 0x285   : > { %3756 = vmatpush.msra.mxu2 %v5094_v56  ;;  %1859 = vmatpush.msra.mxu1 %v3343_v43  ;;  %v3416_v56 = vld [vmem:[%s4955_s30 + $0x788] sm:$0xff]  ;;  %v3317_v42 = vld [vmem:[%s4955_s30 + $0x470] sm:$0xff]  ;;  %v3375_v43 = vld [vmem:[%s4955_s30 + $0x640] sm:$0xff] }
 0x286   : > { %1931 = vmatpush.msra.mxu3 %v3435_v45  ;;  %1941 = vmatpush.msra.mxu0 %v3415_v46  ;;  %v3332_v45 = vld [vmem:[%s4955_s30 + $0x4e8] sm:$0xff]  ;;  %v3330_v46 = vld [vmem:[%s4955_s30 + $0x4d8] sm:$0xff] }
 0x287   : > { %1705 = vmatpush.msrb.mxu2 %v1385_v47  ;;  %1860 = vmatpush.msra.mxu1 %v3336_v48  ;;  %v3310_v47 = vld [vmem:[%s4955_s30 + $0x438] sm:$0xff]  ;;  %v3368_v48 = vld [vmem:[%s4955_s30 + $0x608] sm:$0xff] }
 0x288   : > { %1932 = vmatpush.msra.mxu3 %v3428_v49  ;;  %1942 = vmatpush.msra.mxu0 %v3408_v50  ;;  %v3325_v49 = vld [vmem:[%s4955_s30 + $0x4b0] sm:$0xff]  ;;  %v3438_v50 = vld [vmem:[%s4955_s30 + $0x838] sm:$0xff] }
 0x289   : > { %1642 = vmatmul.f32.gmra.mxu0 %v5068_v41  ;;  %3305 = vmatmul.msk.f32.gmra.mxu1 %vm1386_vm0, %v5028_v16 }
 0x28a   : > { %1706 = vmatpush.msrb.mxu2 %v1378_v51  ;;  %1861 = vmatpush.msra.mxu1 %v3329_v52  ;;  %v3323_v51 = vld [vmem:[%s4955_s30 + $0x4a0] sm:$0xff]  ;;  %v3361_v52 = vld [vmem:[%s4955_s30 + $0x5d0] sm:$0xff] }
 0x28b   : > { %1933 = vmatpush.msra.mxu3 %v3421_v53  ;;  %1943 = vmatpush.msra.mxu0 %v3401_v54  ;;  %v3431_v53 = vld [vmem:[%s4955_s30 + $0x800] sm:$0xff]  ;;  %v3318_v54 = vld [vmem:[%s4955_s30 + $0x478] sm:$0xff] }
 0x28c   : > { %1685 = vmatmul.f32.vlgmr.msrb.gmra.mxu3 %v5041_v23  ;;  %1707 = vmatpush.msrb.mxu2 %v1371_v55  ;;  %v3316_v55 = vld [vmem:[%s4955_s30 + $0x468] sm:$0xff] }
 0x28d   : > { %1987 = vmatpush.msrb.mxu3 %v3416_v56  ;;  %3303 = vmatmul.msk.f32.vlgmr.msra.gmra.mxu2 %vm1386_vm0, %v5028_v16  ;;  %v3354_v56 = vld [vmem:[%s4955_s30 + $0x598] sm:$0xff] }
 0x28e   : > { %1862 = vmatpush.msra.mxu1 %v3322_v57  ;;  %1895 = vmatpush.msra.mxu2 %v3414_v58  ;;  %v3424_v57 = vld [vmem:[%s4955_s30 + $0x7c8] sm:$0xff]  ;;  %v3311_v58 = vld [vmem:[%s4955_s30 + $0x440] sm:$0xff] }
 0x28f   : > { %1944 = vmatpush.msra.mxu0 %v3394_v59  ;;  %1988 = vmatpush.msrb.mxu3 %v3409_v60  ;;  %v3309_v59 = vld [vmem:[%s4955_s30 + $0x430] sm:$0xff]  ;;  %v3347_v60 = vld [vmem:[%s4955_s30 + $0x560] sm:$0xff] }
 0x290   : > { %1863 = vmatpush.msra.mxu1 %v3315_v61  ;;  %1896 = vmatpush.msra.mxu2 %v3407_v62  ;;  %v3439_v61 = vld [vmem:[%s4955_s30 + $0x840] sm:$0xff] }
 0x291   : > { %1945 = vmatpush.msra.mxu0 %v3387_v63  ;;  %1989 = vmatpush.msrb.mxu3 %v3402_v0  ;;  %v3419_v62 = vld [vmem:[%s4955_s30 + $0x7a0] sm:$0xff]  ;;  %v3437_v63 = vld [vmem:[%s4955_s30 + $0x830] sm:$0xff]  ;;  %v3340_v0 = vld [vmem:[%s4955_s30 + $0x528] sm:$0xff] }
 0x292   : > { %1864 = vmatpush.msra.mxu1 %v3308_v1  ;;  %1897 = vmatpush.msra.mxu2 %v3400_v2  ;;  %v3432_v1 = vld [vmem:[%s4955_s30 + $0x808] sm:$0xff] }
 0x293   : > { %1946 = vmatpush.msra.mxu0 %v3380_v3  ;;  %1865 = vmatmul.f32.vlgmr.msra.gmra.mxu1 %v5041_v23  ;;  %v3412_v2 = vld [vmem:[%s4955_s30 + $0x768] sm:$0xff]  ;;  %v3430_v3 = vld [vmem:[%s4955_s30 + $0x7f8] sm:$0xff] }
 0x294   : > { %3441 = vmatmul.msk.f32.vlgmr.msrb.gmra.mxu0 %vm1386_vm0, %v4984_v44  ;;  %1977 = vmatpush.msrb.mxu1 %v3436_v4  ;;  %v3333_v4 = vld [vmem:[%s4955_s30 + $0x4f0] sm:$0xff] }
 0x295   : > { %1990 = vmatpush.msrb.mxu3 %v3395_v5  ;;  %1898 = vmatpush.msra.mxu2 %v3393_v6  ;;  %v3425_v5 = vld [vmem:[%s4955_s30 + $0x7d0] sm:$0xff] }
 0x296   : > { %1947 = vmatpush.msra.mxu0 %v3373_v7  ;;  %1978 = vmatpush.msrb.mxu1 %v3429_v8  ;;  %v3405_v6 = vld [vmem:[%s4955_s30 + $0x730] sm:$0xff]  ;;  %v3423_v7 = vld [vmem:[%s4955_s30 + $0x7c0] sm:$0xff]  ;;  %v3560_v8 = vld [vmem:[%s4955_s30 + $0xb98] sm:$0xff] }
 0x297   : > { %1991 = vmatpush.msrb.mxu3 %v3388_v9  ;;  %3306 = vmatmul.msk.f32.vlgmr.msrb.gmra.mxu2 %vm1386_vm0, %v4984_v44  ;;  %v3326_v9 = vld [vmem:[%s4955_s30 + $0x4b8] sm:$0xff] }
 0x298   : > { %1899 = vmatpush.msra.mxu2 %v3386_v10  ;;  %1948 = vmatpush.msra.mxu0 %v3366_v11  ;;  %v3418_v10 = vld [vmem:[%s4955_s30 + $0x798] sm:$0xff] }
 0x299   : > { %1979 = vmatpush.msrb.mxu1 %v3422_v12  ;;  %1992 = vmatpush.msrb.mxu3 %v3381_v13  ;;  %v3398_v11 = vld [vmem:[%s4955_s30 + $0x6f8] sm:$0xff]  ;;  %v3553_v12 = vld [vmem:[%s4955_s30 + $0xb60] sm:$0xff] }
 0x29a   : > { %1900 = vmatpush.msra.mxu2 %v3379_v14  ;;  %1949 = vmatpush.msra.mxu0 %v3359_v15  ;;  %v3319_v13 = vld [vmem:[%s4955_s30 + $0x480] sm:$0xff] }
 0x29b   : > { %2033 = vmatpush.msra.mxu1 %v3417_v17  ;;  %1688 = vmatmul.f32.gmra.mxu3 %v5068_v41  ;;  %v3411_v14 = vld [vmem:[%s4955_s30 + $0x760] sm:$0xff]  ;;  %v3546_v17 = vld [vmem:[%s4955_s30 + $0xb28] sm:$0xff] }
 0x29c   : > { %1993 = vmatpush.msrb.mxu3 %v3374_v18  ;;  %1901 = vmatpush.msra.mxu2 %v3372_v19  ;;  %v3391_v15 = vld [vmem:[%s4955_s30 + $0x6c0] sm:$0xff]  ;;  %v3312_v18 = vld [vmem:[%s4955_s30 + $0x448] sm:$0xff] }
 0x29d   : > { %1950 = vmatpush.msra.mxu0 %v3352_v20  ;;  %2034 = vmatpush.msra.mxu1 %v3410_v21  ;;  %v3404_v19 = vld [vmem:[%s4955_s30 + $0x728] sm:$0xff] }
 0x29e   : > { %1868 = vmatmul.f32.gmra.mxu1 %v5068_v41  ;;  %3442 = vmatmul.msk.f32.gmra.mxu0 %vm1386_vm0, %v5028_v16  ;;  %v3384_v20 = vld [vmem:[%s4955_s30 + $0x688] sm:$0xff] }
 0x29f   : > { %1994 = vmatpush.msrb.mxu3 %v3367_v22  ;;  %1902 = vmatpush.msra.mxu2 %v3365_v24  ;;  %v3440_v21 = vld [vmem:[%s4955_s30 + $0x848] sm:$0xff]  ;;  %v3539_v22 = vld [vmem:[%s4955_s30 + $0xaf0] sm:$0xff] }
 0x2a0   : > { %1951 = vmatpush.msra.mxu0 %v3345_v25  ;;  %2035 = vmatpush.msra.mxu1 %v3403_v26  ;;  %v3397_v24 = vld [vmem:[%s4955_s30 + $0x6f0] sm:$0xff] }
 0x2a1   : > { %1995 = vmatpush.msrb.mxu3 %v3360_v27  ;;  %1903 = vmatpush.msra.mxu2 %v3358_v28  ;;  %v3377_v25 = vld [vmem:[%s4955_s30 + $0x650] sm:$0xff]  ;;  %v3532_v27 = vld [vmem:[%s4955_s30 + $0xab8] sm:$0xff] }
 0x2a2   : > { %1952 = vmatpush.msra.mxu0 %v3338_v29  ;;  %2036 = vmatpush.msra.mxu1 %v3396_v30  ;;  %v3433_v26 = vld [vmem:[%s4955_s30 + $0x810] sm:$0xff]  ;;  %v3390_v28 = vld [vmem:[%s4955_s30 + $0x6b8] sm:$0xff] }
 0x2a3   : > { %1996 = vmatpush.msrb.mxu3 %v3353_v31  ;;  %1904 = vmatpush.msra.mxu2 %v3351_v32  ;;  %v3370_v29 = vld [vmem:[%s4955_s30 + $0x618] sm:$0xff]  ;;  %v3525_v31 = vld [vmem:[%s4955_s30 + $0xa80] sm:$0xff] }
 0x2a4   : > { %1953 = vmatpush.msra.mxu0 %v3331_v33  ;;  %2037 = vmatpush.msra.mxu1 %v3389_v34  ;;  %v3426_v30 = vld [vmem:[%s4955_s30 + $0x7d8] sm:$0xff]  ;;  %v3383_v32 = vld [vmem:[%s4955_s30 + $0x680] sm:$0xff] }
 0x2a5   : > { %3443 = vmatmul.msk.f32.vlgmr.msra.gmra.mxu3 %vm1386_vm0, %v4984_v44  ;;  %3307 = vmatmul.msk.f32.gmra.mxu2 %vm1386_vm0, %v5028_v16  ;;  %v3363_v33 = vld [vmem:[%s4955_s30 + $0x5e0] sm:$0xff] }
 0x2a6   : > { %1997 = vmatpush.msrb.mxu3 %v3346_v35  ;;  %1905 = vmatpush.msra.mxu2 %v3344_v36  ;;  %v3561_v34 = vld [vmem:[%s4955_s30 + $0xba0] sm:$0xff]  ;;  %v3376_v35 = vld [vmem:[%s4955_s30 + $0x648] sm:$0xff] }
 0x2a7   : > { %1954 = vmatpush.msra.mxu0 %v3324_v37  ;;  %2038 = vmatpush.msra.mxu1 %v3382_v38  ;;  %v3356_v36 = vld [vmem:[%s4955_s30 + $0x5a8] sm:$0xff] }
 0x2a8   : > { %1998 = vmatpush.msrb.mxu3 %v3339_v39  ;;  %1906 = vmatpush.msra.mxu2 %v3337_v40  ;;  %v3554_v37 = vld [vmem:[%s4955_s30 + $0xb68] sm:$0xff]  ;;  %v3511_v39 = vld [vmem:[%s4955_s30 + $0xa10] sm:$0xff] }
 0x2a9   : > { %1955 = vmatpush.msra.mxu0 %v3317_v42  ;;  %2039 = vmatpush.msra.mxu1 %v3375_v43  ;;  %v5317_v38 = vld [vmem:[%s5955_s0 + $0x8] sm:$0xff]  ;;  %v3369_v40 = vld [vmem:[%s4955_s30 + $0x610] sm:$0xff] }
 0x2aa   : > { %1999 = vmatpush.msrb.mxu3 %v3332_v45  ;;  %1907 = vmatpush.msra.mxu2 %v3330_v46  ;;  %v3349_v42 = vld [vmem:[%s4955_s30 + $0x570] sm:$0xff]  ;;  %v3504_v45 = vld [vmem:[%s4955_s30 + $0x9d8] sm:$0xff] }
 0x2ab   : > { %1956 = vmatpush.msra.mxu0 %v3310_v47  ;;  %2040 = vmatpush.msra.mxu1 %v3368_v48  ;;  %v3547_v43 = vld [vmem:[%s4955_s30 + $0xb30] sm:$0xff]  ;;  %v3362_v46 = vld [vmem:[%s4955_s30 + $0x5d8] sm:$0xff] }
 0x2ac   : > { %1957 = vmatmul.f32.vlgmr.msra.gmra.mxu0 %v5041_v23  ;;  %3445 = vmatmul.msk.f32.vlgmr.msrb.gmra.mxu1 %vm1386_vm0, %v4984_v44  ;;  %v3342_v47 = vld [vmem:[%s4955_s30 + $0x538] sm:$0xff] }
 0x2ad   : > { %2000 = vmatpush.msrb.mxu3 %v3325_v49  ;;  %2069 = vmatpush.msrb.mxu0 %v3438_v50  ;;  %v3540_v48 = vld [vmem:[%s4955_s30 + $0xaf8] sm:$0xff]  ;;  %v3497_v50 = vld [vmem:[%s4955_s30 + $0x9a0] sm:$0xff] }
 0x2ae   : > { %1908 = vmatpush.msra.mxu2 %v3323_v51  ;;  %2041 = vmatpush.msra.mxu1 %v3361_v52  ;;  %v3355_v51 = vld [vmem:[%s4955_s30 + $0x5a0] sm:$0xff] }
 0x2af   : > { %3444 = vmatmul.msk.f32.gmra.mxu3 %vm1386_vm0, %v5028_v16  ;;  %2070 = vmatpush.msrb.mxu0 %v3431_v53  ;;  %v3335_v52 = vld [vmem:[%s4955_s30 + $0x500] sm:$0xff] }
 0x2b0   : > { %2001 = vmatpush.msrb.mxu3 %v3318_v54  ;;  %1909 = vmatpush.msra.mxu2 %v3316_v55  ;;  %v3533_v53 = vld [vmem:[%s4955_s30 + $0xac0] sm:$0xff]  ;;  %v3490_v54 = vld [vmem:[%s4955_s30 + $0x968] sm:$0xff] }
 0x2b1   : > { %2042 = vmatpush.msra.mxu1 %v3354_v56  ;;  %2071 = vmatpush.msrb.mxu0 %v3424_v57  ;;  %v3348_v55 = vld [vmem:[%s4955_s30 + $0x568] sm:$0xff] }
 0x2b2   : > { %2002 = vmatpush.msrb.mxu3 %v3311_v58  ;;  %1910 = vmatpush.msra.mxu2 %v3309_v59  ;;  %v3328_v56 = vld [vmem:[%s4955_s30 + $0x4c8] sm:$0xff]  ;;  %v3483_v58 = vld [vmem:[%s4955_s30 + $0x930] sm:$0xff] }
 0x2b3   : > { %2043 = vmatpush.msra.mxu1 %v3347_v60  ;;  %2125 = vmatpush.msra.mxu0 %v3419_v62  ;;  %v3526_v57 = vld [vmem:[%s4955_s30 + $0xa88] sm:$0xff]  ;;  %v3341_v59 = vld [vmem:[%s4955_s30 + $0x530] sm:$0xff]  ;;  %v3476_v62 = vld [vmem:[%s4955_s30 + $0x8f8] sm:$0xff] }
 0x2b4   : > { %2115 = vmatpush.msra.mxu3 %v3439_v61  ;;  %1911 = vmatmul.f32.vlgmr.msra.gmra.mxu2 %v5041_v23  ;;  %v3321_v60 = vld [vmem:[%s4955_s30 + $0x490] sm:$0xff] }
 0x2b5   : > { %2023 = vmatpush.msrb.mxu2 %v3437_v63  ;;  %2044 = vmatpush.msra.mxu1 %v3340_v0  ;;  %v3519_v61 = vld [vmem:[%s4955_s30 + $0xa50] sm:$0xff]  ;;  %v3334_v63 = vld [vmem:[%s4955_s30 + $0x4f8] sm:$0xff] }
 0x2b6   : > { %2116 = vmatpush.msra.mxu3 %v3432_v1  ;;  %2126 = vmatpush.msra.mxu0 %v3412_v2  ;;  %v3512_v0 = vld [vmem:[%s4955_s30 + $0xa18] sm:$0xff]  ;;  %v3469_v2 = vld [vmem:[%s4955_s30 + $0x8c0] sm:$0xff] }
 0x2b7   : > { %1960 = vmatmul.f32.gmra.mxu0 %v5068_v41  ;;  %3446 = vmatmul.msk.f32.gmra.mxu1 %vm1386_vm0, %v5028_v16 }
 0x2b8   : > { %2024 = vmatpush.msrb.mxu2 %v3430_v3  ;;  %2045 = vmatpush.msra.mxu1 %v3333_v4  ;;  %v3582_v3 = vld [vmem:[%s4955_s30 + $0xc48] sm:$0xff]  ;;  %v3327_v4 = vld [vmem:[%s4955_s30 + $0x4c0] sm:$0xff] }
 0x2b9   : > { %2117 = vmatpush.msra.mxu3 %v3425_v5  ;;  %2127 = vmatpush.msra.mxu0 %v3405_v6  ;;  %v3505_v5 = vld [vmem:[%s4955_s30 + $0x9e0] sm:$0xff] }
 0x2ba   : > { %2003 = vmatmul.f32.vlgmr.msrb.gmra.mxu3 %v5041_v23  ;;  %2025 = vmatpush.msrb.mxu2 %v3423_v7  ;;  %v3575_v7 = vld [vmem:[%s4955_s30 + $0xc10] sm:$0xff] }
 0x2bb   : > { %2319 = vmatpush.msrb.mxu3 %v3560_v8  ;;  %2046 = vmatpush.msra.mxu1 %v3326_v9  ;;  %v3462_v8 = vld [vmem:[%s4955_s30 + $0x888] sm:$0xff] }
 0x2bc   : > { %2079 = vmatpush.msra.mxu2 %v3418_v10  ;;  %2128 = vmatpush.msra.mxu0 %v3398_v11  ;;  %v3320_v9 = vld [vmem:[%s4955_s30 + $0x488] sm:$0xff]  ;;  %v3568_v11 = vld [vmem:[%s4955_s30 + $0xbd8] sm:$0xff] }
 0x2bd   : > { %2320 = vmatpush.msrb.mxu3 %v3553_v12  ;;  %2047 = vmatpush.msra.mxu1 %v3319_v13  ;;  %v3498_v10 = vld [vmem:[%s4955_s30 + $0x9a8] sm:$0xff]  ;;  %v3455_v12 = vld [vmem:[%s4955_s30 + $0x850] sm:$0xff] }
 0x2be   : > { %2080 = vmatpush.msra.mxu2 %v3411_v14  ;;  %2129 = vmatpush.msra.mxu0 %v3391_v15  ;;  %v3313_v13 = vld [vmem:[%s4955_s30 + $0x450] sm:$0xff] }
 0x2bf   : > { %1914 = vmatmul.f32.gmra.mxu2 %v5068_v41  ;;  %2321 = vmatpush.msrb.mxu3 %v3546_v17  ;;  %v3491_v14 = vld [vmem:[%s4955_s30 + $0x970] sm:$0xff] }
 0x2c0   : > { %2048 = vmatpush.msra.mxu1 %v3312_v18  ;;  %2081 = vmatpush.msra.mxu2 %v3404_v19  ;;  %v3583_v15 = vld [vmem:[%s4955_s30 + $0xc50] sm:$0xff]  ;;  %v3581_v18 = vld [vmem:[%s4955_s30 + $0xc40] sm:$0xff]  ;;  %v3484_v19 = vld [vmem:[%s4955_s30 + $0x938] sm:$0xff] }
 0x2c1   : > { %2130 = vmatpush.msra.mxu0 %v3384_v20  ;;  %2049 = vmatmul.f32.vlgmr.msra.gmra.mxu1 %v5041_v23  ;;  %v3563_v17 = vld [vmem:[%s4955_s30 + $0xbb0] sm:$0xff]  ;;  %v3576_v20 = vld [vmem:[%s4955_s30 + $0xc18] sm:$0xff] }
 0x2c2   : > { %3449 = vmatmul.msk.f32.vlgmr.msrb.gmra.mxu0 %vm1386_vm0, %v4984_v44  ;;  %2161 = vmatpush.msrb.mxu1 %v3440_v21  ;;  %v3518_v44 = vld [vmem:[%s4955_s30 + $0xa48] sm:$0xff]  ;;  %v3556_v21 = vld [vmem:[%s4955_s30 + $0xb78] sm:$0xff] }
 0x2c3   : > { %2322 = vmatpush.msrb.mxu3 %v3539_v22  ;;  %2082 = vmatpush.msra.mxu2 %v3397_v24  ;;  %v5391_v24 = vld [vmem:[%s5955_s0] sm:$0xff] }
 0x2c4   : > { %2131 = vmatpush.msra.mxu0 %v3377_v25  ;;  %2162 = vmatpush.msrb.mxu1 %v3433_v26  ;;  %v3574_v25 = vld [vmem:[%s4955_s30 + $0xc08] sm:$0xff]  ;;  %v3477_v26 = vld [vmem:[%s4955_s30 + $0x900] sm:$0xff] }
 0x2c5   : > { %2323 = vmatpush.msrb.mxu3 %v3532_v27  ;;  %2083 = vmatpush.msra.mxu2 %v3390_v28  ;;  %v5332_v49 = vpop.f32.mrf.mxu1  ;;  %v3569_v28 = vld [vmem:[%s4955_s30 + $0xbe0] sm:$0xff] }
 0x2c6   : > { %2132 = vmatpush.msra.mxu0 %v3370_v29  ;;  %2163 = vmatpush.msrb.mxu1 %v3426_v30  ;;  %v3549_v29 = vld [vmem:[%s4955_s30 + $0xb40] sm:$0xff]  ;;  %v3567_v30 = vld [vmem:[%s4955_s30 + $0xbd0] sm:$0xff] }
 0x2c7   : > { %2324 = vmatpush.msrb.mxu3 %v3525_v31  ;;  %2084 = vmatpush.msra.mxu2 %v3383_v32  ;;  %v3564_v31 = vld [vmem:[%s4955_s30 + $0xbb8] sm:$0xff]  ;;  %v5405_v32 = vpop.f32.mrf.mxu3 }
 0x2c8   : > { %2133 = vmatpush.msra.mxu0 %v3363_v33  ;;  %2365 = vmatpush.msra.mxu1 %v3561_v34  ;;  %v3470_v33 = vld [vmem:[%s4955_s30 + $0x8c8] sm:$0xff] }
 0x2c9   : > { %2006 = vmatmul.f32.gmra.mxu3 %v5068_v41  ;;  %3447 = vmatmul.msk.f32.vlgmr.msrb.gmra.mxu2 %vm1386_vm0, %v5317_v38  ;;  %v3562_v34 = vld [vmem:[%s4955_s30 + $0xba8] sm:$0xff] }
 0x2ca   : > { %2325 = vmatpush.msrb.mxu3 %v3518_v44  ;;  %2085 = vmatpush.msra.mxu2 %v3376_v35  ;;  %v3542_v44 = vld [vmem:[%s4955_s30 + $0xb08] sm:$0xff]  ;;  %v3463_v35 = vld [vmem:[%s4955_s30 + $0x890] sm:$0xff] }
 0x2cb   : > { %2134 = vmatpush.msra.mxu0 %v3356_v36  ;;  %2366 = vmatpush.msra.mxu1 %v3554_v37  ;;  %v3555_v36 = vld [vmem:[%s4955_s30 + $0xb70] sm:$0xff] }
 0x2cc   : > { %2052 = vmatmul.f32.gmra.mxu1 %v5068_v41  ;;  %3450 = vmatmul.msk.f32.gmra.mxu0 %vm1386_vm0, %v5028_v16  ;;  %v3535_v37 = vld [vmem:[%s4955_s30 + $0xad0] sm:$0xff] }
 0x2cd   : > { %2326 = vmatpush.msrb.mxu3 %v3511_v39  ;;  %2086 = vmatpush.msra.mxu2 %v3369_v40  ;;  %v5354_v1 = vpop.f32.mrf.mxu1  ;;  %v3550_v39 = vld [vmem:[%s4955_s30 + $0xb48] sm:$0xff]  ;;  %v3456_v40 = vld [vmem:[%s4955_s30 + $0x858] sm:$0xff] }
 0x2ce   : > { %2135 = vmatpush.msra.mxu0 %v3349_v42  ;;  %2367 = vmatpush.msra.mxu1 %v3547_v43  ;;  %v3548_v42 = vld [vmem:[%s4955_s30 + $0xb38] sm:$0xff] }
 0x2cf   : > { %2327 = vmatpush.msrb.mxu3 %v3504_v45  ;;  %2087 = vmatpush.msra.mxu2 %v3362_v46  ;;  %v3528_v46 = vld [vmem:[%s4955_s30 + $0xa98] sm:$0xff] }
 0x2d0   : > { %2136 = vmatpush.msra.mxu0 %v3342_v47  ;;  %2368 = vmatpush.msra.mxu1 %v3540_v48  ;;  %v5426_v47 = vld [vmem:[%s5955_s0 + $0x10] sm:$0xff]  ;;  %v3584_v48 = vld [vmem:[%s4955_s30 + $0xc58] sm:$0xff] }
 0x2d1   : > { %2328 = vmatpush.msrb.mxu3 %v3497_v50  ;;  %2088 = vmatpush.msra.mxu2 %v3355_v51  ;;  %v3543_v50 = vld [vmem:[%s4955_s30 + $0xb10] sm:$0xff]  ;;  %v3541_v51 = vld [vmem:[%s4955_s30 + $0xb00] sm:$0xff] }
 0x2d2   : > { %2137 = vmatpush.msra.mxu0 %v3335_v52  ;;  %2369 = vmatpush.msra.mxu1 %v3533_v53  ;;  %v3521_v53 = vld [vmem:[%s4955_s30 + $0xa60] sm:$0xff] }
 0x2d3   : > { %3448 = vmatmul.msk.f32.gmra.mxu2 %vm1386_vm0, %v5028_v16  ;;  %3451 = vmatmul.msk.f32.vlgmr.msra.gmra.mxu3 %vm1386_vm0, %v5317_v38  ;;  %v3314_v16 = vld [vmem:[%s4955_s30 + $0x458] sm:$0xff]  ;;  %v5360_v6 = vpop.f32.mrf.mxu0 }
 0x2d4   : > { %2329 = vmatpush.msrb.mxu3 %v3490_v54  ;;  %2089 = vmatpush.msra.mxu2 %v3348_v55  ;;  %v3577_v54 = vld [vmem:[%s4955_s30 + $0xc20] sm:$0xff]  ;;  %v3536_v55 = vld [vmem:[%s4955_s30 + $0xad8] sm:$0xff] }
 0x2d5   : > { %2138 = vmatpush.msra.mxu0 %v3328_v56  ;;  %2370 = vmatpush.msra.mxu1 %v3526_v57  ;;  %v3534_v56 = vld [vmem:[%s4955_s30 + $0xac8] sm:$0xff] }
 0x2d6   : > { %2330 = vmatpush.msrb.mxu3 %v3483_v58  ;;  %2090 = vmatpush.msra.mxu2 %v3341_v59  ;;  %v3514_v58 = vld [vmem:[%s4955_s30 + $0xa28] sm:$0xff] }
 0x2d7   : > { %2139 = vmatpush.msra.mxu0 %v3321_v60  ;;  %2371 = vmatpush.msra.mxu1 %v3519_v61  ;;  %v5441_v57 = vpop.f32.mrf.mxu2  ;;  %v3570_v59 = vld [vmem:[%s4955_s30 + $0xbe8] sm:$0xff]  ;;  %v3529_v60 = vld [vmem:[%s4955_s30 + $0xaa0] sm:$0xff]  ;;  %v3527_v61 = vld [vmem:[%s4955_s30 + $0xa90] sm:$0xff] }
 0x2d8   : > { %2331 = vmatpush.msrb.mxu3 %v3476_v62  ;;  %2091 = vmatpush.msra.mxu2 %v3334_v63  ;;  %v5386_v22 = vpop.f32.mrf.mxu1  ;;  %v3507_v62 = vld [vmem:[%s4955_s30 + $0x9f0] sm:$0xff]  ;;  %v3565_v63 = vld [vmem:[%s4955_s30 + $0xbc0] sm:$0xff] }
 0x2d9   : > { %2140 = vmatpush.msra.mxu0 %v3314_v16  ;;  %2372 = vmatpush.msra.mxu1 %v3512_v0  ;;  %v3522_v16 = vld [vmem:[%s4955_s30 + $0xa68] sm:$0xff]  ;;  %v3520_v0 = vld [vmem:[%s4955_s30 + $0xa58] sm:$0xff] }
 0x2da   : > { %2141 = vmatmul.f32.vlgmr.msra.gmra.mxu0 %v5041_v23  ;;  %3453 = vmatmul.msk.f32.vlgmr.msrb.gmra.mxu1 %vm1386_vm0, %v5317_v38  ;;  %v5373_v23 = vld [vmem:[%s5955_s0 + $0x18] sm:$0xff]  ;;  %v5432_v52 = vpop.f32.mrf.mxu3 }
 0x2db   : > { %2332 = vmatpush.msrb.mxu3 %v3469_v2  ;;  %2401 = vmatpush.msrb.mxu0 %v3582_v3 }
 0x2dc   : > { %2092 = vmatpush.msra.mxu2 %v3327_v4  ;;  %2373 = vmatpush.msra.mxu1 %v3505_v5  ;;  %v5396_v27 = vpop.f32.mrf.mxu0  ;;  %v3500_v4 = vld [vmem:[%s4955_s30 + $0x9b8] sm:$0xff]  ;;  %v3558_v5 = vld [vmem:[%s4955_s30 + $0xb88] sm:$0xff] }
 0x2dd   : > { %3452 = vmatmul.msk.f32.gmra.mxu3 %vm1386_vm0, %v5373_v23  ;;  %2402 = vmatpush.msrb.mxu0 %v3575_v7  ;;  %v3515_v7 = vld [vmem:[%s4955_s30 + $0xa30] sm:$0xff] }
 0x2de   : > { %2333 = vmatpush.msrb.mxu3 %v3462_v8  ;;  %2093 = vmatpush.msra.mxu2 %v3320_v9  ;;  %v3513_v8 = vld [vmem:[%s4955_s30 + $0xa20] sm:$0xff] }
 0x2df   : > { %2374 = vmatpush.msra.mxu1 %v3498_v10  ;;  %2403 = vmatpush.msrb.mxu0 %v3568_v11  ;;  %v3493_v11 = vld [vmem:[%s4955_s30 + $0x980] sm:$0xff] }
 0x2e0   : > { %2334 = vmatpush.msrb.mxu3 %v3455_v12  ;;  %2094 = vmatpush.msra.mxu2 %v3313_v13  ;;  %v5462_v9 = vpop.f32.mrf.mxu2  ;;  %v3551_v12 = vld [vmem:[%s4955_s30 + $0xb50] sm:$0xff]  ;;  %v3508_v13 = vld [vmem:[%s4955_s30 + $0x9f8] sm:$0xff] }
 0x2e1   : > { %2375 = vmatpush.msra.mxu1 %v3491_v14  ;;  %2457 = vmatpush.msra.mxu0 %v3563_v17  ;;  %v5418_v43 = vpop.f32.mrf.mxu1  ;;  %v3506_v14 = vld [vmem:[%s4955_s30 + $0x9e8] sm:$0xff]  ;;  %v3544_v17 = vld [vmem:[%s4955_s30 + $0xb18] sm:$0xff] }
 0x2e2   : > { %2447 = vmatpush.msra.mxu3 %v3583_v15  ;;  %2095 = vmatmul.f32.vlgmr.msra.gmra.mxu2 %v5391_v24  ;;  %v3486_v15 = vld [vmem:[%s4955_s30 + $0x948] sm:$0xff] }
 0x2e3   : > { %2355 = vmatpush.msrb.mxu2 %v3581_v18  ;;  %2376 = vmatpush.msra.mxu1 %v3484_v19  ;;  %v5464_v10 = vpop.f32.mrf.mxu3  ;;  %v3501_v18 = vld [vmem:[%s4955_s30 + $0x9c0] sm:$0xff]  ;;  %v3499_v19 = vld [vmem:[%s4955_s30 + $0x9b0] sm:$0xff] }
 0x2e4   : > { %2448 = vmatpush.msra.mxu3 %v3576_v20  ;;  %2458 = vmatpush.msra.mxu0 %v3556_v21  ;;  %v3479_v20 = vld [vmem:[%s4955_s30 + $0x910] sm:$0xff]  ;;  %v3537_v21 = vld [vmem:[%s4955_s30 + $0xae0] sm:$0xff] }
 0x2e5   : > { %2144 = vmatmul.f32.gmra.mxu0 %v5068_v41  ;;  %3454 = vmatmul.msk.f32.gmra.mxu1 %vm1386_vm0, %v5373_v23  ;;  %v3557_v41 = vld [vmem:[%s4955_s30 + $0xb80] sm:$0xff] }
 0x2e6   : > { %2356 = vmatpush.msrb.mxu2 %v3574_v25  ;;  %2377 = vmatpush.msra.mxu1 %v3477_v26  ;;  %v3494_v25 = vld [vmem:[%s4955_s30 + $0x988] sm:$0xff]  ;;  %v3492_v26 = vld [vmem:[%s4955_s30 + $0x978] sm:$0xff] }
 0x2e7   : > { %2449 = vmatpush.msra.mxu3 %v3569_v28  ;;  %2459 = vmatpush.msra.mxu0 %v3549_v29 }
 0x2e8   : > { %2335 = vmatmul.f32.vlgmr.msrb.gmra.mxu3 %v5391_v24  ;;  %2357 = vmatpush.msrb.mxu2 %v3567_v30  ;;  %v3472_v30 = vld [vmem:[%s4955_s30 + $0x8d8] sm:$0xff] }
 0x2e9   : > { %2503 = vmatpush.msrb.mxu3 %v3564_v31  ;;  %2378 = vmatpush.msra.mxu1 %v3470_v33  ;;  %v5420_v45 = vpop.f32.mrf.mxu0  ;;  %v3530_v31 = vld [vmem:[%s4955_s30 + $0xaa8] sm:$0xff] }
 0x2ea   : > { %2411 = vmatpush.msra.mxu2 %v3562_v34  ;;  %2460 = vmatpush.msra.mxu0 %v3542_v44  ;;  %v3487_v44 = vld [vmem:[%s4955_s30 + $0x950] sm:$0xff] }
 0x2eb   : > { %2504 = vmatpush.msrb.mxu3 %v3557_v41  ;;  %2379 = vmatpush.msra.mxu1 %v3463_v35  ;;  %v5453_v3 = vpop.f32.mrf.mxu1  ;;  %v3485_v41 = vld [vmem:[%s4955_s30 + $0x940] sm:$0xff] }
 0x2ec   : > { %2412 = vmatpush.msra.mxu2 %v3555_v36  ;;  %2461 = vmatpush.msra.mxu0 %v3535_v37  ;;  %v3465_v35 = vld [vmem:[%s4955_s30 + $0x8a0] sm:$0xff]  ;;  %v3523_v36 = vld [vmem:[%s4955_s30 + $0xa70] sm:$0xff] }
 0x2ed   : > { %2098 = vmatmul.f32.gmra.mxu2 %v5426_v47  ;;  %2505 = vmatpush.msrb.mxu3 %v3550_v39  ;;  %v3480_v39 = vld [vmem:[%s4955_s30 + $0x918] sm:$0xff] }
 0x2ee   : > { %2380 = vmatpush.msra.mxu1 %v3456_v40  ;;  %2413 = vmatpush.msra.mxu2 %v3548_v42  ;;  %v5495_v37 = vpop.f32.mrf.mxu3  ;;  %v3478_v40 = vld [vmem:[%s4955_s30 + $0x908] sm:$0xff] }
 0x2ef   : > { %2462 = vmatpush.msra.mxu0 %v3528_v46  ;;  %2381 = vmatmul.f32.vlgmr.msra.gmra.mxu1 %v5391_v24  ;;  %v3458_v42 = vld [vmem:[%s4955_s30 + $0x868] sm:$0xff]  ;;  %v3516_v46 = vld [vmem:[%s4955_s30 + $0xa38] sm:$0xff] }
 0x2f0   : > { %3590 = vmatmul.msk.f32.vlgmr.msrb.gmra.mxu0 %vm1386_vm0, %v5317_v38  ;;  %2493 = vmatpush.msrb.mxu1 %v3584_v48  ;;  %v3473_v48 = vld [vmem:[%s4955_s30 + $0x8e0] sm:$0xff] }
 0x2f1   : > { %2506 = vmatpush.msrb.mxu3 %v3543_v50  ;;  %2414 = vmatpush.msra.mxu2 %v3541_v51  ;;  %v3586_v50 = vld [vmem:[%s4955_s30 + $0xc68] sm:$0xff]  ;;  %v3471_v51 = vld [vmem:[%s4955_s30 + $0x8d0] sm:$0xff] }
 0x2f2   : > { %2463 = vmatpush.msra.mxu0 %v3521_v53  ;;  %2494 = vmatpush.msrb.mxu1 %v3577_v54  ;;  %v5451_v2 = vpop.f32.mrf.mxu0  ;;  %v3509_v53 = vld [vmem:[%s4955_s30 + $0xa00] sm:$0xff]  ;;  %v3579_v54 = vld [vmem:[%s4955_s30 + $0xc30] sm:$0xff] }
 0x2f3   : > { %2507 = vmatpush.msrb.mxu3 %v3536_v55  ;;  %2415 = vmatpush.msra.mxu2 %v3534_v56  ;;  %v3466_v55 = vld [vmem:[%s4955_s30 + $0x8a8] sm:$0xff]  ;;  %v3464_v56 = vld [vmem:[%s4955_s30 + $0x898] sm:$0xff] }
 0x2f4   : > { %2464 = vmatpush.msra.mxu0 %v3514_v58  ;;  %2495 = vmatpush.msrb.mxu1 %v3570_v59 }
 0x2f5   : > { %2508 = vmatpush.msrb.mxu3 %v3529_v60  ;;  %2416 = vmatpush.msra.mxu2 %v3527_v61  ;;  %v3502_v60 = vld [vmem:[%s4955_s30 + $0x9c8] sm:$0xff]  ;;  %v3572_v61 = vld [vmem:[%s4955_s30 + $0xbf8] sm:$0xff] }
 0x2f6   : > { %2465 = vmatpush.msra.mxu0 %v3507_v62  ;;  %2549 = vmatpush.msra.mxu1 %v3565_v63 }
 0x2f7   : > { %2338 = vmatmul.f32.gmra.mxu3 %v5426_v47  ;;  %3588 = vmatmul.msk.f32.vlgmr.msrb.gmra.mxu2 %vm1386_vm0, %v5317_v38 }
 0x2f8   : > { %2509 = vmatpush.msrb.mxu3 %v3522_v16  ;;  %2417 = vmatpush.msra.mxu2 %v3520_v0  ;;  %v1663_v29 = vpop.f32.mrf.mxu1  ;;  %v3459_v0 = vld [vmem:[%s4955_s30 + $0x870] sm:$0xff] }
 0x2f9   : > { %2466 = vmatpush.msra.mxu0 %v3500_v4  ;;  %2550 = vmatpush.msra.mxu1 %v3558_v5  ;;  %v3457_v4 = vld [vmem:[%s4955_s30 + $0x860] sm:$0xff]  ;;  %v3495_v5 = vld [vmem:[%s4955_s30 + $0x990] sm:$0xff] }
 0x2fa   : > { %2384 = vmatmul.f32.gmra.mxu1 %v5426_v47  ;;  %3591 = vmatmul.msk.f32.gmra.mxu0 %vm1386_vm0, %v5373_v23 }
 0x2fb   : > { %2510 = vmatpush.msrb.mxu3 %v3515_v7  ;;  %2418 = vmatpush.msra.mxu2 %v3513_v8  ;;  %v5515_v63 = vpop.f32.mrf.mxu3  ;;  %v3587_v7 = vld [vmem:[%s4955_s30 + $0xc70] sm:$0xff]  ;;  %v3707_v8 = vld [vmem:[%s4955_s30 + $0xfc0] sm:$0xff] }
 0x2fc   : > { %2467 = vmatpush.msra.mxu0 %v3493_v11  ;;  %2551 = vmatpush.msra.mxu1 %v3551_v12  ;;  %v1640_v28 = vpop.f32.mrf.mxu0  ;;  %v5485_v34 = vpop.f32.mrf.mxu2  ;;  %v3585_v11 = vld [vmem:[%s4955_s30 + $0xc60] sm:$0xff]  ;;  %v3488_v12 = vld [vmem:[%s4955_s30 + $0x958] sm:$0xff] }
 0x2fd   : > { %2511 = vmatpush.msrb.mxu3 %v3508_v13  ;;  %2419 = vmatpush.msra.mxu2 %v3506_v14  ;;  %v5483_v33 = vadd.f32 %v1663_v29, %v1640_v28  ;;  %v3580_v13 = vld [vmem:[%s4955_s30 + $0xc38] sm:$0xff]  ;;  %v3700_v14 = vld [vmem:[%s4955_s30 + $0xf88] sm:$0xff] }
 0x2fe   : > { %2468 = vmatpush.msra.mxu0 %v3486_v15  ;;  %2552 = vmatpush.msra.mxu1 %v3544_v17  ;;  %v3578_v15 = vld [vmem:[%s4955_s30 + $0xc28] sm:$0xff]  ;;  %v3481_v17 = vld [vmem:[%s4955_s30 + $0x920] sm:$0xff] }
 0x2ff   : > { %2512 = vmatpush.msrb.mxu3 %v3501_v18  ;;  %2420 = vmatpush.msra.mxu2 %v3499_v19  ;;  %v3573_v18 = vld [vmem:[%s4955_s30 + $0xc00] sm:$0xff]  ;;  %v3693_v19 = vld [vmem:[%s4955_s30 + $0xf50] sm:$0xff] }
 0x300   : > { %2469 = vmatpush.msra.mxu0 %v3479_v20  ;;  %2553 = vmatpush.msra.mxu1 %v3537_v21 }
 0x301   : > { %3589 = vmatmul.msk.f32.gmra.mxu2 %vm1386_vm0, %v5373_v23  ;;  %3592 = vmatmul.msk.f32.vlgmr.msra.gmra.mxu3 %vm1386_vm0, %v5317_v38 }
 0x302   : > { %2513 = vmatpush.msrb.mxu3 %v3494_v25  ;;  %2421 = vmatpush.msra.mxu2 %v3492_v26  ;;  %v3571_v25 = vld [vmem:[%s4955_s30 + $0xbf0] sm:$0xff] }
 0x303   : > { %2470 = vmatpush.msra.mxu0 %v3472_v30  ;;  %2554 = vmatpush.msra.mxu1 %v3530_v31  ;;  %v3708_v30 = vld [vmem:[%s4955_s30 + $0xfc8] sm:$0xff] }
 0x304   : > { %2514 = vmatpush.msrb.mxu3 %v3487_v44  ;;  %2422 = vmatpush.msra.mxu2 %v3485_v41  ;;  %v1597_v16 = vpop.f32.mrf.mxu2  ;;  %v1551_v28 = vpop.f32.mrf.mxu3  ;;  %v3474_v31 = vld [vmem:[%s4955_s30 + $0x8e8] sm:$0xff] }
 0x305   : > { %2471 = vmatpush.msra.mxu0 %v3465_v35  ;;  %2555 = vmatpush.msra.mxu1 %v3523_v36  ;;  %v5542_v44 = vadd.f32 %v5451_v2, %v1551_v28  ;;  %v3566_v35 = vld [vmem:[%s4955_s30 + $0xbc8] sm:$0xff]  ;;  %v3686_v36 = vld [vmem:[%s4955_s30 + $0xf18] sm:$0xff]  ;;  %v3559_v2 = vld [vmem:[%s4955_s30 + $0xb90] sm:$0xff] }
 0x306   : > { %2515 = vmatpush.msrb.mxu3 %v3480_v39  ;;  %2423 = vmatpush.msra.mxu2 %v3478_v40  ;;  %v1643_v58 = vpop.f32.mrf.mxu0  ;;  %v1666_v59 = vpop.f32.mrf.mxu1  ;;  %v3701_v39 = vld [vmem:[%s4955_s30 + $0xf90] sm:$0xff] }
 0x307   : > { %2472 = vmatpush.msra.mxu0 %v3458_v42  ;;  %2556 = vmatpush.msra.mxu1 %v3516_v46  ;;  %v5513_v62 = vadd.f32 %v1666_v59, %v1643_v58  ;;  %v3467_v40 = vld [vmem:[%s4955_s30 + $0x8b0] sm:$0xff]  ;;  %v3679_v42 = vld [vmem:[%s4955_s30 + $0xee0] sm:$0xff]  ;;  %v3694_v46 = vld [vmem:[%s4955_s30 + $0xf58] sm:$0xff] }
 0x308   : > { %2473 = vmatmul.f32.vlgmr.msra.gmra.mxu0 %v5391_v24  ;;  %3594 = vmatmul.msk.f32.vlgmr.msrb.gmra.mxu1 %vm1386_vm0, %v5317_v38  ;;  %v3665_v59 = vld [vmem:[%s4955_s30 + $0xe70] sm:$0xff] }
 0x309   : > { %2516 = vmatpush.msrb.mxu3 %v3473_v48  ;;  %2585 = vmatpush.msrb.mxu0 %v3586_v50  ;;  %v3460_v48 = vld [vmem:[%s4955_s30 + $0x878] sm:$0xff]  ;;  %v3637_v28 = vld [vmem:[%s4955_s30 + $0xd90] sm:$0xff] }
 0x30a   : > { %2424 = vmatpush.msra.mxu2 %v3471_v51  ;;  %2557 = vmatpush.msra.mxu1 %v3509_v53  ;;  %v3552_v50 = vld [vmem:[%s4955_s30 + $0xb58] sm:$0xff]  ;;  %v3672_v51 = vld [vmem:[%s4955_s30 + $0xea8] sm:$0xff] }
 0x30b   : > { %3593 = vmatmul.msk.f32.gmra.mxu3 %vm1386_vm0, %v5373_v23  ;;  %2586 = vmatpush.msrb.mxu0 %v3579_v54  ;;  %v3728_v53 = vld [vmem:[%s4955_s30 + $0x1068] sm:$0xff]  ;;  %v3687_v54 = vld [vmem:[%s4955_s30 + $0xf20] sm:$0xff] }
 0x30c   : > { %2517 = vmatpush.msrb.mxu3 %v3466_v55  ;;  %2425 = vmatpush.msra.mxu2 %v3464_v56  ;;  %v3545_v55 = vld [vmem:[%s4955_s30 + $0xb20] sm:$0xff] }
 0x30d   : > { %2558 = vmatpush.msra.mxu1 %v3502_v60  ;;  %2587 = vmatpush.msrb.mxu0 %v3572_v61  ;;  %v3721_v60 = vld [vmem:[%s4955_s30 + $0x1030] sm:$0xff] }
 0x30e   : > { %2518 = vmatpush.msrb.mxu3 %v3459_v0  ;;  %2426 = vmatpush.msra.mxu2 %v3457_v4  ;;  %v3538_v0 = vld [vmem:[%s4955_s30 + $0xae8] sm:$0xff] }
 0x30f   : > { %2559 = vmatpush.msra.mxu1 %v3495_v5  ;;  %2789 = vmatpush.msra.mxu0 %v3707_v8  ;;  %v1686_v4 = vpop.f32.mrf.mxu3  ;;  %v3714_v8 = vld [vmem:[%s4955_s30 + $0xff8] sm:$0xff] }
 0x310   : > { %2631 = vmatpush.msra.mxu3 %v3587_v7  ;;  %2427 = vmatmul.f32.vlgmr.msra.gmra.mxu2 %v5391_v24  ;;  %v1866_v20 = vpop.f32.mrf.mxu1  ;;  %v1620_v29 = vpop.f32.mrf.mxu2  ;;  %v3658_v7 = vld [vmem:[%s4955_s30 + $0xe38] sm:$0xff] }
 0x311   : > { %2539 = vmatpush.msrb.mxu2 %v3585_v11  ;;  %2560 = vmatpush.msra.mxu1 %v3488_v12  ;;  %v1889_v21 = vpop.f32.mrf.mxu0  ;;  %v5544_v41 = vadd.f32 %v1620_v29, %v1597_v16  ;;  %v3680_v16 = vld [vmem:[%s4955_s30 + $0xee8] sm:$0xff]  ;;  %v3673_v12 = vld [vmem:[%s4955_s30 + $0xeb0] sm:$0xff]  ;;  %v3695_v29 = vld [vmem:[%s4955_s30 + $0xf60] sm:$0xff] }
 0x312   : > { %2632 = vmatpush.msra.mxu3 %v3580_v13  ;;  %2790 = vmatpush.msra.mxu0 %v3700_v14  ;;  %v5537_v26 = vadd.f32 %v1889_v21, %v1866_v20  ;;  %v3531_v13 = vld [vmem:[%s4955_s30 + $0xab0] sm:$0xff]  ;;  %v3651_v14 = vld [vmem:[%s4955_s30 + $0xe00] sm:$0xff]  ;;  %v3702_v20 = vld [vmem:[%s4955_s30 + $0xf98] sm:$0xff] }
 0x313   : > { %2476 = vmatmul.f32.gmra.mxu0 %v5426_v47  ;;  %3595 = vmatmul.msk.f32.gmra.mxu1 %vm1386_vm0, %v5373_v23  ;;  %v3659_v21 = vld [vmem:[%s4955_s30 + $0xe40] sm:$0xff] }
 0x314   : > { %2540 = vmatpush.msrb.mxu2 %v3578_v15  ;;  %2561 = vmatpush.msra.mxu1 %v3481_v17  ;;  %v3709_v15 = vld [vmem:[%s4955_s30 + $0xfd0] sm:$0xff]  ;;  %v3666_v17 = vld [vmem:[%s4955_s30 + $0xe78] sm:$0xff] }
 0x315   : > { %2633 = vmatpush.msra.mxu3 %v3573_v18  ;;  %2791 = vmatpush.msra.mxu0 %v3693_v19  ;;  %v3524_v18 = vld [vmem:[%s4955_s30 + $0xa78] sm:$0xff]  ;;  %v3644_v19 = vld [vmem:[%s4955_s30 + $0xdc8] sm:$0xff] }
 0x316   : > { %2519 = vmatmul.f32.vlgmr.msrb.gmra.mxu3 %v5391_v24  ;;  %2541 = vmatpush.msrb.mxu2 %v3571_v25  ;;  %v3517_v25 = vld [vmem:[%s4955_s30 + $0xa40] sm:$0xff] }
 0x317   : > { %2835 = vmatpush.msrb.mxu3 %v3708_v30  ;;  %2562 = vmatpush.msra.mxu1 %v3474_v31  ;;  %v3652_v30 = vld [vmem:[%s4955_s30 + $0xe08] sm:$0xff] }
 0x318   : > { %2595 = vmatpush.msra.mxu2 %v3566_v35  ;;  %2792 = vmatpush.msra.mxu0 %v3686_v36  ;;  %v3510_v31 = vld [vmem:[%s4955_s30 + $0xa08] sm:$0xff]  ;;  %v3630_v35 = vld [vmem:[%s4955_s30 + $0xd58] sm:$0xff] }
 0x319   : > { %2836 = vmatpush.msrb.mxu3 %v3701_v39  ;;  %2563 = vmatpush.msra.mxu1 %v3467_v40  ;;  %v3688_v36 = vld [vmem:[%s4955_s30 + $0xf28] sm:$0xff]  ;;  %v3645_v39 = vld [vmem:[%s4955_s30 + $0xdd0] sm:$0xff] }
 0x31a   : > { %2596 = vmatpush.msra.mxu2 %v3559_v2  ;;  %2793 = vmatpush.msra.mxu0 %v3679_v42  ;;  %v1709_v5 = vpop.f32.mrf.mxu2  ;;  %v3503_v40 = vld [vmem:[%s4955_s30 + $0x9d0] sm:$0xff]  ;;  %v3623_v2 = vld [vmem:[%s4955_s30 + $0xd20] sm:$0xff] }
 0x31b   : > { %2430 = vmatmul.f32.gmra.mxu2 %v5426_v47  ;;  %2837 = vmatpush.msrb.mxu3 %v3694_v46  ;;  %v1869_v56 = vpop.f32.mrf.mxu1  ;;  %v1892_v58 = vpop.f32.mrf.mxu0  ;;  %v5572_v11 = vadd.f32 %v1709_v5, %v1686_v4  ;;  %v3681_v42 = vld [vmem:[%s4955_s30 + $0xef0] sm:$0xff]  ;;  %v3638_v46 = vld [vmem:[%s4955_s30 + $0xd98] sm:$0xff]  ;;  %v3624_v5 = vld [vmem:[%s4955_s30 + $0xd28] sm:$0xff] }
 0x31c   : > { %2564 = vmatpush.msra.mxu1 %v3460_v48  ;;  %2597 = vmatpush.msra.mxu2 %v3552_v50  ;;  %v5564_v61 = vadd.f32 %v1892_v58, %v1869_v56  ;;  %v3496_v48 = vld [vmem:[%s4955_s30 + $0x998] sm:$0xff]  ;;  %v3616_v50 = vld [vmem:[%s4955_s30 + $0xce8] sm:$0xff]  ;;  %v3489_v56 = vld [vmem:[%s4955_s30 + $0x960] sm:$0xff] }
 0x31d   : > { %2794 = vmatpush.msra.mxu0 %v3672_v51  ;;  %2565 = vmatmul.f32.vlgmr.msra.gmra.mxu1 %v5391_v24  ;;  %v3674_v51 = vld [vmem:[%s4955_s30 + $0xeb8] sm:$0xff] }
 0x31e   : > { %3598 = vmatmul.msk.f32.vlgmr.msrb.gmra.mxu0 %vm1386_vm0, %v5317_v38  ;;  %2825 = vmatpush.msrb.mxu1 %v3728_v53 }
 0x31f   : > { %2838 = vmatpush.msrb.mxu3 %v3687_v54  ;;  %2598 = vmatpush.msra.mxu2 %v3545_v55  ;;  %v3631_v55 = vld [vmem:[%s4955_s30 + $0xd60] sm:$0xff] }
 0x320   : > { %2795 = vmatpush.msra.mxu0 %v3665_v59  ;;  %2826 = vmatpush.msrb.mxu1 %v3721_v60  ;;  %v1689_v59 = vpop.f32.mrf.mxu3 }
 0x321   : > { %2839 = vmatpush.msrb.mxu3 %v3680_v16  ;;  %2599 = vmatpush.msra.mxu2 %v3538_v0  ;;  %v3609_v16 = vld [vmem:[%s4955_s30 + $0xcb0] sm:$0xff]  ;;  %v3667_v0 = vld [vmem:[%s4955_s30 + $0xe80] sm:$0xff] }
 0x322   : > { %2796 = vmatpush.msra.mxu0 %v3658_v7  ;;  %2827 = vmatpush.msrb.mxu1 %v3714_v8  ;;  %v3482_v7 = vld [vmem:[%s4955_s30 + $0x928] sm:$0xff]  ;;  %v3602_v8 = vld [vmem:[%s4955_s30 + $0xc78] sm:$0xff] }
 0x323   : > { %2840 = vmatpush.msrb.mxu3 %v3673_v12  ;;  %2600 = vmatpush.msra.mxu2 %v3531_v13  ;;  %v3660_v12 = vld [vmem:[%s4955_s30 + $0xe48] sm:$0xff]  ;;  %v3617_v13 = vld [vmem:[%s4955_s30 + $0xcf0] sm:$0xff] }
 0x324   : > { %2522 = vmatmul.f32.gmra.mxu3 %v5426_v47  ;;  %2797 = vmatpush.msra.mxu0 %v3651_v14  ;;  %v3730_v14 = vld [vmem:[%s4955_s30 + $0x1078] sm:$0xff] }
 0x325   : > { %2881 = vmatpush.msra.mxu1 %v3709_v15  ;;  %3596 = vmatmul.msk.f32.vlgmr.msrb.gmra.mxu2 %vm1386_vm0, %v5317_v38  ;;  %v3475_v15 = vld [vmem:[%s4955_s30 + $0x8f0] sm:$0xff] }
 0x326   : > { %2841 = vmatpush.msrb.mxu3 %v3666_v17  ;;  %2601 = vmatpush.msra.mxu2 %v3524_v18  ;;  %v3653_v17 = vld [vmem:[%s4955_s30 + $0xe10] sm:$0xff]  ;;  %v3610_v18 = vld [vmem:[%s4955_s30 + $0xcb8] sm:$0xff] }
 0x327   : > { %2798 = vmatpush.msra.mxu0 %v3644_v19  ;;  %2882 = vmatpush.msra.mxu1 %v3702_v20  ;;  %v3723_v19 = vld [vmem:[%s4955_s30 + $0x1040] sm:$0xff]  ;;  %v3468_v20 = vld [vmem:[%s4955_s30 + $0x8b8] sm:$0xff] }
 0x328   : > { %2568 = vmatmul.f32.gmra.mxu1 %v5426_v47  ;;  %3599 = vmatmul.msk.f32.gmra.mxu0 %vm1386_vm0, %v5373_v23  ;;  %v1712_v60 = vpop.f32.mrf.mxu2 }
 0x329   : > { %2842 = vmatpush.msrb.mxu3 %v3659_v21  ;;  %2602 = vmatpush.msra.mxu2 %v3517_v25  ;;  %v1958_v53 = vpop.f32.mrf.mxu0  ;;  %v1981_v54 = vpop.f32.mrf.mxu1  ;;  %v5614_v4 = vadd.f32 %v1712_v60, %v1689_v59  ;;  %v3646_v21 = vld [vmem:[%s4955_s30 + $0xdd8] sm:$0xff]  ;;  %v3603_v25 = vld [vmem:[%s4955_s30 + $0xc80] sm:$0xff] }
 0x32a   : > { %2799 = vmatpush.msra.mxu0 %v3637_v28  ;;  %2883 = vmatpush.msra.mxu1 %v3695_v29  ;;  %v5610_v58 = vadd.f32 %v1981_v54, %v1958_v53  ;;  %v3722_v53 = vld [vmem:[%s4955_s30 + $0x1038] sm:$0xff]  ;;  %v3625_v54 = vld [vmem:[%s4955_s30 + $0xd30] sm:$0xff]  ;;  %v3715_v59 = vld [vmem:[%s4955_s30 + $0x1000] sm:$0xff] }
 0x32b   : > { %2843 = vmatpush.msrb.mxu3 %v3652_v30  ;;  %2603 = vmatpush.msra.mxu2 %v3510_v31  ;;  %v3461_v30 = vld [vmem:[%s4955_s30 + $0x880] sm:$0xff] }
 0x32c   : > { %2800 = vmatpush.msra.mxu0 %v3630_v35  ;;  %2884 = vmatpush.msra.mxu1 %v3688_v36  ;;  %v3639_v35 = vld [vmem:[%s4955_s30 + $0xda0] sm:$0xff] }
 0x32d   : > { %2844 = vmatpush.msrb.mxu3 %v3645_v39  ;;  %2604 = vmatpush.msra.mxu2 %v3503_v40  ;;  %v3731_v36 = vld [vmem:[%s4955_s30 + $0x1080] sm:$0xff]  ;;  %v1935_v39 = vpop.f32.mrf.mxu3 }
 0x32e   : > { %3600 = vmatmul.msk.f32.vlgmr.msra.gmra.mxu3 %vm1386_vm0, %v5317_v38  ;;  %2801 = vmatpush.msra.mxu0 %v3623_v2  ;;  %v3711_v40 = vld [vmem:[%s4955_s30 + $0xfe0] sm:$0xff]  ;;  %v3729_v2 = vld [vmem:[%s4955_s30 + $0x1070] sm:$0xff] }
 0x32f   : > { %2885 = vmatpush.msra.mxu1 %v3681_v42  ;;  %3597 = vmatmul.msk.f32.gmra.mxu2 %vm1386_vm0, %v5373_v23  ;;  %v3632_v42 = vld [vmem:[%s4955_s30 + $0xd68] sm:$0xff] }
 0x330   : > { %2845 = vmatpush.msrb.mxu3 %v3638_v46  ;;  %2605 = vmatpush.msra.mxu2 %v3496_v48  ;;  %v3724_v46 = vld [vmem:[%s4955_s30 + $0x1048] sm:$0xff] }
 0x331   : > { %2802 = vmatpush.msra.mxu0 %v3616_v50  ;;  %2886 = vmatpush.msra.mxu1 %v3674_v51  ;;  %v3704_v48 = vld [vmem:[%s4955_s30 + $0xfa8] sm:$0xff] }
 0x332   : > { %2846 = vmatpush.msrb.mxu3 %v3631_v55  ;;  %2606 = vmatpush.msra.mxu2 %v3489_v56  ;;  %v3717_v55 = vld [vmem:[%s4955_s30 + $0x1010] sm:$0xff] }
 0x333   : > { %2803 = vmatpush.msra.mxu0 %v3609_v16  ;;  %2887 = vmatpush.msra.mxu1 %v3667_v0  ;;  %v3697_v56 = vld [vmem:[%s4955_s30 + $0xf70] sm:$0xff]  ;;  %v3712_v0 = vld [vmem:[%s4955_s30 + $0xfe8] sm:$0xff] }
 0x334   : > { %2847 = vmatpush.msrb.mxu3 %v3624_v5  ;;  %2607 = vmatpush.msra.mxu2 %v3482_v7  ;;  %v1961_v28 = vpop.f32.mrf.mxu0  ;;  %v1984_v29 = vpop.f32.mrf.mxu1  ;;  %v3618_v5 = vld [vmem:[%s4955_s30 + $0xcf8] sm:$0xff] }
 0x335   : > { %2804 = vmatpush.msra.mxu0 %v3602_v8  ;;  %2888 = vmatpush.msra.mxu1 %v3660_v12  ;;  %v5636_v31 = vadd.f32 %v1984_v29, %v1961_v28  ;;  %v3710_v8 = vld [vmem:[%s4955_s30 + $0xfd8] sm:$0xff]  ;;  %v3696_v28 = vld [vmem:[%s4955_s30 + $0xf68] sm:$0xff] }
 0x336   : > { %2805 = vmatmul.f32.vlgmr.msra.gmra.mxu0 %v5391_v24  ;;  %3735 = vmatmul.msk.f32.vlgmr.msrb.gmra.mxu1 %vm1386_vm0, %v5317_v38  ;;  %v3716_v38 = vld [vmem:[%s4955_s30 + $0x1008] sm:$0xff]  ;;  %v3690_v12 = vld [vmem:[%s4955_s30 + $0xf38] sm:$0xff] }
 0x337   : > { %2848 = vmatpush.msrb.mxu3 %v3617_v13  ;;  %2917 = vmatpush.msrb.mxu0 %v3730_v14  ;;  %v1912_v50 = vpop.f32.mrf.mxu2  ;;  %v3705_v13 = vld [vmem:[%s4955_s30 + $0xfb0] sm:$0xff]  ;;  %v3611_v14 = vld [vmem:[%s4955_s30 + $0xcc0] sm:$0xff] }
 0x338   : > { %2608 = vmatpush.msra.mxu2 %v3475_v15  ;;  %3601 = vmatmul.msk.f32.gmra.mxu3 %vm1386_vm0, %v5373_v23  ;;  %v5646_v51 = vadd.f32 %v1935_v39, %v1912_v50  ;;  %v1938_v15 = vpop.f32.mrf.mxu3  ;;  %v3689_v39 = vld [vmem:[%s4955_s30 + $0xf30] sm:$0xff] }
 0x339   : > { %2889 = vmatpush.msra.mxu1 %v3653_v17  ;;  %2849 = vmatpush.msrb.mxu3 %v3610_v18  ;;  %v3703_v17 = vld [vmem:[%s4955_s30 + $0xfa0] sm:$0xff]  ;;  %v3725_v50 = vld [vmem:[%s4955_s30 + $0x1050] sm:$0xff] }
 0x33a   : > { %2918 = vmatpush.msrb.mxu0 %v3723_v19  ;;  %2609 = vmatpush.msra.mxu2 %v3468_v20  ;;  %v3683_v18 = vld [vmem:[%s4955_s30 + $0xf00] sm:$0xff]  ;;  %v3698_v19 = vld [vmem:[%s4955_s30 + $0xf78] sm:$0xff] }
 0x33b   : > { %2890 = vmatpush.msra.mxu1 %v3646_v21  ;;  %2850 = vmatpush.msrb.mxu3 %v3603_v25  ;;  %v3125_v20 = vld [vmem:[%s5956_s1] sm:$0xff]  ;;  %v3604_v25 = vld [vmem:[%s4955_s30 + $0xc88] sm:$0xff] }
 0x33c   : > { %2919 = vmatpush.msrb.mxu0 %v3716_v38  ;;  %2610 = vmatpush.msra.mxu2 %v3461_v30  ;;  %v3821_v38 = vmov 0   ;;  %v3676_v30 = vld [vmem:[%s4955_s30 + $0xec8] sm:$0xff] }
 0x33d   : > { %2891 = vmatpush.msra.mxu1 %v3639_v35  ;;  %2963 = vmatpush.msra.mxu3 %v3731_v36  ;;  %v3732_v35 = vld [vmem:[%s4955_s30 + $0x1088] sm:$0xff]  ;;  %v3691_v36 = vld [vmem:[%s4955_s30 + $0xf40] sm:$0xff] }
 0x33e   : > { %2973 = vmatpush.msra.mxu0 %v3711_v40  ;;  %2611 = vmatmul.f32.vlgmr.msra.gmra.mxu2 %v5391_v24  ;;  %v2050_v60 = vpop.f32.mrf.mxu1 }
 0x33f   : > { %2871 = vmatpush.msrb.mxu2 %v3729_v2  ;;  %2892 = vmatpush.msra.mxu1 %v3632_v42  ;;  %v2073_v16 = vpop.f32.mrf.mxu0  ;;  %v3669_v42 = vld [vmem:[%s4955_s30 + $0xe90] sm:$0xff] }
 0x340   : > { %2964 = vmatpush.msra.mxu3 %v3724_v46  ;;  %2974 = vmatpush.msra.mxu0 %v3704_v48  ;;  %v5659_v7 = vadd.f32 %v2073_v16, %v2050_v60  ;;  %v5687_v48 = vld [vmem:[%s5955_s0 + $0x8] sm:$0xff]  ;;  %v3677_v60 = vld [vmem:[%s4955_s30 + $0xed0] sm:$0xff] }
 0x341   : > { %2808 = vmatmul.f32.gmra.mxu0 %v5426_v47  ;;  %3736 = vmatmul.msk.f32.gmra.mxu1 %vm1386_vm0, %v5373_v23 }
 0x342   : > { %2872 = vmatpush.msrb.mxu2 %v3722_v53  ;;  %2851 = vmatmul.f32.vlgmr.msrb.gmra.mxu3 %v5391_v24  ;;  %v1915_v21 = vpop.f32.mrf.mxu2  ;;  %v3684_v53 = vld [vmem:[%s4955_s30 + $0xf08] sm:$0xff] }
 0x343   : > { %2893 = vmatpush.msra.mxu1 %v3625_v54  ;;  %2965 = vmatpush.msra.mxu3 %v3717_v55  ;;  %v5673_v29 = vadd.f32 %v1938_v15, %v1915_v21  ;;  %v3662_v54 = vld [vmem:[%s4955_s30 + $0xe58] sm:$0xff]  ;;  %v3668_v15 = vld [vmem:[%s4955_s30 + $0xe88] sm:$0xff] }
 0x344   : > { %2975 = vmatpush.msra.mxu0 %v3697_v56  ;;  %2873 = vmatpush.msrb.mxu2 %v3715_v59  ;;  %v2004_v56 = vpop.f32.mrf.mxu3  ;;  %v3718_v59 = vld [vmem:[%s4955_s30 + $0x1018] sm:$0xff] }
 0x345   : > { %3019 = vmatpush.msrb.mxu3 %v3712_v0  ;;  %2894 = vmatpush.msra.mxu1 %v3618_v5  ;;  %v3675_v0 = vld [vmem:[%s4955_s30 + $0xec0] sm:$0xff] }
 0x346   : > { %2927 = vmatpush.msra.mxu2 %v3710_v8  ;;  %2976 = vmatpush.msra.mxu0 %v3690_v12  ;;  %v3655_v5 = vld [vmem:[%s4955_s30 + $0xe20] sm:$0xff]  ;;  %v3713_v12 = vld [vmem:[%s4955_s30 + $0xff0] sm:$0xff] }
 0x347   : > { %3020 = vmatpush.msrb.mxu3 %v3705_v13  ;;  %2895 = vmatpush.msra.mxu1 %v3611_v14  ;;  %v3670_v13 = vld [vmem:[%s4955_s30 + $0xe98] sm:$0xff]  ;;  %v3126_v14 = vld [vmem:[%s5956_s1 + $0x8] sm:$0xff] }
 0x348   : > { %2928 = vmatpush.msra.mxu2 %v3703_v17  ;;  %2977 = vmatpush.msra.mxu0 %v3683_v18  ;;  %v3648_v17 = vld [vmem:[%s4955_s30 + $0xde8] sm:$0xff]  ;;  %v3706_v18 = vld [vmem:[%s4955_s30 + $0xfb8] sm:$0xff] }
 0x349   : > { %3788 = vset.pattern.permute.xlu0 %v3821_v38  ;;  %2614 = vmatmul.f32.gmra.mxu2 %v5426_v47  ;;  %v2053_v40 = vpop.f32.mrf.mxu1  ;;  %v2076_v2 = vpop.f32.mrf.mxu0 }
 0x34a   : > { %3021 = vmatpush.msrb.mxu3 %v3698_v19  ;;  %3129 = vperm.xlu0 %3788, %v3125_v20   ;;  %v5682_v46 = vadd.f32 %v2076_v2, %v2053_v40  ;;  %v3663_v19 = vld [vmem:[%s4955_s30 + $0xe60] sm:$0xff]  ;;  %v3661_v20 = vld [vmem:[%s4955_s30 + $0xe50] sm:$0xff]  ;;  %v3692_v2 = vld [vmem:[%s4955_s30 + $0xf48] sm:$0xff] }
 0x34b   : > { %2896 = vmatpush.msra.mxu1 %v3604_v25  ;;  %2929 = vmatpush.msra.mxu2 %v3696_v28  ;;  %v3641_v25 = vld [vmem:[%s4955_s30 + $0xdb0] sm:$0xff]  ;;  %v3699_v28 = vld [vmem:[%s4955_s30 + $0xf80] sm:$0xff] }
 0x34c   : > { %2978 = vmatpush.msra.mxu0 %v3676_v30  ;;  %2897 = vmatmul.f32.vlgmr.msra.gmra.mxu1 %v5391_v24  ;;  %v3682_v24 = vld [vmem:[%s4955_s30 + $0xef8] sm:$0xff]  ;;  %v2182_v55 = vmax.f32 %v5544_v41, %v5682_v46  ;;  %v2027_v16 = vpop.f32.mrf.mxu2  ;;  %v2007_v21 = vpop.f32.mrf.mxu3 }
 0x34d   : > { %3739 = vmatmul.msk.f32.vlgmr.msrb.gmra.mxu0 %vm1386_vm0, %v5687_v48  ;;  %3009 = vmatpush.msrb.mxu1 %v3732_v35  ;;  %v5702_v8 = vadd.f32 %v2027_v16, %v2004_v56  ;;  %v3656_v35 = vld [vmem:[%s4955_s30 + $0xe28] sm:$0xff] }
 0x34e   : > { %3022 = vmatpush.msrb.mxu3 %v3691_v36  ;;  %2930 = vmatpush.msra.mxu2 %v3689_v39  ;;  %v3654_v36 = vld [vmem:[%s4955_s30 + $0xe18] sm:$0xff]  ;;  %v3620_v16 = vld [vmem:[%s4955_s30 + $0xd08] sm:$0xff] }
 0x34f   : > { %2854 = vmatmul.f32.gmra.mxu3 %v5426_v47  ;;  %2979 = vmatpush.msra.mxu0 %v3669_v42 }
 0x350   : > { %3010 = vmatpush.msrb.mxu1 %v3725_v50  ;;  %3023 = vmatpush.msrb.mxu3 %v3684_v53  ;;  %v3647_v50 = vld [vmem:[%s4955_s30 + $0xde0] sm:$0xff] }
 0x351   : > { %2931 = vmatpush.msra.mxu2 %v3682_v24  ;;  %2980 = vmatpush.msra.mxu0 %v3662_v54  ;;  %v3627_v24 = vld [vmem:[%s4955_s30 + $0xd40] sm:$0xff]  ;;  %v3685_v54 = vld [vmem:[%s4955_s30 + $0xf10] sm:$0xff] }
 0x352   : > { %3011 = vmatpush.msrb.mxu1 %v3718_v59  ;;  %3024 = vmatpush.msrb.mxu3 %v3677_v60  ;;  %v3642_v59 = vld [vmem:[%s4955_s30 + $0xdb8] sm:$0xff]  ;;  %v3640_v60 = vld [vmem:[%s4955_s30 + $0xda8] sm:$0xff] }
 0x353   : > { %2932 = vmatpush.msra.mxu2 %v3675_v0  ;;  %2981 = vmatpush.msra.mxu0 %v3655_v5  ;;  %v3678_v0 = vld [vmem:[%s4955_s30 + $0xed8] sm:$0xff]  ;;  %v3635_v5 = vld [vmem:[%s4955_s30 + $0xd80] sm:$0xff] }
 0x354   : > { %3065 = vmatpush.msra.mxu1 %v3713_v12  ;;  %3737 = vmatmul.msk.f32.vlgmr.msrb.gmra.mxu2 %vm1386_vm0, %v5687_v48  ;;  %v5747_v12 = vld [vmem:[%s5955_s0 + $0x18] sm:$0xff] }
 0x355   : > { %3025 = vmatpush.msrb.mxu3 %v3670_v13  ;;  %3134 = vperm.xlu0 %3788, %v3126_v14   ;;  %v3633_v13 = vld [vmem:[%s4955_s30 + $0xd70] sm:$0xff] }
 0x356   : > { %2933 = vmatpush.msra.mxu2 %v3668_v15  ;;  %2982 = vmatpush.msra.mxu0 %v3648_v17  ;;  %v2030_v38 = vpop.f32.mrf.mxu2  ;;  %v3613_v14 = vld [vmem:[%s4955_s30 + $0xcd0] sm:$0xff]  ;;  %v3671_v15 = vld [vmem:[%s4955_s30 + $0xea0] sm:$0xff]  ;;  %v3628_v17 = vld [vmem:[%s4955_s30 + $0xd48] sm:$0xff] }
 0x357   : > { %3066 = vmatpush.msra.mxu1 %v3706_v18  ;;  %3740 = vmatmul.msk.f32.gmra.mxu0 %vm1386_vm0, %v5373_v23  ;;  %v2142_v30 = vpop.f32.mrf.mxu0  ;;  %v5723_v39 = vadd.f32 %v2030_v38, %v2007_v21  ;;  %v2165_v40 = vpop.f32.mrf.mxu1  ;;  %v3634_v23 = vld [vmem:[%s4955_s30 + $0xd78] sm:$0xff]  ;;  %v3664_v21 = vld [vmem:[%s4955_s30 + $0xe68] sm:$0xff] }
 0x358   : > { %2900 = vmatmul.f32.gmra.mxu1 %v5426_v47  ;;  %3026 = vmatpush.msrb.mxu3 %v3663_v19  ;;  %v5729_v42 = vadd.f32 %v2165_v40, %v2142_v30  ;;  %v3649_v47 = vld [vmem:[%s4955_s30 + $0xdf0] sm:$0xff]  ;;  %v3626_v18 = vld [vmem:[%s4955_s30 + $0xd38] sm:$0xff]  ;;  %v2119_v19 = vpop.f32.mrf.mxu3 }
 0x359   : > { %2934 = vmatpush.msra.mxu2 %v3661_v20  ;;  %3741 = vmatmul.msk.f32.vlgmr.msra.gmra.mxu3 %vm1386_vm0, %v5687_v48  ;;  %v2181_v53 = vmax.f32 %v5542_v44, %v5723_v39  ;;  %v3606_v20 = vld [vmem:[%s4955_s30 + $0xc98] sm:$0xff]  ;;  %v3621_v30 = vld [vmem:[%s4955_s30 + $0xd10] sm:$0xff] }
 0x35a   : > { %2983 = vmatpush.msra.mxu0 %v3641_v25  ;;  %3067 = vmatpush.msra.mxu1 %v3699_v28  ;;  %v2177_v56 = vmax.f32 %v5572_v11, %v5729_v42  ;;  %v3734_v40 = vld [vmem:[%s4955_s30 + $0x1098] sm:$0xff] }
 0x35b   : > { %3027 = vmatpush.msrb.mxu3 %v3656_v35  ;;  %2935 = vmatpush.msra.mxu2 %v3654_v36  ;;  %v3619_v35 = vld [vmem:[%s4955_s30 + $0xd00] sm:$0xff]  ;;  %v3657_v36 = vld [vmem:[%s4955_s30 + $0xe30] sm:$0xff] }
 0x35c   : > { %2984 = vmatpush.msra.mxu0 %v3634_v23  ;;  %3068 = vmatpush.msra.mxu1 %v3692_v2 }
 0x35d   : > { %3028 = vmatpush.msrb.mxu3 %v3649_v47  ;;  %2936 = vmatpush.msra.mxu2 %v3647_v50  ;;  %v3795_v47 = vld [vmem:[%s5955_s0] sm:$0xff]  ;;  %v3614_v50 = vld [vmem:[%s4955_s30 + $0xcd8] sm:$0xff] }
 0x35e   : > { %2985 = vmatpush.msra.mxu0 %v3627_v24  ;;  %3069 = vmatpush.msra.mxu1 %v3685_v54  ;;  %v3612_v24 = vld [vmem:[%s4955_s30 + $0xcc8] sm:$0xff] }
 0x35f   : > { %3738 = vmatmul.msk.f32.gmra.mxu2 %vm1386_vm0, %v5747_v12  ;;  %3029 = vmatpush.msrb.mxu3 %v3642_v59  ;;  %v3650_v59 = vld [vmem:[%s4955_s30 + $0xdf8] sm:$0xff] }
 0x360   : > { %2937 = vmatpush.msra.mxu2 %v3640_v60  ;;  %2986 = vmatpush.msra.mxu0 %v3620_v16  ;;  %v3727_v60 = vld [vmem:[%s4955_s30 + $0x1060] sm:$0xff] }
 0x361   : > { %3070 = vmatpush.msra.mxu1 %v3678_v0  ;;  %3030 = vmatpush.msrb.mxu3 %v3635_v5  ;;  %v3607_v16 = vld [vmem:[%s4955_s30 + $0xca0] sm:$0xff]  ;;  %v3605_v0 = vld [vmem:[%s4955_s30 + $0xc90] sm:$0xff] }
 0x362   : > { %2938 = vmatpush.msra.mxu2 %v3633_v13  ;;  %3742 = vmatmul.msk.f32.gmra.mxu3 %vm1386_vm0, %v5747_v12  ;;  %v2145_v25 = vpop.f32.mrf.mxu0  ;;  %v2168_v28 = vpop.f32.mrf.mxu1  ;;  %v3643_v13 = vld [vmem:[%s4955_s30 + $0xdc0] sm:$0xff] }
 0x363   : > { %2987 = vmatpush.msra.mxu0 %v3613_v14  ;;  %3071 = vmatpush.msra.mxu1 %v3671_v15  ;;  %v5760_v38 = vadd.f32 %v2168_v28, %v2145_v25  ;;  %v3733_v14 = vld [vmem:[%s4955_s30 + $0x1090] sm:$0xff]  ;;  %v3636_v15 = vld [vmem:[%s4955_s30 + $0xd88] sm:$0xff] }
 0x364   : > { %3031 = vmatpush.msrb.mxu3 %v3628_v17  ;;  %2939 = vmatpush.msra.mxu2 %v3626_v18  ;;  %v1480_v17 = vadd.f32 %v5405_v32, %v5441_v57  ;;  %v2122_v18 = vpop.f32.mrf.mxu3  ;;  %v3796_v32 = vld [vmem:[%s5955_s0 + $0x10] sm:$0xff]  ;;  %v3622_v57 = vld [vmem:[%s4955_s30 + $0xd18] sm:$0xff] }
 0x365   : > { %2988 = vmatpush.msra.mxu0 %v3606_v20  ;;  %3072 = vmatpush.msra.mxu1 %v3664_v21  ;;  %v2184_v23 = vmax.f32 %v5614_v4, %v5760_v38  ;;  %v2096_v2 = vpop.f32.mrf.mxu2  ;;  %v3629_v20 = vld [vmem:[%s4955_s30 + $0xd50] sm:$0xff]  ;;  %v3726_v21 = vld [vmem:[%s4955_s30 + $0x1058] sm:$0xff] }
 0x366   : > { %2989 = vmatmul.f32.vlgmr.msra.gmra.mxu0 %v3795_v47  ;;  %3743 = vmatmul.msk.f32.vlgmr.msrb.gmra.mxu1 %vm1386_vm0, %v5687_v48  ;;  %v5775_v54 = vadd.f32 %v2119_v19, %v2096_v2  ;;  %v2172_v28 = vmax.f32 %v1480_v17, %v5646_v51  ;;  %v3615_v2 = vld [vmem:[%s4955_s30 + $0xce0] sm:$0xff] }
 0x367   : > { %3032 = vmatpush.msrb.mxu3 %v3621_v30  ;;  %2940 = vmatpush.msra.mxu2 %v3619_v35  ;;  %v3720_v30 = vld [vmem:[%s4955_s30 + $0x1028] sm:$0xff] }
 0x368   : > { %3073 = vmatpush.msra.mxu1 %v3657_v36  ;;  %3101 = vmatpush.msrb.mxu0 %v3734_v40  ;;  %v2176_v5 = vmax.f32 %v5483_v33, %v5775_v54  ;;  %v3719_v36 = vld [vmem:[%s4955_s30 + $0x1020] sm:$0xff]  ;;  %v1434_v33 = vadd.f32 %v5332_v49, %v5360_v6  ;;  %v1437_v49 = vadd.f32 %v5354_v1, %v5396_v27 }
 0x369   : > { %3033 = vmatpush.msrb.mxu3 %v3614_v50  ;;  %2941 = vmatpush.msra.mxu2 %v3612_v24  ;;  %v3608_v24 = vld [vmem:[%s4955_s30 + $0xca8] sm:$0xff]  ;;  %s3762_s30 = smul.u32 112, %s1225_s28 }
 0x36a   : > { %3074 = vmatpush.msra.mxu1 %v3650_v59  ;;  %3102 = vmatpush.msrb.mxu0 %v3727_v60  ;;  %s3753_s28 = smul.u32 (%p3872_p5), 56, %s3288_s15 }
 0x36b   : > { %3034 = vmatpush.msrb.mxu3 %v3607_v16  ;;  %2942 = vmatpush.msra.mxu2 %v3605_v0  ;;  %v1483_v16 = vadd.f32 %v5432_v52, %v5462_v9  ;;  %v1572_v9 = vadd.f32 %v5420_v45, %v5515_v63  ;;  %s5857_s12 = scalar_lea.vmem [#allocation3], %s3762_s30 }
 0x36c   : > { %3035 = vmatmul.f32.vlgmr.msrb.gmra.mxu3 %v3795_v47  ;;  %3075 = vmatpush.msra.mxu1 %v3643_v13  ;;  %v2382_v19 = vpop.f32.mrf.mxu1  ;;  %v2336_v0 = vpop.f32.mrf.mxu3  ;;  %s3188_s20 = scalar_lea.vmem (%p3872_p5), %s5958_s3, %s3753_s28 }
 0x36d   : > { %2943 = vmatmul.f32.vlgmr.msra.gmra.mxu2 %v3795_v47  ;;  %3757 = vmatpush.msra.mxu3 %v3734_v40  ;;  %v2405_v25 = vpop.f32.mrf.mxu0 }
 0x36e   : > { %3055 = vmatpush.msrb.mxu2 %v3733_v14  ;;  %3076 = vmatpush.msra.mxu1 %v3636_v15  ;;  %v2406_v35 = vadd.f32 %v2405_v25, %v2382_v19  ;;  %v2179_v14 = vmax.f32 %v1483_v16, %v5673_v29  ;;  %v2174_v29 = vmax.f32 %v1572_v9, %v5702_v8 }
 0x36f   : > { %2992 = vmatmul.f32.gmra.mxu0 %v3796_v32  ;;  %3744 = vmatmul.msk.f32.gmra.mxu1 %vm1386_vm0, %v5747_v12 }
 0x370   : > { %3077 = vmatpush.msra.mxu1 %v3629_v20  ;;  %3056 = vmatpush.msrb.mxu2 %v3726_v21  ;;  %v5799_v40 = vmax.f32 %v2172_v28, %v2406_v35  ;;  %v2099_v51 = vpop.f32.mrf.mxu2 }
 0x371   : > { %3103 = vmatpush.msrb.mxu0 %v3720_v30  ;;  %3758 = vmatpush.msra.mxu3 %v3727_v60  ;;  %v2123_v50 = vadd.f32 %v2122_v18, %v2099_v51 }
 0x372   : > { %3078 = vmatpush.msra.mxu1 %v3622_v57  ;;  %3057 = vmatpush.msrb.mxu2 %v3719_v36 }
 0x373   : > { %3759 = vmatpush.msra.mxu3 %v3720_v30  ;;  %v2183_v59 = vmax.f32 %v5513_v62, %v2123_v50 }
 0x374   : > { %3038 = vmatmul.f32.gmra.mxu3 %v3796_v32  ;;  %3079 = vmatpush.msra.mxu1 %v3615_v2 }
 0x375   : > { %2946 = vmatmul.f32.gmra.mxu2 %v3796_v32 }
 0x376   : > { %3080 = vmatpush.msra.mxu1 %v3608_v24 }
 0x377   : > { %3081 = vmatmul.f32.vlgmr.msra.gmra.mxu1 %v3795_v47  ;;  %3747 = vmatmul.msk.f32.vlgmr.msrb.gmra.mxu0 %vm1386_vm0, %v5687_v48  ;;  %v2385_v60 = vpop.f32.mrf.mxu1  ;;  %v2408_v13 = vpop.f32.mrf.mxu0 }
 0x378   : > { %v2409_v15 = vadd.f32 %v2408_v13, %v2385_v60  ;;  %v2171_v13 = vmax.f32 %v1434_v33, %v5537_v26 }
 0x37a   : > { %v5809_v17 = vmax.f32 %v2179_v14, %v2409_v15  ;;  %v2339_v52 = vpop.f32.mrf.mxu3  ;;  %v2359_v21 = vpop.f32.mrf.mxu2 }
 0x37b   : > { %v2360_v54 = vadd.f32 %v2359_v21, %v2336_v0  ;;  %v2178_v21 = vmax.f32 %v1437_v49, %v5564_v61 }
 0x37c   : > { %3748 = vmatmul.msk.f32.vlgmr.msra.gmra.mxu3 %vm1386_vm0, %v5747_v12 }
 0x37d   : > { %3745 = vmatmul.msk.f32.vlgmr.msrb.gmra.mxu2 %vm1386_vm0, %v5687_v48  ;;  %v2641_v15 = vmax.f32 %v2171_v13, %v2360_v54 }
 0x37f   : > { %3084 = vmatmul.f32.gmra.mxu1 %v3796_v32 }
 0x384   : > { %v2451_v20 = vpop.f32.mrf.mxu3  ;;  %v2362_v63 = vpop.f32.mrf.mxu2 }
 0x385   : > { %3746 = vmatmul.msk.f32.gmra.mxu2 %vm1386_vm0, %v5747_v12  ;;  %v2474_v62 = vpop.f32.mrf.mxu0  ;;  %v2497_v47 = vpop.f32.mrf.mxu1  ;;  %v2363_v6 = vadd.f32 %v2362_v63, %v2339_v52 }
 0x386   : > { %v2498_v18 = vadd.f32 %v2497_v47, %v2474_v62 }
 0x388   : > { %v5820_v19 = vmax.f32 %v2174_v29, %v2498_v18 }
 0x38e   : > { %v2454_v45 = vpop.f32.mrf.mxu3 }
 0x390   : > { %v2477_v25 = vpop.f32.mrf.mxu0  ;;  %v2500_v28 = vpop.f32.mrf.mxu1 }
 0x391   : > { %v2501_v48 = vadd.f32 %v2500_v28, %v2477_v25  ;;  %v2648_v28 = vmax.f32 %v2178_v21, %v2363_v6 }
 0x393   : > { %v5825_v30 = vmax.f32 %v2181_v53, %v2501_v48  ;;  %v2428_v57 = vpop.f32.mrf.mxu2 }
 0x394   : > { %v2452_v1 = vadd.f32 %v2451_v20, %v2428_v57  ;;  %v1529_v20 = vadd.f32 %v5495_v37, %v5418_v43 }
 0x399   : > { %v5832_v36 = vpop.f32.mrf.mxu3 }
 0x39a   : > { %v2566_v12 = vpop.f32.mrf.mxu1 }
 0x39b   : > { %v2589_v35 = vpop.f32.mrf.mxu0 }
 0x39c   : > { %v2590_v32 = vadd.f32 %v2589_v35, %v2566_v12  ;;  %v1526_v35 = vadd.f32 %v5464_v10, %v5386_v22 }
 0x39e   : > { %v5830_v8 = vmax.f32 %v2176_v5, %v2590_v32  ;;  %v2431_v44 = vpop.f32.mrf.mxu2  ;;  %v2173_v63 = vmax.f32 %v1526_v35, %v5610_v58  ;;  %v2180_v58 = vmax.f32 %v1529_v20, %v5636_v31  ;;  %v1618_v31 = vadd.f32 %v5453_v3, %v5485_v34 }
 0x39f   : > { %v2455_v57 = vadd.f32 %v2454_v45, %v2431_v44 }
 0x3a0   : > { %v2175_v21 = vmax.f32 %v1618_v31, %v5659_v7 }
 0x3a5   : > { %v2569_v51 = vpop.f32.mrf.mxu1  ;;  %v2592_v2 = vpop.f32.mrf.mxu0 }
 0x3a6   : > { %v2593_v50 = vadd.f32 %v2592_v2, %v2569_v51 }
 0x3a7   : > { %v5836_v53 = vpop.f32.mrf.mxu3 }
 0x3a8   : > { %v5834_v39 = vmax.f32 %v2183_v59, %v2593_v50  ;;  %v5838_v24 = vpop.f32.mrf.mxu2  ;;  %v2643_v50 = vmax.f32 %v2173_v63, %v2452_v1 }
 0x3a9   : > { %v2544_v44 = vadd.f32 %v5838_v24, %v5832_v36 }
 0x3ab   : > { %v2645_v35 = vmax.f32 %v2175_v21, %v2544_v44 }
 0x3b1   : > { %v5840_v16 = vpop.f32.mrf.mxu3 }
 0x3b2   : > { %v5847_v59 = vpop.f32.mrf.mxu2 }
 0x3b3   : > { %v2806_v5 = vpop.f32.mrf.mxu0  ;;  %v2829_v60 = vpop.f32.mrf.mxu1  ;;  %v2547_v36 = vadd.f32 %v5847_v59, %v5836_v53 }
 0x3b4   : > { %v2830_v14 = vadd.f32 %v2829_v60, %v2806_v5 }
 0x3b6   : > { %v3111_v9 = vmax.f32 %v2641_v15, %v2830_v14  ;;  %v2650_v15 = vmax.f32 %v2180_v58, %v2455_v57 }
 0x3bb   : > { %v5852_v29 = vpop.f32.mrf.mxu3 }
 0x3bc   : > { %v5849_v62 = vpop.permute.xlu0 %3129 }
 0x3bd   : > { %v3137_v47 = vadd.f32 %v5849_v62, %v3111_v9 }
 0x3be   : > { %v2809_v0 = vpop.f32.mrf.mxu0  ;;  %v2832_v18 = vpop.f32.mrf.mxu1 }
 0x3bf   : > { %v3151_v26 = vmax.f32 %v3137_v47, 0.0  ;;  %v2833_v25 = vadd.f32 %v2832_v18, %v2809_v0 }
 0x3c1   : > { %3165 = vst [vmem:[%s5857_s12] sm:$0xff] %v3151_v26  ;;  %v5860_v48 = vpop.f32.mrf.mxu2  ;;  %v3118_v12 = vmax.f32 %v2648_v28, %v2833_v25 }
 0x3c5   : > { %v2852_v61 = vpop.f32.mrf.mxu3 }
 0x3c7   : > { %v5864_v27 = vpop.permute.xlu0 %3134 }
 0x3c8   : > { %v3144_v52 = vadd.f32 %v5864_v27, %v3118_v12 }
 0x3c9   : > { %v2898_v32 = vpop.f32.mrf.mxu1 }
 0x3ca   : > { %v3158_v51 = vmax.f32 %v3144_v52, 0.0  ;;  %v2921_v2 = vpop.f32.mrf.mxu0 }
 0x3cb   : > { %v2922_v33 = vadd.f32 %v2921_v2, %v2898_v32 }
 0x3cc   : > { %3172 = vst [vmem:[%s5857_s12 + $0x38] sm:$0xff] %v3158_v51  ;;  %v5869_v5 = vpop.f32.mrf.mxu2 }
 0x3cd   : > { %v3113_v54 = vmax.f32 %v2643_v50, %v2922_v33  ;;  %v2639_v11 = vadd.f32 %v5852_v29, %v5869_v5 }
 0x3cf   : > { %v3139_v22 = vadd.f32 %v5849_v62, %v3113_v54 }
 0x3d1   : > { %v3153_v10 = vmax.f32 %v3139_v22, 0.0  ;;  %v2636_v22 = vadd.f32 %v5840_v16, %v5860_v48 }
 0x3d2   : > { %v2855_v60 = vpop.f32.mrf.mxu3 }
 0x3d3   : > { %3167 = vst [vmem:[%s5857_s12 + $0x10] sm:$0xff] %v3153_v10  ;;  %v2647_v41 = vmax.f32 %v2177_v56, %v2636_v22 }
 0x3d4   : > { %v2924_v13 = vpop.f32.mrf.mxu0 }
 0x3d5   : > { %v2901_v14 = vpop.f32.mrf.mxu1 }
 0x3d6   : > { %v2925_v9 = vadd.f32 %v2924_v13, %v2901_v14 }
 0x3d7   : > { %v2875_v47 = vpop.f32.mrf.mxu2 }
 0x3d8   : > { %v3120_v49 = vmax.f32 %v2650_v15, %v2925_v9  ;;  %v2876_v6 = vadd.f32 %v2875_v47, %v2852_v61 }
 0x3da   : > { %v3146_v0 = vadd.f32 %v5864_v27, %v3120_v49  ;;  %v3112_v18 = vmax.f32 %v5799_v40, %v2876_v6  ;;  %v2654_v6 = vmax.f32 %v2184_v23, %v2639_v11 }
 0x3dc   : > { %v3160_v26 = vmax.f32 %v3146_v0, 0.0  ;;  %v3138_v43 = vadd.f32 %v5849_v62, %v3112_v18  ;;  %v2967_v37 = vpop.f32.mrf.mxu3 }
 0x3de   : > { %3174 = vst [vmem:[%s5857_s12 + $0x48] sm:$0xff] %v3160_v26  ;;  %v3152_v45 = vmax.f32 %v3138_v43, 0.0 }
 0x3e0   : > { %3166 = vst [vmem:[%s5857_s12 + $0x8] sm:$0xff] %v3152_v45 }
 0x3e2   : > { %v2878_v25 = vpop.f32.mrf.mxu2 }
 0x3e3   : > { %v2879_v28 = vadd.f32 %v2878_v25, %v2855_v60  ;;  %v2990_v40 = vpop.f32.mrf.mxu0  ;;  %v3013_v12 = vpop.f32.mrf.mxu1 }
 0x3e4   : > { %v3014_v1 = vadd.f32 %v3013_v12, %v2990_v40  ;;  %v3215_v40 = vld [vmem:[%s5857_s12 + $0x38] sm:$0xff] (%p3872_p5) }
 0x3e5   : > { %v3119_v52 = vmax.f32 %v5809_v17, %v2879_v28  ;;  %v2970_v61 = vpop.f32.mrf.mxu3  ;;  %v2652_v17 = vmax.f32 %v2182_v55, %v2547_v36  ;;  %3216 = vst [vmem:[%s3188_s20 + $0xe0] sm:$0xff] (%p3872_p5), %v3215_v40 }
 0x3e6   : > { %v3115_v63 = vmax.f32 %v2645_v35, %v3014_v1  ;;  %v3219_v35 = vld [vmem:[%s5857_s12 + $0x48] sm:$0xff] (%p3872_p5) }
 0x3e7   : > { %v3145_v3 = vadd.f32 %v5864_v27, %v3119_v52  ;;  %3220 = vst [vmem:[%s3188_s20 + $0xf0] sm:$0xff] (%p3872_p5), %v3219_v35 }
 0x3e8   : > { %v3141_v34 = vadd.f32 %v5849_v62, %v3115_v63 }
 0x3e9   : > { %v3159_v24 = vmax.f32 %v3145_v3, 0.0 }
 0x3ea   : > { %v3155_v7 = vmax.f32 %v3141_v34, 0.0 }
 0x3eb   : > { %3173 = vst [vmem:[%s5857_s12 + $0x40] sm:$0xff] %v3159_v24 }
 0x3ec   : > { %3169 = vst [vmem:[%s5857_s12 + $0x20] sm:$0xff] %v3155_v7  ;;  %v2993_v32 = vpop.f32.mrf.mxu0  ;;  %v3016_v51 = vpop.f32.mrf.mxu1 }
 0x3ed   : > { %v3017_v2 = vadd.f32 %v3016_v51, %v2993_v32 }
 0x3ef   : > { %v3122_v50 = vmax.f32 %v2652_v17, %v3017_v2  ;;  %v3036_v33 = vpop.f32.mrf.mxu3 }
 0x3f0   : > { %v2944_v54 = vpop.f32.mrf.mxu2 }
 0x3f1   : > { %v3148_v53 = vadd.f32 %v5864_v27, %v3122_v50  ;;  %v2968_v59 = vadd.f32 %v2967_v37, %v2944_v54 }
 0x3f2   : > { %v3217_v12 = vld [vmem:[%s5857_s12 + $0x40] sm:$0xff] (%p3872_p5) }
 0x3f3   : > { %v3162_v10 = vmax.f32 %v3148_v53, 0.0  ;;  %v3114_v20 = vmax.f32 %v5820_v19, %v2968_v59  ;;  %v3209_v21 = vld [vmem:[%s5857_s12 + $0x20] sm:$0xff] (%p3872_p5)  ;;  %3218 = vst [vmem:[%s3188_s20 + $0xe8] sm:$0xff] (%p3872_p5), %v3217_v12 }
 0x3f4   : > { %v3082_v57 = vpop.f32.mrf.mxu1  ;;  %v3105_v60 = vpop.f32.mrf.mxu0  ;;  %3210 = vst [vmem:[%s3188_s20 + $0x20] sm:$0xff] (%p3872_p5), %v3209_v21 }
 0x3f5   : > { %3176 = vst [vmem:[%s5857_s12 + $0x58] sm:$0xff] %v3162_v10  ;;  %v3140_v46 = vadd.f32 %v5849_v62, %v3114_v20  ;;  %v3106_v55 = vadd.f32 %v3105_v60, %v3082_v57 }
 0x3f7   : > { %v3154_v58 = vmax.f32 %v3140_v46, 0.0  ;;  %v3117_v13 = vmax.f32 %v2647_v41, %v3106_v55  ;;  %v3039_v16 = vpop.f32.mrf.mxu3 }
 0x3f8   : > { %v2947_v48 = vpop.f32.mrf.mxu2 }
 0x3f9   : > { %3168 = vst [vmem:[%s5857_s12 + $0x18] sm:$0xff] %v3154_v58  ;;  %v3143_v14 = vadd.f32 %v5849_v62, %v3117_v13  ;;  %v2971_v19 = vadd.f32 %v2970_v61, %v2947_v48 }
 0x3fb   : > { %v3157_v15 = vmax.f32 %v3143_v14, 0.0  ;;  %v3121_v9 = vmax.f32 %v5825_v30, %v2971_v19 }
 0x3fc   : > { %v3085_v56 = vpop.f32.mrf.mxu1  ;;  %v3223_v52 = vld [vmem:[%s5857_s12 + $0x58] sm:$0xff] (%p3872_p5) }
 0x3fd   : > { %3171 = vst [vmem:[%s5857_s12 + $0x30] sm:$0xff] %v3157_v15  ;;  %v3147_v42 = vadd.f32 %v5864_v27, %v3121_v9 }
 0x3fe   : > { %3224 = vst [vmem:[%s3188_s20 + $0x100] sm:$0xff] (%p3872_p5), %v3223_v52 }
 0x3ff   : > { %v3161_v47 = vmax.f32 %v3147_v42, 0.0  ;;  %v3108_v49 = vpop.f32.mrf.mxu3 }
 0x400   : > { %v3109_v0 = vadd.f32 %v3108_v49, %v3085_v56  ;;  %v3059_v18 = vpop.f32.mrf.mxu2 }
 0x401   : > { %3175 = vst [vmem:[%s5857_s12 + $0x50] sm:$0xff] %v3161_v47  ;;  %v3060_v30 = vadd.f32 %v3059_v18, %v3036_v33 }
 0x402   : > { %v3124_v26 = vmax.f32 %v2654_v6, %v3109_v0 }
 0x403   : > { %v3116_v29 = vmax.f32 %v5830_v8, %v3060_v30  ;;  %v3201_v8 = vld [vmem:[%s5857_s12] sm:$0xff] (%p3872_p5) }
 0x404   : > { %v3150_v5 = vadd.f32 %v5864_v27, %v3124_v26  ;;  %3202 = vst [vmem:[%s3188_s20] sm:$0xff] (%p3872_p5), %v3201_v8  ;;  %v3213_v28 = vld [vmem:[%s5857_s12 + $0x30] sm:$0xff] (%p3872_p5) }
 0x405   : > { %v3142_v43 = vadd.f32 %v5849_v62, %v3116_v29  ;;  %v3205_v62 = vld [vmem:[%s5857_s12 + $0x10] sm:$0xff] (%p3872_p5)  ;;  %3214 = vst [vmem:[%s3188_s20 + $0x30] sm:$0xff] (%p3872_p5), %v3213_v28 }
 0x406   : > { %v3164_v37 = vmax.f32 %v3150_v5, 0.0  ;;  %3206 = vst [vmem:[%s3188_s20 + $0x10] sm:$0xff] (%p3872_p5), %v3205_v62 }
 0x407   : > { %v3156_v45 = vmax.f32 %v3142_v43, 0.0 }
 0x408   : > { %3178 = vst [vmem:[%s5857_s12 + $0x68] sm:$0xff] %v3164_v37  ;;  %v3062_v31 = vpop.f32.mrf.mxu2  ;;  %v3221_v1 = vld [vmem:[%s5857_s12 + $0x50] sm:$0xff] (%p3872_p5) }
 0x409   : > { %3170 = vst [vmem:[%s5857_s12 + $0x28] sm:$0xff] %v3156_v45  ;;  %v3063_v44 = vadd.f32 %v3062_v31, %v3039_v16 }
 0x40a   : > { %3222 = vst [vmem:[%s3188_s20 + $0xf8] sm:$0xff] (%p3872_p5), %v3221_v1 }
 0x40b   : > { %v3123_v4 = vmax.f32 %v5834_v39, %v3063_v44  ;;  %v3203_v39 = vld [vmem:[%s5857_s12 + $0x8] sm:$0xff] (%p3872_p5) }
 0x40c   : > { %3204 = vst [vmem:[%s3188_s20 + $0x8] sm:$0xff] (%p3872_p5), %v3203_v39 }
 0x40d   : > { %v3149_v38 = vadd.f32 %v5864_v27, %v3123_v4  ;;  %3185 = sbr.rel (!%p3872_p5) target bundleno = 1050 (0x41a), region = 59  ;;  %v3207_v27 = vld [vmem:[%s5857_s12 + $0x18] sm:$0xff] (%p3872_p5) }
 0x40e   : > { %3208 = vst [vmem:[%s3188_s20 + $0x18] sm:$0xff] (%p3872_p5), %v3207_v27 }
 0x40f   : > { %v3163_v23 = vmax.f32 %v3149_v38, 0.0  ;;  %v3227_v63 = vld [vmem:[%s5857_s12 + $0x68] sm:$0xff] (%p3872_p5) }
 0x410   : > { %v3211_v25 = vld [vmem:[%s5857_s12 + $0x28] sm:$0xff] (%p3872_p5)  ;;  %3228 = vst [vmem:[%s3188_s20 + $0x110] sm:$0xff] (%p3872_p5), %v3227_v63 }
 0x411   : > { %3177 = vst [vmem:[%s5857_s12 + $0x60] sm:$0xff] %v3163_v23 }
 0x412   : > { %3212 = vst [vmem:[%s3188_s20 + $0x28] sm:$0xff] %v3211_v25 }
 0x418   : > { %v3225_v61 = vld [vmem:[%s5857_s12 + $0x60] sm:$0xff] }
 0x419   : > { %3226 = vst [vmem:[%s3188_s20 + $0x108] sm:$0xff] %v3225_v61 }
 0x41a PF: > { %p10_p10 = scmp.ge.s32.totalorder %s3859_s16, 6   ;;  %s5960_s12 = smov %s3815_s13 }
 0x41b   : > { %s5961_s13 = smov %s3870_s19  ;;  %s5962_s14 = smov %s3859_s16 }
 0x41c   :  { %12 = sbr.rel (!%p10_p10) target bundleno = 2 (0x2), region = 116 }

// kernel: lenet_forward.5
= control target key start
LH: loop header
LB: loop body
LE: loop exit
PB: predicated region body
PF: predicated region fallthrough
CT: control target
= control target key end

     0   :  { %v786_v3 = vmov 0   ;;  %vm236_vm0 = vcmask 130048   ;;  %vm724_vm1 = vcmask 785408   ;;  %s1383_s0 = inlined_call_operand.vmem [shape: f32[400,128], index: 0, kind: input, shape index: {}]   ;;  %s1384_s2 = inlined_call_operand.vmem [shape: f32[128,1], index: 2, kind: input, shape index: {}]   ;;  %s1385_s1 = inlined_call_operand.vmem [shape: f32[128,400], index: 1, kind: input, shape index: {}]   ;;  %s1386_s4 = inlined_call_operand.vmem [shape: f32[96,1], index: 4, kind: input, shape index: {}]   ;;  %s1387_s6 = inlined_call_operand.vmem [shape: f32[16,1], index: 6, kind: input, shape index: {}]   ;;  %s1388_s3 = inlined_call_operand.vmem [shape: f32[96,128], index: 3, kind: input, shape index: {}]   ;;  %s1389_s5 = inlined_call_operand.vmem [shape: f32[16,96], index: 5, kind: input, shape index: {}]   ;;  %s1390_s7 = inlined_call_operand.vmem [shape: f32[16,128], index: 7, kind: output, shape index: {}]  }
   0x1   :  { %v105_v0 = vld [vmem:[%s1383_s0 + $0x78] sm:$0xff]  ;;  %783 = vset.pattern.permute.xlu0 %v786_v3  ;;  %784 = vset.pattern.permute.xlu1 %v786_v3  ;;  %v104_v4 = vld [vmem:[%s1383_s0 + $0x70] sm:$0xff]  ;;  %v103_v8 = vld [vmem:[%s1383_s0 + $0x68] sm:$0xff] }
   0x2   :  { %v121_v1 = vld [vmem:[%s1383_s0 + $0xf8] sm:$0xff]  ;;  %285 = vmatpush.msra.mxu0 %v105_v0  ;;  %v120_v5 = vld [vmem:[%s1383_s0 + $0xf0] sm:$0xff]  ;;  %v119_v9 = vld [vmem:[%s1383_s0 + $0xe8] sm:$0xff]  ;;  %785 = vset.pattern.permute.xlu2 %v786_v3 }
   0x3   :  { %v137_v2 = vld [vmem:[%s1383_s0 + $0x178] sm:$0xff]  ;;  %350 = vmatpush.msra.mxu1 %v121_v1  ;;  %v136_v6 = vld [vmem:[%s1383_s0 + $0x170] sm:$0xff]  ;;  %v135_v10 = vld [vmem:[%s1383_s0 + $0x168] sm:$0xff] }
   0x4   :  { %415 = vmatpush.msra.mxu2 %v137_v2  ;;  %v155_v7 = vld [vmem:[%s1384_s2 + $0x78] sm:$0xff]  ;;  %286 = vmatpush.msra.mxu0 %v104_v4  ;;  %v102_v11 = vld [vmem:[%s1383_s0 + $0x60] sm:$0xff]  ;;  %v100_v17 = vld [vmem:[%s1383_s0 + $0x50] sm:$0xff] }
   0x5   :  { %351 = vmatpush.msra.mxu1 %v120_v5  ;;  %233 = vperm.xlu0 %783, %v155_v7   ;;  %v118_v12 = vld [vmem:[%s1383_s0 + $0xe0] sm:$0xff]  ;;  %v101_v14 = vld [vmem:[%s1383_s0 + $0x58] sm:$0xff]  ;;  %v116_v18 = vld [vmem:[%s1383_s0 + $0xd0] sm:$0xff] }
   0x6   :  { %416 = vmatpush.msra.mxu2 %v136_v6  ;;  %287 = vmatpush.msra.mxu0 %v103_v8  ;;  %v134_v13 = vld [vmem:[%s1383_s0 + $0x160] sm:$0xff]  ;;  %v117_v15 = vld [vmem:[%s1383_s0 + $0xd8] sm:$0xff]  ;;  %v132_v19 = vld [vmem:[%s1383_s0 + $0x150] sm:$0xff] }
   0x7   :  { %352 = vmatpush.msra.mxu1 %v119_v9  ;;  %v133_v16 = vld [vmem:[%s1383_s0 + $0x158] sm:$0xff]  ;;  %v154_v20 = vld [vmem:[%s1384_s2 + $0x70] sm:$0xff]  ;;  %v99_v21 = vld [vmem:[%s1383_s0 + $0x48] sm:$0xff] }
   0x8   :  { %417 = vmatpush.msra.mxu2 %v135_v10  ;;  %288 = vmatpush.msra.mxu0 %v102_v11  ;;  %v115_v22 = vld [vmem:[%s1383_s0 + $0xc8] sm:$0xff]  ;;  %v98_v24 = vld [vmem:[%s1383_s0 + $0x40] sm:$0xff]  ;;  %v97_v27 = vld [vmem:[%s1383_s0 + $0x38] sm:$0xff] }
   0x9   :  { %353 = vmatpush.msra.mxu1 %v118_v12  ;;  %v131_v23 = vld [vmem:[%s1383_s0 + $0x148] sm:$0xff]  ;;  %v114_v25 = vld [vmem:[%s1383_s0 + $0xc0] sm:$0xff]  ;;  %v113_v28 = vld [vmem:[%s1383_s0 + $0xb8] sm:$0xff] }
   0xa   :  { %418 = vmatpush.msra.mxu2 %v134_v13  ;;  %289 = vmatpush.msra.mxu0 %v101_v14  ;;  %v130_v26 = vld [vmem:[%s1383_s0 + $0x140] sm:$0xff]  ;;  %v129_v29 = vld [vmem:[%s1383_s0 + $0x138] sm:$0xff]  ;;  %v153_v30 = vld [vmem:[%s1384_s2 + $0x68] sm:$0xff] }
   0xb   :  { %354 = vmatpush.msra.mxu1 %v117_v15  ;;  %v96_v31 = vld [vmem:[%s1383_s0 + $0x30] sm:$0xff]  ;;  %223 = vperm.xlu1 %784, %v153_v30   ;;  %v149_v34 = vld [vmem:[%s1384_s2 + $0x48] sm:$0xff]  ;;  %v94_v38 = vld [vmem:[%s1383_s0 + $0x20] sm:$0xff] }
   0xc   :  { %419 = vmatpush.msra.mxu2 %v133_v16  ;;  %290 = vmatpush.msra.mxu0 %v100_v17  ;;  %v112_v32 = vld [vmem:[%s1383_s0 + $0xb0] sm:$0xff]  ;;  %v95_v35 = vld [vmem:[%s1383_s0 + $0x28] sm:$0xff]  ;;  %v110_v39 = vld [vmem:[%s1383_s0 + $0xa0] sm:$0xff] }
   0xd   :  { %355 = vmatpush.msra.mxu1 %v116_v18  ;;  %228 = vperm.xlu0 %783, %v154_v20   ;;  %v128_v33 = vld [vmem:[%s1383_s0 + $0x130] sm:$0xff]  ;;  %v111_v36 = vld [vmem:[%s1383_s0 + $0xa8] sm:$0xff]  ;;  %v151_v40 = vld [vmem:[%s1384_s2 + $0x58] sm:$0xff] }
   0xe   :  { %420 = vmatpush.msra.mxu2 %v132_v19  ;;  %291 = vmatpush.msra.mxu0 %v99_v21  ;;  %v127_v37 = vld [vmem:[%s1383_s0 + $0x128] sm:$0xff]  ;;  %v126_v41 = vld [vmem:[%s1383_s0 + $0x120] sm:$0xff]  ;;  %v93_v43 = vld [vmem:[%s1383_s0 + $0x18] sm:$0xff] }
   0xf   :  { %356 = vmatpush.msra.mxu1 %v115_v22  ;;  %v152_v42 = vld [vmem:[%s1384_s2 + $0x60] sm:$0xff]  ;;  %v109_v44 = vld [vmem:[%s1383_s0 + $0x98] sm:$0xff]  ;;  %213 = vperm.xlu2 %785, %v151_v40   ;;  %v92_v46 = vld [vmem:[%s1383_s0 + $0x10] sm:$0xff] }
  0x10   :  { %421 = vmatpush.msra.mxu2 %v131_v23  ;;  %292 = vmatpush.msra.mxu0 %v98_v24  ;;  %v125_v45 = vld [vmem:[%s1383_s0 + $0x118] sm:$0xff]  ;;  %v108_v47 = vld [vmem:[%s1383_s0 + $0x90] sm:$0xff]  ;;  %v91_v50 = vld [vmem:[%s1383_s0 + $0x8] sm:$0xff] }
  0x11   :  { %357 = vmatpush.msra.mxu1 %v114_v25  ;;  %v124_v48 = vld [vmem:[%s1383_s0 + $0x110] sm:$0xff]  ;;  %v107_v51 = vld [vmem:[%s1383_s0 + $0x88] sm:$0xff]  ;;  %v90_v54 = vld [vmem:[%s1383_s0] sm:$0xff] }
  0x12   :  { %422 = vmatpush.msra.mxu2 %v130_v26  ;;  %293 = vmatpush.msra.mxu0 %v97_v27  ;;  %v146_v49 = vld [vmem:[%s1384_s2 + $0x30] sm:$0xff]  ;;  %v123_v52 = vld [vmem:[%s1383_s0 + $0x108] sm:$0xff]  ;;  %v106_v55 = vld [vmem:[%s1383_s0 + $0x80] sm:$0xff] }
  0x13   :  { %358 = vmatpush.msra.mxu1 %v113_v28  ;;  %218 = vperm.xlu1 %784, %v152_v42   ;;  %v150_v53 = vld [vmem:[%s1384_s2 + $0x50] sm:$0xff]  ;;  %v122_v56 = vld [vmem:[%s1383_s0 + $0x100] sm:$0xff]  ;;  %v27_v58 = vld [vmem:[%s1385_s1 + $0x8] sm:$0xff] }
  0x14   :  { %423 = vmatpush.msra.mxu2 %v129_v29  ;;  %294 = vmatpush.msra.mxu0 %v96_v31  ;;  %v26_v57 = vld [vmem:[%s1385_s1] sm:$0xff]  ;;  %v28_v59 = vld [vmem:[%s1385_s1 + $0x10] sm:$0xff]  ;;  %v143_v61 = vld [vmem:[%s1384_s2 + $0x18] sm:$0xff] }
  0x15   :  { %359 = vmatpush.msra.mxu1 %v112_v32  ;;  %203 = vperm.xlu0 %783, %v149_v34   ;;  %v148_v60 = vld [vmem:[%s1384_s2 + $0x40] sm:$0xff]  ;;  %v139_v62 = vld [vmem:[%s1383_s0 + $0x188] sm:$0xff]  ;;  %v147_v63 = vld [vmem:[%s1384_s2 + $0x38] sm:$0xff] }
  0x16   :  { %424 = vmatpush.msra.mxu2 %v128_v33  ;;  %295 = vmatpush.msra.mxu0 %v95_v35  ;;  %v30_v0 = vld [vmem:[%s1385_s1 + $0x20] sm:$0xff]  ;;  %v31_v1 = vld [vmem:[%s1385_s1 + $0x28] sm:$0xff]  ;;  %v32_v2 = vld [vmem:[%s1385_s1 + $0x30] sm:$0xff] }
  0x17   :  { %360 = vmatpush.msra.mxu1 %v111_v36  ;;  %208 = vperm.xlu2 %785, %v150_v53   ;;  %v145_v3 = vld [vmem:[%s1384_s2 + $0x28] sm:$0xff]  ;;  %v140_v4 = vld [vmem:[%s1384_s2] sm:$0xff]  ;;  %v49_v6 = vld [vmem:[%s1385_s1 + $0xb8] sm:$0xff] }
  0x18   :  { %425 = vmatpush.msra.mxu2 %v127_v37  ;;  %296 = vmatpush.msra.mxu0 %v94_v38  ;;  %v138_v5 = vld [vmem:[%s1383_s0 + $0x180] sm:$0xff]  ;;  %v35_v9 = vld [vmem:[%s1385_s1 + $0x48] sm:$0xff]  ;;  %v36_v10 = vld [vmem:[%s1385_s1 + $0x50] sm:$0xff] }
  0x19   :  { %361 = vmatpush.msra.mxu1 %v110_v39  ;;  %779 = vmatpush.msra.mxu3 %v139_v62  ;;  %v144_v7 = vld [vmem:[%s1384_s2 + $0x20] sm:$0xff]  ;;  %v142_v11 = vld [vmem:[%s1384_s2 + $0x10] sm:$0xff]  ;;  %v53_v12 = vld [vmem:[%s1385_s1 + $0xd8] sm:$0xff] }
  0x1a   :  { %426 = vmatpush.msra.mxu2 %v126_v41  ;;  %297 = vmatpush.msra.mxu0 %v93_v43  ;;  %v34_v8 = vld [vmem:[%s1385_s1 + $0x40] sm:$0xff]  ;;  %v141_v13 = vld [vmem:[%s1384_s2 + $0x8] sm:$0xff]  ;;  %v40_v16 = vld [vmem:[%s1385_s1 + $0x70] sm:$0xff] }
  0x1b   :  { %362 = vmatpush.msra.mxu1 %v109_v44  ;;  %198 = vperm.xlu1 %784, %v148_v60   ;;  %v38_v14 = vld [vmem:[%s1385_s1 + $0x60] sm:$0xff]  ;;  %v39_v15 = vld [vmem:[%s1385_s1 + $0x68] sm:$0xff]  ;;  %v57_v17 = vld [vmem:[%s1385_s1 + $0xf8] sm:$0xff] }
  0x1c   :  { %427 = vmatpush.msra.mxu2 %v125_v45  ;;  %298 = vmatpush.msra.mxu0 %v92_v46  ;;  %v42_v18 = vld [vmem:[%s1385_s1 + $0x80] sm:$0xff]  ;;  %v43_v19 = vld [vmem:[%s1385_s1 + $0x88] sm:$0xff]  ;;  %v44_v20 = vld [vmem:[%s1385_s1 + $0x90] sm:$0xff] }
  0x1d   :  { %363 = vmatpush.msra.mxu1 %v108_v47  ;;  %188 = vperm.xlu0 %783, %v146_v49   ;;  %v61_v21 = vld [vmem:[%s1385_s1 + $0x118] sm:$0xff]  ;;  %v46_v22 = vld [vmem:[%s1385_s1 + $0xa0] sm:$0xff]  ;;  %v47_v23 = vld [vmem:[%s1385_s1 + $0xa8] sm:$0xff] }
  0x1e   :  { %428 = vmatpush.msra.mxu2 %v124_v48  ;;  %299 = vmatpush.msra.mxu0 %v91_v50  ;;  %v48_v24 = vld [vmem:[%s1385_s1 + $0xb0] sm:$0xff]  ;;  %v65_v25 = vld [vmem:[%s1385_s1 + $0x138] sm:$0xff]  ;;  %v50_v26 = vld [vmem:[%s1385_s1 + $0xc0] sm:$0xff] }
  0x1f   :  { %364 = vmatpush.msra.mxu1 %v107_v51  ;;  %193 = vperm.xlu2 %785, %v147_v63   ;;  %v51_v27 = vld [vmem:[%s1385_s1 + $0xc8] sm:$0xff]  ;;  %v52_v28 = vld [vmem:[%s1385_s1 + $0xd0] sm:$0xff]  ;;  %v69_v29 = vld [vmem:[%s1385_s1 + $0x158] sm:$0xff] }
  0x20   :  { %429 = vmatpush.msra.mxu2 %v123_v52  ;;  %300 = vmatpush.msra.mxu0 %v90_v54  ;;  %v54_v30 = vld [vmem:[%s1385_s1 + $0xe0] sm:$0xff]  ;;  %v55_v31 = vld [vmem:[%s1385_s1 + $0xe8] sm:$0xff]  ;;  %v56_v32 = vld [vmem:[%s1385_s1 + $0xf0] sm:$0xff] }
  0x21   :  { %365 = vmatpush.msra.mxu1 %v106_v55  ;;  %301 = vmatmul.f32.vlgmr.msra.gmra.mxu0 %v26_v57  ;;  %v73_v33 = vld [vmem:[%s1385_s1 + $0x178] sm:$0xff]  ;;  %v58_v34 = vld [vmem:[%s1385_s1 + $0x100] sm:$0xff]  ;;  %v59_v35 = vld [vmem:[%s1385_s1 + $0x108] sm:$0xff] }
  0x22   :  { %430 = vmatpush.msra.mxu2 %v122_v56  ;;  %366 = vmatmul.f32.vlgmr.msra.gmra.mxu1 %v27_v58  ;;  %v60_v36 = vld [vmem:[%s1385_s1 + $0x110] sm:$0xff]  ;;  %v584_v37 = vld [vmem:[%s1386_s4 + $0x58] sm:$0xff]  ;;  %v582_v39 = vld [vmem:[%s1386_s4 + $0x48] sm:$0xff] }
  0x23   :  { %431 = vmatmul.f32.vlgmr.msra.gmra.mxu2 %v28_v59  ;;  %494 = vmatpush.msrb.mxu1 %v139_v62  ;;  %v77_v38 = vld [vmem:[%s1385_s1 + $0x198] sm:$0xff]  ;;  %v62_v40 = vld [vmem:[%s1385_s1 + $0x120] sm:$0xff]  ;;  %v63_v41 = vld [vmem:[%s1385_s1 + $0x128] sm:$0xff] }
  0x24   :  { %778 = vmatpush.msrb.mxu2 %v139_v62  ;;  %183 = vperm.xlu1 %784, %v145_v3   ;;  %v64_v42 = vld [vmem:[%s1385_s1 + $0x130] sm:$0xff]  ;;  %v581_v43 = vld [vmem:[%s1386_s4 + $0x40] sm:$0xff]  ;;  %v81_v44 = vld [vmem:[%s1385_s1 + $0x1b8] sm:$0xff] }
  0x25   :  { %173 = vperm.xlu0 %783, %v143_v61   ;;  %781 = vmatpush.msra.mxu3 %v138_v5  ;;  %v579_v45 = vld [vmem:[%s1386_s4 + $0x30] sm:$0xff]  ;;  %v66_v46 = vld [vmem:[%s1385_s1 + $0x140] sm:$0xff]  ;;  %v67_v47 = vld [vmem:[%s1385_s1 + $0x148] sm:$0xff] }
  0x26   :  { %765 = vmatmul.msk.f32.vlgmr.msra.gmra.mxu3 %vm236_vm0, %v49_v6  ;;  %495 = vmatpush.msrb.mxu1 %v138_v5  ;;  %v68_v48 = vld [vmem:[%s1385_s1 + $0x150] sm:$0xff]  ;;  %v578_v49 = vld [vmem:[%s1386_s4 + $0x28] sm:$0xff]  ;;  %v85_v50 = vld [vmem:[%s1385_s1 + $0x1d8] sm:$0xff] }
  0x27   :  { %780 = vmatpush.msrb.mxu2 %v138_v5  ;;  %178 = vperm.xlu2 %785, %v144_v7   ;;  %v576_v51 = vld [vmem:[%s1386_s4 + $0x18] sm:$0xff]  ;;  %v70_v52 = vld [vmem:[%s1385_s1 + $0x160] sm:$0xff]  ;;  %v71_v54 = vld [vmem:[%s1385_s1 + $0x168] sm:$0xff] }
  0x28   :  { %v72_v55 = vld [vmem:[%s1385_s1 + $0x170] sm:$0xff]  ;;  %v89_v58 = vld [vmem:[%s1385_s1 + $0x1f8] sm:$0xff]  ;;  %v573_v59 = vld [vmem:[%s1386_s4] sm:$0xff] }
  0x29   :  { %304 = vmatmul.f32.gmra.mxu0 %v30_v0  ;;  %v575_v56 = vld [vmem:[%s1386_s4 + $0x10] sm:$0xff]  ;;  %v74_v61 = vld [vmem:[%s1385_s1 + $0x180] sm:$0xff]  ;;  %v75_v63 = vld [vmem:[%s1385_s1 + $0x188] sm:$0xff] }
  0x2a   :  { %369 = vmatmul.f32.gmra.mxu1 %v31_v1  ;;  %v583_v57 = vld [vmem:[%s1386_s4 + $0x50] sm:$0xff]  ;;  %v712_v1 = vld [vmem:[%s1387_s6] sm:$0xff]  ;;  %v79_v7 = vld [vmem:[%s1385_s1 + $0x1a8] sm:$0xff] }
  0x2b   :  { %434 = vmatmul.f32.gmra.mxu2 %v32_v2  ;;  %v76_v0 = vld [vmem:[%s1385_s1 + $0x190] sm:$0xff]  ;;  %v580_v2 = vld [vmem:[%s1386_s4 + $0x38] sm:$0xff] }
  0x2c   :  { %168 = vperm.xlu1 %784, %v142_v11  }
  0x2d   :  { %158 = vperm.xlu0 %783, %v140_v4   ;;  %v78_v4 = vld [vmem:[%s1385_s1 + $0x1a0] sm:$0xff] }
  0x2e   :  { %766 = vmatmul.msk.f32.gmra.mxu3 %vm236_vm0, %v53_v12 }
  0x2f   :  { %163 = vperm.xlu2 %785, %v141_v13   ;;  %v83_v13 = vld [vmem:[%s1385_s1 + $0x1c8] sm:$0xff] }
  0x31   :  { %307 = vmatmul.f32.gmra.mxu0 %v34_v8  ;;  %v80_v8 = vld [vmem:[%s1385_s1 + $0x1b0] sm:$0xff] }
  0x32   :  { %372 = vmatmul.f32.gmra.mxu1 %v35_v9  ;;  %v577_v9 = vld [vmem:[%s1386_s4 + $0x20] sm:$0xff] }
  0x33   :  { %437 = vmatmul.f32.gmra.mxu2 %v36_v10  ;;  %v82_v10 = vld [vmem:[%s1385_s1 + $0x1c0] sm:$0xff] }
  0x34   :  { %642 = vperm.xlu1 %784, %v584_v37  }
  0x35   :  { %632 = vperm.xlu0 %783, %v582_v39   ;;  %v45_v39 = vld [vmem:[%s1385_s1 + $0x98] sm:$0xff] }
  0x36   :  { %767 = vmatmul.msk.f32.gmra.mxu3 %vm236_vm0, %v57_v17  ;;  %v86_v17 = vld [vmem:[%s1385_s1 + $0x1e0] sm:$0xff] }
  0x37   :  { %637 = vperm.xlu2 %785, %v583_v57  }
  0x39   :  { %310 = vmatmul.f32.gmra.mxu0 %v38_v14  ;;  %v84_v14 = vld [vmem:[%s1385_s1 + $0x1d0] sm:$0xff] }
  0x3a   :  { %375 = vmatmul.f32.gmra.mxu1 %v39_v15 }
  0x3b   :  { %440 = vmatmul.f32.gmra.mxu2 %v40_v16  ;;  %v574_v16 = vld [vmem:[%s1386_s4 + $0x8] sm:$0xff] }
  0x3c   :  { %627 = vperm.xlu1 %784, %v581_v43  }
  0x3d   :  { %617 = vperm.xlu0 %783, %v579_v45  }
  0x3e   :  { %768 = vmatmul.msk.f32.gmra.mxu3 %vm236_vm0, %v61_v21 }
  0x3f   :  { %622 = vperm.xlu2 %785, %v580_v2  }
  0x41   :  { %313 = vmatmul.f32.gmra.mxu0 %v42_v18 }
  0x42   :  { %378 = vmatmul.f32.gmra.mxu1 %v43_v19  ;;  %v87_v19 = vld [vmem:[%s1385_s1 + $0x1e8] sm:$0xff] }
  0x43   :  { %443 = vmatmul.f32.gmra.mxu2 %v44_v20  ;;  %v88_v20 = vld [vmem:[%s1385_s1 + $0x1f0] sm:$0xff] }
  0x44   :  { %612 = vperm.xlu1 %784, %v578_v49  }
  0x45   :  { %602 = vperm.xlu0 %783, %v576_v51  }
  0x46   :  { %769 = vmatmul.msk.f32.gmra.mxu3 %vm236_vm0, %v65_v25 }
  0x47   :  { %607 = vperm.xlu2 %785, %v577_v9  }
  0x49   :  { %316 = vmatmul.f32.gmra.mxu0 %v46_v22  ;;  %v713_v22 = vld [vmem:[%s1387_s6 + $0x8] sm:$0xff] }
  0x4a   :  { %381 = vmatmul.f32.gmra.mxu1 %v47_v23 }
  0x4b   :  { %446 = vmatmul.f32.gmra.mxu2 %v48_v24 }
  0x4c   :  { %597 = vperm.xlu1 %784, %v575_v56  }
  0x4d   :  { %587 = vperm.xlu0 %783, %v573_v59  }
  0x4e   :  { %770 = vmatmul.msk.f32.gmra.mxu3 %vm236_vm0, %v69_v29 }
  0x4f   :  { %592 = vperm.xlu2 %785, %v574_v16  }
  0x51   :  { %319 = vmatmul.f32.gmra.mxu0 %v50_v26 }
  0x52   :  { %384 = vmatmul.f32.gmra.mxu1 %v51_v27  ;;  %v29_v27 = vld [vmem:[%s1385_s1 + $0x18] sm:$0xff] }
  0x53   :  { %449 = vmatmul.f32.gmra.mxu2 %v52_v28  ;;  %v41_v28 = vld [vmem:[%s1385_s1 + $0x78] sm:$0xff] }
  0x54   :  { %716 = vperm.xlu1 %784, %v712_v1  }
  0x56   :  { %771 = vmatmul.msk.f32.gmra.mxu3 %vm236_vm0, %v73_v33 }
  0x57   :  { %721 = vperm.xlu2 %785, %v713_v22  }
  0x59   :  { %322 = vmatmul.f32.gmra.mxu0 %v54_v30 }
  0x5a   :  { %387 = vmatmul.f32.gmra.mxu1 %v55_v31 }
  0x5b   :  { %452 = vmatmul.f32.gmra.mxu2 %v56_v32 }
  0x5e   :  { %772 = vmatmul.msk.f32.gmra.mxu3 %vm236_vm0, %v77_v38  ;;  %v33_v38 = vld [vmem:[%s1385_s1 + $0x38] sm:$0xff] }
  0x61   :  { %325 = vmatmul.f32.gmra.mxu0 %v58_v34 }
  0x62   :  { %390 = vmatmul.f32.gmra.mxu1 %v59_v35 }
  0x63   :  { %455 = vmatmul.f32.gmra.mxu2 %v60_v36 }
  0x66   :  { %773 = vmatmul.msk.f32.gmra.mxu3 %vm236_vm0, %v81_v44 }
  0x69   :  { %328 = vmatmul.f32.gmra.mxu0 %v62_v40  ;;  %v1205_v60 = vpop.permute.xlu2 %213 }
  0x6a   :  { %393 = vmatmul.f32.gmra.mxu1 %v63_v41 }
  0x6b   :  { %458 = vmatmul.f32.gmra.mxu2 %v64_v42 }
  0x6e   :  { %774 = vmatmul.msk.f32.gmra.mxu3 %vm236_vm0, %v85_v50 }
  0x71   :  { %331 = vmatmul.f32.gmra.mxu0 %v66_v46  ;;  %v1230_v5 = vpop.permute.xlu2 %208 }
  0x72   :  { %396 = vmatmul.f32.gmra.mxu1 %v67_v47  ;;  %v37_v47 = vld [vmem:[%s1385_s1 + $0x58] sm:$0xff] }
  0x73   :  { %461 = vmatmul.f32.gmra.mxu2 %v68_v48 }
  0x76   :  { %775 = vmatmul.msk.f32.gmra.mxu3 %vm236_vm0, %v89_v58 }
  0x77   :  { %v1185_v53 = vpop.permute.xlu0 %233 }
  0x79   :  { %334 = vmatmul.f32.gmra.mxu0 %v70_v52  ;;  %v1256_v15 = vpop.permute.xlu2 %193 }
  0x7a   :  { %399 = vmatmul.f32.gmra.mxu1 %v71_v54 }
  0x7b   :  { %464 = vmatmul.f32.gmra.mxu2 %v72_v55 }
  0x7d   :  { %v1225_v3 = vpop.permute.xlu1 %223 }
  0x7f   :  { %v1211_v62 = vpop.permute.xlu0 %228 }
  0x81   :  { %337 = vmatmul.f32.gmra.mxu0 %v74_v61  ;;  %v179_v23 = vpop.permute.xlu2 %178 }
  0x82   :  { %402 = vmatmul.f32.gmra.mxu1 %v75_v63 }
  0x83   :  { %467 = vmatmul.f32.gmra.mxu2 %v76_v0 }
  0x85   :  { %v1246_v11 = vpop.permute.xlu1 %218 }
  0x87   :  { %v1232_v6 = vpop.permute.xlu0 %203 }
  0x89   :  { %340 = vmatmul.f32.gmra.mxu0 %v78_v4  ;;  %v164_v32 = vpop.permute.xlu2 %163 }
  0x8a   :  { %405 = vmatmul.f32.gmra.mxu1 %v79_v7 }
  0x8b   :  { %470 = vmatmul.f32.gmra.mxu2 %v80_v8 }
  0x8d   :  { %v1270_v21 = vpop.permute.xlu1 %198 }
  0x8f   :  { %v1248_v12 = vpop.permute.xlu0 %188 }
  0x91   :  { %343 = vmatmul.f32.gmra.mxu0 %v82_v10 }
  0x92   :  { %408 = vmatmul.f32.gmra.mxu1 %v83_v13 }
  0x93   :  { %473 = vmatmul.f32.gmra.mxu2 %v84_v14 }
  0x96   :  { %v184_v31 = vpop.permute.xlu1 %183 }
  0x97   :  { %v174_v18 = vpop.permute.xlu0 %173 }
  0x99   :  { %346 = vmatmul.f32.gmra.mxu0 %v86_v17 }
  0x9a   :  { %411 = vmatmul.f32.gmra.mxu1 %v87_v19 }
  0x9b   :  { %476 = vmatmul.f32.gmra.mxu2 %v88_v20 }
  0x9e   :  { %v302_v24 = vpop.f32.mrf.mxu0  ;;  %v169_v41 = vpop.permute.xlu1 %168 }
  0x9f   :  { %v367_v25 = vpop.f32.mrf.mxu1  ;;  %v159_v26 = vpop.permute.xlu0 %158 }
  0xa0   :  { %v303_v29 = vadd.f32 %v302_v24, %v159_v26 }
  0xa2   :  { %760 = vmatmul.msk.f32.vlgmr.msrb.gmra.mxu1 %vm236_vm0, %v29_v27  ;;  %v368_v30 = vadd.f32 %v367_v25, %v303_v29 }
  0xa3   :  { %763 = vmatmul.msk.f32.vlgmr.msrb.gmra.mxu2 %vm236_vm0, %v41_v28 }
  0xa6   :  { %v432_v33 = vpop.f32.mrf.mxu2  ;;  %v305_v35 = vpop.f32.mrf.mxu0 }
  0xa7   :  { %v1283_v34 = vadd.f32 %v432_v33, %v368_v30  ;;  %v370_v36 = vpop.f32.mrf.mxu1  ;;  %v306_v37 = vadd.f32 %v305_v35, %v164_v32 }
  0xa9   :  { %v371_v40 = vadd.f32 %v370_v36, %v306_v37  ;;  %v512_v56 = vpop.f32.mrf.mxu3 }
  0xaa   :  { %761 = vmatmul.msk.f32.gmra.mxu1 %vm236_vm0, %v33_v38 }
  0xab   :  { %764 = vmatmul.msk.f32.gmra.mxu2 %vm236_vm0, %v45_v39 }
  0xae   :  { %v435_v42 = vpop.f32.mrf.mxu2  ;;  %v308_v44 = vpop.f32.mrf.mxu0 }
  0xaf   :  { %v1293_v43 = vadd.f32 %v435_v42, %v371_v40  ;;  %v373_v45 = vpop.f32.mrf.mxu1  ;;  %v309_v46 = vadd.f32 %v308_v44, %v169_v41 }
  0xb1   :  { %v374_v48 = vadd.f32 %v373_v45, %v309_v46  ;;  %v515_v1 = vpop.f32.mrf.mxu3 }
  0xb2   :  { %762 = vmatmul.msk.f32.gmra.mxu1 %vm236_vm0, %v37_v47 }
  0xb6   :  { %v438_v49 = vpop.f32.mrf.mxu2  ;;  %v311_v51 = vpop.f32.mrf.mxu0 }
  0xb7   :  { %v1299_v50 = vadd.f32 %v438_v49, %v374_v48  ;;  %v312_v52 = vadd.f32 %v311_v51, %v174_v18  ;;  %v376_v54 = vpop.f32.mrf.mxu1 }
  0xb9   :  { %v377_v55 = vadd.f32 %v376_v54, %v312_v52  ;;  %v518_v14 = vpop.f32.mrf.mxu3 }
  0xbe   :  { %v441_v57 = vpop.f32.mrf.mxu2  ;;  %v314_v59 = vpop.f32.mrf.mxu0 }
  0xbf   :  { %v1301_v58 = vadd.f32 %v441_v57, %v377_v55  ;;  %v315_v61 = vadd.f32 %v314_v59, %v179_v23  ;;  %v379_v63 = vpop.f32.mrf.mxu1 }
  0xc1   :  { %v380_v0 = vadd.f32 %v379_v63, %v315_v61  ;;  %v521_v28 = vpop.f32.mrf.mxu3 }
  0xc6   :  { %v444_v2 = vpop.f32.mrf.mxu2  ;;  %v317_v7 = vpop.f32.mrf.mxu0 }
  0xc7   :  { %v1303_v4 = vadd.f32 %v444_v2, %v380_v0  ;;  %v318_v8 = vadd.f32 %v317_v7, %v184_v31  ;;  %v382_v9 = vpop.f32.mrf.mxu1 }
  0xc9   :  { %v383_v10 = vadd.f32 %v382_v9, %v318_v8  ;;  %v1314_v38 = vpop.f32.mrf.mxu3 }
  0xce   :  { %v447_v13 = vpop.f32.mrf.mxu2  ;;  %v320_v17 = vpop.f32.mrf.mxu0 }
  0xcf   :  { %v448_v16 = vadd.f32 %v447_v13, %v383_v10  ;;  %v321_v18 = vadd.f32 %v320_v17, %v1248_v12  ;;  %v385_v19 = vpop.f32.mrf.mxu1 }
  0xd1   :  { %v1306_v20 = vadd.f32 %v512_v56, %v448_v16  ;;  %v386_v22 = vadd.f32 %v385_v19, %v321_v18  ;;  %v527_v44 = vpop.f32.mrf.mxu3 }
  0xd6   :  { %v450_v23 = vpop.f32.mrf.mxu2  ;;  %v323_v25 = vpop.f32.mrf.mxu0 }
  0xd7   :  { %v451_v24 = vadd.f32 %v450_v23, %v386_v22  ;;  %v324_v26 = vadd.f32 %v323_v25, %v1256_v15  ;;  %v388_v27 = vpop.f32.mrf.mxu1 }
  0xd9   :  { %v1309_v29 = vadd.f32 %v515_v1, %v451_v24  ;;  %v389_v30 = vadd.f32 %v388_v27, %v324_v26  ;;  %v530_v49 = vpop.f32.mrf.mxu3 }
  0xde   :  { %v453_v31 = vpop.f32.mrf.mxu2  ;;  %v326_v33 = vpop.f32.mrf.mxu0 }
  0xdf   :  { %v454_v32 = vadd.f32 %v453_v31, %v389_v30  ;;  %v327_v35 = vadd.f32 %v326_v33, %v1270_v21  ;;  %v391_v12 = vpop.f32.mrf.mxu1 }
  0xe1   :  { %v1312_v36 = vadd.f32 %v518_v14, %v454_v32  ;;  %v392_v37 = vadd.f32 %v391_v12, %v327_v35  ;;  %v533_v56 = vpop.f32.mrf.mxu3 }
  0xe6   :  { %v456_v39 = vpop.f32.mrf.mxu2  ;;  %v329_v41 = vpop.f32.mrf.mxu0 }
  0xe7   :  { %v457_v40 = vadd.f32 %v456_v39, %v392_v37  ;;  %v394_v15 = vpop.f32.mrf.mxu1 }
  0xe9   :  { %v1316_v42 = vadd.f32 %v521_v28, %v457_v40  ;;  %v536_v63 = vpop.f32.mrf.mxu3 }
  0xee   :  { %v459_v45 = vpop.f32.mrf.mxu2  ;;  %v332_v46 = vpop.f32.mrf.mxu0 }
  0xef   :  { %v397_v47 = vpop.f32.mrf.mxu1  ;;  %v333_v23 = vadd.f32 %v332_v46, %v1230_v5 }
  0xf1   :  { %v539_v7 = vpop.f32.mrf.mxu3  ;;  %v398_v32 = vadd.f32 %v397_v47, %v333_v23 }
  0xf6   :  { %v462_v48 = vpop.f32.mrf.mxu2  ;;  %v335_v51 = vpop.f32.mrf.mxu0 }
  0xf7   :  { %v400_v21 = vpop.f32.mrf.mxu1  ;;  %v336_v18 = vadd.f32 %v335_v51, %v1205_v60  ;;  %v463_v5 = vadd.f32 %v462_v48, %v398_v32  ;;  %v553_v48 = vmax.f32 %v1316_v42, 0.0 }
  0xf9   :  { %v542_v28 = vpop.f32.mrf.mxu3 }
  0xfe   :  { %v465_v52 = vpop.f32.mrf.mxu2  ;;  %v338_v54 = vpop.f32.mrf.mxu0 }
  0xff   :  { %v403_v55 = vpop.f32.mrf.mxu1  ;;  %v339_v16 = vadd.f32 %v338_v54, %v1246_v11 }
 0x101   :  { %v404_v24 = vadd.f32 %v403_v55, %v339_v16  ;;  %v571_v16 = vld [vmem:[%s1388_s3 + $0x50] sm:$0xff] }
 0x106   :  { %v468_v57 = vpop.f32.mrf.mxu2  ;;  %v341_v59 = vpop.f32.mrf.mxu0 }
 0x107   :  { %v406_v61 = vpop.f32.mrf.mxu1  ;;  %v342_v9 = vadd.f32 %v341_v59, %v1225_v3  ;;  %v330_v3 = vadd.f32 %v329_v41, %v1232_v6  ;;  %v469_v11 = vadd.f32 %v468_v57, %v404_v24  ;;  %v528_v41 = vadd.f32 %v527_v44, %v463_v5 }
 0x108   :  { %v551_v44 = vmax.f32 %v1309_v29, 0.0 }
 0x109   :  { %v407_v19 = vadd.f32 %v406_v61, %v342_v9  ;;  %v395_v60 = vadd.f32 %v394_v15, %v330_v3  ;;  %v534_v40 = vadd.f32 %v533_v56, %v469_v11  ;;  %v550_v61 = vmax.f32 %v1306_v20, 0.0  ;;  %v565_v20 = vld [vmem:[%s1388_s3 + $0x20] sm:$0xff]  ;;  %v567_v9 = vld [vmem:[%s1388_s3 + $0x30] sm:$0xff] }
 0x10b   :  { %v460_v51 = vadd.f32 %v459_v45, %v395_v60 }
 0x10d   :  { %v525_v47 = vadd.f32 %v1314_v38, %v460_v51 }
 0x10e   :  { %v471_v0 = vpop.f32.mrf.mxu2  ;;  %v344_v1 = vpop.f32.mrf.mxu0 }
 0x10f   :  { %v409_v2 = vpop.f32.mrf.mxu1  ;;  %v345_v10 = vadd.f32 %v344_v1, %v1211_v62  ;;  %v401_v62 = vadd.f32 %v400_v21, %v336_v18  ;;  %v472_v30 = vadd.f32 %v471_v0, %v407_v19  ;;  %v557_v21 = vmax.f32 %v534_v40, 0.0 }
 0x110   :  { %v554_v59 = vmax.f32 %v525_v47, 0.0 }
 0x111   :  { %v410_v22 = vadd.f32 %v409_v2, %v345_v10  ;;  %v466_v12 = vadd.f32 %v465_v52, %v401_v62  ;;  %v537_v37 = vadd.f32 %v536_v63, %v472_v30  ;;  %v555_v52 = vmax.f32 %v528_v41, 0.0  ;;  %v568_v10 = vld [vmem:[%s1388_s3 + $0x38] sm:$0xff]  ;;  %v643_v62 = vpop.permute.xlu1 %642  ;;  %v638_v30 = vpop.permute.xlu2 %637 }
 0x113   :  { %v531_v54 = vadd.f32 %v530_v49, %v466_v12  ;;  %v558_v55 = vmax.f32 %v537_v37, 0.0  ;;  %v552_v49 = vmax.f32 %v1312_v36, 0.0 }
 0x115   :  { %v556_v57 = vmax.f32 %v531_v54, 0.0 }
 0x116   :  { %v474_v8 = vpop.f32.mrf.mxu2  ;;  %v347_v13 = vpop.f32.mrf.mxu0 }
 0x117   :  { %v412_v14 = vpop.f32.mrf.mxu1  ;;  %v348_v17 = vadd.f32 %v347_v13, %v1185_v53  ;;  %v475_v25 = vadd.f32 %v474_v8, %v410_v22  ;;  %v566_v8 = vld [vmem:[%s1388_s3 + $0x28] sm:$0xff]  ;;  %v569_v13 = vld [vmem:[%s1388_s3 + $0x40] sm:$0xff] }
 0x119   :  { %v413_v26 = vadd.f32 %v412_v14, %v348_v17  ;;  %v540_v33 = vadd.f32 %v539_v7, %v475_v25  ;;  %v570_v14 = vld [vmem:[%s1388_s3 + $0x48] sm:$0xff]  ;;  %v572_v17 = vld [vmem:[%s1388_s3 + $0x58] sm:$0xff]  ;;  %v628_v11 = vpop.permute.xlu1 %627 }
 0x11b   :  { %v559_v46 = vmax.f32 %v540_v33, 0.0  ;;  %v623_v33 = vpop.permute.xlu2 %622 }
 0x11e   :  { %v477_v27 = vpop.f32.mrf.mxu2 }
 0x11f   :  { %v478_v31 = vadd.f32 %v477_v27, %v413_v26  ;;  %v497_v35 = vpop.f32.mrf.mxu1 }
 0x120   :  { %v498_v36 = vadd.f32 %v497_v35, %v1283_v34  ;;  %v563_v34 = vld [vmem:[%s1388_s3 + $0x10] sm:$0xff] }
 0x121   :  { %v543_v53 = vadd.f32 %v542_v28, %v478_v31  ;;  %v633_v31 = vpop.permute.xlu0 %632 }
 0x122   :  { %v545_v7 = vmax.f32 %v498_v36, 0.0  ;;  %v710_v36 = vld [vmem:[%s1389_s5] sm:$0xff] }
 0x123   :  { %v560_v39 = vmax.f32 %v543_v53, 0.0 }
 0x125   :  { %645 = vmatpush.msrb.mxu3 %v560_v39 }
 0x126   :  { %v506_v6 = vpop.f32.mrf.mxu2 }
 0x127   :  { %646 = vmatpush.msrb.mxu3 %v559_v46  ;;  %v500_v15 = vpop.f32.mrf.mxu1  ;;  %v507_v63 = vadd.f32 %v506_v6, %v1301_v58  ;;  %v561_v58 = vld [vmem:[%s1388_s3] sm:$0xff]  ;;  %v613_v46 = vpop.permute.xlu1 %612 }
 0x128   :  { %v501_v2 = vadd.f32 %v500_v15, %v1293_v43  ;;  %v564_v43 = vld [vmem:[%s1388_s3 + $0x18] sm:$0xff] }
 0x129   :  { %647 = vmatpush.msrb.mxu3 %v558_v55  ;;  %v548_v42 = vmax.f32 %v507_v63, 0.0  ;;  %v618_v53 = vpop.permute.xlu0 %617  ;;  %v608_v55 = vpop.permute.xlu2 %607 }
 0x12b   :  { %648 = vmatpush.msrb.mxu3 %v557_v21 }
 0x12d   :  { %649 = vmatpush.msrb.mxu3 %v556_v57 }
 0x12e   :  { %v509_v45 = vpop.f32.mrf.mxu2 }
 0x12f   :  { %650 = vmatpush.msrb.mxu3 %v555_v52  ;;  %v510_v56 = vadd.f32 %v509_v45, %v1303_v4  ;;  %v503_v38 = vpop.f32.mrf.mxu1  ;;  %v546_v4 = vmax.f32 %v501_v2, 0.0  ;;  %v598_v45 = vpop.permute.xlu1 %597 }
 0x130   :  { %v504_v1 = vadd.f32 %v503_v38, %v1299_v50  ;;  %v562_v50 = vld [vmem:[%s1388_s3 + $0x8] sm:$0xff] }
 0x131   :  { %651 = vmatpush.msrb.mxu3 %v554_v59  ;;  %v549_v0 = vmax.f32 %v510_v56, 0.0  ;;  %v603_v21 = vpop.permute.xlu0 %602  ;;  %v593_v56 = vpop.permute.xlu2 %592 }
 0x132   :  { %v547_v29 = vmax.f32 %v504_v1, 0.0 }
 0x133   :  { %652 = vmatpush.msrb.mxu3 %v553_v48 }
 0x135   :  { %653 = vmatpush.msrb.mxu3 %v552_v49 }
 0x137   :  { %654 = vmatpush.msrb.mxu3 %v551_v44 }
 0x139   :  { %655 = vmatpush.msrb.mxu3 %v550_v61  ;;  %v588_v63 = vpop.permute.xlu0 %587 }
 0x13b   :  { %656 = vmatpush.msrb.mxu3 %v549_v0 }
 0x13d   :  { %657 = vmatpush.msrb.mxu3 %v548_v42 }
 0x13f   :  { %658 = vmatpush.msrb.mxu3 %v547_v29  ;;  %v711_v29 = vld [vmem:[%s1389_s5 + $0x8] sm:$0xff] }
 0x141   :  { %659 = vmatpush.msrb.mxu3 %v546_v4  ;;  %v717_v4 = vpop.permute.xlu1 %716 }
 0x143   :  { %660 = vmatpush.msrb.mxu3 %v545_v7 }
 0x144   :  { %661 = vmatmul.f32.vlgmr.msrb.gmra.mxu3 %v561_v58 }
 0x14c   :  { %664 = vmatmul.f32.gmra.mxu3 %v562_v50  ;;  %v722_v50 = vpop.permute.xlu2 %721 }
 0x154   :  { %667 = vmatmul.f32.gmra.mxu3 %v563_v34 }
 0x15c   :  { %670 = vmatmul.f32.gmra.mxu3 %v564_v43 }
 0x164   :  { %673 = vmatmul.f32.gmra.mxu3 %v565_v20 }
 0x16c   :  { %676 = vmatmul.f32.gmra.mxu3 %v566_v8 }
 0x174   :  { %679 = vmatmul.f32.gmra.mxu3 %v567_v9 }
 0x17c   :  { %682 = vmatmul.f32.gmra.mxu3 %v568_v10 }
 0x184   :  { %685 = vmatmul.f32.gmra.mxu3 %v569_v13 }
 0x18c   :  { %688 = vmatmul.f32.gmra.mxu3 %v570_v14 }
 0x194   :  { %691 = vmatmul.f32.gmra.mxu3 %v571_v16 }
 0x19c   :  { %694 = vmatmul.f32.gmra.mxu3 %v572_v17 }
 0x1c7   :  { %v662_v18 = vpop.f32.mrf.mxu3 }
 0x1c8   :  { %v663_v0 = vadd.f32 %v662_v18, %v588_v63 }
 0x1ca   :  { %v698_v2 = vmax.f32 %v663_v0, 0.0 }
 0x1cf   :  { %v665_v19 = vpop.f32.mrf.mxu3 }
 0x1d0   :  { %v666_v38 = vadd.f32 %v665_v19, %v593_v56 }
 0x1d2   :  { %v699_v42 = vmax.f32 %v666_v38, 0.0 }
 0x1d7   :  { %v668_v22 = vpop.f32.mrf.mxu3 }
 0x1d8   :  { %v669_v49 = vadd.f32 %v668_v22, %v598_v45 }
 0x1da   :  { %v700_v1 = vmax.f32 %v669_v49, 0.0 }
 0x1df   :  { %v671_v23 = vpop.f32.mrf.mxu3 }
 0x1e0   :  { %v672_v59 = vadd.f32 %v671_v23, %v603_v21 }
 0x1e2   :  { %v701_v61 = vmax.f32 %v672_v59, 0.0 }
 0x1e7   :  { %v674_v24 = vpop.f32.mrf.mxu3 }
 0x1e8   :  { %v675_v15 = vadd.f32 %v674_v24, %v608_v55 }
 0x1ea   :  { %v702_v44 = vmax.f32 %v675_v15, 0.0 }
 0x1ef   :  { %v677_v25 = vpop.f32.mrf.mxu3 }
 0x1f0   :  { %v678_v47 = vadd.f32 %v677_v25, %v613_v46 }
 0x1f2   :  { %v703_v48 = vmax.f32 %v678_v47, 0.0 }
 0x1f7   :  { %v680_v26 = vpop.f32.mrf.mxu3 }
 0x1f8   :  { %v681_v6 = vadd.f32 %v680_v26, %v618_v53 }
 0x1fa   :  { %v704_v52 = vmax.f32 %v681_v6, 0.0 }
 0x1ff   :  { %v683_v27 = vpop.f32.mrf.mxu3 }
 0x200   :  { %v684_v51 = vadd.f32 %v683_v27, %v623_v33 }
 0x202   :  { %v705_v57 = vmax.f32 %v684_v51, 0.0 }
 0x207   :  { %v686_v28 = vpop.f32.mrf.mxu3 }
 0x208   :  { %v687_v5 = vadd.f32 %v686_v28, %v628_v11 }
 0x20a   :  { %v706_v41 = vmax.f32 %v687_v5, 0.0 }
 0x20f   :  { %v689_v3 = vpop.f32.mrf.mxu3 }
 0x210   :  { %v690_v37 = vadd.f32 %v689_v3, %v633_v31 }
 0x212   :  { %v707_v54 = vmax.f32 %v690_v37, 0.0 }
 0x217   :  { %v692_v32 = vpop.f32.mrf.mxu3 }
 0x218   :  { %v693_v60 = vadd.f32 %v692_v32, %v638_v30 }
 0x21a   :  { %v708_v40 = vmax.f32 %v693_v60, 0.0 }
 0x21f   :  { %v695_v35 = vpop.f32.mrf.mxu3 }
 0x220   :  { %v696_v12 = vadd.f32 %v695_v35, %v643_v62 }
 0x222   :  { %v709_v39 = vmax.f32 %v696_v12, 0.0 }
 0x224   :  { %735 = vmatpush.msrb.mxu0 %v709_v39 }
 0x226   :  { %736 = vmatpush.msrb.mxu0 %v708_v40 }
 0x228   :  { %737 = vmatpush.msrb.mxu0 %v707_v54 }
 0x22a   :  { %738 = vmatpush.msrb.mxu0 %v706_v41 }
 0x22c   :  { %739 = vmatpush.msrb.mxu0 %v705_v57 }
 0x22e   :  { %740 = vmatpush.msrb.mxu0 %v704_v52 }
 0x230   :  { %741 = vmatpush.msrb.mxu0 %v703_v48 }
 0x232   :  { %742 = vmatpush.msrb.mxu0 %v702_v44 }
 0x234   :  { %743 = vmatpush.msrb.mxu0 %v701_v61 }
 0x236   :  { %744 = vmatpush.msrb.mxu0 %v700_v1 }
 0x238   :  { %745 = vmatpush.msrb.mxu0 %v699_v42 }
 0x23a   :  { %746 = vmatpush.msrb.mxu0 %v698_v2 }
 0x23b   :  { %776 = vmatmul.msk.f32.vlgmr.msrb.gmra.mxu0 %vm724_vm1, %v710_v36 }
 0x243   :  { %777 = vmatmul.msk.f32.gmra.mxu0 %vm724_vm1, %v711_v29 }
 0x2b8   :  { %v748_v7 = vpop.f32.mrf.mxu0 }
 0x2b9   :  { %v749_v58 = vadd.f32 %v748_v7, %v717_v4 }
 0x2bb   :  { %754 = vst [vmem:[%s1390_s7] sm:$0xff] %v749_v58 }
 0x2c0   :  { %v751_v34 = vpop.f32.mrf.mxu0 }
 0x2c1   :  { %v752_v43 = vadd.f32 %v751_v34, %v722_v50 }
 0x2c3   :  { %755 = vst [vmem:[%s1390_s7 + $0x8] sm:$0xff] %v752_v43 }

</bundles_post_ra>
